<compile_context>
chip_gen: v5e
topology: v5e:2x2
jax: 0.10.0
libtpu: 0.0.40
codegen_flags: <defaults>
</compile_context>

<pallas_src>
import functools

import jax
import jax.numpy as jnp
from jax import lax
from jax.experimental import pallas as pl
from jax.experimental.pallas import tpu as pltpu

_EPS = 1e-5


def _round_up(x, m):
    return (x + m - 1) // m * m


# ----------------------------------------------------------------------------
# In-kernel helpers (all indices below are static Python ints -> static slices)
# ----------------------------------------------------------------------------
def _instance_norm(x, eps=_EPS):
    """InstanceNorm2d(affine=False): per-channel over spatial, single pass."""
    inv_n = 1.0 / float(x.shape[0] * x.shape[1])
    s1 = jnp.sum(x, axis=(0, 1), keepdims=True)
    s2 = jnp.sum(x * x, axis=(0, 1), keepdims=True)
    mean = s1 * inv_n
    var = s2 * inv_n - mean * mean          # biased variance (torch default)
    return (x - mean) * lax.rsqrt(var + eps)


def _zero_border(pad_ref, Bt, Hi, Wi, Wp, Cin, tail):
    """Zero only the halo cells (+ slab-overhang tail) of the flat padded
    buffer.  The interior is fully rewritten every grid step, so full-buffer
    zeroing would be pure wasted vector-store work."""
    Mi = (Hi + 2) * Wp
    z_top = jnp.zeros((Wp + 1, Cin), jnp.float32)
    z_gap = jnp.zeros((Wp - Wi, Cin), jnp.float32)
    z_bot = jnp.zeros((2 * Wp - Wi - 1, Cin), jnp.float32)
    for b in range(Bt):
        base = b * Mi
        # top padded row + left halo of the first interior row (one run)
        pad_ref[base:base + Wp + 1, :] = z_top
        # right halo of padded row y .. left halo of padded row y+1 (one run)
        for y in range(1, Hi):
            r0 = base + y * Wp + Wi + 1
            pad_ref[r0:r0 + Wp - Wi, :] = z_gap
        # right halo of last interior row + full bottom padded row (one run)
        r0 = base + Hi * Wp + Wi + 1
        pad_ref[r0:r0 + 2 * Wp - Wi - 1, :] = z_bot
    pad_ref[Bt * Mi:Bt * Mi + tail, :] = jnp.zeros((tail, Cin), jnp.float32)


def _fill_interior(pad_ref, row_fn, Bt, Hi, Wi, Wp):
    """Write the (Hi, Wi, Cin) interior of every image into the flat padded
    buffer: one contiguous (Wi, Cin) store per input row (single data copy)."""
    Mi = (Hi + 2) * Wp
    for b in range(Bt):
        base = b * Mi
        for y in range(Hi):
            r0 = base + (y + 1) * Wp + 1
            pad_ref[r0:r0 + Wi, :] = row_fn(b, y)


def _conv3x3_mxu(pad_ref, acc_ref, w_ref, Cin, Wp, R):
    """3x3 conv (pad=1) as 9 accumulating MXU matmuls whose LHS are
    *contiguous* flat slabs of the padded buffer (no im2col scratch, no
    strided slice+reshape copies).  Halo/junk rows are computed by the MXU
    (which has slack) and sliced away in the epilogue."""
    for t in range(9):
        dy, dx = divmod(t, 3)
        off = dy * Wp + dx
        prod = jnp.dot(pad_ref[off:off + R, :],
                       w_ref[t * Cin:(t + 1) * Cin, :],
                       preferred_element_type=jnp.float32)
        if t == 0:
            acc_ref[...] = prod
        else:
            acc_ref[...] = acc_ref[...] + prod


def _bias_pool_relu(acc_ref, bias, b, Hi, Wi, Wp, Cout):
    """Per-image epilogue: slice the valid conv rows, 2x2 maxpool, bias, ReLU."""
    base = b * (Hi + 2) * Wp
    y = acc_ref[base:base + Hi * Wp, :].reshape(Hi, Wp, Cout)[:, :Wi, :]
    y = jnp.max(y.reshape(Hi // 2, 2, Wi // 2, 2, Cout), axis=(1, 3))
    return jnp.maximum(y + bias, 0.0)                     # (Hi/2, Wi/2, Cout)


# ----------------------------------------------------------------------------
# Fused decoder kernel: one grid step == Bt batch elements, all layers.
# ----------------------------------------------------------------------------
def _decoder_fused_kernel(x_ref, w1_ref, b1_ref, w2_ref, b2_ref, w3_ref,
                          b3_ref, o_ref,
                          pad1, acc1, pad2, acc2, pad3,
                          *, Bt, H, W, C0, C1, C2):
    H1, W1 = H, W
    H2, W2 = H // 2, W // 2
    H3, W3 = H // 4, W // 4
    Ho, Wo = H // 8, W // 8
    Wp1 = _round_up(W1 + 2, 8)
    Wp2 = _round_up(W2 + 2, 8)
    Wp3 = _round_up(W3 + 2, 8)
    M1, M2, M3 = (H1 + 2) * Wp1, (H2 + 2) * Wp2, (H3 + 2) * Wp3
    R1, R2, R3 = Bt * M1, Bt * M2, Bt * M3

    # ---- DownBlock 1 + InstanceNorm ---------------------------------------
    _zero_border(pad1, Bt, H1, W1, Wp1, C0, pad1.shape[0] - R1)
    _fill_interior(pad1, lambda b, y: x_ref[b, y], Bt, H1, W1, Wp1)
    _conv3x3_mxu(pad1, acc1, w1_ref, C0, Wp1, R1)
    h1 = [_instance_norm(
        _bias_pool_relu(acc1, b1_ref[...], b, H1, W1, Wp1, C1))
        for b in range(Bt)]

    # ---- DownBlock 2 + InstanceNorm ---------------------------------------
    _zero_border(pad2, Bt, H2, W2, Wp2, C1, pad2.shape[0] - R2)
    _fill_interior(pad2, lambda b, y: h1[b][y], Bt, H2, W2, Wp2)
    _conv3x3_mxu(pad2, acc2, w2_ref, C1, Wp2, R2)
    h2 = [_instance_norm(
        _bias_pool_relu(acc2, b2_ref[...], b, H2, W2, Wp2, C2))
        for b in range(Bt)]

    # ---- DownBlock 3 (Cout == 1): VPU taps, single deferred channel-sum ---
    _zero_border(pad3, Bt, H3, W3, Wp3, C2, pad3.shape[0] - R3)
    _fill_interior(pad3, lambda b, y: h2[b][y], Bt, H3, W3, Wp3)
    acc = pad3[0:R3, :] * w3_ref[0:1, :]
    for t in range(1, 9):
        dy, dx = divmod(t, 3)
        off = dy * Wp3 + dx
        acc = acc + pad3[off:off + R3, :] * w3_ref[t:t + 1, :]
    s = jnp.sum(acc, axis=-1, keepdims=True)          # (R3, 1)  one XLU reduce
    b3 = b3_ref[0]                                    # scalar (SMEM)
    for b in range(Bt):
        base = b * M3
        v = s[base:base + H3 * Wp3, :].reshape(H3, Wp3, 1)[:, :W3, :]
        p = jnp.max(v.reshape(H3 // 2, 2, W3 // 2, 2, 1), axis=(1, 3))
        p = jnp.maximum(p + b3, 0.0)                  # (Ho, Wo, 1)
        o_ref[b] = p.reshape(1, Ho * Wo)              # lane-dense store


# ----------------------------------------------------------------------------
# Public wrapper (NCHW in / NCHW out), single pallas_call.
# ----------------------------------------------------------------------------
def decoder_forward(x_nchw, params, *, block_batch=None):
    (w1, b1), (w2, b2), (w3, b3) = params
    N, C0, H, W = x_nchw.shape
    assert H % 8 == 0 and W % 8 == 0, "H, W must be divisible by 8"
    C1, C2 = w1.shape[-1], w2.shape[-1]
    assert w3.shape[-1] == 1
    Ho, Wo = H // 8, W // 8

    Wp1 = _round_up(W + 2, 8)
    Wp2 = _round_up(W // 2 + 2, 8)
    Wp3 = _round_up(W // 4 + 2, 8)
    M1 = (H + 2) * Wp1
    M2 = (H // 2 + 2) * Wp2
    M3 = (H // 4 + 2) * Wp3
    tail1 = _round_up(2 * Wp1 + 2, 8)
    tail2 = _round_up(2 * Wp2 + 2, 8)
    tail3 = _round_up(2 * Wp3 + 2, 8)

    # Batch tile: amortize per-step overhead, keep >= 2 grid steps (v7x has
    # two TensorCores), and stay within a conservative VMEM budget (v7x has
    # only 64 MiB physical VMEM).
    if block_batch is None:
        Bt = max(1, N // 2)
        per_img_bytes = 4 * (2 * H * W * C0 + M1 * (C0 + C1)
                             + M2 * (C1 + C2) + M3 * C2)
        Bt = min(Bt, 8, max(1, (20 * 1024 * 1024) // per_img_bytes))
    else:
        Bt = max(1, block_batch)
    while N % Bt:
        Bt -= 1

    x = jnp.transpose(x_nchw, (0, 2, 3, 1)).astype(jnp.float32)   # -> NHWC
    # Weight packing: (3,3,Cin,Cout) -> (9*Cin, Cout), row order (dy,dx,c).
    w1f = w1.reshape(9 * C0, C1).astype(jnp.float32)
    w2f = w2.reshape(9 * C1, C2).astype(jnp.float32)
    w3f = w3.reshape(9, C2).astype(jnp.float32)       # Cout==1 squeezed
    b1f = b1.reshape(1, C1).astype(jnp.float32)
    b2f = b2.reshape(1, C2).astype(jnp.float32)
    b3f = b3.reshape(1).astype(jnp.float32)           # scalar -> SMEM

    kern = functools.partial(_decoder_fused_kernel, Bt=Bt, H=H, W=W,
                             C0=C0, C1=C1, C2=C2)

    flops = 2 * N * (M1 * 9 * C0 * C1 + M2 * 9 * C1 * C2 + M3 * 9 * C2)
    transcendentals = N * (C1 + C2)                    # rsqrt per IN channel
    bytes_accessed = 4 * (x.size + w1f.size + w2f.size + w3f.size
                          + b1f.size + b2f.size + 1 + N * Ho * Wo)

    out_flat = pl.pallas_call(
        kern,
        out_shape=jax.ShapeDtypeStruct((N, 1, Ho * Wo), jnp.float32),
        grid_spec=pltpu.PrefetchScalarGridSpec(
            num_scalar_prefetch=0,
            grid=(N // Bt,),
            in_specs=[
                pl.BlockSpec((Bt, H, W, C0), lambda n: (n, 0, 0, 0)),
                pl.BlockSpec((9 * C0, C1), lambda n: (0, 0)),
                pl.BlockSpec((1, C1), lambda n: (0, 0)),
                pl.BlockSpec((9 * C1, C2), lambda n: (0, 0)),
                pl.BlockSpec((1, C2), lambda n: (0, 0)),
                pl.BlockSpec((9, C2), lambda n: (0, 0)),
                pl.BlockSpec(memory_space=pltpu.MemorySpace.SMEM),  # b3 scalar
            ],
            out_specs=pl.BlockSpec((Bt, 1, Ho * Wo), lambda n: (n, 0, 0)),
            scratch_shapes=[
                pltpu.VMEM((Bt * M1 + tail1, C0), jnp.float32),   # pad1 (flat)
                pltpu.VMEM((Bt * M1, C1), jnp.float32),           # acc1
                pltpu.VMEM((Bt * M2 + tail2, C1), jnp.float32),   # pad2 (flat)
                pltpu.VMEM((Bt * M2, C2), jnp.float32),           # acc2
                pltpu.VMEM((Bt * M3 + tail3, C2), jnp.float32),   # pad3 (flat)
            ],
        ),
        compiler_params=pltpu.CompilerParams(
            dimension_semantics=("parallel",),     # batch-step across TCs
            vmem_limit_bytes=48 * 1024 * 1024,     # <= v7x 64 MiB physical
        ),
        cost_estimate=pl.CostEstimate(
            flops=flops, transcendentals=transcendentals,
            bytes_accessed=bytes_accessed),
    )(x, w1f, b1f, w2f, b2f, w3f, b3f)

    return out_flat.reshape(N, 1, Ho, Wo)             # -> NCHW (N,1,H/8,W/8)


# ----------------------------------------------------------------------------
# Parameter init (matches PyTorch Conv2d default init bounds 1/sqrt(fan_in))
# ----------------------------------------------------------------------------
def init_decoder_params(key, channels=(128, 64, 32), out_channel=1):
    chans = list(channels) + [out_channel]
    params = []
    for cin, cout in zip(chans[:-1], chans[1:]):
        key, kw, kb = jax.random.split(key, 3)
        bound = float(1.0 / (cin * 9) ** 0.5)
        w = jax.random.uniform(kw, (3, 3, cin, cout), jnp.float32,
                               -bound, bound)
        b = jax.random.uniform(kb, (cout,), jnp.float32, -bound, bound)
        params.append((w, b))
    return params


# ----------------------------------------------------------------------------
# Pure-JAX reference (for correctness check)
# ----------------------------------------------------------------------------
def _ref_forward(x_nchw, params):
    x = jnp.transpose(x_nchw, (0, 2, 3, 1)).astype(jnp.float32)
    n_blocks = len(params)
    for i, (w, b) in enumerate(params):
        y = lax.conv_general_dilated(
            x, w, window_strides=(1, 1), padding="SAME",
            dimension_numbers=("NHWC", "HWIO", "NHWC")) + b
        N, H, W, C = y.shape
        y = jnp.max(y.reshape(N, H // 2, 2, W // 2, 2, C), axis=(2, 4))
        x = jnp.maximum(y, 0.0)
        if i < n_blocks - 1:
            m = jnp.mean(x, axis=(1, 2), keepdims=True)
            v = jnp.mean((x - m) ** 2, axis=(1, 2), keepdims=True)
            x = (x - m) * lax.rsqrt(v + _EPS)
    return jnp.transpose(x, (0, 3, 1, 2))


if __name__ == "__main__":
    key = jax.random.PRNGKey(0)
    k_x, k_p = jax.random.split(key)

    # Small input consistent with Decoder defaults: NCHW, 128 input channels.
    N, C, H, W = 2, 128, 16, 16
    x = jax.random.normal(k_x, (N, C, H, W), jnp.float32)

    params = init_decoder_params(k_p)        # channels=(128, 64, 32), out=1

    out = jax.block_until_ready(decoder_forward(x, params))
    assert out.shape == (N, 1, H // 8, W // 8), out.shape

    ref = jax.block_until_ready(_ref_forward(x, params))
    max_err = float(jnp.max(jnp.abs(out - ref)))
    assert max_err < 1e-3, max_err

    print("KERNEL_OK")
</pallas_src>

<mosaic_0001>
module attributes {stable_mosaic.version = 11 : i64} {
  func.func @_decoder_fused_kernel(%arg0: i32, %arg1: memref<1x16x16x128xf32, #tpu.memory_space<vmem>>, %arg2: memref<1152x64xf32, #tpu.memory_space<vmem>>, %arg3: memref<1x64xf32, #tpu.memory_space<vmem>>, %arg4: memref<576x32xf32, #tpu.memory_space<vmem>>, %arg5: memref<1x32xf32, #tpu.memory_space<vmem>>, %arg6: memref<9x32xf32, #tpu.memory_space<vmem>>, %arg7: memref<1xf32, #tpu.memory_space<smem>>, %arg8: memref<1x1x4xf32, #tpu.memory_space<vmem>>, %arg9: memref<488x128xf32, #tpu.memory_space<vmem>>, %arg10: memref<432x64xf32, #tpu.memory_space<vmem>>, %arg11: memref<200x64xf32, #tpu.memory_space<vmem>>, %arg12: memref<160x32xf32, #tpu.memory_space<vmem>>, %arg13: memref<72x32xf32, #tpu.memory_space<vmem>>) attributes {dimension_semantics = [#tpu.dimension_semantics<parallel>], iteration_bounds = array<i64: 2>, scalar_prefetch = 0 : i64, scratch_operands = 5 : i64, tpu.core_type = #tpu.core_type<tc>, window_params = [{transform_indices = @transform_0, window_bounds = array<i64: 1, 16, 16, 128>}, {pipeline_mode = #tpu.pipeline_mode<synchronous>, transform_indices = @transform_1, window_bounds = array<i64: 1152, 64>}, {pipeline_mode = #tpu.pipeline_mode<synchronous>, transform_indices = @transform_2, window_bounds = array<i64: 1, 64>}, {pipeline_mode = #tpu.pipeline_mode<synchronous>, transform_indices = @transform_3, window_bounds = array<i64: 576, 32>}, {pipeline_mode = #tpu.pipeline_mode<synchronous>, transform_indices = @transform_4, window_bounds = array<i64: 1, 32>}, {pipeline_mode = #tpu.pipeline_mode<synchronous>, transform_indices = @transform_5, window_bounds = array<i64: 9, 32>}, {transform_indices = @transform_6, window_bounds = array<i64: 1>}, {transform_indices = @transform_7, window_bounds = array<i64: 1, 1, 4>}]} {
    %cst = arith.constant 0.000000e+00 : f32
    %0 = vector.broadcast %cst : f32 to vector<25x128xf32>
    %cst_0 = arith.constant 0.000000e+00 : f32
    %1 = vector.broadcast %cst_0 : f32 to vector<8x128xf32>
    %cst_1 = arith.constant 0.000000e+00 : f32
    %2 = vector.broadcast %cst_1 : f32 to vector<31x128xf32>
    %c0 = arith.constant 0 : index
    %c0_2 = arith.constant 0 : index
    %3 = vector.load %arg9[%c0, %c0_2] : memref<488x128xf32, #tpu.memory_space<vmem>>, vector<25x128xf32>
    tpu.vector_store %arg9[%c0, %c0_2], %0 {strides = array<i32>} : memref<488x128xf32, #tpu.memory_space<vmem>>, vector<25x128xf32>,
    %c41 = arith.constant 41 : index
    %c0_3 = arith.constant 0 : index
    %4 = vector.load %arg9[%c41, %c0_3] : memref<488x128xf32, #tpu.memory_space<vmem>>, vector<8x128xf32>
    tpu.vector_store %arg9[%c41, %c0_3], %1 {strides = array<i32>} : memref<488x128xf32, #tpu.memory_space<vmem>>, vector<8x128xf32>,
    %c65 = arith.constant 65 : index
    %c0_4 = arith.constant 0 : index
    %5 = vector.load %arg9[%c65, %c0_4] : memref<488x128xf32, #tpu.memory_space<vmem>>, vector<8x128xf32>
    tpu.vector_store %arg9[%c65, %c0_4], %1 {strides = array<i32>} : memref<488x128xf32, #tpu.memory_space<vmem>>, vector<8x128xf32>,
    %c89 = arith.constant 89 : index
    %c0_5 = arith.constant 0 : index
    %6 = vector.load %arg9[%c89, %c0_5] : memref<488x128xf32, #tpu.memory_space<vmem>>, vector<8x128xf32>
    tpu.vector_store %arg9[%c89, %c0_5], %1 {strides = array<i32>} : memref<488x128xf32, #tpu.memory_space<vmem>>, vector<8x128xf32>,
    %c113 = arith.constant 113 : index
    %c0_6 = arith.constant 0 : index
    %7 = vector.load %arg9[%c113, %c0_6] : memref<488x128xf32, #tpu.memory_space<vmem>>, vector<8x128xf32>
    tpu.vector_store %arg9[%c113, %c0_6], %1 {strides = array<i32>} : memref<488x128xf32, #tpu.memory_space<vmem>>, vector<8x128xf32>,
    %c137 = arith.constant 137 : index
    %c0_7 = arith.constant 0 : index
    %8 = vector.load %arg9[%c137, %c0_7] : memref<488x128xf32, #tpu.memory_space<vmem>>, vector<8x128xf32>
    tpu.vector_store %arg9[%c137, %c0_7], %1 {strides = array<i32>} : memref<488x128xf32, #tpu.memory_space<vmem>>, vector<8x128xf32>,
    %c161 = arith.constant 161 : index
    %c0_8 = arith.constant 0 : index
    %9 = vector.load %arg9[%c161, %c0_8] : memref<488x128xf32, #tpu.memory_space<vmem>>, vector<8x128xf32>
    tpu.vector_store %arg9[%c161, %c0_8], %1 {strides = array<i32>} : memref<488x128xf32, #tpu.memory_space<vmem>>, vector<8x128xf32>,
    %c185 = arith.constant 185 : index
    %c0_9 = arith.constant 0 : index
    %10 = vector.load %arg9[%c185, %c0_9] : memref<488x128xf32, #tpu.memory_space<vmem>>, vector<8x128xf32>
    tpu.vector_store %arg9[%c185, %c0_9], %1 {strides = array<i32>} : memref<488x128xf32, #tpu.memory_space<vmem>>, vector<8x128xf32>,
    %c209 = arith.constant 209 : index
    %c0_10 = arith.constant 0 : index
    %11 = vector.load %arg9[%c209, %c0_10] : memref<488x128xf32, #tpu.memory_space<vmem>>, vector<8x128xf32>
    tpu.vector_store %arg9[%c209, %c0_10], %1 {strides = array<i32>} : memref<488x128xf32, #tpu.memory_space<vmem>>, vector<8x128xf32>,
    %c233 = arith.constant 233 : index
    %c0_11 = arith.constant 0 : index
    %12 = vector.load %arg9[%c233, %c0_11] : memref<488x128xf32, #tpu.memory_space<vmem>>, vector<8x128xf32>
    tpu.vector_store %arg9[%c233, %c0_11], %1 {strides = array<i32>} : memref<488x128xf32, #tpu.memory_space<vmem>>, vector<8x128xf32>,
    %c257 = arith.constant 257 : index
    %c0_12 = arith.constant 0 : index
    %13 = vector.load %arg9[%c257, %c0_12] : memref<488x128xf32, #tpu.memory_space<vmem>>, vector<8x128xf32>
    tpu.vector_store %arg9[%c257, %c0_12], %1 {strides = array<i32>} : memref<488x128xf32, #tpu.memory_space<vmem>>, vector<8x128xf32>,
    %c281 = arith.constant 281 : index
    %c0_13 = arith.constant 0 : index
    %14 = vector.load %arg9[%c281, %c0_13] : memref<488x128xf32, #tpu.memory_space<vmem>>, vector<8x128xf32>
    tpu.vector_store %arg9[%c281, %c0_13], %1 {strides = array<i32>} : memref<488x128xf32, #tpu.memory_space<vmem>>, vector<8x128xf32>,
    %c305 = arith.constant 305 : index
    %c0_14 = arith.constant 0 : index
    %15 = vector.load %arg9[%c305, %c0_14] : memref<488x128xf32, #tpu.memory_space<vmem>>, vector<8x128xf32>
    tpu.vector_store %arg9[%c305, %c0_14], %1 {strides = array<i32>} : memref<488x128xf32, #tpu.memory_space<vmem>>, vector<8x128xf32>,
    %c329 = arith.constant 329 : index
    %c0_15 = arith.constant 0 : index
    %16 = vector.load %arg9[%c329, %c0_15] : memref<488x128xf32, #tpu.memory_space<vmem>>, vector<8x128xf32>
    tpu.vector_store %arg9[%c329, %c0_15], %1 {strides = array<i32>} : memref<488x128xf32, #tpu.memory_space<vmem>>, vector<8x128xf32>,
    %c353 = arith.constant 353 : index
    %c0_16 = arith.constant 0 : index
    %17 = vector.load %arg9[%c353, %c0_16] : memref<488x128xf32, #tpu.memory_space<vmem>>, vector<8x128xf32>
    tpu.vector_store %arg9[%c353, %c0_16], %1 {strides = array<i32>} : memref<488x128xf32, #tpu.memory_space<vmem>>, vector<8x128xf32>,
    %c377 = arith.constant 377 : index
    %c0_17 = arith.constant 0 : index
    %18 = vector.load %arg9[%c377, %c0_17] : memref<488x128xf32, #tpu.memory_space<vmem>>, vector<8x128xf32>
    tpu.vector_store %arg9[%c377, %c0_17], %1 {strides = array<i32>} : memref<488x128xf32, #tpu.memory_space<vmem>>, vector<8x128xf32>,
    %c401 = arith.constant 401 : index
    %c0_18 = arith.constant 0 : index
    %19 = vector.load %arg9[%c401, %c0_18] : memref<488x128xf32, #tpu.memory_space<vmem>>, vector<31x128xf32>
    tpu.vector_store %arg9[%c401, %c0_18], %2 {strides = array<i32>} : memref<488x128xf32, #tpu.memory_space<vmem>>, vector<31x128xf32>,
    %cst_19 = arith.constant 0.000000e+00 : f32
    %20 = vector.broadcast %cst_19 : f32 to vector<56x128xf32>
    %c432 = arith.constant 432 : index
    %c0_20 = arith.constant 0 : index
    %21 = vector.load %arg9[%c432, %c0_20] : memref<488x128xf32, #tpu.memory_space<vmem>>, vector<56x128xf32>
    tpu.vector_store %arg9[%c432, %c0_20], %20 {strides = array<i32>} : memref<488x128xf32, #tpu.memory_space<vmem>>, vector<56x128xf32>,
    %c0_21 = arith.constant 0 : index
    %c0_22 = arith.constant 0 : index
    %c0_23 = arith.constant 0 : index
    %c0_24 = arith.constant 0 : index
    %22 = vector.load %arg1[%c0_21, %c0_22, %c0_23, %c0_24] : memref<1x16x16x128xf32, #tpu.memory_space<vmem>>, vector<1x1x16x128xf32>
    %23 = vector.shape_cast %22 : vector<1x1x16x128xf32> to vector<16x128xf32>
    %c25 = arith.constant 25 : index
    %c0_25 = arith.constant 0 : index
    %24 = vector.load %arg9[%c25, %c0_25] : memref<488x128xf32, #tpu.memory_space<vmem>>, vector<16x128xf32>
    tpu.vector_store %arg9[%c25, %c0_25], %23 {strides = array<i32>} : memref<488x128xf32, #tpu.memory_space<vmem>>, vector<16x128xf32>,
    %c0_26 = arith.constant 0 : index
    %c1 = arith.constant 1 : index
    %c0_27 = arith.constant 0 : index
    %c0_28 = arith.constant 0 : index
    %25 = vector.load %arg1[%c0_26, %c1, %c0_27, %c0_28] : memref<1x16x16x128xf32, #tpu.memory_space<vmem>>, vector<1x1x16x128xf32>
    %26 = vector.shape_cast %25 : vector<1x1x16x128xf32> to vector<16x128xf32>
    %c49 = arith.constant 49 : index
    %c0_29 = arith.constant 0 : index
    %27 = vector.load %arg9[%c49, %c0_29] : memref<488x128xf32, #tpu.memory_space<vmem>>, vector<16x128xf32>
    tpu.vector_store %arg9[%c49, %c0_29], %26 {strides = array<i32>} : memref<488x128xf32, #tpu.memory_space<vmem>>, vector<16x128xf32>,
    %c0_30 = arith.constant 0 : index
    %c2 = arith.constant 2 : index
    %c0_31 = arith.constant 0 : index
    %c0_32 = arith.constant 0 : index
    %28 = vector.load %arg1[%c0_30, %c2, %c0_31, %c0_32] : memref<1x16x16x128xf32, #tpu.memory_space<vmem>>, vector<1x1x16x128xf32>
    %29 = vector.shape_cast %28 : vector<1x1x16x128xf32> to vector<16x128xf32>
    %c73 = arith.constant 73 : index
    %c0_33 = arith.constant 0 : index
    %30 = vector.load %arg9[%c73, %c0_33] : memref<488x128xf32, #tpu.memory_space<vmem>>, vector<16x128xf32>
    tpu.vector_store %arg9[%c73, %c0_33], %29 {strides = array<i32>} : memref<488x128xf32, #tpu.memory_space<vmem>>, vector<16x128xf32>,
    %c0_34 = arith.constant 0 : index
    %c3 = arith.constant 3 : index
    %c0_35 = arith.constant 0 : index
    %c0_36 = arith.constant 0 : index
    %31 = vector.load %arg1[%c0_34, %c3, %c0_35, %c0_36] : memref<1x16x16x128xf32, #tpu.memory_space<vmem>>, vector<1x1x16x128xf32>
    %32 = vector.shape_cast %31 : vector<1x1x16x128xf32> to vector<16x128xf32>
    %c97 = arith.constant 97 : index
    %c0_37 = arith.constant 0 : index
    %33 = vector.load %arg9[%c97, %c0_37] : memref<488x128xf32, #tpu.memory_space<vmem>>, vector<16x128xf32>
    tpu.vector_store %arg9[%c97, %c0_37], %32 {strides = array<i32>} : memref<488x128xf32, #tpu.memory_space<vmem>>, vector<16x128xf32>,
    %c0_38 = arith.constant 0 : index
    %c4 = arith.constant 4 : index
    %c0_39 = arith.constant 0 : index
    %c0_40 = arith.constant 0 : index
    %34 = vector.load %arg1[%c0_38, %c4, %c0_39, %c0_40] : memref<1x16x16x128xf32, #tpu.memory_space<vmem>>, vector<1x1x16x128xf32>
    %35 = vector.shape_cast %34 : vector<1x1x16x128xf32> to vector<16x128xf32>
    %c121 = arith.constant 121 : index
    %c0_41 = arith.constant 0 : index
    %36 = vector.load %arg9[%c121, %c0_41] : memref<488x128xf32, #tpu.memory_space<vmem>>, vector<16x128xf32>
    tpu.vector_store %arg9[%c121, %c0_41], %35 {strides = array<i32>} : memref<488x128xf32, #tpu.memory_space<vmem>>, vector<16x128xf32>,
    %c0_42 = arith.constant 0 : index
    %c5 = arith.constant 5 : index
    %c0_43 = arith.constant 0 : index
    %c0_44 = arith.constant 0 : index
    %37 = vector.load %arg1[%c0_42, %c5, %c0_43, %c0_44] : memref<1x16x16x128xf32, #tpu.memory_space<vmem>>, vector<1x1x16x128xf32>
    %38 = vector.shape_cast %37 : vector<1x1x16x128xf32> to vector<16x128xf32>
    %c145 = arith.constant 145 : index
    %c0_45 = arith.constant 0 : index
    %39 = vector.load %arg9[%c145, %c0_45] : memref<488x128xf32, #tpu.memory_space<vmem>>, vector<16x128xf32>
    tpu.vector_store %arg9[%c145, %c0_45], %38 {strides = array<i32>} : memref<488x128xf32, #tpu.memory_space<vmem>>, vector<16x128xf32>,
    %c0_46 = arith.constant 0 : index
    %c6 = arith.constant 6 : index
    %c0_47 = arith.constant 0 : index
    %c0_48 = arith.constant 0 : index
    %40 = vector.load %arg1[%c0_46, %c6, %c0_47, %c0_48] : memref<1x16x16x128xf32, #tpu.memory_space<vmem>>, vector<1x1x16x128xf32>
    %41 = vector.shape_cast %40 : vector<1x1x16x128xf32> to vector<16x128xf32>
    %c169 = arith.constant 169 : index
    %c0_49 = arith.constant 0 : index
    %42 = vector.load %arg9[%c169, %c0_49] : memref<488x128xf32, #tpu.memory_space<vmem>>, vector<16x128xf32>
    tpu.vector_store %arg9[%c169, %c0_49], %41 {strides = array<i32>} : memref<488x128xf32, #tpu.memory_space<vmem>>, vector<16x128xf32>,
    %c0_50 = arith.constant 0 : index
    %c7 = arith.constant 7 : index
    %c0_51 = arith.constant 0 : index
    %c0_52 = arith.constant 0 : index
    %43 = vector.load %arg1[%c0_50, %c7, %c0_51, %c0_52] : memref<1x16x16x128xf32, #tpu.memory_space<vmem>>, vector<1x1x16x128xf32>
    %44 = vector.shape_cast %43 : vector<1x1x16x128xf32> to vector<16x128xf32>
    %c193 = arith.constant 193 : index
    %c0_53 = arith.constant 0 : index
    %45 = vector.load %arg9[%c193, %c0_53] : memref<488x128xf32, #tpu.memory_space<vmem>>, vector<16x128xf32>
    tpu.vector_store %arg9[%c193, %c0_53], %44 {strides = array<i32>} : memref<488x128xf32, #tpu.memory_space<vmem>>, vector<16x128xf32>,
    %c0_54 = arith.constant 0 : index
    %c8 = arith.constant 8 : index
    %c0_55 = arith.constant 0 : index
    %c0_56 = arith.constant 0 : index
    %46 = vector.load %arg1[%c0_54, %c8, %c0_55, %c0_56] : memref<1x16x16x128xf32, #tpu.memory_space<vmem>>, vector<1x1x16x128xf32>
    %47 = vector.shape_cast %46 : vector<1x1x16x128xf32> to vector<16x128xf32>
    %c217 = arith.constant 217 : index
    %c0_57 = arith.constant 0 : index
    %48 = vector.load %arg9[%c217, %c0_57] : memref<488x128xf32, #tpu.memory_space<vmem>>, vector<16x128xf32>
    tpu.vector_store %arg9[%c217, %c0_57], %47 {strides = array<i32>} : memref<488x128xf32, #tpu.memory_space<vmem>>, vector<16x128xf32>,
    %c0_58 = arith.constant 0 : index
    %c9 = arith.constant 9 : index
    %c0_59 = arith.constant 0 : index
    %c0_60 = arith.constant 0 : index
    %49 = vector.load %arg1[%c0_58, %c9, %c0_59, %c0_60] : memref<1x16x16x128xf32, #tpu.memory_space<vmem>>, vector<1x1x16x128xf32>
    %50 = vector.shape_cast %49 : vector<1x1x16x128xf32> to vector<16x128xf32>
    %c241 = arith.constant 241 : index
    %c0_61 = arith.constant 0 : index
    %51 = vector.load %arg9[%c241, %c0_61] : memref<488x128xf32, #tpu.memory_space<vmem>>, vector<16x128xf32>
    tpu.vector_store %arg9[%c241, %c0_61], %50 {strides = array<i32>} : memref<488x128xf32, #tpu.memory_space<vmem>>, vector<16x128xf32>,
    %c0_62 = arith.constant 0 : index
    %c10 = arith.constant 10 : index
    %c0_63 = arith.constant 0 : index
    %c0_64 = arith.constant 0 : index
    %52 = vector.load %arg1[%c0_62, %c10, %c0_63, %c0_64] : memref<1x16x16x128xf32, #tpu.memory_space<vmem>>, vector<1x1x16x128xf32>
    %53 = vector.shape_cast %52 : vector<1x1x16x128xf32> to vector<16x128xf32>
    %c265 = arith.constant 265 : index
    %c0_65 = arith.constant 0 : index
    %54 = vector.load %arg9[%c265, %c0_65] : memref<488x128xf32, #tpu.memory_space<vmem>>, vector<16x128xf32>
    tpu.vector_store %arg9[%c265, %c0_65], %53 {strides = array<i32>} : memref<488x128xf32, #tpu.memory_space<vmem>>, vector<16x128xf32>,
    %c0_66 = arith.constant 0 : index
    %c11 = arith.constant 11 : index
    %c0_67 = arith.constant 0 : index
    %c0_68 = arith.constant 0 : index
    %55 = vector.load %arg1[%c0_66, %c11, %c0_67, %c0_68] : memref<1x16x16x128xf32, #tpu.memory_space<vmem>>, vector<1x1x16x128xf32>
    %56 = vector.shape_cast %55 : vector<1x1x16x128xf32> to vector<16x128xf32>
    %c289 = arith.constant 289 : index
    %c0_69 = arith.constant 0 : index
    %57 = vector.load %arg9[%c289, %c0_69] : memref<488x128xf32, #tpu.memory_space<vmem>>, vector<16x128xf32>
    tpu.vector_store %arg9[%c289, %c0_69], %56 {strides = array<i32>} : memref<488x128xf32, #tpu.memory_space<vmem>>, vector<16x128xf32>,
    %c0_70 = arith.constant 0 : index
    %c12 = arith.constant 12 : index
    %c0_71 = arith.constant 0 : index
    %c0_72 = arith.constant 0 : index
    %58 = vector.load %arg1[%c0_70, %c12, %c0_71, %c0_72] : memref<1x16x16x128xf32, #tpu.memory_space<vmem>>, vector<1x1x16x128xf32>
    %59 = vector.shape_cast %58 : vector<1x1x16x128xf32> to vector<16x128xf32>
    %c313 = arith.constant 313 : index
    %c0_73 = arith.constant 0 : index
    %60 = vector.load %arg9[%c313, %c0_73] : memref<488x128xf32, #tpu.memory_space<vmem>>, vector<16x128xf32>
    tpu.vector_store %arg9[%c313, %c0_73], %59 {strides = array<i32>} : memref<488x128xf32, #tpu.memory_space<vmem>>, vector<16x128xf32>,
    %c0_74 = arith.constant 0 : index
    %c13 = arith.constant 13 : index
    %c0_75 = arith.constant 0 : index
    %c0_76 = arith.constant 0 : index
    %61 = vector.load %arg1[%c0_74, %c13, %c0_75, %c0_76] : memref<1x16x16x128xf32, #tpu.memory_space<vmem>>, vector<1x1x16x128xf32>
    %62 = vector.shape_cast %61 : vector<1x1x16x128xf32> to vector<16x128xf32>
    %c337 = arith.constant 337 : index
    %c0_77 = arith.constant 0 : index
    %63 = vector.load %arg9[%c337, %c0_77] : memref<488x128xf32, #tpu.memory_space<vmem>>, vector<16x128xf32>
    tpu.vector_store %arg9[%c337, %c0_77], %62 {strides = array<i32>} : memref<488x128xf32, #tpu.memory_space<vmem>>, vector<16x128xf32>,
    %c0_78 = arith.constant 0 : index
    %c14 = arith.constant 14 : index
    %c0_79 = arith.constant 0 : index
    %c0_80 = arith.constant 0 : index
    %64 = vector.load %arg1[%c0_78, %c14, %c0_79, %c0_80] : memref<1x16x16x128xf32, #tpu.memory_space<vmem>>, vector<1x1x16x128xf32>
    %65 = vector.shape_cast %64 : vector<1x1x16x128xf32> to vector<16x128xf32>
    %c361 = arith.constant 361 : index
    %c0_81 = arith.constant 0 : index
    %66 = vector.load %arg9[%c361, %c0_81] : memref<488x128xf32, #tpu.memory_space<vmem>>, vector<16x128xf32>
    tpu.vector_store %arg9[%c361, %c0_81], %65 {strides = array<i32>} : memref<488x128xf32, #tpu.memory_space<vmem>>, vector<16x128xf32>,
    %c0_82 = arith.constant 0 : index
    %c15 = arith.constant 15 : index
    %c0_83 = arith.constant 0 : index
    %c0_84 = arith.constant 0 : index
    %67 = vector.load %arg1[%c0_82, %c15, %c0_83, %c0_84] : memref<1x16x16x128xf32, #tpu.memory_space<vmem>>, vector<1x1x16x128xf32>
    %68 = vector.shape_cast %67 : vector<1x1x16x128xf32> to vector<16x128xf32>
    %c385 = arith.constant 385 : index
    %c0_85 = arith.constant 0 : index
    %69 = vector.load %arg9[%c385, %c0_85] : memref<488x128xf32, #tpu.memory_space<vmem>>, vector<16x128xf32>
    tpu.vector_store %arg9[%c385, %c0_85], %68 {strides = array<i32>} : memref<488x128xf32, #tpu.memory_space<vmem>>, vector<16x128xf32>,
    %c0_86 = arith.constant 0 : index
    %c0_87 = arith.constant 0 : index
    %70 = vector.load %arg9[%c0_86, %c0_87] : memref<488x128xf32, #tpu.memory_space<vmem>>, vector<432x128xf32>
    %c0_88 = arith.constant 0 : index
    %c0_89 = arith.constant 0 : index
    %71 = vector.load %arg2[%c0_88, %c0_89] : memref<1152x64xf32, #tpu.memory_space<vmem>>, vector<128x64xf32>
    %cst_90 = arith.constant dense<0.000000e+00> : vector<432x64xf32>
    %72 = tpu.matmul %70, %71, %cst_90 {dimension_numbers = #tpu.dot_dimension_numbers<[1], [0], [0], [1], [0, 0, 1, 1], [], []>} : vector<432x128xf32>, vector<128x64xf32>, vector<432x64xf32> -> vector<432x64xf32>
    %c0_91 = arith.constant 0 : index
    %c0_92 = arith.constant 0 : index
    %73 = vector.load %arg10[%c0_91, %c0_92] : memref<432x64xf32, #tpu.memory_space<vmem>>, vector<432x64xf32>
    tpu.vector_store %arg10[%c0_91, %c0_92], %72 {strides = array<i32>} : memref<432x64xf32, #tpu.memory_space<vmem>>, vector<432x64xf32>,
    %c1_93 = arith.constant 1 : index
    %c0_94 = arith.constant 0 : index
    %74 = vector.load %arg9[%c1_93, %c0_94] : memref<488x128xf32, #tpu.memory_space<vmem>>, vector<432x128xf32>
    %c128 = arith.constant 128 : index
    %c0_95 = arith.constant 0 : index
    %75 = vector.load %arg2[%c128, %c0_95] : memref<1152x64xf32, #tpu.memory_space<vmem>>, vector<128x64xf32>
    %cst_96 = arith.constant dense<0.000000e+00> : vector<432x64xf32>
    %76 = tpu.matmul %74, %75, %cst_96 {dimension_numbers = #tpu.dot_dimension_numbers<[1], [0], [0], [1], [0, 0, 1, 1], [], []>} : vector<432x128xf32>, vector<128x64xf32>, vector<432x64xf32> -> vector<432x64xf32>
    %c0_97 = arith.constant 0 : index
    %c0_98 = arith.constant 0 : index
    %77 = vector.load %arg10[%c0_97, %c0_98] : memref<432x64xf32, #tpu.memory_space<vmem>>, vector<432x64xf32>
    %78 = arith.addf %77, %76 : vector<432x64xf32>
    %c0_99 = arith.constant 0 : index
    %c0_100 = arith.constant 0 : index
    %79 = vector.load %arg10[%c0_99, %c0_100] : memref<432x64xf32, #tpu.memory_space<vmem>>, vector<432x64xf32>
    tpu.vector_store %arg10[%c0_99, %c0_100], %78 {strides = array<i32>} : memref<432x64xf32, #tpu.memory_space<vmem>>, vector<432x64xf32>,
    %c2_101 = arith.constant 2 : index
    %c0_102 = arith.constant 0 : index
    %80 = vector.load %arg9[%c2_101, %c0_102] : memref<488x128xf32, #tpu.memory_space<vmem>>, vector<432x128xf32>
    %c256 = arith.constant 256 : index
    %c0_103 = arith.constant 0 : index
    %81 = vector.load %arg2[%c256, %c0_103] : memref<1152x64xf32, #tpu.memory_space<vmem>>, vector<128x64xf32>
    %cst_104 = arith.constant dense<0.000000e+00> : vector<432x64xf32>
    %82 = tpu.matmul %80, %81, %cst_104 {dimension_numbers = #tpu.dot_dimension_numbers<[1], [0], [0], [1], [0, 0, 1, 1], [], []>} : vector<432x128xf32>, vector<128x64xf32>, vector<432x64xf32> -> vector<432x64xf32>
    %c0_105 = arith.constant 0 : index
    %c0_106 = arith.constant 0 : index
    %83 = vector.load %arg10[%c0_105, %c0_106] : memref<432x64xf32, #tpu.memory_space<vmem>>, vector<432x64xf32>
    %84 = arith.addf %83, %82 : vector<432x64xf32>
    %c0_107 = arith.constant 0 : index
    %c0_108 = arith.constant 0 : index
    %85 = vector.load %arg10[%c0_107, %c0_108] : memref<432x64xf32, #tpu.memory_space<vmem>>, vector<432x64xf32>
    tpu.vector_store %arg10[%c0_107, %c0_108], %84 {strides = array<i32>} : memref<432x64xf32, #tpu.memory_space<vmem>>, vector<432x64xf32>,
    %c24 = arith.constant 24 : index
    %c0_109 = arith.constant 0 : index
    %86 = vector.load %arg9[%c24, %c0_109] : memref<488x128xf32, #tpu.memory_space<vmem>>, vector<432x128xf32>
    %c384 = arith.constant 384 : index
    %c0_110 = arith.constant 0 : index
    %87 = vector.load %arg2[%c384, %c0_110] : memref<1152x64xf32, #tpu.memory_space<vmem>>, vector<128x64xf32>
    %cst_111 = arith.constant dense<0.000000e+00> : vector<432x64xf32>
    %88 = tpu.matmul %86, %87, %cst_111 {dimension_numbers = #tpu.dot_dimension_numbers<[1], [0], [0], [1], [0, 0, 1, 1], [], []>} : vector<432x128xf32>, vector<128x64xf32>, vector<432x64xf32> -> vector<432x64xf32>
    %c0_112 = arith.constant 0 : index
    %c0_113 = arith.constant 0 : index
    %89 = vector.load %arg10[%c0_112, %c0_113] : memref<432x64xf32, #tpu.memory_space<vmem>>, vector<432x64xf32>
    %90 = arith.addf %89, %88 : vector<432x64xf32>
    %c0_114 = arith.constant 0 : index
    %c0_115 = arith.constant 0 : index
    %91 = vector.load %arg10[%c0_114, %c0_115] : memref<432x64xf32, #tpu.memory_space<vmem>>, vector<432x64xf32>
    tpu.vector_store %arg10[%c0_114, %c0_115], %90 {strides = array<i32>} : memref<432x64xf32, #tpu.memory_space<vmem>>, vector<432x64xf32>,
    %c25_116 = arith.constant 25 : index
    %c0_117 = arith.constant 0 : index
    %92 = vector.load %arg9[%c25_116, %c0_117] : memref<488x128xf32, #tpu.memory_space<vmem>>, vector<432x128xf32>
    %c512 = arith.constant 512 : index
    %c0_118 = arith.constant 0 : index
    %93 = vector.load %arg2[%c512, %c0_118] : memref<1152x64xf32, #tpu.memory_space<vmem>>, vector<128x64xf32>
    %cst_119 = arith.constant dense<0.000000e+00> : vector<432x64xf32>
    %94 = tpu.matmul %92, %93, %cst_119 {dimension_numbers = #tpu.dot_dimension_numbers<[1], [0], [0], [1], [0, 0, 1, 1], [], []>} : vector<432x128xf32>, vector<128x64xf32>, vector<432x64xf32> -> vector<432x64xf32>
    %c0_120 = arith.constant 0 : index
    %c0_121 = arith.constant 0 : index
    %95 = vector.load %arg10[%c0_120, %c0_121] : memref<432x64xf32, #tpu.memory_space<vmem>>, vector<432x64xf32>
    %96 = arith.addf %95, %94 : vector<432x64xf32>
    %c0_122 = arith.constant 0 : index
    %c0_123 = arith.constant 0 : index
    %97 = vector.load %arg10[%c0_122, %c0_123] : memref<432x64xf32, #tpu.memory_space<vmem>>, vector<432x64xf32>
    tpu.vector_store %arg10[%c0_122, %c0_123], %96 {strides = array<i32>} : memref<432x64xf32, #tpu.memory_space<vmem>>, vector<432x64xf32>,
    %c26 = arith.constant 26 : index
    %c0_124 = arith.constant 0 : index
    %98 = vector.load %arg9[%c26, %c0_124] : memref<488x128xf32, #tpu.memory_space<vmem>>, vector<432x128xf32>
    %c640 = arith.constant 640 : index
    %c0_125 = arith.constant 0 : index
    %99 = vector.load %arg2[%c640, %c0_125] : memref<1152x64xf32, #tpu.memory_space<vmem>>, vector<128x64xf32>
    %cst_126 = arith.constant dense<0.000000e+00> : vector<432x64xf32>
    %100 = tpu.matmul %98, %99, %cst_126 {dimension_numbers = #tpu.dot_dimension_numbers<[1], [0], [0], [1], [0, 0, 1, 1], [], []>} : vector<432x128xf32>, vector<128x64xf32>, vector<432x64xf32> -> vector<432x64xf32>
    %c0_127 = arith.constant 0 : index
    %c0_128 = arith.constant 0 : index
    %101 = vector.load %arg10[%c0_127, %c0_128] : memref<432x64xf32, #tpu.memory_space<vmem>>, vector<432x64xf32>
    %102 = arith.addf %101, %100 : vector<432x64xf32>
    %c0_129 = arith.constant 0 : index
    %c0_130 = arith.constant 0 : index
    %103 = vector.load %arg10[%c0_129, %c0_130] : memref<432x64xf32, #tpu.memory_space<vmem>>, vector<432x64xf32>
    tpu.vector_store %arg10[%c0_129, %c0_130], %102 {strides = array<i32>} : memref<432x64xf32, #tpu.memory_space<vmem>>, vector<432x64xf32>,
    %c48 = arith.constant 48 : index
    %c0_131 = arith.constant 0 : index
    %104 = vector.load %arg9[%c48, %c0_131] : memref<488x128xf32, #tpu.memory_space<vmem>>, vector<432x128xf32>
    %c768 = arith.constant 768 : index
    %c0_132 = arith.constant 0 : index
    %105 = vector.load %arg2[%c768, %c0_132] : memref<1152x64xf32, #tpu.memory_space<vmem>>, vector<128x64xf32>
    %cst_133 = arith.constant dense<0.000000e+00> : vector<432x64xf32>
    %106 = tpu.matmul %104, %105, %cst_133 {dimension_numbers = #tpu.dot_dimension_numbers<[1], [0], [0], [1], [0, 0, 1, 1], [], []>} : vector<432x128xf32>, vector<128x64xf32>, vector<432x64xf32> -> vector<432x64xf32>
    %c0_134 = arith.constant 0 : index
    %c0_135 = arith.constant 0 : index
    %107 = vector.load %arg10[%c0_134, %c0_135] : memref<432x64xf32, #tpu.memory_space<vmem>>, vector<432x64xf32>
    %108 = arith.addf %107, %106 : vector<432x64xf32>
    %c0_136 = arith.constant 0 : index
    %c0_137 = arith.constant 0 : index
    %109 = vector.load %arg10[%c0_136, %c0_137] : memref<432x64xf32, #tpu.memory_space<vmem>>, vector<432x64xf32>
    tpu.vector_store %arg10[%c0_136, %c0_137], %108 {strides = array<i32>} : memref<432x64xf32, #tpu.memory_space<vmem>>, vector<432x64xf32>,
    %c49_138 = arith.constant 49 : index
    %c0_139 = arith.constant 0 : index
    %110 = vector.load %arg9[%c49_138, %c0_139] : memref<488x128xf32, #tpu.memory_space<vmem>>, vector<432x128xf32>
    %c896 = arith.constant 896 : index
    %c0_140 = arith.constant 0 : index
    %111 = vector.load %arg2[%c896, %c0_140] : memref<1152x64xf32, #tpu.memory_space<vmem>>, vector<128x64xf32>
    %cst_141 = arith.constant dense<0.000000e+00> : vector<432x64xf32>
    %112 = tpu.matmul %110, %111, %cst_141 {dimension_numbers = #tpu.dot_dimension_numbers<[1], [0], [0], [1], [0, 0, 1, 1], [], []>} : vector<432x128xf32>, vector<128x64xf32>, vector<432x64xf32> -> vector<432x64xf32>
    %c0_142 = arith.constant 0 : index
    %c0_143 = arith.constant 0 : index
    %113 = vector.load %arg10[%c0_142, %c0_143] : memref<432x64xf32, #tpu.memory_space<vmem>>, vector<432x64xf32>
    %114 = arith.addf %113, %112 : vector<432x64xf32>
    %c0_144 = arith.constant 0 : index
    %c0_145 = arith.constant 0 : index
    %115 = vector.load %arg10[%c0_144, %c0_145] : memref<432x64xf32, #tpu.memory_space<vmem>>, vector<432x64xf32>
    tpu.vector_store %arg10[%c0_144, %c0_145], %114 {strides = array<i32>} : memref<432x64xf32, #tpu.memory_space<vmem>>, vector<432x64xf32>,
    %c50 = arith.constant 50 : index
    %c0_146 = arith.constant 0 : index
    %116 = vector.load %arg9[%c50, %c0_146] : memref<488x128xf32, #tpu.memory_space<vmem>>, vector<432x128xf32>
    %c1024 = arith.constant 1024 : index
    %c0_147 = arith.constant 0 : index
    %117 = vector.load %arg2[%c1024, %c0_147] : memref<1152x64xf32, #tpu.memory_space<vmem>>, vector<128x64xf32>
    %cst_148 = arith.constant dense<0.000000e+00> : vector<432x64xf32>
    %118 = tpu.matmul %116, %117, %cst_148 {dimension_numbers = #tpu.dot_dimension_numbers<[1], [0], [0], [1], [0, 0, 1, 1], [], []>} : vector<432x128xf32>, vector<128x64xf32>, vector<432x64xf32> -> vector<432x64xf32>
    %c0_149 = arith.constant 0 : index
    %c0_150 = arith.constant 0 : index
    %119 = vector.load %arg10[%c0_149, %c0_150] : memref<432x64xf32, #tpu.memory_space<vmem>>, vector<432x64xf32>
    %120 = arith.addf %119, %118 : vector<432x64xf32>
    %c0_151 = arith.constant 0 : index
    %c0_152 = arith.constant 0 : index
    %121 = vector.load %arg10[%c0_151, %c0_152] : memref<432x64xf32, #tpu.memory_space<vmem>>, vector<432x64xf32>
    tpu.vector_store %arg10[%c0_151, %c0_152], %120 {strides = array<i32>} : memref<432x64xf32, #tpu.memory_space<vmem>>, vector<432x64xf32>,
    %c0_153 = arith.constant 0 : index
    %c0_154 = arith.constant 0 : index
    %122 = vector.load %arg3[%c0_153, %c0_154] : memref<1x64xf32, #tpu.memory_space<vmem>>, vector<1x64xf32>
    %c0_155 = arith.constant 0 : index
    %c0_156 = arith.constant 0 : index
    %123 = vector.load %arg10[%c0_155, %c0_156] : memref<432x64xf32, #tpu.memory_space<vmem>>, vector<384x64xf32>
    %124 = vector.shape_cast %123 : vector<384x64xf32> to vector<16x24x64xf32>
    %125 = vector.extract_strided_slice %124 {offsets = [0, 0, 0], sizes = [16, 16, 64], strides = [1, 1, 1]} : vector<16x24x64xf32> to vector<16x16x64xf32>
    %126 = vector.shape_cast %125 : vector<16x16x64xf32> to vector<8x2x8x2x64xf32>
    %cst_157 = arith.constant dense<0xFF800000> : vector<8x8x64xf32>
    %127 = vector.multi_reduction <maximumf>, %126, %cst_157 [1, 3] : vector<8x2x8x2x64xf32> to vector<8x8x64xf32>
    %128 = vector.shape_cast %122 : vector<1x64xf32> to vector<1x1x64xf32>
    %129 = vector.broadcast %128 : vector<1x1x64xf32> to vector<8x8x64xf32>
    %130 = arith.addf %127, %129 : vector<8x8x64xf32>
    %cst_158 = arith.constant 0.000000e+00 : f32
    %131 = vector.broadcast %cst_158 : f32 to vector<8x8x64xf32>
    %132 = arith.maximumf %130, %131 : vector<8x8x64xf32>
    %cst_159 = arith.constant dense<0.000000e+00> : vector<64xf32>
    %133 = vector.multi_reduction <add>, %132, %cst_159 [0, 1] : vector<8x8x64xf32> to vector<64xf32>
    %134 = vector.shape_cast %133 : vector<64xf32> to vector<1x1x64xf32>
    %135 = arith.mulf %132, %132 : vector<8x8x64xf32>
    %cst_160 = arith.constant dense<0.000000e+00> : vector<64xf32>
    %136 = vector.multi_reduction <add>, %135, %cst_160 [0, 1] : vector<8x8x64xf32> to vector<64xf32>
    %137 = vector.shape_cast %136 : vector<64xf32> to vector<1x1x64xf32>
    %cst_161 = arith.constant 1.562500e-02 : f32
    %138 = vector.broadcast %cst_161 : f32 to vector<1x1x64xf32>
    %139 = arith.mulf %134, %138 : vector<1x1x64xf32>
    %cst_162 = arith.constant 1.562500e-02 : f32
    %140 = vector.broadcast %cst_162 : f32 to vector<1x1x64xf32>
    %141 = arith.mulf %137, %140 : vector<1x1x64xf32>
    %142 = arith.mulf %139, %139 : vector<1x1x64xf32>
    %143 = arith.subf %141, %142 : vector<1x1x64xf32>
    %144 = vector.broadcast %139 : vector<1x1x64xf32> to vector<8x8x64xf32>
    %145 = arith.subf %132, %144 : vector<8x8x64xf32>
    %cst_163 = arith.constant 9.99999974E-6 : f32
    %146 = vector.broadcast %cst_163 : f32 to vector<1x1x64xf32>
    %147 = arith.addf %143, %146 : vector<1x1x64xf32>
    %148 = math.rsqrt %147 : vector<1x1x64xf32>
    %149 = vector.broadcast %148 : vector<1x1x64xf32> to vector<8x8x64xf32>
    %150 = arith.mulf %145, %149 : vector<8x8x64xf32>
    %cst_164 = arith.constant 0.000000e+00 : f32
    %151 = vector.broadcast %cst_164 : f32 to vector<17x64xf32>
    %cst_165 = arith.constant 0.000000e+00 : f32
    %152 = vector.broadcast %cst_165 : f32 to vector<8x64xf32>
    %cst_166 = arith.constant 0.000000e+00 : f32
    %153 = vector.broadcast %cst_166 : f32 to vector<23x64xf32>
    %c0_167 = arith.constant 0 : index
    %c0_168 = arith.constant 0 : index
    %154 = vector.load %arg11[%c0_167, %c0_168] : memref<200x64xf32, #tpu.memory_space<vmem>>, vector<17x64xf32>
    tpu.vector_store %arg11[%c0_167, %c0_168], %151 {strides = array<i32>} : memref<200x64xf32, #tpu.memory_space<vmem>>, vector<17x64xf32>,
    %c25_169 = arith.constant 25 : index
    %c0_170 = arith.constant 0 : index
    %155 = vector.load %arg11[%c25_169, %c0_170] : memref<200x64xf32, #tpu.memory_space<vmem>>, vector<8x64xf32>
    tpu.vector_store %arg11[%c25_169, %c0_170], %152 {strides = array<i32>} : memref<200x64xf32, #tpu.memory_space<vmem>>, vector<8x64xf32>,
    %c41_171 = arith.constant 41 : index
    %c0_172 = arith.constant 0 : index
    %156 = vector.load %arg11[%c41_171, %c0_172] : memref<200x64xf32, #tpu.memory_space<vmem>>, vector<8x64xf32>
    tpu.vector_store %arg11[%c41_171, %c0_172], %152 {strides = array<i32>} : memref<200x64xf32, #tpu.memory_space<vmem>>, vector<8x64xf32>,
    %c57 = arith.constant 57 : index
    %c0_173 = arith.constant 0 : index
    %157 = vector.load %arg11[%c57, %c0_173] : memref<200x64xf32, #tpu.memory_space<vmem>>, vector<8x64xf32>
    tpu.vector_store %arg11[%c57, %c0_173], %152 {strides = array<i32>} : memref<200x64xf32, #tpu.memory_space<vmem>>, vector<8x64xf32>,
    %c73_174 = arith.constant 73 : index
    %c0_175 = arith.constant 0 : index
    %158 = vector.load %arg11[%c73_174, %c0_175] : memref<200x64xf32, #tpu.memory_space<vmem>>, vector<8x64xf32>
    tpu.vector_store %arg11[%c73_174, %c0_175], %152 {strides = array<i32>} : memref<200x64xf32, #tpu.memory_space<vmem>>, vector<8x64xf32>,
    %c89_176 = arith.constant 89 : index
    %c0_177 = arith.constant 0 : index
    %159 = vector.load %arg11[%c89_176, %c0_177] : memref<200x64xf32, #tpu.memory_space<vmem>>, vector<8x64xf32>
    tpu.vector_store %arg11[%c89_176, %c0_177], %152 {strides = array<i32>} : memref<200x64xf32, #tpu.memory_space<vmem>>, vector<8x64xf32>,
    %c105 = arith.constant 105 : index
    %c0_178 = arith.constant 0 : index
    %160 = vector.load %arg11[%c105, %c0_178] : memref<200x64xf32, #tpu.memory_space<vmem>>, vector<8x64xf32>
    tpu.vector_store %arg11[%c105, %c0_178], %152 {strides = array<i32>} : memref<200x64xf32, #tpu.memory_space<vmem>>, vector<8x64xf32>,
    %c121_179 = arith.constant 121 : index
    %c0_180 = arith.constant 0 : index
    %161 = vector.load %arg11[%c121_179, %c0_180] : memref<200x64xf32, #tpu.memory_space<vmem>>, vector<8x64xf32>
    tpu.vector_store %arg11[%c121_179, %c0_180], %152 {strides = array<i32>} : memref<200x64xf32, #tpu.memory_space<vmem>>, vector<8x64xf32>,
    %c137_181 = arith.constant 137 : index
    %c0_182 = arith.constant 0 : index
    %162 = vector.load %arg11[%c137_181, %c0_182] : memref<200x64xf32, #tpu.memory_space<vmem>>, vector<23x64xf32>
    tpu.vector_store %arg11[%c137_181, %c0_182], %153 {strides = array<i32>} : memref<200x64xf32, #tpu.memory_space<vmem>>, vector<23x64xf32>,
    %cst_183 = arith.constant 0.000000e+00 : f32
    %163 = vector.broadcast %cst_183 : f32 to vector<40x64xf32>
    %c160 = arith.constant 160 : index
    %c0_184 = arith.constant 0 : index
    %164 = vector.load %arg11[%c160, %c0_184] : memref<200x64xf32, #tpu.memory_space<vmem>>, vector<40x64xf32>
    tpu.vector_store %arg11[%c160, %c0_184], %163 {strides = array<i32>} : memref<200x64xf32, #tpu.memory_space<vmem>>, vector<40x64xf32>,
    %165 = vector.extract_strided_slice %150 {offsets = [0, 0, 0], sizes = [1, 8, 64], strides = [1, 1, 1]} : vector<8x8x64xf32> to vector<1x8x64xf32>
    %166 = vector.shape_cast %165 : vector<1x8x64xf32> to vector<8x64xf32>
    %c17 = arith.constant 17 : index
    %c0_185 = arith.constant 0 : index
    %167 = vector.load %arg11[%c17, %c0_185] : memref<200x64xf32, #tpu.memory_space<vmem>>, vector<8x64xf32>
    tpu.vector_store %arg11[%c17, %c0_185], %166 {strides = array<i32>} : memref<200x64xf32, #tpu.memory_space<vmem>>, vector<8x64xf32>,
    %168 = vector.extract_strided_slice %150 {offsets = [1, 0, 0], sizes = [1, 8, 64], strides = [1, 1, 1]} : vector<8x8x64xf32> to vector<1x8x64xf32>
    %169 = vector.shape_cast %168 : vector<1x8x64xf32> to vector<8x64xf32>
    %c33 = arith.constant 33 : index
    %c0_186 = arith.constant 0 : index
    %170 = vector.load %arg11[%c33, %c0_186] : memref<200x64xf32, #tpu.memory_space<vmem>>, vector<8x64xf32>
    tpu.vector_store %arg11[%c33, %c0_186], %169 {strides = array<i32>} : memref<200x64xf32, #tpu.memory_space<vmem>>, vector<8x64xf32>,
    %171 = vector.extract_strided_slice %150 {offsets = [2, 0, 0], sizes = [1, 8, 64], strides = [1, 1, 1]} : vector<8x8x64xf32> to vector<1x8x64xf32>
    %172 = vector.shape_cast %171 : vector<1x8x64xf32> to vector<8x64xf32>
    %c49_187 = arith.constant 49 : index
    %c0_188 = arith.constant 0 : index
    %173 = vector.load %arg11[%c49_187, %c0_188] : memref<200x64xf32, #tpu.memory_space<vmem>>, vector<8x64xf32>
    tpu.vector_store %arg11[%c49_187, %c0_188], %172 {strides = array<i32>} : memref<200x64xf32, #tpu.memory_space<vmem>>, vector<8x64xf32>,
    %174 = vector.extract_strided_slice %150 {offsets = [3, 0, 0], sizes = [1, 8, 64], strides = [1, 1, 1]} : vector<8x8x64xf32> to vector<1x8x64xf32>
    %175 = vector.shape_cast %174 : vector<1x8x64xf32> to vector<8x64xf32>
    %c65_189 = arith.constant 65 : index
    %c0_190 = arith.constant 0 : index
    %176 = vector.load %arg11[%c65_189, %c0_190] : memref<200x64xf32, #tpu.memory_space<vmem>>, vector<8x64xf32>
    tpu.vector_store %arg11[%c65_189, %c0_190], %175 {strides = array<i32>} : memref<200x64xf32, #tpu.memory_space<vmem>>, vector<8x64xf32>,
    %177 = vector.extract_strided_slice %150 {offsets = [4, 0, 0], sizes = [1, 8, 64], strides = [1, 1, 1]} : vector<8x8x64xf32> to vector<1x8x64xf32>
    %178 = vector.shape_cast %177 : vector<1x8x64xf32> to vector<8x64xf32>
    %c81 = arith.constant 81 : index
    %c0_191 = arith.constant 0 : index
    %179 = vector.load %arg11[%c81, %c0_191] : memref<200x64xf32, #tpu.memory_space<vmem>>, vector<8x64xf32>
    tpu.vector_store %arg11[%c81, %c0_191], %178 {strides = array<i32>} : memref<200x64xf32, #tpu.memory_space<vmem>>, vector<8x64xf32>,
    %180 = vector.extract_strided_slice %150 {offsets = [5, 0, 0], sizes = [1, 8, 64], strides = [1, 1, 1]} : vector<8x8x64xf32> to vector<1x8x64xf32>
    %181 = vector.shape_cast %180 : vector<1x8x64xf32> to vector<8x64xf32>
    %c97_192 = arith.constant 97 : index
    %c0_193 = arith.constant 0 : index
    %182 = vector.load %arg11[%c97_192, %c0_193] : memref<200x64xf32, #tpu.memory_space<vmem>>, vector<8x64xf32>
    tpu.vector_store %arg11[%c97_192, %c0_193], %181 {strides = array<i32>} : memref<200x64xf32, #tpu.memory_space<vmem>>, vector<8x64xf32>,
    %183 = vector.extract_strided_slice %150 {offsets = [6, 0, 0], sizes = [1, 8, 64], strides = [1, 1, 1]} : vector<8x8x64xf32> to vector<1x8x64xf32>
    %184 = vector.shape_cast %183 : vector<1x8x64xf32> to vector<8x64xf32>
    %c113_194 = arith.constant 113 : index
    %c0_195 = arith.constant 0 : index
    %185 = vector.load %arg11[%c113_194, %c0_195] : memref<200x64xf32, #tpu.memory_space<vmem>>, vector<8x64xf32>
    tpu.vector_store %arg11[%c113_194, %c0_195], %184 {strides = array<i32>} : memref<200x64xf32, #tpu.memory_space<vmem>>, vector<8x64xf32>,
    %186 = vector.extract_strided_slice %150 {offsets = [7, 0, 0], sizes = [1, 8, 64], strides = [1, 1, 1]} : vector<8x8x64xf32> to vector<1x8x64xf32>
    %187 = vector.shape_cast %186 : vector<1x8x64xf32> to vector<8x64xf32>
    %c129 = arith.constant 129 : index
    %c0_196 = arith.constant 0 : index
    %188 = vector.load %arg11[%c129, %c0_196] : memref<200x64xf32, #tpu.memory_space<vmem>>, vector<8x64xf32>
    tpu.vector_store %arg11[%c129, %c0_196], %187 {strides = array<i32>} : memref<200x64xf32, #tpu.memory_space<vmem>>, vector<8x64xf32>,
    %c0_197 = arith.constant 0 : index
    %c0_198 = arith.constant 0 : index
    %189 = vector.load %arg11[%c0_197, %c0_198] : memref<200x64xf32, #tpu.memory_space<vmem>>, vector<160x64xf32>
    %c0_199 = arith.constant 0 : index
    %c0_200 = arith.constant 0 : index
    %190 = vector.load %arg4[%c0_199, %c0_200] : memref<576x32xf32, #tpu.memory_space<vmem>>, vector<64x32xf32>
    %cst_201 = arith.constant dense<0.000000e+00> : vector<160x32xf32>
    %191 = tpu.matmul %189, %190, %cst_201 {dimension_numbers = #tpu.dot_dimension_numbers<[1], [0], [0], [1], [0, 0, 1, 1], [], []>} : vector<160x64xf32>, vector<64x32xf32>, vector<160x32xf32> -> vector<160x32xf32>
    %c0_202 = arith.constant 0 : index
    %c0_203 = arith.constant 0 : index
    %192 = vector.load %arg12[%c0_202, %c0_203] : memref<160x32xf32, #tpu.memory_space<vmem>>, vector<160x32xf32>
    tpu.vector_store %arg12[%c0_202, %c0_203], %191 {strides = array<i32>} : memref<160x32xf32, #tpu.memory_space<vmem>>, vector<160x32xf32>,
    %c1_204 = arith.constant 1 : index
    %c0_205 = arith.constant 0 : index
    %193 = vector.load %arg11[%c1_204, %c0_205] : memref<200x64xf32, #tpu.memory_space<vmem>>, vector<160x64xf32>
    %c64 = arith.constant 64 : index
    %c0_206 = arith.constant 0 : index
    %194 = vector.load %arg4[%c64, %c0_206] : memref<576x32xf32, #tpu.memory_space<vmem>>, vector<64x32xf32>
    %cst_207 = arith.constant dense<0.000000e+00> : vector<160x32xf32>
    %195 = tpu.matmul %193, %194, %cst_207 {dimension_numbers = #tpu.dot_dimension_numbers<[1], [0], [0], [1], [0, 0, 1, 1], [], []>} : vector<160x64xf32>, vector<64x32xf32>, vector<160x32xf32> -> vector<160x32xf32>
    %c0_208 = arith.constant 0 : index
    %c0_209 = arith.constant 0 : index
    %196 = vector.load %arg12[%c0_208, %c0_209] : memref<160x32xf32, #tpu.memory_space<vmem>>, vector<160x32xf32>
    %197 = arith.addf %196, %195 : vector<160x32xf32>
    %c0_210 = arith.constant 0 : index
    %c0_211 = arith.constant 0 : index
    %198 = vector.load %arg12[%c0_210, %c0_211] : memref<160x32xf32, #tpu.memory_space<vmem>>, vector<160x32xf32>
    tpu.vector_store %arg12[%c0_210, %c0_211], %197 {strides = array<i32>} : memref<160x32xf32, #tpu.memory_space<vmem>>, vector<160x32xf32>,
    %c2_212 = arith.constant 2 : index
    %c0_213 = arith.constant 0 : index
    %199 = vector.load %arg11[%c2_212, %c0_213] : memref<200x64xf32, #tpu.memory_space<vmem>>, vector<160x64xf32>
    %c128_214 = arith.constant 128 : index
    %c0_215 = arith.constant 0 : index
    %200 = vector.load %arg4[%c128_214, %c0_215] : memref<576x32xf32, #tpu.memory_space<vmem>>, vector<64x32xf32>
    %cst_216 = arith.constant dense<0.000000e+00> : vector<160x32xf32>
    %201 = tpu.matmul %199, %200, %cst_216 {dimension_numbers = #tpu.dot_dimension_numbers<[1], [0], [0], [1], [0, 0, 1, 1], [], []>} : vector<160x64xf32>, vector<64x32xf32>, vector<160x32xf32> -> vector<160x32xf32>
    %c0_217 = arith.constant 0 : index
    %c0_218 = arith.constant 0 : index
    %202 = vector.load %arg12[%c0_217, %c0_218] : memref<160x32xf32, #tpu.memory_space<vmem>>, vector<160x32xf32>
    %203 = arith.addf %202, %201 : vector<160x32xf32>
    %c0_219 = arith.constant 0 : index
    %c0_220 = arith.constant 0 : index
    %204 = vector.load %arg12[%c0_219, %c0_220] : memref<160x32xf32, #tpu.memory_space<vmem>>, vector<160x32xf32>
    tpu.vector_store %arg12[%c0_219, %c0_220], %203 {strides = array<i32>} : memref<160x32xf32, #tpu.memory_space<vmem>>, vector<160x32xf32>,
    %c16 = arith.constant 16 : index
    %c0_221 = arith.constant 0 : index
    %205 = vector.load %arg11[%c16, %c0_221] : memref<200x64xf32, #tpu.memory_space<vmem>>, vector<160x64xf32>
    %c192 = arith.constant 192 : index
    %c0_222 = arith.constant 0 : index
    %206 = vector.load %arg4[%c192, %c0_222] : memref<576x32xf32, #tpu.memory_space<vmem>>, vector<64x32xf32>
    %cst_223 = arith.constant dense<0.000000e+00> : vector<160x32xf32>
    %207 = tpu.matmul %205, %206, %cst_223 {dimension_numbers = #tpu.dot_dimension_numbers<[1], [0], [0], [1], [0, 0, 1, 1], [], []>} : vector<160x64xf32>, vector<64x32xf32>, vector<160x32xf32> -> vector<160x32xf32>
    %c0_224 = arith.constant 0 : index
    %c0_225 = arith.constant 0 : index
    %208 = vector.load %arg12[%c0_224, %c0_225] : memref<160x32xf32, #tpu.memory_space<vmem>>, vector<160x32xf32>
    %209 = arith.addf %208, %207 : vector<160x32xf32>
    %c0_226 = arith.constant 0 : index
    %c0_227 = arith.constant 0 : index
    %210 = vector.load %arg12[%c0_226, %c0_227] : memref<160x32xf32, #tpu.memory_space<vmem>>, vector<160x32xf32>
    tpu.vector_store %arg12[%c0_226, %c0_227], %209 {strides = array<i32>} : memref<160x32xf32, #tpu.memory_space<vmem>>, vector<160x32xf32>,
    %c17_228 = arith.constant 17 : index
    %c0_229 = arith.constant 0 : index
    %211 = vector.load %arg11[%c17_228, %c0_229] : memref<200x64xf32, #tpu.memory_space<vmem>>, vector<160x64xf32>
    %c256_230 = arith.constant 256 : index
    %c0_231 = arith.constant 0 : index
    %212 = vector.load %arg4[%c256_230, %c0_231] : memref<576x32xf32, #tpu.memory_space<vmem>>, vector<64x32xf32>
    %cst_232 = arith.constant dense<0.000000e+00> : vector<160x32xf32>
    %213 = tpu.matmul %211, %212, %cst_232 {dimension_numbers = #tpu.dot_dimension_numbers<[1], [0], [0], [1], [0, 0, 1, 1], [], []>} : vector<160x64xf32>, vector<64x32xf32>, vector<160x32xf32> -> vector<160x32xf32>
    %c0_233 = arith.constant 0 : index
    %c0_234 = arith.constant 0 : index
    %214 = vector.load %arg12[%c0_233, %c0_234] : memref<160x32xf32, #tpu.memory_space<vmem>>, vector<160x32xf32>
    %215 = arith.addf %214, %213 : vector<160x32xf32>
    %c0_235 = arith.constant 0 : index
    %c0_236 = arith.constant 0 : index
    %216 = vector.load %arg12[%c0_235, %c0_236] : memref<160x32xf32, #tpu.memory_space<vmem>>, vector<160x32xf32>
    tpu.vector_store %arg12[%c0_235, %c0_236], %215 {strides = array<i32>} : memref<160x32xf32, #tpu.memory_space<vmem>>, vector<160x32xf32>,
    %c18 = arith.constant 18 : index
    %c0_237 = arith.constant 0 : index
    %217 = vector.load %arg11[%c18, %c0_237] : memref<200x64xf32, #tpu.memory_space<vmem>>, vector<160x64xf32>
    %c320 = arith.constant 320 : index
    %c0_238 = arith.constant 0 : index
    %218 = vector.load %arg4[%c320, %c0_238] : memref<576x32xf32, #tpu.memory_space<vmem>>, vector<64x32xf32>
    %cst_239 = arith.constant dense<0.000000e+00> : vector<160x32xf32>
    %219 = tpu.matmul %217, %218, %cst_239 {dimension_numbers = #tpu.dot_dimension_numbers<[1], [0], [0], [1], [0, 0, 1, 1], [], []>} : vector<160x64xf32>, vector<64x32xf32>, vector<160x32xf32> -> vector<160x32xf32>
    %c0_240 = arith.constant 0 : index
    %c0_241 = arith.constant 0 : index
    %220 = vector.load %arg12[%c0_240, %c0_241] : memref<160x32xf32, #tpu.memory_space<vmem>>, vector<160x32xf32>
    %221 = arith.addf %220, %219 : vector<160x32xf32>
    %c0_242 = arith.constant 0 : index
    %c0_243 = arith.constant 0 : index
    %222 = vector.load %arg12[%c0_242, %c0_243] : memref<160x32xf32, #tpu.memory_space<vmem>>, vector<160x32xf32>
    tpu.vector_store %arg12[%c0_242, %c0_243], %221 {strides = array<i32>} : memref<160x32xf32, #tpu.memory_space<vmem>>, vector<160x32xf32>,
    %c32 = arith.constant 32 : index
    %c0_244 = arith.constant 0 : index
    %223 = vector.load %arg11[%c32, %c0_244] : memref<200x64xf32, #tpu.memory_space<vmem>>, vector<160x64xf32>
    %c384_245 = arith.constant 384 : index
    %c0_246 = arith.constant 0 : index
    %224 = vector.load %arg4[%c384_245, %c0_246] : memref<576x32xf32, #tpu.memory_space<vmem>>, vector<64x32xf32>
    %cst_247 = arith.constant dense<0.000000e+00> : vector<160x32xf32>
    %225 = tpu.matmul %223, %224, %cst_247 {dimension_numbers = #tpu.dot_dimension_numbers<[1], [0], [0], [1], [0, 0, 1, 1], [], []>} : vector<160x64xf32>, vector<64x32xf32>, vector<160x32xf32> -> vector<160x32xf32>
    %c0_248 = arith.constant 0 : index
    %c0_249 = arith.constant 0 : index
    %226 = vector.load %arg12[%c0_248, %c0_249] : memref<160x32xf32, #tpu.memory_space<vmem>>, vector<160x32xf32>
    %227 = arith.addf %226, %225 : vector<160x32xf32>
    %c0_250 = arith.constant 0 : index
    %c0_251 = arith.constant 0 : index
    %228 = vector.load %arg12[%c0_250, %c0_251] : memref<160x32xf32, #tpu.memory_space<vmem>>, vector<160x32xf32>
    tpu.vector_store %arg12[%c0_250, %c0_251], %227 {strides = array<i32>} : memref<160x32xf32, #tpu.memory_space<vmem>>, vector<160x32xf32>,
    %c33_252 = arith.constant 33 : index
    %c0_253 = arith.constant 0 : index
    %229 = vector.load %arg11[%c33_252, %c0_253] : memref<200x64xf32, #tpu.memory_space<vmem>>, vector<160x64xf32>
    %c448 = arith.constant 448 : index
    %c0_254 = arith.constant 0 : index
    %230 = vector.load %arg4[%c448, %c0_254] : memref<576x32xf32, #tpu.memory_space<vmem>>, vector<64x32xf32>
    %cst_255 = arith.constant dense<0.000000e+00> : vector<160x32xf32>
    %231 = tpu.matmul %229, %230, %cst_255 {dimension_numbers = #tpu.dot_dimension_numbers<[1], [0], [0], [1], [0, 0, 1, 1], [], []>} : vector<160x64xf32>, vector<64x32xf32>, vector<160x32xf32> -> vector<160x32xf32>
    %c0_256 = arith.constant 0 : index
    %c0_257 = arith.constant 0 : index
    %232 = vector.load %arg12[%c0_256, %c0_257] : memref<160x32xf32, #tpu.memory_space<vmem>>, vector<160x32xf32>
    %233 = arith.addf %232, %231 : vector<160x32xf32>
    %c0_258 = arith.constant 0 : index
    %c0_259 = arith.constant 0 : index
    %234 = vector.load %arg12[%c0_258, %c0_259] : memref<160x32xf32, #tpu.memory_space<vmem>>, vector<160x32xf32>
    tpu.vector_store %arg12[%c0_258, %c0_259], %233 {strides = array<i32>} : memref<160x32xf32, #tpu.memory_space<vmem>>, vector<160x32xf32>,
    %c34 = arith.constant 34 : index
    %c0_260 = arith.constant 0 : index
    %235 = vector.load %arg11[%c34, %c0_260] : memref<200x64xf32, #tpu.memory_space<vmem>>, vector<160x64xf32>
    %c512_261 = arith.constant 512 : index
    %c0_262 = arith.constant 0 : index
    %236 = vector.load %arg4[%c512_261, %c0_262] : memref<576x32xf32, #tpu.memory_space<vmem>>, vector<64x32xf32>
    %cst_263 = arith.constant dense<0.000000e+00> : vector<160x32xf32>
    %237 = tpu.matmul %235, %236, %cst_263 {dimension_numbers = #tpu.dot_dimension_numbers<[1], [0], [0], [1], [0, 0, 1, 1], [], []>} : vector<160x64xf32>, vector<64x32xf32>, vector<160x32xf32> -> vector<160x32xf32>
    %c0_264 = arith.constant 0 : index
    %c0_265 = arith.constant 0 : index
    %238 = vector.load %arg12[%c0_264, %c0_265] : memref<160x32xf32, #tpu.memory_space<vmem>>, vector<160x32xf32>
    %239 = arith.addf %238, %237 : vector<160x32xf32>
    %c0_266 = arith.constant 0 : index
    %c0_267 = arith.constant 0 : index
    %240 = vector.load %arg12[%c0_266, %c0_267] : memref<160x32xf32, #tpu.memory_space<vmem>>, vector<160x32xf32>
    tpu.vector_store %arg12[%c0_266, %c0_267], %239 {strides = array<i32>} : memref<160x32xf32, #tpu.memory_space<vmem>>, vector<160x32xf32>,
    %c0_268 = arith.constant 0 : index
    %c0_269 = arith.constant 0 : index
    %241 = vector.load %arg5[%c0_268, %c0_269] : memref<1x32xf32, #tpu.memory_space<vmem>>, vector<1x32xf32>
    %c0_270 = arith.constant 0 : index
    %c0_271 = arith.constant 0 : index
    %242 = vector.load %arg12[%c0_270, %c0_271] : memref<160x32xf32, #tpu.memory_space<vmem>>, vector<128x32xf32>
    %243 = vector.shape_cast %242 : vector<128x32xf32> to vector<8x16x32xf32>
    %244 = vector.extract_strided_slice %243 {offsets = [0, 0, 0], sizes = [8, 8, 32], strides = [1, 1, 1]} : vector<8x16x32xf32> to vector<8x8x32xf32>
    %245 = vector.shape_cast %244 : vector<8x8x32xf32> to vector<4x2x4x2x32xf32>
    %cst_272 = arith.constant dense<0xFF800000> : vector<4x4x32xf32>
    %246 = vector.multi_reduction <maximumf>, %245, %cst_272 [1, 3] : vector<4x2x4x2x32xf32> to vector<4x4x32xf32>
    %247 = vector.shape_cast %241 : vector<1x32xf32> to vector<1x1x32xf32>
    %248 = vector.broadcast %247 : vector<1x1x32xf32> to vector<4x4x32xf32>
    %249 = arith.addf %246, %248 : vector<4x4x32xf32>
    %cst_273 = arith.constant 0.000000e+00 : f32
    %250 = vector.broadcast %cst_273 : f32 to vector<4x4x32xf32>
    %251 = arith.maximumf %249, %250 : vector<4x4x32xf32>
    %cst_274 = arith.constant dense<0.000000e+00> : vector<32xf32>
    %252 = vector.multi_reduction <add>, %251, %cst_274 [0, 1] : vector<4x4x32xf32> to vector<32xf32>
    %253 = vector.shape_cast %252 : vector<32xf32> to vector<1x1x32xf32>
    %254 = arith.mulf %251, %251 : vector<4x4x32xf32>
    %cst_275 = arith.constant dense<0.000000e+00> : vector<32xf32>
    %255 = vector.multi_reduction <add>, %254, %cst_275 [0, 1] : vector<4x4x32xf32> to vector<32xf32>
    %256 = vector.shape_cast %255 : vector<32xf32> to vector<1x1x32xf32>
    %cst_276 = arith.constant 6.250000e-02 : f32
    %257 = vector.broadcast %cst_276 : f32 to vector<1x1x32xf32>
    %258 = arith.mulf %253, %257 : vector<1x1x32xf32>
    %cst_277 = arith.constant 6.250000e-02 : f32
    %259 = vector.broadcast %cst_277 : f32 to vector<1x1x32xf32>
    %260 = arith.mulf %256, %259 : vector<1x1x32xf32>
    %261 = arith.mulf %258, %258 : vector<1x1x32xf32>
    %262 = arith.subf %260, %261 : vector<1x1x32xf32>
    %263 = vector.broadcast %258 : vector<1x1x32xf32> to vector<4x4x32xf32>
    %264 = arith.subf %251, %263 : vector<4x4x32xf32>
    %cst_278 = arith.constant 9.99999974E-6 : f32
    %265 = vector.broadcast %cst_278 : f32 to vector<1x1x32xf32>
    %266 = arith.addf %262, %265 : vector<1x1x32xf32>
    %267 = math.rsqrt %266 : vector<1x1x32xf32>
    %268 = vector.broadcast %267 : vector<1x1x32xf32> to vector<4x4x32xf32>
    %269 = arith.mulf %264, %268 : vector<4x4x32xf32>
    %cst_279 = arith.constant 0.000000e+00 : f32
    %270 = vector.broadcast %cst_279 : f32 to vector<9x32xf32>
    %cst_280 = arith.constant 0.000000e+00 : f32
    %271 = vector.broadcast %cst_280 : f32 to vector<4x32xf32>
    %cst_281 = arith.constant 0.000000e+00 : f32
    %272 = vector.broadcast %cst_281 : f32 to vector<11x32xf32>
    %c0_282 = arith.constant 0 : index
    %c0_283 = arith.constant 0 : index
    %273 = vector.load %arg13[%c0_282, %c0_283] : memref<72x32xf32, #tpu.memory_space<vmem>>, vector<9x32xf32>
    tpu.vector_store %arg13[%c0_282, %c0_283], %270 {strides = array<i32>} : memref<72x32xf32, #tpu.memory_space<vmem>>, vector<9x32xf32>,
    %c13_284 = arith.constant 13 : index
    %c0_285 = arith.constant 0 : index
    %274 = vector.load %arg13[%c13_284, %c0_285] : memref<72x32xf32, #tpu.memory_space<vmem>>, vector<4x32xf32>
    tpu.vector_store %arg13[%c13_284, %c0_285], %271 {strides = array<i32>} : memref<72x32xf32, #tpu.memory_space<vmem>>, vector<4x32xf32>,
    %c21 = arith.constant 21 : index
    %c0_286 = arith.constant 0 : index
    %275 = vector.load %arg13[%c21, %c0_286] : memref<72x32xf32, #tpu.memory_space<vmem>>, vector<4x32xf32>
    tpu.vector_store %arg13[%c21, %c0_286], %271 {strides = array<i32>} : memref<72x32xf32, #tpu.memory_space<vmem>>, vector<4x32xf32>,
    %c29 = arith.constant 29 : index
    %c0_287 = arith.constant 0 : index
    %276 = vector.load %arg13[%c29, %c0_287] : memref<72x32xf32, #tpu.memory_space<vmem>>, vector<4x32xf32>
    tpu.vector_store %arg13[%c29, %c0_287], %271 {strides = array<i32>} : memref<72x32xf32, #tpu.memory_space<vmem>>, vector<4x32xf32>,
    %c37 = arith.constant 37 : index
    %c0_288 = arith.constant 0 : index
    %277 = vector.load %arg13[%c37, %c0_288] : memref<72x32xf32, #tpu.memory_space<vmem>>, vector<11x32xf32>
    tpu.vector_store %arg13[%c37, %c0_288], %272 {strides = array<i32>} : memref<72x32xf32, #tpu.memory_space<vmem>>, vector<11x32xf32>,
    %cst_289 = arith.constant 0.000000e+00 : f32
    %278 = vector.broadcast %cst_289 : f32 to vector<24x32xf32>
    %c48_290 = arith.constant 48 : index
    %c0_291 = arith.constant 0 : index
    %279 = vector.load %arg13[%c48_290, %c0_291] : memref<72x32xf32, #tpu.memory_space<vmem>>, vector<24x32xf32>
    tpu.vector_store %arg13[%c48_290, %c0_291], %278 {strides = array<i32>} : memref<72x32xf32, #tpu.memory_space<vmem>>, vector<24x32xf32>,
    %280 = vector.extract_strided_slice %269 {offsets = [0, 0, 0], sizes = [1, 4, 32], strides = [1, 1, 1]} : vector<4x4x32xf32> to vector<1x4x32xf32>
    %281 = vector.shape_cast %280 : vector<1x4x32xf32> to vector<4x32xf32>
    %c9_292 = arith.constant 9 : index
    %c0_293 = arith.constant 0 : index
    %282 = vector.load %arg13[%c9_292, %c0_293] : memref<72x32xf32, #tpu.memory_space<vmem>>, vector<4x32xf32>
    tpu.vector_store %arg13[%c9_292, %c0_293], %281 {strides = array<i32>} : memref<72x32xf32, #tpu.memory_space<vmem>>, vector<4x32xf32>,
    %283 = vector.extract_strided_slice %269 {offsets = [1, 0, 0], sizes = [1, 4, 32], strides = [1, 1, 1]} : vector<4x4x32xf32> to vector<1x4x32xf32>
    %284 = vector.shape_cast %283 : vector<1x4x32xf32> to vector<4x32xf32>
    %c17_294 = arith.constant 17 : index
    %c0_295 = arith.constant 0 : index
    %285 = vector.load %arg13[%c17_294, %c0_295] : memref<72x32xf32, #tpu.memory_space<vmem>>, vector<4x32xf32>
    tpu.vector_store %arg13[%c17_294, %c0_295], %284 {strides = array<i32>} : memref<72x32xf32, #tpu.memory_space<vmem>>, vector<4x32xf32>,
    %286 = vector.extract_strided_slice %269 {offsets = [2, 0, 0], sizes = [1, 4, 32], strides = [1, 1, 1]} : vector<4x4x32xf32> to vector<1x4x32xf32>
    %287 = vector.shape_cast %286 : vector<1x4x32xf32> to vector<4x32xf32>
    %c25_296 = arith.constant 25 : index
    %c0_297 = arith.constant 0 : index
    %288 = vector.load %arg13[%c25_296, %c0_297] : memref<72x32xf32, #tpu.memory_space<vmem>>, vector<4x32xf32>
    tpu.vector_store %arg13[%c25_296, %c0_297], %287 {strides = array<i32>} : memref<72x32xf32, #tpu.memory_space<vmem>>, vector<4x32xf32>,
    %289 = vector.extract_strided_slice %269 {offsets = [3, 0, 0], sizes = [1, 4, 32], strides = [1, 1, 1]} : vector<4x4x32xf32> to vector<1x4x32xf32>
    %290 = vector.shape_cast %289 : vector<1x4x32xf32> to vector<4x32xf32>
    %c33_298 = arith.constant 33 : index
    %c0_299 = arith.constant 0 : index
    %291 = vector.load %arg13[%c33_298, %c0_299] : memref<72x32xf32, #tpu.memory_space<vmem>>, vector<4x32xf32>
    tpu.vector_store %arg13[%c33_298, %c0_299], %290 {strides = array<i32>} : memref<72x32xf32, #tpu.memory_space<vmem>>, vector<4x32xf32>,
    %c0_300 = arith.constant 0 : index
    %c0_301 = arith.constant 0 : index
    %292 = vector.load %arg13[%c0_300, %c0_301] : memref<72x32xf32, #tpu.memory_space<vmem>>, vector<48x32xf32>
    %c0_302 = arith.constant 0 : index
    %c0_303 = arith.constant 0 : index
    %293 = vector.load %arg6[%c0_302, %c0_303] : memref<9x32xf32, #tpu.memory_space<vmem>>, vector<1x32xf32>
    %294 = vector.broadcast %293 : vector<1x32xf32> to vector<48x32xf32>
    %295 = arith.mulf %292, %294 : vector<48x32xf32>
    %c1_304 = arith.constant 1 : index
    %c0_305 = arith.constant 0 : index
    %296 = vector.load %arg13[%c1_304, %c0_305] : memref<72x32xf32, #tpu.memory_space<vmem>>, vector<48x32xf32>
    %c1_306 = arith.constant 1 : index
    %c0_307 = arith.constant 0 : index
    %297 = vector.load %arg6[%c1_306, %c0_307] : memref<9x32xf32, #tpu.memory_space<vmem>>, vector<1x32xf32>
    %298 = vector.broadcast %297 : vector<1x32xf32> to vector<48x32xf32>
    %299 = arith.mulf %296, %298 : vector<48x32xf32>
    %300 = arith.addf %295, %299 : vector<48x32xf32>
    %c2_308 = arith.constant 2 : index
    %c0_309 = arith.constant 0 : index
    %301 = vector.load %arg13[%c2_308, %c0_309] : memref<72x32xf32, #tpu.memory_space<vmem>>, vector<48x32xf32>
    %c2_310 = arith.constant 2 : index
    %c0_311 = arith.constant 0 : index
    %302 = vector.load %arg6[%c2_310, %c0_311] : memref<9x32xf32, #tpu.memory_space<vmem>>, vector<1x32xf32>
    %303 = vector.broadcast %302 : vector<1x32xf32> to vector<48x32xf32>
    %304 = arith.mulf %301, %303 : vector<48x32xf32>
    %305 = arith.addf %300, %304 : vector<48x32xf32>
    %c8_312 = arith.constant 8 : index
    %c0_313 = arith.constant 0 : index
    %306 = vector.load %arg13[%c8_312, %c0_313] : memref<72x32xf32, #tpu.memory_space<vmem>>, vector<48x32xf32>
    %c3_314 = arith.constant 3 : index
    %c0_315 = arith.constant 0 : index
    %307 = vector.load %arg6[%c3_314, %c0_315] : memref<9x32xf32, #tpu.memory_space<vmem>>, vector<1x32xf32>
    %308 = vector.broadcast %307 : vector<1x32xf32> to vector<48x32xf32>
    %309 = arith.mulf %306, %308 : vector<48x32xf32>
    %310 = arith.addf %305, %309 : vector<48x32xf32>
    %c9_316 = arith.constant 9 : index
    %c0_317 = arith.constant 0 : index
    %311 = vector.load %arg13[%c9_316, %c0_317] : memref<72x32xf32, #tpu.memory_space<vmem>>, vector<48x32xf32>
    %c4_318 = arith.constant 4 : index
    %c0_319 = arith.constant 0 : index
    %312 = vector.load %arg6[%c4_318, %c0_319] : memref<9x32xf32, #tpu.memory_space<vmem>>, vector<1x32xf32>
    %313 = vector.broadcast %312 : vector<1x32xf32> to vector<48x32xf32>
    %314 = arith.mulf %311, %313 : vector<48x32xf32>
    %315 = arith.addf %310, %314 : vector<48x32xf32>
    %c10_320 = arith.constant 10 : index
    %c0_321 = arith.constant 0 : index
    %316 = vector.load %arg13[%c10_320, %c0_321] : memref<72x32xf32, #tpu.memory_space<vmem>>, vector<48x32xf32>
    %c5_322 = arith.constant 5 : index
    %c0_323 = arith.constant 0 : index
    %317 = vector.load %arg6[%c5_322, %c0_323] : memref<9x32xf32, #tpu.memory_space<vmem>>, vector<1x32xf32>
    %318 = vector.broadcast %317 : vector<1x32xf32> to vector<48x32xf32>
    %319 = arith.mulf %316, %318 : vector<48x32xf32>
    %320 = arith.addf %315, %319 : vector<48x32xf32>
    %c16_324 = arith.constant 16 : index
    %c0_325 = arith.constant 0 : index
    %321 = vector.load %arg13[%c16_324, %c0_325] : memref<72x32xf32, #tpu.memory_space<vmem>>, vector<48x32xf32>
    %c6_326 = arith.constant 6 : index
    %c0_327 = arith.constant 0 : index
    %322 = vector.load %arg6[%c6_326, %c0_327] : memref<9x32xf32, #tpu.memory_space<vmem>>, vector<1x32xf32>
    %323 = vector.broadcast %322 : vector<1x32xf32> to vector<48x32xf32>
    %324 = arith.mulf %321, %323 : vector<48x32xf32>
    %325 = arith.addf %320, %324 : vector<48x32xf32>
    %c17_328 = arith.constant 17 : index
    %c0_329 = arith.constant 0 : index
    %326 = vector.load %arg13[%c17_328, %c0_329] : memref<72x32xf32, #tpu.memory_space<vmem>>, vector<48x32xf32>
    %c7_330 = arith.constant 7 : index
    %c0_331 = arith.constant 0 : index
    %327 = vector.load %arg6[%c7_330, %c0_331] : memref<9x32xf32, #tpu.memory_space<vmem>>, vector<1x32xf32>
    %328 = vector.broadcast %327 : vector<1x32xf32> to vector<48x32xf32>
    %329 = arith.mulf %326, %328 : vector<48x32xf32>
    %330 = arith.addf %325, %329 : vector<48x32xf32>
    %c18_332 = arith.constant 18 : index
    %c0_333 = arith.constant 0 : index
    %331 = vector.load %arg13[%c18_332, %c0_333] : memref<72x32xf32, #tpu.memory_space<vmem>>, vector<48x32xf32>
    %c8_334 = arith.constant 8 : index
    %c0_335 = arith.constant 0 : index
    %332 = vector.load %arg6[%c8_334, %c0_335] : memref<9x32xf32, #tpu.memory_space<vmem>>, vector<1x32xf32>
    %333 = vector.broadcast %332 : vector<1x32xf32> to vector<48x32xf32>
    %334 = arith.mulf %331, %333 : vector<48x32xf32>
    %335 = arith.addf %330, %334 : vector<48x32xf32>
    %cst_336 = arith.constant dense<0.000000e+00> : vector<48xf32>
    %336 = vector.multi_reduction <add>, %335, %cst_336 [1] : vector<48x32xf32> to vector<48xf32>
    %337 = vector.shape_cast %336 : vector<48xf32> to vector<48x1xf32>
    %c0_337 = arith.constant 0 : index
    %338 = memref.load %arg7[%c0_337] : memref<1xf32, #tpu.memory_space<smem>>
    %339 = vector.extract_strided_slice %337 {offsets = [0, 0], sizes = [32, 1], strides = [1, 1]} : vector<48x1xf32> to vector<32x1xf32>
    %340 = vector.shape_cast %339 : vector<32x1xf32> to vector<4x8x1xf32>
    %341 = vector.extract_strided_slice %340 {offsets = [0, 0, 0], sizes = [4, 4, 1], strides = [1, 1, 1]} : vector<4x8x1xf32> to vector<4x4x1xf32>
    %342 = vector.shape_cast %341 : vector<4x4x1xf32> to vector<2x2x2x2x1xf32>
    %cst_338 = arith.constant dense<0xFF800000> : vector<2x2x1xf32>
    %343 = vector.multi_reduction <maximumf>, %342, %cst_338 [1, 3] : vector<2x2x2x2x1xf32> to vector<2x2x1xf32>
    %344 = vector.broadcast %338 : f32 to vector<2x2x1xf32>
    %345 = arith.addf %343, %344 : vector<2x2x1xf32>
    %cst_339 = arith.constant 0.000000e+00 : f32
    %346 = vector.broadcast %cst_339 : f32 to vector<2x2x1xf32>
    %347 = arith.maximumf %345, %346 : vector<2x2x1xf32>
    %348 = vector.shape_cast %347 : vector<2x2x1xf32> to vector<1x4xf32>
    %c0_340 = arith.constant 0 : index
    %c0_341 = arith.constant 0 : index
    %c0_342 = arith.constant 0 : index
    %349 = vector.load %arg8[%c0_340, %c0_341, %c0_342] : memref<1x1x4xf32, #tpu.memory_space<vmem>>, vector<1x1x4xf32>
    %350 = vector.shape_cast %349 : vector<1x1x4xf32> to vector<1x4xf32>
    %351 = vector.shape_cast %348 : vector<1x4xf32> to vector<1x1x4xf32>
    tpu.vector_store %arg8[%c0_340, %c0_341, %c0_342], %351 {strides = array<i32>} : memref<1x1x4xf32, #tpu.memory_space<vmem>>, vector<1x1x4xf32>,
    return
  }
  func.func @transform_0(%arg0: i32) -> (i32, i32, i32, i32) {
    %c0_i32 = arith.constant 0 : i32
    %c0_i32_0 = arith.constant 0 : i32
    %c0_i32_1 = arith.constant 0 : i32
    %c0_i32_2 = arith.constant 0 : i32
    return %arg0, %c0_i32, %c0_i32_0, %c0_i32_1 : i32, i32, i32, i32
  }
  func.func @transform_1(%arg0: i32) -> (i32, i32) {
    %c0_i32 = arith.constant 0 : i32
    %c0_i32_0 = arith.constant 0 : i32
    %c0_i32_1 = arith.constant 0 : i32
    return %c0_i32, %c0_i32_0 : i32, i32
  }
  func.func @transform_2(%arg0: i32) -> (i32, i32) {
    %c0_i32 = arith.constant 0 : i32
    %c0_i32_0 = arith.constant 0 : i32
    %c0_i32_1 = arith.constant 0 : i32
    return %c0_i32, %c0_i32_0 : i32, i32
  }
  func.func @transform_3(%arg0: i32) -> (i32, i32) {
    %c0_i32 = arith.constant 0 : i32
    %c0_i32_0 = arith.constant 0 : i32
    %c0_i32_1 = arith.constant 0 : i32
    return %c0_i32, %c0_i32_0 : i32, i32
  }
  func.func @transform_4(%arg0: i32) -> (i32, i32) {
    %c0_i32 = arith.constant 0 : i32
    %c0_i32_0 = arith.constant 0 : i32
    %c0_i32_1 = arith.constant 0 : i32
    return %c0_i32, %c0_i32_0 : i32, i32
  }
  func.func @transform_5(%arg0: i32) -> (i32, i32) {
    %c0_i32 = arith.constant 0 : i32
    %c0_i32_0 = arith.constant 0 : i32
    %c0_i32_1 = arith.constant 0 : i32
    return %c0_i32, %c0_i32_0 : i32, i32
  }
  func.func @transform_6(%arg0: i32) -> i32 {
    %c0_i32 = arith.constant 0 : i32
    %c0_i32_0 = arith.constant 0 : i32
    return %c0_i32 : i32
  }
  func.func @transform_7(%arg0: i32) -> (i32, i32, i32) {
    %c0_i32 = arith.constant 0 : i32
    %c0_i32_0 = arith.constant 0 : i32
    %c0_i32_1 = arith.constant 0 : i32
    return %arg0, %c0_i32, %c0_i32_0 : i32, i32, i32
  }
}

</mosaic_0001>

<bundles_post_ra>
// kernel: tpu_custom_call.1
= control target key start
LH: loop header
LB: loop body
LE: loop exit
PB: predicated region body
PF: predicated region fallthrough
CT: control target
= control target key end

     0   :  { %s12747_s0 = inlined_call_operand.vmem [shape: f32[2,16,16,128], index: 0, kind: input, shape index: {}]   ;;  %s12748_s1 = inlined_call_operand.vmem [shape: f32[1152,64], index: 1, kind: input, shape index: {}]   ;;  %s12749_s2 = inlined_call_operand.vmem [shape: f32[1,64], index: 2, kind: input, shape index: {}]   ;;  %s12750_s3 = inlined_call_operand.vmem [shape: f32[576,32], index: 3, kind: input, shape index: {}]   ;;  %s12751_s4 = inlined_call_operand.vmem [shape: f32[1,32], index: 4, kind: input, shape index: {}]   ;;  %s12752_s5 = inlined_call_operand.vmem [shape: f32[9,32], index: 5, kind: input, shape index: {}]   ;;  %s12753_s6 = inlined_call_operand.<no memory space> [shape: f32[1], index: 6, kind: input, shape index: {}]   ;;  %s12754_s7 = inlined_call_operand.hbm [shape: f32[2,1,4], index: 7, kind: output, shape index: {}]  }
   0x1   :  { %12 = sst [smem:[#allocation7]] %s12753_s6 }
   0x2   :  { %13 = vsyncpa [#allocation9], 0 }
   0x3   :  { %15 = vsyncpa [#allocation9 + $0x1], 0  ;;  %s8972_s26 = smov 0   ;;  %s8974_s27 = smov 0  }
   0x4   :  { %s8976_s28 = smov 0   ;;  %s8978_s29 = smov 0  }
   0x5 LB: > { %s8993_s6 = sadd.s32 4294967295, %s8924_s29   ;;  %s8540_s30 = sadd.s32 4294967294, %s8924_s29   ;;  %s8924_s29 = sphi %s8978_s29, %s12998_s29   ;;  %s8920_s28 = sphi %s8976_s28, %s12997_s28   ;;  %s8916_s27 = sphi %s8974_s27, %s12996_s27   ;;  %s8912_s26 = sphi %s8972_s26, %s12995_s26  }
   0x6   : > { %s8997_s8 = sadd.s32 1, %s8924_s29   ;;  %s180_s9 = sadd.s32 1, %s8920_s28 }
   0x7   : > { %s177_s10 = ssub.s32 %s8924_s29, %s8997_s8  ;;  %p190_p0 = scmp.ne.s32.totalorder %s8920_s28, %s8916_s27 }
   0x8   : > { %p178_p1 = scmp.eq.s32.totalorder %s177_s10, 0  ;;  %p191_p2 = scmp.eq.s32.totalorder %s8993_s6, 1 }
   0x9   : > { %p196_p3 = scmp.ne.s32.totalorder %s8916_s27, %s8912_s26  ;;  %p197_p4 = scmp.eq.s32.totalorder %s8540_s30, 1 }
   0xa   : > { %s9008_s11 = scalar_select %p178_p1, %s8920_s28, %s180_s9  }
   0xb   : > { %p9010_p5 = por %p191_p2, %p190_p0  ;;  %p9014_p6 = por %p197_p4, %p196_p3 }
   0xc   : > { %p8543_p7 = scmp.ge.s32.totalorder %s8924_s29, 1  ;;  %p241_p8 = scmp.lt.s32.totalorder %s8924_s29, 3 }
   0xe   : > { %p242_p9 = pnand %p8543_p7, %p241_p8 }
  0x10   : > { %245 = sbr.rel (%p242_p9) target bundleno = 2350 (0x92e), region = 48 }
  0x15   : > { %v455_v0 = vld [vmem:[%s12748_s1 + $0x78] sm:$0xff]  ;;  %v454_v1 = vld [vmem:[%s12748_s1 + $0x70] sm:$0xff]  ;;  %v8926_v3 = vmov 0.0   ;;  %v453_v4 = vld [vmem:[%s12748_s1 + $0x68] sm:$0xff]  ;;  %p272_p10 = scmp.lt.s32.totalorder %s8993_s6, 1  ;;  %vm635_vm0 = vcmask 523264  }
  0x16   : > { %456 = vmatpush.msra.mxu0 %v455_v0  ;;  %v759_v2 = vld [vmem:[%s12748_s1 + $0xf8] sm:$0xff]  ;;  %277 = vst [vmem:[#allocation2] sm:$0xff] %v8926_v3  ;;  %v758_v5 = vld [vmem:[%s12748_s1 + $0xf0] sm:$0xff]  ;;  %v757_v6 = vld [vmem:[%s12748_s1 + $0xe8] sm:$0xff]  ;;  %vm4235_vm1 = vcmask 517120   ;;  %vm5008_vm2 = vcmask 1041409  }
  0x17   : > { %760 = vmatpush.msra.mxu1 %v759_v2  ;;  %278 = vst [vmem:[#allocation2 + $0x8] sm:$0xff] %v8926_v3  ;;  %v1170_v7 = vld [vmem:[%s12748_s1 + $0x178] sm:$0xff]  ;;  %v452_v8 = vld [vmem:[%s12748_s1 + $0x60] sm:$0xff]  ;;  %v1169_v9 = vld [vmem:[%s12748_s1 + $0x170] sm:$0xff]  ;;  %s9153_s10 = scalar_select %p272_p10, %s8993_s6, 1  ;;  %vm5011_vm3 = vcmask 1042434  }
  0x18   : > { %457 = vmatpush.msra.mxu0 %v454_v1  ;;  %279 = vst [vmem:[#allocation2 + $0x10] sm:$0xff] %v8926_v3  ;;  %1171 = vmatpush.msra.mxu2 %v1170_v7  ;;  %v756_v10 = vld [vmem:[%s12748_s1 + $0xe0] sm:$0xff]  ;;  %v1168_v11 = vld [vmem:[%s12748_s1 + $0x168] sm:$0xff]  ;;  %v451_v12 = vld [vmem:[%s12748_s1 + $0x58] sm:$0xff]  ;;  %vm5014_vm4 = vcmask 1043459   ;;  %vm5017_vm5 = vcmask 1044484  }
  0x19   : > { %761 = vmatpush.msra.mxu1 %v758_v5  ;;  %280 = vst [vmem:[#allocation2 + $0x18] sm:$0x1] %v8926_v3  ;;  %v755_v13 = vld [vmem:[%s12748_s1 + $0xd8] sm:$0xff]  ;;  %v1167_v14 = vld [vmem:[%s12748_s1 + $0x160] sm:$0xff]  ;;  %v450_v15 = vld [vmem:[%s12748_s1 + $0x50] sm:$0xff]  ;;  %s8758_s20 = sshll.u32 %s9153_s10, 8 }
  0x1a   : > { %458 = vmatpush.msra.mxu0 %v453_v4  ;;  %281 = vst [vmem:[#allocation2 + $0x29] sm:$0xff] %v8926_v3  ;;  %1172 = vmatpush.msra.mxu2 %v1169_v9  ;;  %v1581_v16 = vld [vmem:[%s12748_s1 + $0x1f8] sm:$0xff]  ;;  %v754_v17 = vld [vmem:[%s12748_s1 + $0xd0] sm:$0xff]  ;;  %v449_v19 = vld [vmem:[%s12748_s1 + $0x48] sm:$0xff]  ;;  %s9217_s23 = scalar_lea.vmem %s12747_s0, %s8758_s20  ;;  %vm5020_vm6 = vcmask 1045509   ;;  %vm5023_vm7 = vcmask 1046534  }
  0x1b   : > { %762 = vmatpush.msra.mxu1 %v757_v6  ;;  %282 = vst [vmem:[#allocation2 + $0x41] sm:$0xff] %v8926_v3  ;;  %v1166_v18 = vld [vmem:[%s12748_s1 + $0x158] sm:$0xff]  ;;  %1582 = vmatpush.msra.mxu3 %v1581_v16  ;;  %v1580_v20 = vld [vmem:[%s12748_s1 + $0x1f0] sm:$0xff]  ;;  %v753_v21 = vld [vmem:[%s12748_s1 + $0xc8] sm:$0xff]  ;;  %vm5026_vm8 = vcmask 1047559   ;;  %vm5571_vm9 = vcmask 516096  }
  0x1c   : > { %459 = vmatpush.msra.mxu0 %v452_v8  ;;  %283 = vst [vmem:[#allocation2 + $0x59] sm:$0xff] %v8926_v3  ;;  %1173 = vmatpush.msra.mxu2 %v1168_v11  ;;  %v1165_v22 = vld [vmem:[%s12748_s1 + $0x150] sm:$0xff]  ;;  %v1579_v23 = vld [vmem:[%s12748_s1 + $0x1e8] sm:$0xff]  ;;  %v448_v24 = vld [vmem:[%s12748_s1 + $0x40] sm:$0xff]  ;;  %vm5946_vm13 = vcmask 261120   ;;  %vm5582_vm14 = vcmask 522240  }
  0x1d   : > { %763 = vmatpush.msra.mxu1 %v756_v10  ;;  %284 = vst [vmem:[#allocation2 + $0x71] sm:$0xff] %v8926_v3  ;;  %1583 = vmatpush.msra.mxu3 %v1580_v20  ;;  %v1578_v25 = vld [vmem:[%s12748_s1 + $0x1e0] sm:$0xff]  ;;  %v1164_v27 = vld [vmem:[%s12748_s1 + $0x148] sm:$0xff]  ;;  %v447_v28 = vld [vmem:[%s12748_s1 + $0x38] sm:$0xff]  ;;  %vm8056_vm15 = vcmask 257024   ;;  %s8368_s20 = sld [smem:[#allocation7]] }
  0x1e   : > { %460 = vmatpush.msra.mxu0 %v451_v12  ;;  %285 = vst [vmem:[#allocation2 + $0x89] sm:$0xff] %v8926_v3  ;;  %1174 = vmatpush.msra.mxu2 %v1167_v14  ;;  %v752_v26 = vld [vmem:[%s12748_s1 + $0xc0] sm:$0xff]  ;;  %v1577_v29 = vld [vmem:[%s12748_s1 + $0x1d8] sm:$0xff]  ;;  %v446_v32 = vld [vmem:[%s12748_s1 + $0x30] sm:$0xff]  ;;  %s270_s14 = sand.u32 1, %s8916_s27   ;;  %s8882_s25 = scalar_lea.hbm %s12754_s7, 2 }
  0x1f   : > { %764 = vmatpush.msra.mxu1 %v755_v13  ;;  %286 = vst [vmem:[#allocation2 + $0xa1] sm:$0xff] %v8926_v3  ;;  %1584 = vmatpush.msra.mxu3 %v1579_v23  ;;  %v751_v30 = vld [vmem:[%s12748_s1 + $0xb8] sm:$0xff]  ;;  %v1163_v31 = vld [vmem:[%s12748_s1 + $0x140] sm:$0xff]  ;;  %v1576_v33 = vld [vmem:[%s12748_s1 + $0x1d0] sm:$0xff]  ;;  %s271_s16 = scalar_lea.vmem [#allocation8], %s270_s14  ;;  %s8473_s19 = scalar_lea.sflag [#allocation9], %s270_s14 }
  0x20   : > { %461 = vmatpush.msra.mxu0 %v450_v15  ;;  %287 = vst [vmem:[#allocation2 + $0xb9] sm:$0xff] %v8926_v3  ;;  %1175 = vmatpush.msra.mxu2 %v1166_v18  ;;  %v750_v34 = vld [vmem:[%s12748_s1 + $0xb0] sm:$0xff]  ;;  %v1162_v35 = vld [vmem:[%s12748_s1 + $0x138] sm:$0xff]  ;;  %v445_v36 = vld [vmem:[%s12748_s1 + $0x28] sm:$0xff]  ;;  %s8483_s17 = sshll.u32 %s271_s16, 4  ;;  %s8484_s17 = int_to_ptr.vmem [resolvable:$true] %s8483_s17 }
  0x21   : > { %765 = vmatpush.msra.mxu1 %v754_v17  ;;  %288 = vst [vmem:[#allocation2 + $0xd1] sm:$0xff] %v8926_v3  ;;  %1585 = vmatpush.msra.mxu3 %v1578_v25  ;;  %v1575_v37 = vld [vmem:[%s12748_s1 + $0x1c8] sm:$0xff]  ;;  %v1161_v39 = vld [vmem:[%s12748_s1 + $0x130] sm:$0xff]  ;;  %v444_v40 = vld [vmem:[%s12748_s1 + $0x20] sm:$0xff] }
  0x22   : > { %462 = vmatpush.msra.mxu0 %v449_v19  ;;  %289 = vst [vmem:[#allocation2 + $0xe9] sm:$0xff] %v8926_v3  ;;  %1176 = vmatpush.msra.mxu2 %v1165_v22  ;;  %v749_v38 = vld [vmem:[%s12748_s1 + $0xa8] sm:$0xff]  ;;  %v1574_v41 = vld [vmem:[%s12748_s1 + $0x1c0] sm:$0xff]  ;;  %v443_v42 = vld [vmem:[%s12748_s1 + $0x18] sm:$0xff] }
  0x23   : > { %766 = vmatpush.msra.mxu1 %v753_v21  ;;  %290 = vst [vmem:[#allocation2 + $0x101] sm:$0xff] %v8926_v3  ;;  %1586 = vmatpush.msra.mxu3 %v1577_v29  ;;  %v748_v43 = vld [vmem:[%s12748_s1 + $0xa0] sm:$0xff]  ;;  %v1160_v44 = vld [vmem:[%s12748_s1 + $0x128] sm:$0xff]  ;;  %v442_v45 = vld [vmem:[%s12748_s1 + $0x10] sm:$0xff] }
  0x24   : > { %463 = vmatpush.msra.mxu0 %v448_v24  ;;  %291 = vst [vmem:[#allocation2 + $0x119] sm:$0xff] %v8926_v3  ;;  %1177 = vmatpush.msra.mxu2 %v1164_v27  ;;  %v747_v46 = vld [vmem:[%s12748_s1 + $0x98] sm:$0xff]  ;;  %v746_v48 = vld [vmem:[%s12748_s1 + $0x90] sm:$0xff]  ;;  %v1159_v49 = vld [vmem:[%s12748_s1 + $0x120] sm:$0xff] }
  0x25   : > { %767 = vmatpush.msra.mxu1 %v752_v26  ;;  %292 = vst [vmem:[#allocation2 + $0x131] sm:$0xff] %v8926_v3  ;;  %1587 = vmatpush.msra.mxu3 %v1576_v33  ;;  %v1573_v47 = vld [vmem:[%s12748_s1 + $0x1b8] sm:$0xff]  ;;  %v441_v51 = vld [vmem:[%s12748_s1 + $0x8] sm:$0xff]  ;;  %v1572_v52 = vld [vmem:[%s12748_s1 + $0x1b0] sm:$0xff] }
  0x26   : > { %464 = vmatpush.msra.mxu0 %v447_v28  ;;  %293 = vst [vmem:[#allocation2 + $0x149] sm:$0xff] %v8926_v3  ;;  %1178 = vmatpush.msra.mxu2 %v1163_v31  ;;  %v1158_v50 = vld [vmem:[%s12748_s1 + $0x118] sm:$0xff]  ;;  %v745_v53 = vld [vmem:[%s12748_s1 + $0x88] sm:$0xff]  ;;  %v1157_v54 = vld [vmem:[%s12748_s1 + $0x110] sm:$0xff] }
  0x27   : > { %768 = vmatpush.msra.mxu1 %v751_v30  ;;  %294 = vst [vmem:[#allocation2 + $0x161] sm:$0xff] %v8926_v3  ;;  %1588 = vmatpush.msra.mxu3 %v1575_v37  ;;  %v440_v55 = vld [vmem:[%s12748_s1] sm:$0xff]  ;;  %v1571_v56 = vld [vmem:[%s12748_s1 + $0x1a8] sm:$0xff]  ;;  %v1992_v61 = vld [vmem:[%s12748_s1 + $0x278] sm:$0xff] }
  0x28   : > { %465 = vmatpush.msra.mxu0 %v446_v32  ;;  %295 = vst [vmem:[#allocation2 + $0x179] sm:$0xff] %v8926_v3  ;;  %1179 = vmatpush.msra.mxu2 %v1162_v35  ;;  %v1570_v57 = vld [vmem:[%s12748_s1 + $0x1a0] sm:$0xff]  ;;  %v308_v60 = vld [vmem:[%s9217_s23 + $0x8] sm:$0xff]  ;;  %v1569_v0 = vld [vmem:[%s12748_s1 + $0x198] sm:$0xff] }
  0x29   : > { %769 = vmatpush.msra.mxu1 %v750_v34  ;;  %296 = vst [vmem:[#allocation2 + $0x191] sm:$0xff] %v8926_v3  ;;  %1589 = vmatpush.msra.mxu3 %v1574_v41  ;;  %v307_v58 = vld [vmem:[%s9217_s23] sm:$0xff]  ;;  %v1156_v63 = vld [vmem:[%s12748_s1 + $0x108] sm:$0xff]  ;;  %v1991_v1 = vld [vmem:[%s12748_s1 + $0x270] sm:$0xff] }
  0x2a   : > { %466 = vmatpush.msra.mxu0 %v445_v36  ;;  %297 = vst [vmem:[#allocation2 + $0x199] sm:$0xff] %v8926_v3  ;;  %1180 = vmatpush.msra.mxu2 %v1161_v39  ;;  %v744_v59 = vld [vmem:[%s12748_s1 + $0x80] sm:$0xff]  ;;  %v1568_v4 = vld [vmem:[%s12748_s1 + $0x190] sm:$0xff]  ;;  %v1567_v6 = vld [vmem:[%s12748_s1 + $0x188] sm:$0xff] }
  0x2b   : > { %770 = vmatpush.msra.mxu1 %v749_v38  ;;  %298 = vst [vmem:[#allocation2 + $0x1a1] sm:$0xff] %v8926_v3  ;;  %1590 = vmatpush.msra.mxu3 %v1573_v47  ;;  %v690_v62 = vld [vmem:[#allocation2 + $0x1] sm:$0xff]  ;;  %v8546_v8 = vld [vmem:[%s9217_s23 + $0x10] sm:$0xff]  ;;  %v8547_v12 = vld [vmem:[%s9217_s23 + $0x18] sm:$0xff] }
  0x2c   : > { %467 = vmatpush.msra.mxu0 %v444_v40  ;;  %299 = vst [vmem:[#allocation2 + $0x1a9] sm:$0x7f] %v8926_v3  ;;  %1181 = vmatpush.msra.mxu2 %v1160_v44  ;;  %v1155_v2 = vld [vmem:[%s12748_s1 + $0x100] sm:$0xff]  ;;  %v691_v9 = vld [vmem:[#allocation2 + $0x9] sm:$0xff]  ;;  %v692_v13 = vld [vmem:[#allocation2 + $0x11] sm:$0xff] }
  0x2d   : > { %771 = vmatpush.msra.mxu1 %v748_v43  ;;  %300 = vst [vmem:[#allocation2 + $0x1b0] sm:$0xff] %v8926_v3  ;;  %1591 = vmatpush.msra.mxu3 %v1572_v52  ;;  %v1101_v5 = vld [vmem:[#allocation2 + $0x2] sm:$0xff]  ;;  %v1102_v11 = vld [vmem:[#allocation2 + $0xa] sm:$0xff]  ;;  %v8551_v31 = vld [vmem:[%s9217_s23 + $0x38] sm:$0xff] }
  0x2e   : > { %468 = vmatpush.msra.mxu0 %v443_v42  ;;  %301 = vst [vmem:[#allocation2 + $0x1b8] sm:$0xff] %v8926_v3  ;;  %1182 = vmatpush.msra.mxu2 %v1159_v49  ;;  %v1566_v7 = vld [vmem:[%s12748_s1 + $0x180] sm:$0xff]  ;;  %v1990_v15 = vld [vmem:[%s12748_s1 + $0x268] sm:$0xff]  ;;  %v8550_v28 = vld [vmem:[%s9217_s23 + $0x30] sm:$0xff] }
  0x2f   : > { %302 = vst [vmem:[#allocation2 + $0x1c0] sm:$0xff] %v8926_v3  ;;  %772 = vmatpush.msra.mxu1 %v747_v46  ;;  %1592 = vmatpush.msra.mxu3 %v1571_v56  ;;  %v8548_v19 = vld [vmem:[%s9217_s23 + $0x20] sm:$0xff]  ;;  %v8549_v22 = vld [vmem:[%s9217_s23 + $0x28] sm:$0xff]  ;;  %v1988_v35 = vld [vmem:[%s12748_s1 + $0x258] sm:$0xff] }
  0x30   : > { %469 = vmatpush.msra.mxu0 %v442_v45  ;;  %303 = vst [vmem:[#allocation2 + $0x1c8] sm:$0xff] %v8926_v3  ;;  %1183 = vmatpush.msra.mxu2 %v1158_v50  ;;  %v1989_v26 = vld [vmem:[%s12748_s1 + $0x260] sm:$0xff]  ;;  %v8553_v40 = vld [vmem:[%s9217_s23 + $0x48] sm:$0xff]  ;;  %v1987_v46 = vld [vmem:[%s12748_s1 + $0x250] sm:$0xff] }
  0x31   : > { %304 = vst [vmem:[#allocation2 + $0x1d0] sm:$0xff] %v8926_v3  ;;  %773 = vmatpush.msra.mxu1 %v746_v48  ;;  %1593 = vmatpush.msra.mxu3 %v1570_v57  ;;  %v8552_v37 = vld [vmem:[%s9217_s23 + $0x40] sm:$0xff]  ;;  %v8554_v48 = vld [vmem:[%s9217_s23 + $0x50] sm:$0xff]  ;;  %v9322_v49 = vld [vmem:[%s9217_s23 + $0x58] sm:$0xff] }
  0x32   : > { %470 = vmatpush.msra.mxu0 %v441_v51  ;;  %305 = vst [vmem:[#allocation2 + $0x1d8] sm:$0xff] %v8926_v3  ;;  %1184 = vmatpush.msra.mxu2 %v1157_v54 }
  0x33   : > { %306 = vst [vmem:[#allocation2 + $0x1e0] sm:$0xff] %v8926_v3  ;;  %774 = vmatpush.msra.mxu1 %v745_v53  ;;  %1594 = vmatpush.msra.mxu3 %v1569_v0 }
  0x34   : > { %471 = vmatpush.msra.mxu0 %v440_v55  ;;  %309 = vst [vmem:[#allocation2 + $0x19] sm:$0xff] %v307_v58  ;;  %1185 = vmatpush.msra.mxu2 %v1156_v63  ;;  %v9327_v55 = vld [vmem:[%s9217_s23 + $0x60] sm:$0xff] }
  0x35   : > { %472 = vmatmul.f32.vlgmr.msra.gmra.mxu0 %v8926_v3  ;;  %775 = vmatpush.msra.mxu1 %v744_v59  ;;  %310 = vst [vmem:[#allocation2 + $0x21] sm:$0xff] %v308_v60  ;;  %v1986_v59 = vld [vmem:[%s12748_s1 + $0x248] sm:$0xff] }
  0x36   : > { %1993 = vmatpush.msrb.mxu0 %v1992_v61  ;;  %776 = vmatmul.f32.vlgmr.msra.gmra.mxu1 %v690_v62  ;;  %314 = vst [vmem:[#allocation2 + $0x31] sm:$0xff] %v8546_v8  ;;  %v9335_v62 = vld [vmem:[%s9217_s23 + $0x68] sm:$0xff] }
  0x37   : > { %1186 = vmatpush.msra.mxu2 %v1155_v2  ;;  %1595 = vmatpush.msra.mxu3 %v1568_v4  ;;  %315 = vst [vmem:[#allocation2 + $0x39] sm:$0xff] %v8547_v12 }
  0x38   : > { %1994 = vmatpush.msrb.mxu0 %v1991_v1  ;;  %1187 = vmatmul.f32.vlgmr.msra.gmra.mxu2 %v1101_v5  ;;  %319 = vst [vmem:[#allocation2 + $0x49] sm:$0xff] %v8548_v19 }
  0x39   : > { %1596 = vmatpush.msra.mxu3 %v1567_v6  ;;  %320 = vst [vmem:[#allocation2 + $0x51] sm:$0xff] %v8549_v22 }
  0x3a   : > { %1995 = vmatpush.msrb.mxu0 %v1990_v15  ;;  %324 = vst [vmem:[#allocation2 + $0x61] sm:$0xff] %v8550_v28 }
  0x3b   : > { %v1512_v10 = vld [vmem:[#allocation2 + $0x18] sm:$0xff]  ;;  %1597 = vmatpush.msra.mxu3 %v1566_v7  ;;  %325 = vst [vmem:[#allocation2 + $0x69] sm:$0xff] %v8551_v31 }
  0x3c   : > { %1598 = vmatmul.f32.vlgmr.msra.gmra.mxu3 %v1512_v10  ;;  %v1513_v14 = vld [vmem:[#allocation2 + $0x20] sm:$0xff]  ;;  %v1103_v16 = vld [vmem:[#allocation2 + $0x12] sm:$0xff]  ;;  %v1514_v17 = vld [vmem:[#allocation2 + $0x28] sm:$0xff]  ;;  %1996 = vmatpush.msrb.mxu0 %v1989_v26  ;;  %329 = vst [vmem:[#allocation2 + $0x79] sm:$0xff] %v8552_v37 }
  0x3d   : > { %475 = vmatmul.f32.gmra.mxu0 %v8926_v3  ;;  %v1104_v18 = vld [vmem:[#allocation2 + $0x1a] sm:$0xff]  ;;  %v1515_v20 = vld [vmem:[#allocation2 + $0x30] sm:$0xff]  ;;  %v1105_v21 = vld [vmem:[#allocation2 + $0x22] sm:$0xff]  ;;  %330 = vst [vmem:[#allocation2 + $0x81] sm:$0xff] %v8553_v40 }
  0x3e   : > { %779 = vmatmul.f32.gmra.mxu1 %v691_v9  ;;  %v1516_v23 = vld [vmem:[#allocation2 + $0x38] sm:$0xff]  ;;  %v1106_v24 = vld [vmem:[#allocation2 + $0x2a] sm:$0xff]  ;;  %v1517_v25 = vld [vmem:[#allocation2 + $0x40] sm:$0xff]  ;;  %1997 = vmatpush.msrb.mxu0 %v1988_v35  ;;  %5569 = vst.msk [vmem:[#allocation4] sm:$0xff] %vm635_vm0, %v8926_v3 }
  0x3f   : > { %v1107_v27 = vld [vmem:[#allocation2 + $0x32] sm:$0xff]  ;;  %v1518_v29 = vld [vmem:[#allocation2 + $0x48] sm:$0xff]  ;;  %v1108_v30 = vld [vmem:[#allocation2 + $0x3a] sm:$0xff]  ;;  %5570 = vst.msk [vmem:[#allocation4 + $0x8] sm:$0xff] %vm635_vm0, %v8926_v3 }
  0x40   : > { %1190 = vmatmul.f32.gmra.mxu2 %v1102_v11  ;;  %v1519_v32 = vld [vmem:[#allocation2 + $0x50] sm:$0xff]  ;;  %v1109_v33 = vld [vmem:[#allocation2 + $0x42] sm:$0xff]  ;;  %v1520_v34 = vld [vmem:[#allocation2 + $0x58] sm:$0xff]  ;;  %5573 = vst.msk [vmem:[#allocation4 + $0x19] sm:$0xff] %vm635_vm0, %v8926_v3  ;;  %1998 = vmatpush.msrb.mxu0 %v1987_v46 }
  0x41   : > { %v1110_v36 = vld [vmem:[#allocation2 + $0x4a] sm:$0xff]  ;;  %v1521_v38 = vld [vmem:[#allocation2 + $0x60] sm:$0xff]  ;;  %v1111_v39 = vld [vmem:[#allocation2 + $0x52] sm:$0xff]  ;;  %5574 = vst.msk [vmem:[#allocation4 + $0x29] sm:$0xff] %vm635_vm0, %v8926_v3 }
  0x42   : > { %v1522_v41 = vld [vmem:[#allocation2 + $0x68] sm:$0xff]  ;;  %v1112_v42 = vld [vmem:[#allocation2 + $0x5a] sm:$0xff]  ;;  %v1523_v43 = vld [vmem:[#allocation2 + $0x70] sm:$0xff]  ;;  %5575 = vst.msk [vmem:[#allocation4 + $0x39] sm:$0xff] %vm635_vm0, %v8926_v3  ;;  %1999 = vmatpush.msrb.mxu0 %v1986_v59 }
  0x43   : > { %v1113_v44 = vld [vmem:[#allocation2 + $0x62] sm:$0xff]  ;;  %5576 = vst.msk [vmem:[#allocation4 + $0x49] sm:$0xff] %vm635_vm0, %v8926_v3  ;;  %v1524_v45 = vld [vmem:[#allocation2 + $0x78] sm:$0xff]  ;;  %v1114_v47 = vld [vmem:[#allocation2 + $0x6a] sm:$0xff] }
  0x44   : > { %1601 = vmatmul.f32.gmra.mxu3 %v1513_v14  ;;  %5577 = vst.msk [vmem:[#allocation4 + $0x59] sm:$0xff] %vm635_vm0, %v8926_v3  ;;  %v1525_v50 = vld [vmem:[#allocation2 + $0x80] sm:$0xff]  ;;  %v1115_v51 = vld [vmem:[#allocation2 + $0x72] sm:$0xff]  ;;  %v1526_v52 = vld [vmem:[#allocation2 + $0x88] sm:$0xff] }
  0x45   : > { %478 = vmatmul.f32.gmra.mxu0 %v8926_v3  ;;  %5578 = vst.msk [vmem:[#allocation4 + $0x69] sm:$0xff] %vm635_vm0, %v8926_v3  ;;  %v1116_v53 = vld [vmem:[#allocation2 + $0x7a] sm:$0xff] }
  0x46   : > { %782 = vmatmul.f32.gmra.mxu1 %v692_v13  ;;  %5579 = vst.msk [vmem:[#allocation4 + $0x79] sm:$0xff] %vm635_vm0, %v8926_v3 }
  0x47   : > { %5580 = vst.msk [vmem:[#allocation4 + $0x89] sm:$0xff] %vm635_vm0, %v8926_v3 }
  0x48   : > { %1193 = vmatmul.f32.gmra.mxu2 %v1103_v16  ;;  %5581 = vst.msk [vmem:[#allocation4 + $0x91] sm:$0xff] %vm635_vm0, %v8926_v3 }
  0x49   : > { %5584 = vst.msk [vmem:[#allocation4 + $0xa0] sm:$0xff] %vm635_vm0, %v8926_v3 }
  0x4a   : > { %5585 = vst.msk [vmem:[#allocation4 + $0xa8] sm:$0xff] %vm635_vm0, %v8926_v3 }
  0x4b   : > { %5586 = vst.msk [vmem:[#allocation4 + $0xb0] sm:$0xff] %vm635_vm0, %v8926_v3 }
  0x4c   : > { %1604 = vmatmul.f32.gmra.mxu3 %v1514_v17  ;;  %5587 = vst.msk [vmem:[#allocation4 + $0xb8] sm:$0xff] %vm635_vm0, %v8926_v3 }
  0x4d   : > { %481 = vmatmul.f32.gmra.mxu0 %v1512_v10  ;;  %5588 = vst.msk [vmem:[#allocation4 + $0xc0] sm:$0xff] %vm635_vm0, %v8926_v3 }
  0x4e   : > { %785 = vmatmul.f32.gmra.mxu1 %v307_v58  ;;  %334 = vst [vmem:[#allocation2 + $0x91] sm:$0xff] %v8554_v48  ;;  %v1117_v58 = vld [vmem:[#allocation2 + $0x82] sm:$0xff] }
  0x4f   : > { %335 = vst [vmem:[#allocation2 + $0x99] sm:$0xff] %v9322_v49 }
  0x50   : > { %1196 = vmatmul.f32.gmra.mxu2 %v1104_v18  ;;  %339 = vst [vmem:[#allocation2 + $0xa9] sm:$0xff] %v9327_v55  ;;  %v9345_v18 = vld [vmem:[%s9217_s23 + $0x70] sm:$0xff] }
  0x51   : > { %340 = vst [vmem:[#allocation2 + $0xb1] sm:$0xff] %v9335_v62 }
  0x52   : > { %344 = vst [vmem:[#allocation2 + $0xc1] sm:$0xff] %v9345_v18 }
  0x54   : > { %1607 = vmatmul.f32.gmra.mxu3 %v1515_v20 }
  0x55   : > { %484 = vmatmul.f32.gmra.mxu0 %v1513_v14  ;;  %v1527_v57 = vld [vmem:[#allocation2 + $0x90] sm:$0xff] }
  0x56   : > { %788 = vmatmul.f32.gmra.mxu1 %v308_v60  ;;  %v1528_v1 = vld [vmem:[#allocation2 + $0x98] sm:$0xff]  ;;  %v1118_v4 = vld [vmem:[#allocation2 + $0x8a] sm:$0xff]  ;;  %v1529_v10 = vld [vmem:[#allocation2 + $0xa0] sm:$0xff] }
  0x57   : > { %v1119_v14 = vld [vmem:[#allocation2 + $0x92] sm:$0xff] }
  0x58   : > { %1199 = vmatmul.f32.gmra.mxu2 %v1105_v21  ;;  %v1530_v21 = vld [vmem:[#allocation2 + $0xa8] sm:$0xff] }
  0x5c   : > { %1610 = vmatmul.f32.gmra.mxu3 %v1516_v23 }
  0x5d   : > { %487 = vmatmul.f32.gmra.mxu0 %v1514_v17 }
  0x5e   : > { %791 = vmatmul.f32.gmra.mxu1 %v8926_v3 }
  0x60   : > { %1202 = vmatmul.f32.gmra.mxu2 %v1106_v24 }
  0x64   : > { %1613 = vmatmul.f32.gmra.mxu3 %v1517_v25 }
  0x65   : > { %490 = vmatmul.f32.gmra.mxu0 %v1515_v20 }
  0x66   : > { %794 = vmatmul.f32.gmra.mxu1 %v8546_v8 }
  0x68   : > { %1205 = vmatmul.f32.gmra.mxu2 %v1107_v27  ;;  %v1120_v27 = vld [vmem:[#allocation2 + $0x9a] sm:$0xff] }
  0x6c   : > { %1616 = vmatmul.f32.gmra.mxu3 %v1518_v29 }
  0x6d   : > { %493 = vmatmul.f32.gmra.mxu0 %v1516_v23 }
  0x6e   : > { %797 = vmatmul.f32.gmra.mxu1 %v8547_v12 }
  0x70   : > { %1208 = vmatmul.f32.gmra.mxu2 %v1108_v30 }
  0x74   : > { %1619 = vmatmul.f32.gmra.mxu3 %v1519_v32 }
  0x75   : > { %496 = vmatmul.f32.gmra.mxu0 %v1517_v25 }
  0x76   : > { %800 = vmatmul.f32.gmra.mxu1 %v8926_v3 }
  0x78   : > { %1211 = vmatmul.f32.gmra.mxu2 %v1109_v33 }
  0x7c   : > { %1622 = vmatmul.f32.gmra.mxu3 %v1520_v34 }
  0x7d   : > { %499 = vmatmul.f32.gmra.mxu0 %v1518_v29 }
  0x7e   : > { %803 = vmatmul.f32.gmra.mxu1 %v8548_v19 }
  0x80   : > { %1214 = vmatmul.f32.gmra.mxu2 %v1110_v36 }
  0x84   : > { %1625 = vmatmul.f32.gmra.mxu3 %v1521_v38 }
  0x85   : > { %502 = vmatmul.f32.gmra.mxu0 %v1519_v32 }
  0x86   : > { %806 = vmatmul.f32.gmra.mxu1 %v8549_v22 }
  0x88   : > { %1217 = vmatmul.f32.gmra.mxu2 %v1111_v39 }
  0x8c   : > { %1628 = vmatmul.f32.gmra.mxu3 %v1522_v41 }
  0x8d   : > { %505 = vmatmul.f32.gmra.mxu0 %v1520_v34  ;;  %v1531_v34 = vld [vmem:[#allocation2 + $0xb0] sm:$0xff] }
  0x8e   : > { %809 = vmatmul.f32.gmra.mxu1 %v8926_v3 }
  0x90   : > { %1220 = vmatmul.f32.gmra.mxu2 %v1112_v42 }
  0x94   : > { %1631 = vmatmul.f32.gmra.mxu3 %v1523_v43 }
  0x95   : > { %508 = vmatmul.f32.gmra.mxu0 %v1521_v38  ;;  %v1985_v38 = vld [vmem:[%s12748_s1 + $0x240] sm:$0xff] }
  0x96   : > { %812 = vmatmul.f32.gmra.mxu1 %v8550_v28  ;;  %2000 = vmatpush.msrb.mxu0 %v1985_v38 }
  0x98   : > { %1223 = vmatmul.f32.gmra.mxu2 %v1113_v44 }
  0x9c   : > { %1634 = vmatmul.f32.gmra.mxu3 %v1524_v45 }
  0x9d   : > { %511 = vmatmul.f32.gmra.mxu0 %v1522_v41  ;;  %v1121_v41 = vld [vmem:[#allocation2 + $0xa2] sm:$0xff] }
  0x9e   : > { %815 = vmatmul.f32.gmra.mxu1 %v8551_v31  ;;  %v9354_v31 = vld [vmem:[%s9217_s23 + $0x78] sm:$0xff] }
  0x9f   : > { %345 = vst [vmem:[#allocation2 + $0xc9] sm:$0xff] %v9354_v31 }
  0xa0   : > { %1226 = vmatmul.f32.gmra.mxu2 %v1114_v47  ;;  %v1532_v47 = vld [vmem:[#allocation2 + $0xb8] sm:$0xff] }
  0xa4   : > { %1637 = vmatmul.f32.gmra.mxu3 %v1525_v50 }
  0xa5   : > { %514 = vmatmul.f32.gmra.mxu0 %v1523_v43 }
  0xa6   : > { %818 = vmatmul.f32.gmra.mxu1 %v8926_v3 }
  0xa8   : > { %1229 = vmatmul.f32.gmra.mxu2 %v1115_v51 }
  0xac   : > { %1640 = vmatmul.f32.gmra.mxu3 %v1526_v52 }
  0xad   : > { %517 = vmatmul.f32.gmra.mxu0 %v1524_v45 }
  0xae   : > { %821 = vmatmul.f32.gmra.mxu1 %v8552_v37 }
  0xb0   : > { %1232 = vmatmul.f32.gmra.mxu2 %v1116_v53  ;;  %v1122_v53 = vld [vmem:[#allocation2 + $0xaa] sm:$0xff] }
  0xb2   : > { %v473_v54 = vpop.f32.mrf.mxu0 }
  0xb3   : > { %636 = vst.msk [vmem:[#allocation3] sm:$0xff] %vm635_vm0, %v473_v54  ;;  %v777_v56 = vpop.f32.mrf.mxu1 }
  0xb4   : > { %1643 = vmatmul.f32.gmra.mxu3 %v1527_v57 }
  0xb5   : > { %520 = vmatmul.f32.gmra.mxu0 %v1525_v50 }
  0xb6   : > { %824 = vmatmul.f32.gmra.mxu1 %v8553_v40 }
  0xb8   : > { %1235 = vmatmul.f32.gmra.mxu2 %v1117_v58  ;;  %v9371_v58 = vld [vmem:[%s9217_s23 + $0x80] sm:$0xff] }
  0xb9   : > { %349 = vst [vmem:[#allocation2 + $0xd9] sm:$0xff] %v9371_v58 }
  0xba   : > { %v476_v60 = vpop.f32.mrf.mxu0  ;;  %v939_v61 = vld [vmem:[#allocation3] sm:$0xff] }
  0xbb   : > { %637 = vst.msk [vmem:[#allocation3 + $0x8] sm:$0xff] %vm635_vm0, %v476_v60  ;;  %v993_v63 = vadd.f32 %v939_v61, %v777_v56  ;;  %v780_v0 = vpop.f32.mrf.mxu1  ;;  %v1188_v2 = vpop.f32.mrf.mxu2  ;;  %v1533_v61 = vld [vmem:[#allocation2 + $0xc0] sm:$0xff] }
  0xbc   : > { %1646 = vmatmul.f32.gmra.mxu3 %v1528_v1 }
  0xbd   : > { %1047 = vst.msk [vmem:[#allocation3] sm:$0xff] %vm635_vm0, %v993_v63  ;;  %523 = vmatmul.f32.gmra.mxu0 %v1526_v52 }
  0xbe   : > { %827 = vmatmul.f32.gmra.mxu1 %v8926_v3 }
  0xbf   : > { %v1599_v5 = vpop.f32.mrf.mxu3 }
  0xc0   : > { %1238 = vmatmul.f32.gmra.mxu2 %v1118_v4  ;;  %v1123_v4 = vld [vmem:[#allocation2 + $0xb2] sm:$0xff] }
  0xc2   : > { %v479_v6 = vpop.f32.mrf.mxu0  ;;  %v940_v7 = vld [vmem:[#allocation3 + $0x8] sm:$0xff] }
  0xc3   : > { %638 = vst.msk [vmem:[#allocation3 + $0x10] sm:$0xff] %vm635_vm0, %v479_v6  ;;  %v994_v8 = vadd.f32 %v940_v7, %v780_v0  ;;  %v783_v9 = vpop.f32.mrf.mxu1  ;;  %v1191_v13 = vpop.f32.mrf.mxu2 }
  0xc4   : > { %v1350_v11 = vld [vmem:[#allocation3] sm:$0xff]  ;;  %1649 = vmatmul.f32.gmra.mxu3 %v1529_v10 }
  0xc5   : > { %1048 = vst.msk [vmem:[#allocation3 + $0x8] sm:$0xff] %vm635_vm0, %v994_v8  ;;  %v1404_v12 = vadd.f32 %v1350_v11, %v1188_v2  ;;  %526 = vmatmul.f32.gmra.mxu0 %v1527_v57  ;;  %v9380_v8 = vld [vmem:[%s9217_s23 + $0x88] sm:$0xff] }
  0xc6   : > { %830 = vmatmul.f32.gmra.mxu1 %v8554_v48  ;;  %v1534_v11 = vld [vmem:[#allocation2 + $0xc8] sm:$0xff]  ;;  %350 = vst [vmem:[#allocation2 + $0xe1] sm:$0xff] %v9380_v8 }
  0xc7   : > { %1458 = vst.msk [vmem:[#allocation3] sm:$0xff] %vm635_vm0, %v1404_v12  ;;  %v1602_v15 = vpop.f32.mrf.mxu3 }
  0xc8   : > { %1241 = vmatmul.f32.gmra.mxu2 %v1119_v14 }
  0xca   : > { %v482_v16 = vpop.f32.mrf.mxu0  ;;  %v941_v17 = vld [vmem:[#allocation3 + $0x10] sm:$0xff] }
  0xcb   : > { %639 = vst.msk [vmem:[#allocation3 + $0x18] sm:$0xff] %vm635_vm0, %v482_v16  ;;  %v995_v19 = vadd.f32 %v941_v17, %v783_v9  ;;  %v786_v20 = vpop.f32.mrf.mxu1  ;;  %v1194_v24 = vpop.f32.mrf.mxu2  ;;  %v1124_v16 = vld [vmem:[#allocation2 + $0xba] sm:$0xff] }
  0xcc   : > { %v1351_v22 = vld [vmem:[#allocation3 + $0x8] sm:$0xff]  ;;  %1652 = vmatmul.f32.gmra.mxu3 %v1530_v21  ;;  %v1984_v17 = vld [vmem:[%s12748_s1 + $0x238] sm:$0xff] }
  0xcd   : > { %1049 = vst.msk [vmem:[#allocation3 + $0x10] sm:$0xff] %vm635_vm0, %v995_v19  ;;  %v1405_v23 = vadd.f32 %v1351_v22, %v1191_v13  ;;  %529 = vmatmul.f32.gmra.mxu0 %v1528_v1 }
  0xce   : > { %v1761_v25 = vld [vmem:[#allocation3] sm:$0xff]  ;;  %833 = vmatmul.f32.gmra.mxu1 %v9322_v49  ;;  %2001 = vmatpush.msrb.mxu0 %v1984_v17 }
  0xcf   : > { %1459 = vst.msk [vmem:[#allocation3 + $0x8] sm:$0xff] %vm635_vm0, %v1405_v23  ;;  %v1815_v26 = vadd.f32 %v1761_v25, %v1599_v5  ;;  %v1605_v28 = vpop.f32.mrf.mxu3  ;;  %v1535_v23 = vld [vmem:[#allocation2 + $0xd0] sm:$0xff] }
  0xd0   : > { %1244 = vmatmul.f32.gmra.mxu2 %v1120_v27 }
  0xd1   : > { %1869 = vst.msk [vmem:[#allocation3] sm:$0xff] %vm635_vm0, %v1815_v26 }
  0xd2   : > { %v485_v29 = vpop.f32.mrf.mxu0  ;;  %v942_v30 = vld [vmem:[#allocation3 + $0x18] sm:$0xff] }
  0xd3   : > { %640 = vst.msk [vmem:[#allocation3 + $0x20] sm:$0xff] %vm635_vm0, %v485_v29  ;;  %v996_v32 = vadd.f32 %v942_v30, %v786_v20  ;;  %v789_v33 = vpop.f32.mrf.mxu1  ;;  %v1197_v37 = vpop.f32.mrf.mxu2  ;;  %v1125_v29 = vld [vmem:[#allocation2 + $0xc2] sm:$0xff] }
  0xd4   : > { %v1352_v35 = vld [vmem:[#allocation3 + $0x10] sm:$0xff]  ;;  %1655 = vmatmul.f32.gmra.mxu3 %v1531_v34 }
  0xd5   : > { %1050 = vst.msk [vmem:[#allocation3 + $0x18] sm:$0xff] %vm635_vm0, %v996_v32  ;;  %v1406_v36 = vadd.f32 %v1352_v35, %v1194_v24  ;;  %532 = vmatmul.f32.gmra.mxu0 %v1529_v10 }
  0xd6   : > { %v1762_v39 = vld [vmem:[#allocation3 + $0x8] sm:$0xff]  ;;  %836 = vmatmul.f32.gmra.mxu1 %v8926_v3 }
  0xd7   : > { %1460 = vst.msk [vmem:[#allocation3 + $0x10] sm:$0xff] %vm635_vm0, %v1406_v36  ;;  %v1816_v40 = vadd.f32 %v1762_v39, %v1602_v15  ;;  %v1608_v42 = vpop.f32.mrf.mxu3 }
  0xd8   : > { %1247 = vmatmul.f32.gmra.mxu2 %v1121_v41 }
  0xd9   : > { %1870 = vst.msk [vmem:[#allocation3 + $0x8] sm:$0xff] %vm635_vm0, %v1816_v40 }
  0xda   : > { %v488_v43 = vpop.f32.mrf.mxu0  ;;  %v943_v44 = vld [vmem:[#allocation3 + $0x20] sm:$0xff] }
  0xdb   : > { %641 = vst.msk [vmem:[#allocation3 + $0x28] sm:$0xff] %vm635_vm0, %v488_v43  ;;  %v997_v45 = vadd.f32 %v943_v44, %v789_v33  ;;  %v792_v46 = vpop.f32.mrf.mxu1  ;;  %v1200_v50 = vpop.f32.mrf.mxu2 }
  0xdc   : > { %v1353_v48 = vld [vmem:[#allocation3 + $0x18] sm:$0xff]  ;;  %1658 = vmatmul.f32.gmra.mxu3 %v1532_v47 }
  0xdd   : > { %1051 = vst.msk [vmem:[#allocation3 + $0x20] sm:$0xff] %vm635_vm0, %v997_v45  ;;  %v1407_v49 = vadd.f32 %v1353_v48, %v1197_v37  ;;  %535 = vmatmul.f32.gmra.mxu0 %v1530_v21  ;;  %v1536_v37 = vld [vmem:[#allocation2 + $0xd8] sm:$0xff] }
  0xde   : > { %v1763_v51 = vld [vmem:[#allocation3 + $0x10] sm:$0xff]  ;;  %839 = vmatmul.f32.gmra.mxu1 %v9327_v55 }
  0xdf   : > { %1461 = vst.msk [vmem:[#allocation3 + $0x18] sm:$0xff] %vm635_vm0, %v1407_v49  ;;  %v1817_v52 = vadd.f32 %v1763_v51, %v1605_v28  ;;  %v1611_v54 = vpop.f32.mrf.mxu3  ;;  %v1537_v49 = vld [vmem:[#allocation2 + $0xe0] sm:$0xff] }
  0xe0   : > { %1250 = vmatmul.f32.gmra.mxu2 %v1122_v53  ;;  %v9411_v53 = vld [vmem:[#allocation2] sm:$0xff] }
  0xe1   : > { %1871 = vst.msk [vmem:[#allocation3 + $0x10] sm:$0xff] %vm635_vm0, %v1817_v52 }
  0xe2   : > { %v491_v56 = vpop.f32.mrf.mxu0  ;;  %v944_v57 = vld [vmem:[#allocation3 + $0x28] sm:$0xff] }
  0xe3   : > { %642 = vst.msk [vmem:[#allocation3 + $0x30] sm:$0xff] %vm635_vm0, %v491_v56  ;;  %v998_v59 = vadd.f32 %v944_v57, %v792_v46  ;;  %v795_v60 = vpop.f32.mrf.mxu1  ;;  %v1203_v0 = vpop.f32.mrf.mxu2  ;;  %v9406_v46 = vld [vmem:[%s9217_s23 + $0x98] sm:$0xff] }
  0xe4   : > { %v1354_v63 = vld [vmem:[#allocation3 + $0x20] sm:$0xff]  ;;  %1661 = vmatmul.f32.gmra.mxu3 %v1533_v61  ;;  %355 = vst [vmem:[#allocation2 + $0xf9] sm:$0xff] %v9406_v46  ;;  %v1127_v56 = vld [vmem:[#allocation2 + $0xd2] sm:$0xff] }
  0xe5   : > { %1052 = vst.msk [vmem:[#allocation3 + $0x28] sm:$0xff] %vm635_vm0, %v998_v59  ;;  %v1408_v55 = vadd.f32 %v1354_v63, %v1200_v50  ;;  %538 = vmatmul.f32.gmra.mxu0 %v1531_v34  ;;  %v9397_v34 = vld [vmem:[%s9217_s23 + $0x90] sm:$0xff] }
  0xe6   : > { %v1764_v1 = vld [vmem:[#allocation3 + $0x18] sm:$0xff]  ;;  %842 = vmatmul.f32.gmra.mxu1 %v9335_v62  ;;  %354 = vst [vmem:[#allocation2 + $0xf1] sm:$0xff] %v9397_v34  ;;  %v1983_v59 = vld [vmem:[%s12748_s1 + $0x230] sm:$0xff] }
  0xe7   : > { %1462 = vst.msk [vmem:[#allocation3 + $0x20] sm:$0xff] %vm635_vm0, %v1408_v55  ;;  %v1818_v2 = vadd.f32 %v1764_v1, %v1608_v42  ;;  %v1614_v5 = vpop.f32.mrf.mxu3  ;;  %v1126_v42 = vld [vmem:[#allocation2 + $0xca] sm:$0xff]  ;;  %2002 = vmatpush.msrb.mxu0 %v1983_v59 }
  0xe8   : > { %1253 = vmatmul.f32.gmra.mxu2 %v1123_v4 }
  0xe9   : > { %1872 = vst.msk [vmem:[#allocation3 + $0x18] sm:$0xff] %vm635_vm0, %v1818_v2 }
  0xea   : > { %v494_v6 = vpop.f32.mrf.mxu0  ;;  %v945_v7 = vld [vmem:[#allocation3 + $0x30] sm:$0xff] }
  0xeb   : > { %643 = vst.msk [vmem:[#allocation3 + $0x38] sm:$0xff] %vm635_vm0, %v494_v6  ;;  %v999_v9 = vadd.f32 %v945_v7, %v795_v60  ;;  %v798_v10 = vpop.f32.mrf.mxu1  ;;  %v1206_v13 = vpop.f32.mrf.mxu2  ;;  %v1128_v7 = vld [vmem:[#allocation2 + $0xda] sm:$0xff] }
  0xec   : > { %v1355_v12 = vld [vmem:[#allocation3 + $0x28] sm:$0xff]  ;;  %1664 = vmatmul.f32.gmra.mxu3 %v1534_v11 }
  0xed   : > { %1053 = vst.msk [vmem:[#allocation3 + $0x30] sm:$0xff] %vm635_vm0, %v999_v9  ;;  %v1409_v62 = vadd.f32 %v1355_v12, %v1203_v0  ;;  %541 = vmatmul.f32.gmra.mxu0 %v1532_v47  ;;  %v1538_v0 = vld [vmem:[#allocation2 + $0xe8] sm:$0xff]  ;;  %v9425_v12 = vld [vmem:[%s9217_s23 + $0xa0] sm:$0xff] }
  0xee   : > { %v1765_v14 = vld [vmem:[#allocation3 + $0x20] sm:$0xff]  ;;  %845 = vmatmul.f32.gmra.mxu1 %v8926_v3  ;;  %359 = vst [vmem:[#allocation2 + $0x109] sm:$0xff] %v9425_v12 }
  0xef   : > { %1463 = vst.msk [vmem:[#allocation3 + $0x28] sm:$0xff] %vm635_vm0, %v1409_v62  ;;  %v1819_v15 = vadd.f32 %v1765_v14, %v1611_v54  ;;  %v1617_v19 = vpop.f32.mrf.mxu3  ;;  %v1539_v14 = vld [vmem:[#allocation2 + $0xf0] sm:$0xff] }
  0xf0   : > { %1256 = vmatmul.f32.gmra.mxu2 %v1124_v16 }
  0xf1   : > { %1873 = vst.msk [vmem:[#allocation3 + $0x20] sm:$0xff] %vm635_vm0, %v1819_v15 }
  0xf2   : > { %v497_v20 = vpop.f32.mrf.mxu0  ;;  %v946_v21 = vld [vmem:[#allocation3 + $0x38] sm:$0xff] }
  0xf3   : > { %644 = vst.msk [vmem:[#allocation3 + $0x40] sm:$0xff] %vm635_vm0, %v497_v20  ;;  %v1000_v22 = vadd.f32 %v946_v21, %v798_v10  ;;  %v801_v3 = vpop.f32.mrf.mxu1  ;;  %v1209_v26 = vpop.f32.mrf.mxu2  ;;  %v1129_v20 = vld [vmem:[#allocation2 + $0xe2] sm:$0xff] }
  0xf4   : > { %v1356_v24 = vld [vmem:[#allocation3 + $0x30] sm:$0xff]  ;;  %1667 = vmatmul.f32.gmra.mxu3 %v1535_v23 }
  0xf5   : > { %1054 = vst.msk [vmem:[#allocation3 + $0x38] sm:$0xff] %vm635_vm0, %v1000_v22  ;;  %v1410_v25 = vadd.f32 %v1356_v24, %v1206_v13  ;;  %544 = vmatmul.f32.gmra.mxu0 %v1533_v61 }
  0xf6   : > { %v1766_v27 = vld [vmem:[#allocation3 + $0x28] sm:$0xff]  ;;  %848 = vmatmul.f32.gmra.mxu1 %v9345_v18 }
  0xf7   : > { %1464 = vst.msk [vmem:[#allocation3 + $0x30] sm:$0xff] %vm635_vm0, %v1410_v25  ;;  %v1820_v28 = vadd.f32 %v1766_v27, %v1614_v5  ;;  %v1620_v30 = vpop.f32.mrf.mxu3 }
  0xf8   : > { %1259 = vmatmul.f32.gmra.mxu2 %v1125_v29 }
  0xf9   : > { %1874 = vst.msk [vmem:[#allocation3 + $0x28] sm:$0xff] %vm635_vm0, %v1820_v28 }
  0xfa   : > { %v500_v32 = vpop.f32.mrf.mxu0  ;;  %v947_v33 = vld [vmem:[#allocation3 + $0x40] sm:$0xff] }
  0xfb   : > { %645 = vst.msk [vmem:[#allocation3 + $0x48] sm:$0xff] %vm635_vm0, %v500_v32  ;;  %v1001_v35 = vadd.f32 %v947_v33, %v801_v3  ;;  %v804_v36 = vpop.f32.mrf.mxu1  ;;  %v1212_v39 = vpop.f32.mrf.mxu2  ;;  %v1130_v32 = vld [vmem:[#allocation2 + $0xea] sm:$0xff] }
  0xfc   : > { %v1357_v38 = vld [vmem:[#allocation3 + $0x38] sm:$0xff]  ;;  %1670 = vmatmul.f32.gmra.mxu3 %v1536_v37 }
  0xfd   : > { %1055 = vst.msk [vmem:[#allocation3 + $0x40] sm:$0xff] %vm635_vm0, %v1001_v35  ;;  %v1411_v18 = vadd.f32 %v1357_v38, %v1209_v26  ;;  %547 = vmatmul.f32.gmra.mxu0 %v1534_v11  ;;  %v1540_v26 = vld [vmem:[#allocation2 + $0xf8] sm:$0xff] }
  0xfe   : > { %v1767_v40 = vld [vmem:[#allocation3 + $0x30] sm:$0xff]  ;;  %851 = vmatmul.f32.gmra.mxu1 %v9354_v31 }
  0xff   : > { %1465 = vst.msk [vmem:[#allocation3 + $0x38] sm:$0xff] %vm635_vm0, %v1411_v18  ;;  %v1821_v41 = vadd.f32 %v1767_v40, %v1617_v19  ;;  %v1623_v43 = vpop.f32.mrf.mxu3  ;;  %v1541_v18 = vld [vmem:[#allocation2 + $0x100] sm:$0xff] }
 0x100   : > { %1262 = vmatmul.f32.gmra.mxu2 %v1126_v42  ;;  %v1982_v42 = vld [vmem:[%s12748_s1 + $0x228] sm:$0xff] }
 0x101   : > { %1875 = vst.msk [vmem:[#allocation3 + $0x30] sm:$0xff] %vm635_vm0, %v1821_v41  ;;  %2003 = vmatpush.msrb.mxu0 %v1982_v42 }
 0x102   : > { %v503_v44 = vpop.f32.mrf.mxu0  ;;  %v948_v45 = vld [vmem:[#allocation3 + $0x48] sm:$0xff] }
 0x103   : > { %646 = vst.msk [vmem:[#allocation3 + $0x50] sm:$0xff] %vm635_vm0, %v503_v44  ;;  %v1002_v47 = vadd.f32 %v948_v45, %v804_v36  ;;  %v807_v48 = vpop.f32.mrf.mxu1  ;;  %v1215_v51 = vpop.f32.mrf.mxu2  ;;  %v1131_v45 = vld [vmem:[#allocation2 + $0xf2] sm:$0xff] }
 0x104   : > { %v1358_v50 = vld [vmem:[#allocation3 + $0x40] sm:$0xff]  ;;  %1673 = vmatmul.f32.gmra.mxu3 %v1537_v49 }
 0x105   : > { %1056 = vst.msk [vmem:[#allocation3 + $0x48] sm:$0xff] %vm635_vm0, %v1002_v47  ;;  %v1412_v31 = vadd.f32 %v1358_v50, %v1212_v39  ;;  %550 = vmatmul.f32.gmra.mxu0 %v1535_v23  ;;  %v9434_v23 = vld [vmem:[%s9217_s23 + $0xa8] sm:$0xff]  ;;  %v9451_v50 = vld [vmem:[%s9217_s23 + $0xb0] sm:$0xff] }
 0x106   : > { %v1768_v52 = vld [vmem:[#allocation3 + $0x38] sm:$0xff]  ;;  %854 = vmatmul.f32.gmra.mxu1 %v9411_v53  ;;  %360 = vst [vmem:[#allocation2 + $0x111] sm:$0xff] %v9434_v23 }
 0x107   : > { %1466 = vst.msk [vmem:[#allocation3 + $0x40] sm:$0xff] %vm635_vm0, %v1412_v31  ;;  %v1822_v54 = vadd.f32 %v1768_v52, %v1620_v30  ;;  %v1626_v57 = vpop.f32.mrf.mxu3  ;;  %v1542_v52 = vld [vmem:[#allocation2 + $0x108] sm:$0xff] }
 0x108   : > { %1265 = vmatmul.f32.gmra.mxu2 %v1127_v56  ;;  %364 = vst [vmem:[#allocation2 + $0x121] sm:$0xff] %v9451_v50 }
 0x109   : > { %1876 = vst.msk [vmem:[#allocation3 + $0x38] sm:$0xff] %vm635_vm0, %v1822_v54 }
 0x10a   : > { %v506_v60 = vpop.f32.mrf.mxu0  ;;  %v949_v61 = vld [vmem:[#allocation3 + $0x50] sm:$0xff] }
 0x10b   : > { %647 = vst.msk [vmem:[#allocation3 + $0x58] sm:$0xff] %vm635_vm0, %v506_v60  ;;  %v1003_v63 = vadd.f32 %v949_v61, %v807_v48  ;;  %v810_v55 = vpop.f32.mrf.mxu1  ;;  %v1218_v4 = vpop.f32.mrf.mxu2  ;;  %v1132_v60 = vld [vmem:[#allocation2 + $0xfa] sm:$0xff] }
 0x10c   : > { %v1359_v1 = vld [vmem:[#allocation3 + $0x48] sm:$0xff]  ;;  %1676 = vmatmul.f32.gmra.mxu3 %v1538_v0 }
 0x10d   : > { %1057 = vst.msk [vmem:[#allocation3 + $0x50] sm:$0xff] %vm635_vm0, %v1003_v63  ;;  %v1413_v2 = vadd.f32 %v1359_v1, %v1215_v51  ;;  %553 = vmatmul.f32.gmra.mxu0 %v1536_v37 }
 0x10e   : > { %v1769_v5 = vld [vmem:[#allocation3 + $0x40] sm:$0xff]  ;;  %857 = vmatmul.f32.gmra.mxu1 %v9371_v58 }
 0x10f   : > { %1467 = vst.msk [vmem:[#allocation3 + $0x48] sm:$0xff] %vm635_vm0, %v1413_v2  ;;  %v1823_v6 = vadd.f32 %v1769_v5, %v1623_v43  ;;  %v1629_v9 = vpop.f32.mrf.mxu3 }
 0x110   : > { %1268 = vmatmul.f32.gmra.mxu2 %v1128_v7 }
 0x111   : > { %1877 = vst.msk [vmem:[#allocation3 + $0x40] sm:$0xff] %vm635_vm0, %v1823_v6 }
 0x112   : > { %v509_v10 = vpop.f32.mrf.mxu0  ;;  %v950_v11 = vld [vmem:[#allocation3 + $0x58] sm:$0xff] }
 0x113   : > { %648 = vst.msk [vmem:[#allocation3 + $0x60] sm:$0xff] %vm635_vm0, %v509_v10  ;;  %v1004_v62 = vadd.f32 %v950_v11, %v810_v55  ;;  %v813_v13 = vpop.f32.mrf.mxu1  ;;  %v1221_v16 = vpop.f32.mrf.mxu2  ;;  %v1133_v10 = vld [vmem:[#allocation2 + $0x102] sm:$0xff] }
 0x114   : > { %v1360_v15 = vld [vmem:[#allocation3 + $0x50] sm:$0xff]  ;;  %1679 = vmatmul.f32.gmra.mxu3 %v1539_v14 }
 0x115   : > { %1058 = vst.msk [vmem:[#allocation3 + $0x58] sm:$0xff] %vm635_vm0, %v1004_v62  ;;  %v1414_v58 = vadd.f32 %v1360_v15, %v1218_v4  ;;  %556 = vmatmul.f32.gmra.mxu0 %v1537_v49  ;;  %v1543_v4 = vld [vmem:[#allocation2 + $0x110] sm:$0xff] }
 0x116   : > { %v1770_v17 = vld [vmem:[#allocation3 + $0x48] sm:$0xff]  ;;  %860 = vmatmul.f32.gmra.mxu1 %v9380_v8 }
 0x117   : > { %1468 = vst.msk [vmem:[#allocation3 + $0x50] sm:$0xff] %vm635_vm0, %v1414_v58  ;;  %v1824_v19 = vadd.f32 %v1770_v17, %v1626_v57  ;;  %v1632_v21 = vpop.f32.mrf.mxu3  ;;  %v1544_v58 = vld [vmem:[#allocation2 + $0x118] sm:$0xff] }
 0x118   : > { %1271 = vmatmul.f32.gmra.mxu2 %v1129_v20 }
 0x119   : > { %1878 = vst.msk [vmem:[#allocation3 + $0x48] sm:$0xff] %vm635_vm0, %v1824_v19 }
 0x11a   : > { %v512_v22 = vpop.f32.mrf.mxu0  ;;  %v951_v3 = vld [vmem:[#allocation3 + $0x60] sm:$0xff] }
 0x11b   : > { %649 = vst.msk [vmem:[#allocation3 + $0x68] sm:$0xff] %vm635_vm0, %v512_v22  ;;  %v1005_v24 = vadd.f32 %v951_v3, %v813_v13  ;;  %v816_v25 = vpop.f32.mrf.mxu1  ;;  %v1224_v28 = vpop.f32.mrf.mxu2  ;;  %v1134_v22 = vld [vmem:[#allocation2 + $0x10a] sm:$0xff] }
 0x11c   : > { %v1361_v27 = vld [vmem:[#allocation3 + $0x58] sm:$0xff]  ;;  %1682 = vmatmul.f32.gmra.mxu3 %v1540_v26 }
 0x11d   : > { %1059 = vst.msk [vmem:[#allocation3 + $0x60] sm:$0xff] %vm635_vm0, %v1005_v24  ;;  %v1415_v8 = vadd.f32 %v1361_v27, %v1221_v16  ;;  %559 = vmatmul.f32.gmra.mxu0 %v1538_v0  ;;  %v9460_v0 = vld [vmem:[%s9217_s23 + $0xb8] sm:$0xff]  ;;  %v1981_v24 = vld [vmem:[%s12748_s1 + $0x220] sm:$0xff] }
 0x11e   : > { %v1771_v29 = vld [vmem:[#allocation3 + $0x50] sm:$0xff]  ;;  %863 = vmatmul.f32.gmra.mxu1 %v9411_v53  ;;  %365 = vst [vmem:[#allocation2 + $0x129] sm:$0xff] %v9460_v0  ;;  %2004 = vmatpush.msrb.mxu0 %v1981_v24  ;;  %v9477_v27 = vld [vmem:[%s9217_s23 + $0xc0] sm:$0xff] }
 0x11f   : > { %1469 = vst.msk [vmem:[#allocation3 + $0x58] sm:$0xff] %vm635_vm0, %v1415_v8  ;;  %v1825_v30 = vadd.f32 %v1771_v29, %v1629_v9  ;;  %v1635_v33 = vpop.f32.mrf.mxu3 }
 0x120   : > { %1274 = vmatmul.f32.gmra.mxu2 %v1130_v32  ;;  %369 = vst [vmem:[#allocation2 + $0x139] sm:$0xff] %v9477_v27 }
 0x121   : > { %1879 = vst.msk [vmem:[#allocation3 + $0x50] sm:$0xff] %vm635_vm0, %v1825_v30 }
 0x122   : > { %v515_v35 = vpop.f32.mrf.mxu0  ;;  %v952_v36 = vld [vmem:[#allocation3 + $0x68] sm:$0xff] }
 0x123   : > { %650 = vst.msk [vmem:[#allocation3 + $0x70] sm:$0xff] %vm635_vm0, %v515_v35  ;;  %v1006_v37 = vadd.f32 %v952_v36, %v816_v25  ;;  %v819_v38 = vpop.f32.mrf.mxu1  ;;  %v1227_v41 = vpop.f32.mrf.mxu2  ;;  %v1135_v36 = vld [vmem:[#allocation2 + $0x112] sm:$0xff] }
 0x124   : > { %v1362_v39 = vld [vmem:[#allocation3 + $0x60] sm:$0xff]  ;;  %1685 = vmatmul.f32.gmra.mxu3 %v1541_v18 }
 0x125   : > { %1060 = vst.msk [vmem:[#allocation3 + $0x68] sm:$0xff] %vm635_vm0, %v1006_v37  ;;  %v1416_v40 = vadd.f32 %v1362_v39, %v1224_v28  ;;  %562 = vmatmul.f32.gmra.mxu0 %v1539_v14  ;;  %v1545_v28 = vld [vmem:[#allocation2 + $0x120] sm:$0xff]  ;;  %v9486_v39 = vld [vmem:[%s9217_s23 + $0xc8] sm:$0xff] }
 0x126   : > { %v1772_v43 = vld [vmem:[#allocation3 + $0x58] sm:$0xff]  ;;  %866 = vmatmul.f32.gmra.mxu1 %v9397_v34  ;;  %v1546_v42 = vld [vmem:[#allocation2 + $0x128] sm:$0xff]  ;;  %370 = vst [vmem:[#allocation2 + $0x141] sm:$0xff] %v9486_v39 }
 0x127   : > { %1470 = vst.msk [vmem:[#allocation3 + $0x60] sm:$0xff] %vm635_vm0, %v1416_v40  ;;  %v1826_v44 = vadd.f32 %v1772_v43, %v1632_v21  ;;  %v1638_v47 = vpop.f32.mrf.mxu3 }
 0x128   : > { %1277 = vmatmul.f32.gmra.mxu2 %v1131_v45 }
 0x129   : > { %1880 = vst.msk [vmem:[#allocation3 + $0x58] sm:$0xff] %vm635_vm0, %v1826_v44 }
 0x12a   : > { %v518_v48 = vpop.f32.mrf.mxu0  ;;  %v953_v49 = vld [vmem:[#allocation3 + $0x70] sm:$0xff] }
 0x12b   : > { %651 = vst.msk [vmem:[#allocation3 + $0x78] sm:$0xff] %vm635_vm0, %v518_v48  ;;  %v1007_v31 = vadd.f32 %v953_v49, %v819_v38  ;;  %v822_v51 = vpop.f32.mrf.mxu1  ;;  %v1230_v56 = vpop.f32.mrf.mxu2  ;;  %v1136_v48 = vld [vmem:[#allocation2 + $0x11a] sm:$0xff] }
 0x12c   : > { %v1363_v34 = vld [vmem:[#allocation3 + $0x68] sm:$0xff]  ;;  %1688 = vmatmul.f32.gmra.mxu3 %v1542_v52 }
 0x12d   : > { %1061 = vst.msk [vmem:[#allocation3 + $0x70] sm:$0xff] %vm635_vm0, %v1007_v31  ;;  %v1417_v54 = vadd.f32 %v1363_v34, %v1227_v41  ;;  %565 = vmatmul.f32.gmra.mxu0 %v1540_v26 }
 0x12e   : > { %v1773_v57 = vld [vmem:[#allocation3 + $0x60] sm:$0xff]  ;;  %869 = vmatmul.f32.gmra.mxu1 %v9406_v46 }
 0x12f   : > { %1471 = vst.msk [vmem:[#allocation3 + $0x68] sm:$0xff] %vm635_vm0, %v1417_v54  ;;  %v1827_v59 = vadd.f32 %v1773_v57, %v1635_v33  ;;  %v1641_v61 = vpop.f32.mrf.mxu3  ;;  %v1547_v54 = vld [vmem:[#allocation2 + $0x130] sm:$0xff] }
 0x130   : > { %1280 = vmatmul.f32.gmra.mxu2 %v1132_v60 }
 0x131   : > { %1881 = vst.msk [vmem:[#allocation3 + $0x60] sm:$0xff] %vm635_vm0, %v1827_v59 }
 0x132   : > { %v521_v63 = vpop.f32.mrf.mxu0  ;;  %v954_v55 = vld [vmem:[#allocation3 + $0x78] sm:$0xff] }
 0x133   : > { %652 = vst.msk [vmem:[#allocation3 + $0x80] sm:$0xff] %vm635_vm0, %v521_v63  ;;  %v1008_v1 = vadd.f32 %v954_v55, %v822_v51  ;;  %v825_v2 = vpop.f32.mrf.mxu1  ;;  %v1233_v6 = vpop.f32.mrf.mxu2  ;;  %v1137_v63 = vld [vmem:[#allocation2 + $0x122] sm:$0xff] }
 0x134   : > { %v1364_v5 = vld [vmem:[#allocation3 + $0x70] sm:$0xff]  ;;  %1691 = vmatmul.f32.gmra.mxu3 %v1543_v4 }
 0x135   : > { %1062 = vst.msk [vmem:[#allocation3 + $0x78] sm:$0xff] %vm635_vm0, %v1008_v1  ;;  %v1418_v46 = vadd.f32 %v1364_v5, %v1230_v56  ;;  %568 = vmatmul.f32.gmra.mxu0 %v1541_v18  ;;  %v1980_v1 = vld [vmem:[%s12748_s1 + $0x218] sm:$0xff]  ;;  %v9503_v5 = vld [vmem:[%s9217_s23 + $0xd0] sm:$0xff] }
 0x136   : > { %v1774_v7 = vld [vmem:[#allocation3 + $0x68] sm:$0xff]  ;;  %872 = vmatmul.f32.gmra.mxu1 %v9411_v53  ;;  %2005 = vmatpush.msrb.mxu0 %v1980_v1  ;;  %374 = vst [vmem:[#allocation2 + $0x151] sm:$0xff] %v9503_v5 }
 0x137   : > { %1472 = vst.msk [vmem:[#allocation3 + $0x70] sm:$0xff] %vm635_vm0, %v1418_v46  ;;  %v1828_v9 = vadd.f32 %v1774_v7, %v1638_v47  ;;  %v1644_v11 = vpop.f32.mrf.mxu3 }
 0x138   : > { %1283 = vmatmul.f32.gmra.mxu2 %v1133_v10 }
 0x139   : > { %1882 = vst.msk [vmem:[#allocation3 + $0x68] sm:$0xff] %vm635_vm0, %v1828_v9 }
 0x13a   : > { %v524_v62 = vpop.f32.mrf.mxu0  ;;  %v955_v13 = vld [vmem:[#allocation3 + $0x80] sm:$0xff] }
 0x13b   : > { %653 = vst.msk [vmem:[#allocation3 + $0x88] sm:$0xff] %vm635_vm0, %v524_v62  ;;  %v1009_v14 = vadd.f32 %v955_v13, %v825_v2  ;;  %v828_v15 = vpop.f32.mrf.mxu1  ;;  %v1236_v19 = vpop.f32.mrf.mxu2  ;;  %v1138_v13 = vld [vmem:[#allocation2 + $0x12a] sm:$0xff] }
 0x13c   : > { %v1365_v16 = vld [vmem:[#allocation3 + $0x78] sm:$0xff]  ;;  %1694 = vmatmul.f32.gmra.mxu3 %v1544_v58 }
 0x13d   : > { %1063 = vst.msk [vmem:[#allocation3 + $0x80] sm:$0xff] %vm635_vm0, %v1009_v14  ;;  %v1419_v17 = vadd.f32 %v1365_v16, %v1233_v6  ;;  %571 = vmatmul.f32.gmra.mxu0 %v1542_v52  ;;  %v1548_v6 = vld [vmem:[#allocation2 + $0x138] sm:$0xff] }
 0x13e   : > { %v1775_v20 = vld [vmem:[#allocation3 + $0x70] sm:$0xff]  ;;  %875 = vmatmul.f32.gmra.mxu1 %v9425_v12 }
 0x13f   : > { %1473 = vst.msk [vmem:[#allocation3 + $0x78] sm:$0xff] %vm635_vm0, %v1419_v17  ;;  %v1829_v21 = vadd.f32 %v1775_v20, %v1641_v61  ;;  %v1647_v3 = vpop.f32.mrf.mxu3  ;;  %v9512_v16 = vld [vmem:[%s9217_s23 + $0xd8] sm:$0xff]  ;;  %v1549_v20 = vld [vmem:[#allocation2 + $0x140] sm:$0xff] }
 0x140   : > { %1286 = vmatmul.f32.gmra.mxu2 %v1134_v22  ;;  %375 = vst [vmem:[#allocation2 + $0x159] sm:$0xff] %v9512_v16 }
 0x141   : > { %1883 = vst.msk [vmem:[#allocation3 + $0x70] sm:$0xff] %vm635_vm0, %v1829_v21 }
 0x142   : > { %v527_v25 = vpop.f32.mrf.mxu0  ;;  %v956_v26 = vld [vmem:[#allocation3 + $0x88] sm:$0xff] }
 0x143   : > { %654 = vst.msk [vmem:[#allocation3 + $0x90] sm:$0xff] %vm635_vm0, %v527_v25  ;;  %v1010_v12 = vadd.f32 %v956_v26, %v828_v15  ;;  %v831_v8 = vpop.f32.mrf.mxu1  ;;  %v1239_v32 = vpop.f32.mrf.mxu2  ;;  %v1139_v25 = vld [vmem:[#allocation2 + $0x132] sm:$0xff] }
 0x144   : > { %v1366_v29 = vld [vmem:[#allocation3 + $0x80] sm:$0xff]  ;;  %1697 = vmatmul.f32.gmra.mxu3 %v1545_v28 }
 0x145   : > { %1064 = vst.msk [vmem:[#allocation3 + $0x88] sm:$0xff] %vm635_vm0, %v1010_v12  ;;  %v1420_v30 = vadd.f32 %v1366_v29, %v1236_v19  ;;  %574 = vmatmul.f32.gmra.mxu0 %v1543_v4 }
 0x146   : > { %v1776_v33 = vld [vmem:[#allocation3 + $0x78] sm:$0xff]  ;;  %878 = vmatmul.f32.gmra.mxu1 %v9434_v23 }
 0x147   : > { %1474 = vst.msk [vmem:[#allocation3 + $0x80] sm:$0xff] %vm635_vm0, %v1420_v30  ;;  %v1830_v35 = vadd.f32 %v1776_v33, %v1644_v11  ;;  %v1650_v37 = vpop.f32.mrf.mxu3  ;;  %v1550_v30 = vld [vmem:[#allocation2 + $0x148] sm:$0xff] }
 0x148   : > { %1289 = vmatmul.f32.gmra.mxu2 %v1135_v36 }
 0x149   : > { %1884 = vst.msk [vmem:[#allocation3 + $0x78] sm:$0xff] %vm635_vm0, %v1830_v35 }
 0x14a   : > { %v530_v38 = vpop.f32.mrf.mxu0  ;;  %v957_v18 = vld [vmem:[#allocation3 + $0x90] sm:$0xff] }
 0x14b   : > { %655 = vst.msk [vmem:[#allocation3 + $0x98] sm:$0xff] %vm635_vm0, %v530_v38  ;;  %v1011_v40 = vadd.f32 %v957_v18, %v831_v8  ;;  %v834_v41 = vpop.f32.mrf.mxu1  ;;  %v1242_v44 = vpop.f32.mrf.mxu2  ;;  %v1140_v38 = vld [vmem:[#allocation2 + $0x13a] sm:$0xff] }
 0x14c   : > { %v1367_v43 = vld [vmem:[#allocation3 + $0x88] sm:$0xff]  ;;  %1700 = vmatmul.f32.gmra.mxu3 %v1546_v42 }
 0x14d   : > { %1065 = vst.msk [vmem:[#allocation3 + $0x90] sm:$0xff] %vm635_vm0, %v1011_v40  ;;  %v1421_v23 = vadd.f32 %v1367_v43, %v1239_v32  ;;  %577 = vmatmul.f32.gmra.mxu0 %v1544_v58 }
 0x14e   : > { %v1777_v45 = vld [vmem:[#allocation3 + $0x80] sm:$0xff]  ;;  %881 = vmatmul.f32.gmra.mxu1 %v9411_v53 }
 0x14f   : > { %1475 = vst.msk [vmem:[#allocation3 + $0x88] sm:$0xff] %vm635_vm0, %v1421_v23  ;;  %v1831_v47 = vadd.f32 %v1777_v45, %v1647_v3  ;;  %v1653_v49 = vpop.f32.mrf.mxu3 }
 0x150   : > { %1292 = vmatmul.f32.gmra.mxu2 %v1136_v48 }
 0x151   : > { %1885 = vst.msk [vmem:[#allocation3 + $0x80] sm:$0xff] %vm635_vm0, %v1831_v47 }
 0x152   : > { %v533_v31 = vpop.f32.mrf.mxu0  ;;  %v958_v51 = vld [vmem:[#allocation3 + $0x98] sm:$0xff] }
 0x153   : > { %656 = vst.msk [vmem:[#allocation3 + $0xa0] sm:$0xff] %vm635_vm0, %v533_v31  ;;  %v1012_v52 = vadd.f32 %v958_v51, %v834_v41  ;;  %v837_v34 = vpop.f32.mrf.mxu1  ;;  %v1245_v59 = vpop.f32.mrf.mxu2  ;;  %v1141_v31 = vld [vmem:[#allocation2 + $0x142] sm:$0xff]  ;;  %v1979_v51 = vld [vmem:[%s12748_s1 + $0x210] sm:$0xff] }
 0x154   : > { %v1368_v56 = vld [vmem:[#allocation3 + $0x90] sm:$0xff]  ;;  %1703 = vmatmul.f32.gmra.mxu3 %v1547_v54  ;;  %2006 = vmatpush.msrb.mxu0 %v1979_v51 }
 0x155   : > { %1066 = vst.msk [vmem:[#allocation3 + $0x98] sm:$0xff] %vm635_vm0, %v1012_v52  ;;  %v1422_v57 = vadd.f32 %v1368_v56, %v1242_v44  ;;  %580 = vmatmul.f32.gmra.mxu0 %v1545_v28  ;;  %v1551_v44 = vld [vmem:[#allocation2 + $0x150] sm:$0xff]  ;;  %v9538_v56 = vld [vmem:[%s9217_s23 + $0xe8] sm:$0xff] }
 0x156   : > { %v1778_v60 = vld [vmem:[#allocation3 + $0x88] sm:$0xff]  ;;  %884 = vmatmul.f32.gmra.mxu1 %v9451_v50  ;;  %380 = vst [vmem:[#allocation2 + $0x171] sm:$0xff] %v9538_v56 }
 0x157   : > { %1476 = vst.msk [vmem:[#allocation3 + $0x90] sm:$0xff] %vm635_vm0, %v1422_v57  ;;  %v1832_v61 = vadd.f32 %v1778_v60, %v1650_v37  ;;  %v1656_v55 = vpop.f32.mrf.mxu3 }
 0x158   : > { %1295 = vmatmul.f32.gmra.mxu2 %v1137_v63 }
 0x159   : > { %1886 = vst.msk [vmem:[#allocation3 + $0x88] sm:$0xff] %vm635_vm0, %v1832_v61 }
 0x15a   : > { %v536_v2 = vpop.f32.mrf.mxu0  ;;  %v959_v4 = vld [vmem:[#allocation3 + $0xa0] sm:$0xff] }
 0x15b   : > { %657 = vst.msk [vmem:[#allocation3 + $0xa8] sm:$0xff] %vm635_vm0, %v536_v2  ;;  %v1013_v50 = vadd.f32 %v959_v4, %v837_v34  ;;  %v840_v46 = vpop.f32.mrf.mxu1  ;;  %v1248_v10 = vpop.f32.mrf.mxu2  ;;  %v1142_v2 = vld [vmem:[#allocation2 + $0x14a] sm:$0xff] }
 0x15c   : > { %v1369_v7 = vld [vmem:[#allocation3 + $0x98] sm:$0xff]  ;;  %1706 = vmatmul.f32.gmra.mxu3 %v1548_v6 }
 0x15d   : > { %1067 = vst.msk [vmem:[#allocation3 + $0xa0] sm:$0xff] %vm635_vm0, %v1013_v50  ;;  %v1423_v9 = vadd.f32 %v1369_v7, %v1245_v59  ;;  %583 = vmatmul.f32.gmra.mxu0 %v1546_v42  ;;  %v9526_v42 = vld [vmem:[%s9217_s23 + $0xe0] sm:$0xff]  ;;  %v1552_v59 = vld [vmem:[#allocation2 + $0x158] sm:$0xff] }
 0x15e   : > { %v1779_v11 = vld [vmem:[#allocation3 + $0x90] sm:$0xff]  ;;  %887 = vmatmul.f32.gmra.mxu1 %v9460_v0  ;;  %379 = vst [vmem:[#allocation2 + $0x169] sm:$0xff] %v9526_v42 }
 0x15f   : > { %1477 = vst.msk [vmem:[#allocation3 + $0x98] sm:$0xff] %vm635_vm0, %v1423_v9  ;;  %v1833_v62 = vadd.f32 %v1779_v11, %v1653_v49  ;;  %v1659_v14 = vpop.f32.mrf.mxu3  ;;  %v1553_v9 = vld [vmem:[#allocation2 + $0x160] sm:$0xff] }
 0x160   : > { %1298 = vmatmul.f32.gmra.mxu2 %v1138_v13 }
 0x161   : > { %1887 = vst.msk [vmem:[#allocation3 + $0x90] sm:$0xff] %vm635_vm0, %v1833_v62 }
 0x162   : > { %v539_v15 = vpop.f32.mrf.mxu0  ;;  %v960_v58 = vld [vmem:[#allocation3 + $0xa8] sm:$0xff] }
 0x163   : > { %658 = vst.msk [vmem:[#allocation3 + $0xb0] sm:$0xff] %vm635_vm0, %v539_v15  ;;  %v1014_v17 = vadd.f32 %v960_v58, %v840_v46  ;;  %v843_v19 = vpop.f32.mrf.mxu1  ;;  %v1251_v22 = vpop.f32.mrf.mxu2  ;;  %v1143_v15 = vld [vmem:[#allocation2 + $0x152] sm:$0xff] }
 0x164   : > { %v1370_v21 = vld [vmem:[#allocation3 + $0xa0] sm:$0xff]  ;;  %1709 = vmatmul.f32.gmra.mxu3 %v1549_v20 }
 0x165   : > { %1068 = vst.msk [vmem:[#allocation3 + $0xa8] sm:$0xff] %vm635_vm0, %v1014_v17  ;;  %v1424_v0 = vadd.f32 %v1370_v21, %v1248_v10  ;;  %586 = vmatmul.f32.gmra.mxu0 %v1547_v54 }
 0x166   : > { %v1780_v3 = vld [vmem:[#allocation3 + $0x98] sm:$0xff]  ;;  %890 = vmatmul.f32.gmra.mxu1 %v9411_v53 }
 0x167   : > { %1478 = vst.msk [vmem:[#allocation3 + $0xa0] sm:$0xff] %vm635_vm0, %v1424_v0  ;;  %v1834_v24 = vadd.f32 %v1780_v3, %v1656_v55  ;;  %v1662_v26 = vpop.f32.mrf.mxu3 }
 0x168   : > { %1301 = vmatmul.f32.gmra.mxu2 %v1139_v25 }
 0x169   : > { %1888 = vst.msk [vmem:[#allocation3 + $0x98] sm:$0xff] %vm635_vm0, %v1834_v24 }
 0x16a   : > { %v542_v12 = vpop.f32.mrf.mxu0  ;;  %v961_v8 = vld [vmem:[#allocation3 + $0xb0] sm:$0xff] }
 0x16b   : > { %659 = vst.msk [vmem:[#allocation3 + $0xb8] sm:$0xff] %vm635_vm0, %v542_v12  ;;  %v1015_v28 = vadd.f32 %v961_v8, %v843_v19  ;;  %v846_v29 = vpop.f32.mrf.mxu1  ;;  %v1254_v35 = vpop.f32.mrf.mxu2  ;;  %v1144_v12 = vld [vmem:[#allocation2 + $0x15a] sm:$0xff] }
 0x16c   : > { %v1371_v32 = vld [vmem:[#allocation3 + $0xa8] sm:$0xff]  ;;  %1712 = vmatmul.f32.gmra.mxu3 %v1550_v30 }
 0x16d   : > { %1069 = vst.msk [vmem:[#allocation3 + $0xb0] sm:$0xff] %vm635_vm0, %v1015_v28  ;;  %v1425_v33 = vadd.f32 %v1371_v32, %v1251_v22  ;;  %589 = vmatmul.f32.gmra.mxu0 %v1548_v6  ;;  %v1554_v22 = vld [vmem:[#allocation2 + $0x168] sm:$0xff]  ;;  %v9564_v32 = vld [vmem:[%s9217_s23 + $0xf8] sm:$0xff] }
 0x16e   : > { %v1781_v36 = vld [vmem:[#allocation3 + $0xa0] sm:$0xff]  ;;  %893 = vmatmul.f32.gmra.mxu1 %v9477_v27  ;;  %385 = vst [vmem:[#allocation2 + $0x189] sm:$0xff] %v9564_v32 }
 0x16f   : > { %1479 = vst.msk [vmem:[#allocation3 + $0xa8] sm:$0xff] %vm635_vm0, %v1425_v33  ;;  %v1835_v37 = vadd.f32 %v1781_v36, %v1659_v14  ;;  %v1665_v18 = vpop.f32.mrf.mxu3  ;;  %v1978_v28 = vld [vmem:[%s12748_s1 + $0x208] sm:$0xff] }
 0x170   : > { %1304 = vmatmul.f32.gmra.mxu2 %v1140_v38  ;;  %2007 = vmatpush.msrb.mxu0 %v1978_v28  ;;  %v2400_v28 = vld [vmem:[%s12748_s1 + $0x2e0] sm:$0xff] }
 0x171   : > { %1889 = vst.msk [vmem:[#allocation3 + $0xa0] sm:$0xff] %vm635_vm0, %v1835_v37 }
 0x172   : > { %v545_v40 = vpop.f32.mrf.mxu0  ;;  %v962_v41 = vld [vmem:[#allocation3 + $0xb8] sm:$0xff] }
 0x173   : > { %660 = vst.msk [vmem:[#allocation3 + $0xc0] sm:$0xff] %vm635_vm0, %v545_v40  ;;  %v1016_v43 = vadd.f32 %v962_v41, %v846_v29  ;;  %v849_v23 = vpop.f32.mrf.mxu1  ;;  %v1257_v47 = vpop.f32.mrf.mxu2  ;;  %v1145_v41 = vld [vmem:[#allocation2 + $0x162] sm:$0xff] }
 0x174   : > { %v1372_v45 = vld [vmem:[#allocation3 + $0xb0] sm:$0xff]  ;;  %1715 = vmatmul.f32.gmra.mxu3 %v1551_v44 }
 0x175   : > { %1070 = vst.msk [vmem:[#allocation3 + $0xb8] sm:$0xff] %vm635_vm0, %v1016_v43  ;;  %v1426_v27 = vadd.f32 %v1372_v45, %v1254_v35  ;;  %592 = vmatmul.f32.gmra.mxu0 %v1549_v20  ;;  %v9552_v20 = vld [vmem:[%s9217_s23 + $0xf0] sm:$0xff]  ;;  %s8481_s23 = scalar_lea.hbm %s12754_s7, %s8993_s6 }
 0x176   : > { %v1782_v48 = vld [vmem:[#allocation3 + $0xa8] sm:$0xff]  ;;  %896 = vmatmul.f32.gmra.mxu1 %v9486_v39  ;;  %384 = vst [vmem:[#allocation2 + $0x181] sm:$0xff] %v9552_v20  ;;  %s8485_s18 = sshll.u32 %s8481_s23, 4  ;;  %s8486_s18 = int_to_ptr.hbm [resolvable:$true] %s8485_s18 }
 0x177   : > { %1480 = vst.msk [vmem:[#allocation3 + $0xb0] sm:$0xff] %vm635_vm0, %v1426_v27  ;;  %v1836_v49 = vadd.f32 %v1782_v48, %v1662_v26  ;;  %v1668_v52 = vpop.f32.mrf.mxu3  ;;  %v1555_v35 = vld [vmem:[#allocation2 + $0x170] sm:$0xff]  ;;  %s8876_s6 = sshra.s32 %s8486_s18, 4  ;;  %s8877_s6 = int_to_ptr.hbm [resolvable:$true] %s8876_s6 }
 0x178   : > { %1307 = vmatmul.f32.gmra.mxu2 %v1141_v31  ;;  %s8878_s21 = scalar_lea.hbm %s8877_s6, 1  ;;  %p8883_p0 = scmp.lt.s32.totalorder %s8877_s6, %s12754_s7 }
 0x179   : > { %1890 = vst.msk [vmem:[#allocation3 + $0xa8] sm:$0xff] %vm635_vm0, %v1836_v49  ;;  %p8879_p11 = scmp.ne.s32.totalorder %s8877_s6, %s8878_s21  ;;  %p8884_p1 = scmp.lt.s32.totalorder %s8882_s25, %s8878_s21 }
 0x17a   : > { %v548_v34 = vpop.f32.mrf.mxu0  ;;  %v963_v54 = vld [vmem:[#allocation3 + $0xc0] sm:$0xff] }
 0x17b   : > { %661 = vst.msk [vmem:[#allocation3 + $0xc8] sm:$0xff] %vm635_vm0, %v548_v34  ;;  %v1017_v39 = vadd.f32 %v963_v54, %v849_v23  ;;  %v852_v57 = vpop.f32.mrf.mxu1  ;;  %v1260_v63 = vpop.f32.mrf.mxu2  ;;  %v1146_v34 = vld [vmem:[#allocation2 + $0x16a] sm:$0xff]  ;;  %p8880_p12 = pnand %p8879_p11, %p9010_p5  ;;  %p8885_p2 = por %p8884_p1, %p8883_p0 }
 0x17c   : > { %v1373_v60 = vld [vmem:[#allocation3 + $0xb8] sm:$0xff]  ;;  %1718 = vmatmul.f32.gmra.mxu3 %v1552_v59 }
 0x17d   : > { %1071 = vst.msk [vmem:[#allocation3 + $0xc0] sm:$0xff] %vm635_vm0, %v1017_v39  ;;  %v1427_v61 = vadd.f32 %v1373_v60, %v1257_v47  ;;  %595 = vmatmul.f32.gmra.mxu0 %v1550_v30  ;;  %v1556_v47 = vld [vmem:[#allocation2 + $0x178] sm:$0xff]  ;;  %p8881_p13 = pneg %p8880_p12 }
 0x17e   : > { %v1783_v55 = vld [vmem:[#allocation3 + $0xb0] sm:$0xff]  ;;  %899 = vmatmul.f32.gmra.mxu1 %v9411_v53 }
 0x17f   : > { %1481 = vst.msk [vmem:[#allocation3 + $0xb8] sm:$0xff] %vm635_vm0, %v1427_v61  ;;  %v1837_v1 = vadd.f32 %v1783_v55, %v1665_v18  ;;  %v1671_v4 = vpop.f32.mrf.mxu3  ;;  %v1557_v61 = vld [vmem:[#allocation2 + $0x180] sm:$0xff]  ;;  %p8886_p3 = pnand %p8885_p2, %p8881_p13 }
 0x180   : > { %1310 = vmatmul.f32.gmra.mxu2 %v1142_v2 }
 0x181   : > { %1891 = vst.msk [vmem:[#allocation3 + $0xb0] sm:$0xff] %vm635_vm0, %v1837_v1 }
 0x182   : > { %v551_v50 = vpop.f32.mrf.mxu0  ;;  %v964_v46 = vld [vmem:[#allocation3 + $0xc8] sm:$0xff] }
 0x183   : > { %662 = vst.msk [vmem:[#allocation3 + $0xd0] sm:$0xff] %vm635_vm0, %v551_v50  ;;  %v1018_v6 = vadd.f32 %v964_v46, %v852_v57  ;;  %v855_v7 = vpop.f32.mrf.mxu1  ;;  %v1263_v62 = vpop.f32.mrf.mxu2  ;;  %v2403_v46 = vld [vmem:[%s12748_s1 + $0x2f8] sm:$0xff] }
 0x184   : > { %v1374_v10 = vld [vmem:[#allocation3 + $0xc0] sm:$0xff]  ;;  %1721 = vmatmul.f32.gmra.mxu3 %v1553_v9  ;;  %2404 = vmatpush.msrb.mxu1 %v2403_v46 }
 0x185   : > { %1072 = vst.msk [vmem:[#allocation3 + $0xc8] sm:$0xff] %vm635_vm0, %v1018_v6  ;;  %v1428_v11 = vadd.f32 %v1374_v10, %v1260_v63  ;;  %598 = vmatmul.f32.gmra.mxu0 %v1551_v44  ;;  %v9586_v10 = vld [vmem:[#allocation2 + $0x188] sm:$0xff] }
 0x186   : > { %v1784_v13 = vld [vmem:[#allocation3 + $0xb8] sm:$0xff]  ;;  %902 = vmatmul.f32.gmra.mxu1 %v9503_v5 }
 0x187   : > { %1482 = vst.msk [vmem:[#allocation3 + $0xc0] sm:$0xff] %vm635_vm0, %v1428_v11  ;;  %v1838_v14 = vadd.f32 %v1784_v13, %v1668_v52  ;;  %v1674_v58 = vpop.f32.mrf.mxu3 }
 0x188   : > { %1313 = vmatmul.f32.gmra.mxu2 %v1143_v15  ;;  %v2814_v15 = vld [vmem:[%s12748_s1 + $0x378] sm:$0xff] }
 0x189   : > { %1892 = vst.msk [vmem:[#allocation3 + $0xb8] sm:$0xff] %vm635_vm0, %v1838_v14  ;;  %v1977_v14 = vld [vmem:[%s12748_s1 + $0x200] sm:$0xff]  ;;  %2815 = vmatpush.msrb.mxu2 %v2814_v15 }
 0x18a   : > { %v554_v17 = vpop.f32.mrf.mxu0  ;;  %v965_v19 = vld [vmem:[#allocation3 + $0xd0] sm:$0xff]  ;;  %2008 = vmatpush.msrb.mxu0 %v1977_v14  ;;  %v2805_v14 = vld [vmem:[%s12748_s1 + $0x330] sm:$0xff] }
 0x18b   : > { %663 = vst.msk [vmem:[#allocation3 + $0xd8] sm:$0xff] %vm635_vm0, %v554_v17  ;;  %v1019_v21 = vadd.f32 %v965_v19, %v855_v7  ;;  %v858_v0 = vpop.f32.mrf.mxu1  ;;  %v1266_v24 = vpop.f32.mrf.mxu2  ;;  %v1148_v19 = vld [vmem:[#allocation2 + $0x17a] sm:$0xff] }
 0x18c   : > { %v1375_v3 = vld [vmem:[#allocation3 + $0xc8] sm:$0xff]  ;;  %1724 = vmatmul.f32.gmra.mxu3 %v1554_v22 }
 0x18d   : > { %1073 = vst.msk [vmem:[#allocation3 + $0xd0] sm:$0xff] %vm635_vm0, %v1019_v21  ;;  %v1429_v5 = vadd.f32 %v1375_v3, %v1263_v62  ;;  %601 = vmatmul.f32.gmra.mxu0 %v1552_v59 }
 0x18e   : > { %v1785_v25 = vld [vmem:[#allocation3 + $0xc0] sm:$0xff]  ;;  %905 = vmatmul.f32.gmra.mxu1 %v9512_v16 }
 0x18f   : > { %1483 = vst.msk [vmem:[#allocation3 + $0xc8] sm:$0xff] %vm635_vm0, %v1429_v5  ;;  %v1839_v26 = vadd.f32 %v1785_v25, %v1671_v4  ;;  %v1677_v8 = vpop.f32.mrf.mxu3  ;;  %v1147_v4 = vld [vmem:[#allocation2 + $0x172] sm:$0xff]  ;;  %v2401_v25 = vld [vmem:[%s12748_s1 + $0x2e8] sm:$0xff] }
 0x190   : > { %1316 = vmatmul.f32.gmra.mxu2 %v1144_v12 }
 0x191   : > { %1893 = vst.msk [vmem:[#allocation3 + $0xc0] sm:$0xff] %vm635_vm0, %v1839_v26 }
 0x192   : > { %v557_v29 = vpop.f32.mrf.mxu0  ;;  %v966_v30 = vld [vmem:[#allocation3 + $0xd8] sm:$0xff] }
 0x193   : > { %664 = vst.msk [vmem:[#allocation3 + $0xe0] sm:$0xff] %vm635_vm0, %v557_v29  ;;  %v1020_v16 = vadd.f32 %v966_v30, %v858_v0  ;;  %v861_v33 = vpop.f32.mrf.mxu1  ;;  %v1269_v38 = vpop.f32.mrf.mxu2  ;;  %v2402_v0 = vld [vmem:[%s12748_s1 + $0x2f0] sm:$0xff] }
 0x194   : > { %v1376_v36 = vld [vmem:[#allocation3 + $0xd0] sm:$0xff]  ;;  %1727 = vmatmul.f32.gmra.mxu3 %v1555_v35  ;;  %2405 = vmatpush.msrb.mxu1 %v2402_v0  ;;  %v2813_v29 = vld [vmem:[%s12748_s1 + $0x370] sm:$0xff] }
 0x195   : > { %1074 = vst.msk [vmem:[#allocation3 + $0xd8] sm:$0xff] %vm635_vm0, %v1020_v16  ;;  %v1430_v37 = vadd.f32 %v1376_v36, %v1266_v24  ;;  %604 = vmatmul.f32.gmra.mxu0 %v1553_v9  ;;  %v9603_v24 = vld [vmem:[#allocation2 + $0x190] sm:$0xff]  ;;  %v1149_v16 = vld [vmem:[#allocation2 + $0x182] sm:$0xff]  ;;  %2816 = vmatpush.msrb.mxu2 %v2813_v29  ;;  %v2399_v36 = vld [vmem:[%s12748_s1 + $0x2d8] sm:$0xff] }
 0x196   : > { %v1786_v18 = vld [vmem:[#allocation3 + $0xc8] sm:$0xff]  ;;  %908 = vmatmul.f32.gmra.mxu1 %v9411_v53  ;;  %v2389_v29 = vld [vmem:[%s12748_s1 + $0x288] sm:$0xff] }
 0x197   : > { %1484 = vst.msk [vmem:[#allocation3 + $0xd0] sm:$0xff] %vm635_vm0, %v1430_v37  ;;  %v1840_v40 = vadd.f32 %v1786_v18, %v1674_v58  ;;  %v1680_v43 = vpop.f32.mrf.mxu3  ;;  %2406 = vmatpush.msrb.mxu1 %v2401_v25  ;;  %v2811_v18 = vld [vmem:[%s12748_s1 + $0x360] sm:$0xff]  ;;  %v3220_v0 = vld [vmem:[%s12748_s1 + $0x3d0] sm:$0xff] }
 0x198   : > { %1319 = vmatmul.f32.gmra.mxu2 %v1145_v41 }
 0x199   : > { %1894 = vst.msk [vmem:[#allocation3 + $0xc8] sm:$0xff] %vm635_vm0, %v1840_v40  ;;  %2407 = vmatpush.msrb.mxu1 %v2400_v28  ;;  %v2803_v28 = vld [vmem:[%s12748_s1 + $0x320] sm:$0xff] }
 0x19a   : > { %v560_v23 = vpop.f32.mrf.mxu0  ;;  %v967_v44 = vld [vmem:[#allocation3 + $0xe0] sm:$0xff] }
 0x19b   : > { %665 = vst.msk [vmem:[#allocation3 + $0xe8] sm:$0xff] %vm635_vm0, %v560_v23  ;;  %v1021_v45 = vadd.f32 %v967_v44, %v861_v33  ;;  %v864_v27 = vpop.f32.mrf.mxu1  ;;  %v1272_v31 = vpop.f32.mrf.mxu2  ;;  %2408 = vmatpush.msrb.mxu1 %v2399_v36  ;;  %v9637_v44 = vld [vmem:[#allocation2 + $0x198] sm:$0xff] }
 0x19c   : > { %v1377_v48 = vld [vmem:[#allocation3 + $0xd8] sm:$0xff]  ;;  %1730 = vmatmul.f32.gmra.mxu3 %v1556_v47  ;;  %v2802_v36 = vld [vmem:[%s12748_s1 + $0x318] sm:$0xff] }
 0x19d   : > { %1075 = vst.msk [vmem:[#allocation3 + $0xe0] sm:$0xff] %vm635_vm0, %v1021_v45  ;;  %v1431_v49 = vadd.f32 %v1377_v48, %v1269_v38  ;;  %607 = vmatmul.f32.gmra.mxu0 %v1554_v22  ;;  %v2398_v38 = vld [vmem:[%s12748_s1 + $0x2d0] sm:$0xff]  ;;  %v2397_v45 = vld [vmem:[%s12748_s1 + $0x2c8] sm:$0xff] }
 0x19e   : > { %v1787_v51 = vld [vmem:[#allocation3 + $0xd0] sm:$0xff]  ;;  %911 = vmatmul.f32.gmra.mxu1 %v9526_v42 }
 0x19f   : > { %1485 = vst.msk [vmem:[#allocation3 + $0xd8] sm:$0xff] %vm635_vm0, %v1431_v49  ;;  %v1841_v52 = vadd.f32 %v1787_v51, %v1677_v8  ;;  %v1683_v54 = vpop.f32.mrf.mxu3  ;;  %2409 = vmatpush.msrb.mxu1 %v2398_v38  ;;  %v1152_v38 = vld [vmem:[#allocation2 + $0x19a] sm:$0xff] }
 0x1a0   : > { %1322 = vmatmul.f32.gmra.mxu2 %v1146_v34 }
 0x1a1   : > { %1895 = vst.msk [vmem:[#allocation3 + $0xd0] sm:$0xff] %vm635_vm0, %v1841_v52  ;;  %2410 = vmatpush.msrb.mxu1 %v2397_v45  ;;  %v2809_v52 = vld [vmem:[%s12748_s1 + $0x350] sm:$0xff]  ;;  %v2800_v45 = vld [vmem:[%s12748_s1 + $0x308] sm:$0xff] }
 0x1a2   : > { %v563_v39 = vpop.f32.mrf.mxu0  ;;  %v968_v57 = vld [vmem:[#allocation3 + $0xe8] sm:$0xff] }
 0x1a3   : > { %666 = vst.msk [vmem:[#allocation3 + $0xf0] sm:$0xff] %vm635_vm0, %v563_v39  ;;  %v1022_v59 = vadd.f32 %v968_v57, %v864_v27  ;;  %v867_v60 = vpop.f32.mrf.mxu1  ;;  %v1275_v55 = vpop.f32.mrf.mxu2  ;;  %v2395_v39 = vld [vmem:[%s12748_s1 + $0x2b8] sm:$0xff]  ;;  %v2808_v57 = vld [vmem:[%s12748_s1 + $0x348] sm:$0xff] }
 0x1a4   : > { %v1378_v63 = vld [vmem:[#allocation3 + $0xe0] sm:$0xff]  ;;  %1733 = vmatmul.f32.gmra.mxu3 %v1557_v61 }
 0x1a5   : > { %1076 = vst.msk [vmem:[#allocation3 + $0xe8] sm:$0xff] %vm635_vm0, %v1022_v59  ;;  %v1432_v42 = vadd.f32 %v1378_v63, %v1272_v31  ;;  %610 = vmatmul.f32.gmra.mxu0 %v1555_v35  ;;  %v3225_v35 = vld [vmem:[%s12748_s1 + $0x3f8] sm:$0xff]  ;;  %v2396_v31 = vld [vmem:[%s12748_s1 + $0x2c0] sm:$0xff] }
 0x1a6   : > { %v1788_v1 = vld [vmem:[#allocation3 + $0xd8] sm:$0xff]  ;;  %914 = vmatmul.f32.gmra.mxu1 %v9538_v56  ;;  %3226 = vmatpush.msrb.mxu3 %v3225_v35 }
 0x1a7   : > { %1486 = vst.msk [vmem:[#allocation3 + $0xe0] sm:$0xff] %vm635_vm0, %v1432_v42  ;;  %v1842_v2 = vadd.f32 %v1788_v1, %v1680_v43  ;;  %v1686_v50 = vpop.f32.mrf.mxu3  ;;  %2411 = vmatpush.msrb.mxu1 %v2396_v31  ;;  %v3215_v31 = vld [vmem:[%s12748_s1 + $0x3a8] sm:$0xff] }
 0x1a8   : > { %1325 = vmatmul.f32.gmra.mxu2 %v1147_v4  ;;  %v9678_v4 = vld [vmem:[#allocation2 + $0x1a0] sm:$0xff] }
 0x1a9   : > { %1896 = vst.msk [vmem:[#allocation3 + $0xd8] sm:$0xff] %vm635_vm0, %v1842_v2  ;;  %2412 = vmatpush.msrb.mxu1 %v2395_v39 }
 0x1aa   : > { %v566_v6 = vpop.f32.mrf.mxu0  ;;  %v969_v7 = vld [vmem:[#allocation3 + $0xf0] sm:$0xff] }
 0x1ab   : > { %667 = vst.msk [vmem:[#allocation3 + $0xf8] sm:$0xff] %vm635_vm0, %v566_v6  ;;  %v1023_v9 = vadd.f32 %v969_v7, %v867_v60  ;;  %v870_v56 = vpop.f32.mrf.mxu1  ;;  %v1278_v13 = vpop.f32.mrf.mxu2  ;;  %v2394_v60 = vld [vmem:[%s12748_s1 + $0x2b0] sm:$0xff]  ;;  %v2393_v6 = vld [vmem:[%s12748_s1 + $0x2a8] sm:$0xff]  ;;  %v2806_v7 = vld [vmem:[%s12748_s1 + $0x338] sm:$0xff] }
 0x1ac   : > { %v1379_v11 = vld [vmem:[#allocation3 + $0xe8] sm:$0xff]  ;;  %1736 = vmatmul.f32.gmra.mxu3 %v9586_v10  ;;  %2413 = vmatpush.msrb.mxu1 %v2394_v60 }
 0x1ad   : > { %1077 = vst.msk [vmem:[#allocation3 + $0xf0] sm:$0xff] %vm635_vm0, %v1023_v9  ;;  %v1433_v62 = vadd.f32 %v1379_v11, %v1275_v55  ;;  %613 = vmatmul.f32.gmra.mxu0 %v1556_v47  ;;  %v2810_v47 = vld [vmem:[%s12748_s1 + $0x358] sm:$0xff]  ;;  %v2807_v55 = vld [vmem:[%s12748_s1 + $0x340] sm:$0xff] }
 0x1ae   : > { %v1789_v58 = vld [vmem:[#allocation3 + $0xe0] sm:$0xff]  ;;  %917 = vmatmul.f32.gmra.mxu1 %v9411_v53 }
 0x1af   : > { %1487 = vst.msk [vmem:[#allocation3 + $0xe8] sm:$0xff] %vm635_vm0, %v1433_v62  ;;  %v1843_v17 = vadd.f32 %v1789_v58, %v1683_v54  ;;  %v1689_v21 = vpop.f32.mrf.mxu3  ;;  %v1150_v54 = vld [vmem:[#allocation2 + $0x18a] sm:$0xff]  ;;  %v9694_v62 = vld [vmem:[#allocation2] sm:$0xff]  ;;  %v1151_v58 = vld [vmem:[#allocation2 + $0x192] sm:$0xff]  ;;  %2414 = vmatpush.msrb.mxu1 %v2393_v6 }
 0x1b0   : > { %1328 = vmatmul.f32.gmra.mxu2 %v1148_v19  ;;  %v2391_v19 = vld [vmem:[%s12748_s1 + $0x298] sm:$0xff] }
 0x1b1   : > { %1897 = vst.msk [vmem:[#allocation3 + $0xe0] sm:$0xff] %vm635_vm0, %v1843_v17  ;;  %v3636_v17 = vld [vmem:[%s12748_s1 + $0x478] sm:$0xff] }
 0x1b2   : > { %v569_v22 = vpop.f32.mrf.mxu0  ;;  %v970_v3 = vld [vmem:[#allocation3 + $0xf8] sm:$0xff]  ;;  %3637 = vmatpush.msra.mxu0 %v3636_v17 }
 0x1b3   : > { %668 = vst.msk [vmem:[#allocation3 + $0x100] sm:$0xff] %vm635_vm0, %v569_v22  ;;  %v1024_v53 = vadd.f32 %v970_v3, %v870_v56  ;;  %v873_v5 = vpop.f32.mrf.mxu1  ;;  %v1281_v8 = vpop.f32.mrf.mxu2  ;;  %v3219_v3 = vld [vmem:[%s12748_s1 + $0x3c8] sm:$0xff] }
 0x1b4   : > { %v1380_v26 = vld [vmem:[#allocation3 + $0xf0] sm:$0xff]  ;;  %1739 = vmatmul.f32.gmra.mxu3 %v9603_v24 }
 0x1b5   : > { %1078 = vst.msk [vmem:[#allocation3 + $0xf8] sm:$0xff] %vm635_vm0, %v1024_v53  ;;  %v1434_v12 = vadd.f32 %v1380_v26, %v1278_v13  ;;  %616 = vmatmul.f32.gmra.mxu0 %v1557_v61  ;;  %v3223_v61 = vld [vmem:[%s12748_s1 + $0x3e8] sm:$0xff]  ;;  %v2392_v13 = vld [vmem:[%s12748_s1 + $0x2a0] sm:$0xff] }
 0x1b6   : > { %v1790_v30 = vld [vmem:[#allocation3 + $0xe8] sm:$0xff]  ;;  %920 = vmatmul.f32.gmra.mxu1 %v9552_v20  ;;  %v2812_v20 = vld [vmem:[%s12748_s1 + $0x368] sm:$0xff] }
 0x1b7   : > { %1488 = vst.msk [vmem:[#allocation3 + $0xf0] sm:$0xff] %vm635_vm0, %v1434_v12  ;;  %v1844_v33 = vadd.f32 %v1790_v30, %v1686_v50  ;;  %v9628_v37 = vpop.f32.mrf.mxu3  ;;  %2817 = vmatpush.msrb.mxu2 %v2812_v20  ;;  %v3222_v50 = vld [vmem:[%s12748_s1 + $0x3e0] sm:$0xff]  ;;  %2415 = vmatpush.msrb.mxu1 %v2392_v13  ;;  %v9728_v12 = vld [vmem:[#allocation2 + $0x1a8] sm:$0xff] }
 0x1b8   : > { %1331 = vmatmul.f32.gmra.mxu2 %v1149_v16  ;;  %v2388_v20 = vld [vmem:[%s12748_s1 + $0x280] sm:$0xff] }
 0x1b9   : > { %1898 = vst.msk [vmem:[#allocation3 + $0xe8] sm:$0xff] %vm635_vm0, %v1844_v33  ;;  %2818 = vmatpush.msrb.mxu2 %v2811_v18  ;;  %2416 = vmatpush.msrb.mxu1 %v2391_v19  ;;  %v3218_v33 = vld [vmem:[%s12748_s1 + $0x3c0] sm:$0xff]  ;;  %v3217_v18 = vld [vmem:[%s12748_s1 + $0x3b8] sm:$0xff] }
 0x1ba   : > { %v572_v40 = vpop.f32.mrf.mxu0  ;;  %v971_v41 = vld [vmem:[#allocation3 + $0x100] sm:$0xff]  ;;  %v2334_v19 = vld [vmem:[#allocation2 + $0x1a] sm:$0xff] }
 0x1bb   : > { %669 = vst.msk [vmem:[#allocation3 + $0x108] sm:$0xff] %vm635_vm0, %v572_v40  ;;  %v1025_v43 = vadd.f32 %v971_v41, %v873_v5  ;;  %v876_v23 = vpop.f32.mrf.mxu1  ;;  %v1284_v49 = vpop.f32.mrf.mxu2  ;;  %2819 = vmatpush.msrb.mxu2 %v2810_v47  ;;  %v2801_v40 = vld [vmem:[%s12748_s1 + $0x310] sm:$0xff] }
 0x1bc   : > { %v1381_v27 = vld [vmem:[#allocation3 + $0xf8] sm:$0xff]  ;;  %1742 = vmatmul.f32.gmra.mxu3 %v9637_v44 }
 0x1bd   : > { %1079 = vst.msk [vmem:[#allocation3 + $0x100] sm:$0xff] %vm635_vm0, %v1025_v43  ;;  %v1435_v48 = vadd.f32 %v1381_v27, %v1281_v8  ;;  %619 = vmatmul.f32.gmra.mxu0 %v9586_v10  ;;  %2820 = vmatpush.msrb.mxu2 %v2809_v52  ;;  %v3221_v10 = vld [vmem:[%s12748_s1 + $0x3d8] sm:$0xff]  ;;  %v3216_v43 = vld [vmem:[%s12748_s1 + $0x3b0] sm:$0xff] }
 0x1be   : > { %v1791_v51 = vld [vmem:[#allocation3 + $0xf0] sm:$0xff]  ;;  %923 = vmatmul.f32.gmra.mxu1 %v9564_v32  ;;  %v3224_v32 = vld [vmem:[%s12748_s1 + $0x3f0] sm:$0xff] }
 0x1bf   : > { %1489 = vst.msk [vmem:[#allocation3 + $0xf8] sm:$0xff] %vm635_vm0, %v1435_v48  ;;  %v1845_v34 = vadd.f32 %v1791_v51, %v1689_v21  ;;  %3227 = vmatpush.msrb.mxu3 %v3224_v32  ;;  %v9666_v59 = vpop.f32.mrf.mxu3  ;;  %2821 = vmatpush.msrb.mxu2 %v2808_v57  ;;  %v2804_v21 = vld [vmem:[%s12748_s1 + $0x328] sm:$0xff]  ;;  %v3213_v57 = vld [vmem:[%s12748_s1 + $0x398] sm:$0xff] }
 0x1c0   : > { %1334 = vmatmul.f32.gmra.mxu2 %v1150_v54  ;;  %v3214_v54 = vld [vmem:[%s12748_s1 + $0x3a0] sm:$0xff] }
 0x1c1   : > { %1899 = vst.msk [vmem:[#allocation3 + $0xf0] sm:$0xff] %vm635_vm0, %v1845_v34  ;;  %3228 = vmatpush.msrb.mxu3 %v3223_v61  ;;  %2822 = vmatpush.msrb.mxu2 %v2807_v55  ;;  %v1153_v32 = vld [vmem:[#allocation2 + $0x1a2] sm:$0xff] }
 0x1c2   : > { %v575_v63 = vpop.f32.mrf.mxu0  ;;  %v972_v42 = vld [vmem:[#allocation3 + $0x108] sm:$0xff] }
 0x1c3   : > { %670 = vst.msk [vmem:[#allocation3 + $0x110] sm:$0xff] %vm635_vm0, %v575_v63  ;;  %v1026_v1 = vadd.f32 %v972_v42, %v876_v23  ;;  %v879_v2 = vpop.f32.mrf.mxu1  ;;  %3229 = vmatpush.msrb.mxu3 %v3222_v50  ;;  %v1287_v56 = vpop.f32.mrf.mxu2  ;;  %2823 = vmatpush.msrb.mxu2 %v2806_v7  ;;  %v3212_v63 = vld [vmem:[%s12748_s1 + $0x390] sm:$0xff]  ;;  %v3210_v7 = vld [vmem:[%s12748_s1 + $0x380] sm:$0xff] }
 0x1c4   : > { %v1382_v46 = vld [vmem:[#allocation3 + $0x100] sm:$0xff]  ;;  %1745 = vmatmul.f32.gmra.mxu3 %v9678_v4 }
 0x1c5   : > { %1080 = vst.msk [vmem:[#allocation3 + $0x108] sm:$0xff] %vm635_vm0, %v1026_v1  ;;  %v1436_v9 = vadd.f32 %v1382_v46, %v1284_v49  ;;  %622 = vmatmul.f32.gmra.mxu0 %v9603_v24  ;;  %3230 = vmatpush.msrb.mxu3 %v3221_v10  ;;  %v2390_v24 = vld [vmem:[%s12748_s1 + $0x290] sm:$0xff]  ;;  %v2799_v49 = vld [vmem:[%s12748_s1 + $0x300] sm:$0xff] }
 0x1c6   : > { %v1792_v11 = vld [vmem:[#allocation3 + $0xf8] sm:$0xff]  ;;  %926 = vmatmul.f32.gmra.mxu1 %v9694_v62  ;;  %2824 = vmatpush.msrb.mxu2 %v2805_v14  ;;  %v743_v1 = vld [vmem:[#allocation2 + $0x1a9] sm:$0xff] }
 0x1c7   : > { %1490 = vst.msk [vmem:[#allocation3 + $0x100] sm:$0xff] %vm635_vm0, %v1436_v9  ;;  %v1846_v15 = vadd.f32 %v1792_v11, %v9628_v37  ;;  %v9719_v22 = vpop.f32.mrf.mxu3  ;;  %3231 = vmatpush.msrb.mxu3 %v3220_v0  ;;  %2417 = vmatpush.msrb.mxu1 %v2390_v24  ;;  %v3635_v11 = vld [vmem:[%s12748_s1 + $0x470] sm:$0xff] }
 0x1c8   : > { %1337 = vmatmul.f32.gmra.mxu2 %v1151_v58  ;;  %3638 = vmatpush.msra.mxu0 %v3635_v11 }
 0x1c9   : > { %1900 = vst.msk [vmem:[#allocation3 + $0xf8] sm:$0xff] %vm635_vm0, %v1846_v15  ;;  %2825 = vmatpush.msrb.mxu2 %v2804_v21  ;;  %3232 = vmatpush.msrb.mxu3 %v3219_v3  ;;  %v1923_v15 = vld [vmem:[#allocation2 + $0x19] sm:$0xff] }
 0x1ca   : > { %v578_v53 = vpop.f32.mrf.mxu0  ;;  %v973_v5 = vld [vmem:[#allocation3 + $0x110] sm:$0xff]  ;;  %2418 = vmatpush.msrb.mxu1 %v2389_v29  ;;  %v2335_v29 = vld [vmem:[#allocation2 + $0x22] sm:$0xff] }
 0x1cb   : > { %671 = vst.msk [vmem:[#allocation3 + $0x118] sm:$0xff] %vm635_vm0, %v578_v53  ;;  %v1027_v25 = vadd.f32 %v973_v5, %v879_v2  ;;  %v882_v26 = vpop.f32.mrf.mxu1  ;;  %v1290_v16 = vpop.f32.mrf.mxu2  ;;  %2826 = vmatpush.msrb.mxu2 %v2803_v28  ;;  %3233 = vmatpush.msrb.mxu3 %v3218_v33  ;;  %v2745_v5 = vld [vmem:[#allocation2 + $0x30] sm:$0xff] }
 0x1cc   : > { %v1383_v8 = vld [vmem:[#allocation3 + $0x108] sm:$0xff]  ;;  %1748 = vmatmul.f32.gmra.mxu3 %v9728_v12  ;;  %2419 = vmatpush.msrb.mxu1 %v2388_v20 }
 0x1cd   : > { %1081 = vst.msk [vmem:[#allocation3 + $0x110] sm:$0xff] %vm635_vm0, %v1027_v25  ;;  %v1437_v30 = vadd.f32 %v1383_v8, %v1287_v56  ;;  %625 = vmatmul.f32.gmra.mxu0 %v9637_v44  ;;  %2827 = vmatpush.msrb.mxu2 %v2802_v36  ;;  %v1154_v56 = vld [vmem:[#allocation2 + $0x1aa] sm:$0xff] }
 0x1ce   : > { %v1793_v35 = vld [vmem:[#allocation3 + $0x100] sm:$0xff]  ;;  %929 = vmatmul.f32.gmra.mxu1 %v9694_v62  ;;  %3234 = vmatpush.msrb.mxu3 %v3217_v18 }
 0x1cf   : > { %1491 = vst.msk [vmem:[#allocation3 + $0x108] sm:$0xff] %vm635_vm0, %v1437_v30  ;;  %v1847_v37 = vadd.f32 %v1793_v35, %v9666_v59  ;;  %v1701_v41 = vpop.f32.mrf.mxu3  ;;  %2828 = vmatpush.msrb.mxu2 %v2801_v40  ;;  %v1926_v30 = vld [vmem:[#allocation2 + $0x31] sm:$0xff] }
 0x1d0   : > { %1340 = vmatmul.f32.gmra.mxu2 %v1152_v38  ;;  %3235 = vmatpush.msrb.mxu3 %v3216_v43 }
 0x1d1   : > { %1901 = vst.msk [vmem:[#allocation3 + $0x100] sm:$0xff] %vm635_vm0, %v1847_v37  ;;  %2829 = vmatpush.msrb.mxu2 %v2800_v45  ;;  %v2746_v37 = vld [vmem:[#allocation2 + $0x38] sm:$0xff] }
 0x1d2   : > { %v581_v23 = vpop.f32.mrf.mxu0  ;;  %v974_v44 = vld [vmem:[#allocation3 + $0x118] sm:$0xff]  ;;  %3236 = vmatpush.msrb.mxu3 %v3215_v31 }
 0x1d3   : > { %672 = vst.msk [vmem:[#allocation3 + $0x120] sm:$0xff] %vm635_vm0, %v581_v23  ;;  %v1028_v27 = vadd.f32 %v974_v44, %v882_v26  ;;  %v885_v47 = vpop.f32.mrf.mxu1  ;;  %v1293_v52 = vpop.f32.mrf.mxu2  ;;  %2830 = vmatpush.msrb.mxu2 %v2799_v49  ;;  %v2336_v23 = vld [vmem:[#allocation2 + $0x2a] sm:$0xff]  ;;  %v1927_v44 = vld [vmem:[#allocation2 + $0x39] sm:$0xff] }
 0x1d4   : > { %v1384_v48 = vld [vmem:[#allocation3 + $0x110] sm:$0xff]  ;;  %1751 = vmatmul.f32.gmra.mxu3 %v9694_v62  ;;  %v2747_v31 = vld [vmem:[#allocation2 + $0x40] sm:$0xff] }
 0x1d5   : > { %1082 = vst.msk [vmem:[#allocation3 + $0x118] sm:$0xff] %vm635_vm0, %v1028_v27  ;;  %v1438_v51 = vadd.f32 %v1384_v48, %v1290_v16  ;;  %628 = vmatmul.f32.gmra.mxu0 %v9678_v4  ;;  %3237 = vmatpush.msrb.mxu3 %v3214_v54  ;;  %v3211_v4 = vld [vmem:[%s12748_s1 + $0x388] sm:$0xff] }
 0x1d6   : > { %v1794_v34 = vld [vmem:[#allocation3 + $0x108] sm:$0xff]  ;;  %932 = vmatmul.f32.gmra.mxu1 %v9694_v62 }
 0x1d7   : > { %1492 = vst.msk [vmem:[#allocation3 + $0x110] sm:$0xff] %vm635_vm0, %v1438_v51  ;;  %v1848_v39 = vadd.f32 %v1794_v34, %v9719_v22  ;;  %v1704_v59 = vpop.f32.mrf.mxu3  ;;  %3238 = vmatpush.msrb.mxu3 %v3213_v57 }
 0x1d8   : > { %1343 = vmatmul.f32.gmra.mxu2 %v1153_v32  ;;  %v2337_v32 = vld [vmem:[#allocation2 + $0x32] sm:$0xff] }
 0x1d9   : > { %1902 = vst.msk [vmem:[#allocation3 + $0x108] sm:$0xff] %vm635_vm0, %v1848_v39  ;;  %3239 = vmatpush.msrb.mxu3 %v3212_v63 }
 0x1da   : > { %v584_v60 = vpop.f32.mrf.mxu0  ;;  %v975_v61 = vld [vmem:[#allocation3 + $0x120] sm:$0xff] }
 0x1db   : > { %673 = vst.msk [vmem:[#allocation3 + $0x128] sm:$0xff] %vm635_vm0, %v584_v60  ;;  %v1029_v42 = vadd.f32 %v975_v61, %v885_v47  ;;  %v888_v55 = vpop.f32.mrf.mxu1  ;;  %v1296_v46 = vpop.f32.mrf.mxu2  ;;  %3240 = vmatpush.msrb.mxu3 %v3211_v4  ;;  %v3634_v61 = vld [vmem:[%s12748_s1 + $0x468] sm:$0xff] }
 0x1dc   : > { %v1385_v2 = vld [vmem:[#allocation3 + $0x118] sm:$0xff]  ;;  %1754 = vmatmul.f32.gmra.mxu3 %v9694_v62  ;;  %3639 = vmatpush.msra.mxu0 %v3634_v61 }
 0x1dd   : > { %1083 = vst.msk [vmem:[#allocation3 + $0x120] sm:$0xff] %vm635_vm0, %v1029_v42  ;;  %v1439_v50 = vadd.f32 %v1385_v2, %v1293_v52  ;;  %631 = vmatmul.f32.gmra.mxu0 %v9728_v12  ;;  %3241 = vmatpush.msrb.mxu3 %v3210_v7  ;;  %v1924_v12 = vld [vmem:[#allocation2 + $0x21] sm:$0xff]  ;;  %v1929_v7 = vld [vmem:[#allocation2 + $0x49] sm:$0xff] }
 0x1de   : > { %v1795_v6 = vld [vmem:[#allocation3 + $0x110] sm:$0xff]  ;;  %935 = vmatmul.f32.gmra.mxu1 %v743_v1 }
 0x1df   : > { %1493 = vst.msk [vmem:[#allocation3 + $0x118] sm:$0xff] %vm635_vm0, %v1439_v50  ;;  %v1849_v9 = vadd.f32 %v1795_v6, %v1701_v41  ;;  %v1707_v10 = vpop.f32.mrf.mxu3  ;;  %v2338_v6 = vld [vmem:[#allocation2 + $0x3a] sm:$0xff] }
 0x1e0   : > { %1346 = vmatmul.f32.gmra.mxu2 %v1154_v56 }
 0x1e1   : > { %1903 = vst.msk [vmem:[#allocation3 + $0x110] sm:$0xff] %vm635_vm0, %v1849_v9 }
 0x1e2   : > { %v587_v13 = vpop.f32.mrf.mxu0  ;;  %v976_v14 = vld [vmem:[#allocation3 + $0x128] sm:$0xff] }
 0x1e3   : > { %674 = vst.msk [vmem:[#allocation3 + $0x130] sm:$0xff] %vm635_vm0, %v587_v13  ;;  %v1030_v58 = vadd.f32 %v976_v14, %v888_v55  ;;  %v891_v17 = vpop.f32.mrf.mxu1  ;;  %v1299_v22 = vpop.f32.mrf.mxu2  ;;  %v2748_v55 = vld [vmem:[#allocation2 + $0x48] sm:$0xff]  ;;  %v2749_v14 = vld [vmem:[#allocation2 + $0x50] sm:$0xff] }
 0x1e4   : > { %v1386_v21 = vld [vmem:[#allocation3 + $0x120] sm:$0xff]  ;;  %1757 = vmatmul.f32.gmra.mxu3 %v9694_v62 }
 0x1e5   : > { %1084 = vst.msk [vmem:[#allocation3 + $0x128] sm:$0xff] %vm635_vm0, %v1030_v58  ;;  %v1440_v0 = vadd.f32 %v1386_v21, %v1296_v46  ;;  %2009 = vmatmul.f32.vlgmr.msrb.gmra.mxu0 %v1923_v15 }
 0x1e6   : > { %v1796_v3 = vld [vmem:[#allocation3 + $0x118] sm:$0xff]  ;;  %2420 = vmatmul.f32.vlgmr.msrb.gmra.mxu1 %v2334_v19 }
 0x1e7   : > { %1494 = vst.msk [vmem:[#allocation3 + $0x120] sm:$0xff] %vm635_vm0, %v1440_v0  ;;  %v1850_v53 = vadd.f32 %v1796_v3, %v1704_v59  ;;  %v1710_v24 = vpop.f32.mrf.mxu3  ;;  %v2339_v0 = vld [vmem:[#allocation2 + $0x42] sm:$0xff] }
 0x1e8   : > { %2831 = vmatmul.f32.vlgmr.msrb.gmra.mxu2 %v2745_v5 }
 0x1e9   : > { %1904 = vst.msk [vmem:[#allocation3 + $0x118] sm:$0xff] %vm635_vm0, %v1850_v53 }
 0x1ea   : > { %v590_v25 = vpop.f32.mrf.mxu0  ;;  %v977_v26 = vld [vmem:[#allocation3 + $0x130] sm:$0xff] }
 0x1eb   : > { %675 = vst.msk [vmem:[#allocation3 + $0x138] sm:$0xff] %vm635_vm0, %v590_v25  ;;  %v1031_v8 = vadd.f32 %v977_v26, %v891_v17  ;;  %v894_v28 = vpop.f32.mrf.mxu1  ;;  %v1302_v35 = vpop.f32.mrf.mxu2  ;;  %v2750_v26 = vld [vmem:[#allocation2 + $0x58] sm:$0xff] }
 0x1ec   : > { %v1387_v16 = vld [vmem:[#allocation3 + $0x128] sm:$0xff]  ;;  %3242 = vmatmul.f32.vlgmr.msrb.gmra.mxu3 %v1926_v30 }
 0x1ed   : > { %1085 = vst.msk [vmem:[#allocation3 + $0x130] sm:$0xff] %vm635_vm0, %v1031_v8  ;;  %v1441_v33 = vadd.f32 %v1387_v16, %v1299_v22  ;;  %2012 = vmatmul.f32.gmra.mxu0 %v1924_v12  ;;  %v1930_v22 = vld [vmem:[#allocation2 + $0x51] sm:$0xff] }
 0x1ee   : > { %v1797_v36 = vld [vmem:[#allocation3 + $0x120] sm:$0xff]  ;;  %2423 = vmatmul.f32.gmra.mxu1 %v2335_v29 }
 0x1ef   : > { %1495 = vst.msk [vmem:[#allocation3 + $0x128] sm:$0xff] %vm635_vm0, %v1441_v33  ;;  %v1851_v20 = vadd.f32 %v1797_v36, %v1707_v10  ;;  %v1713_v38 = vpop.f32.mrf.mxu3  ;;  %v2340_v16 = vld [vmem:[#allocation2 + $0x4a] sm:$0xff] }
 0x1f0   : > { %2834 = vmatmul.f32.gmra.mxu2 %v2746_v37 }
 0x1f1   : > { %1905 = vst.msk [vmem:[#allocation3 + $0x120] sm:$0xff] %vm635_vm0, %v1851_v20 }
 0x1f2   : > { %v593_v18 = vpop.f32.mrf.mxu0  ;;  %v978_v40 = vld [vmem:[#allocation3 + $0x138] sm:$0xff] }
 0x1f3   : > { %676 = vst.msk [vmem:[#allocation3 + $0x140] sm:$0xff] %vm635_vm0, %v593_v18  ;;  %v1032_v41 = vadd.f32 %v978_v40, %v894_v28  ;;  %v897_v43 = vpop.f32.mrf.mxu1  ;;  %v1305_v47 = vpop.f32.mrf.mxu2  ;;  %v3633_v40 = vld [vmem:[%s12748_s1 + $0x460] sm:$0xff] }
 0x1f4   : > { %v1388_v45 = vld [vmem:[#allocation3 + $0x130] sm:$0xff]  ;;  %3245 = vmatmul.f32.gmra.mxu3 %v1927_v44  ;;  %3640 = vmatpush.msra.mxu0 %v3633_v40 }
 0x1f5   : > { %1086 = vst.msk [vmem:[#allocation3 + $0x138] sm:$0xff] %vm635_vm0, %v1032_v41  ;;  %v1442_v27 = vadd.f32 %v1388_v45, %v1302_v35  ;;  %2015 = vmatmul.f32.gmra.mxu0 %v9694_v62  ;;  %v2341_v45 = vld [vmem:[#allocation2 + $0x52] sm:$0xff] }
 0x1f6   : > { %v1798_v48 = vld [vmem:[#allocation3 + $0x128] sm:$0xff]  ;;  %2426 = vmatmul.f32.gmra.mxu1 %v2336_v23 }
 0x1f7   : > { %1496 = vst.msk [vmem:[#allocation3 + $0x130] sm:$0xff] %vm635_vm0, %v1442_v27  ;;  %v1852_v49 = vadd.f32 %v1798_v48, %v1710_v24  ;;  %v1716_v51 = vpop.f32.mrf.mxu3  ;;  %v1932_v27 = vld [vmem:[#allocation2 + $0x61] sm:$0xff] }
 0x1f8   : > { %2837 = vmatmul.f32.gmra.mxu2 %v2747_v31 }
 0x1f9   : > { %1906 = vst.msk [vmem:[#allocation3 + $0x128] sm:$0xff] %vm635_vm0, %v1852_v49 }
 0x1fa   : > { %v596_v52 = vpop.f32.mrf.mxu0  ;;  %v979_v34 = vld [vmem:[#allocation3 + $0x140] sm:$0xff] }
 0x1fb   : > { %677 = vst.msk [vmem:[#allocation3 + $0x148] sm:$0xff] %vm635_vm0, %v596_v52  ;;  %v1033_v54 = vadd.f32 %v979_v34, %v897_v43  ;;  %v900_v39 = vpop.f32.mrf.mxu1  ;;  %v1308_v60 = vpop.f32.mrf.mxu2  ;;  %v2752_v52 = vld [vmem:[#allocation2 + $0x68] sm:$0xff] }
 0x1fc   : > { %v1389_v57 = vld [vmem:[#allocation3 + $0x138] sm:$0xff]  ;;  %3248 = vmatmul.f32.gmra.mxu3 %v9694_v62 }
 0x1fd   : > { %1087 = vst.msk [vmem:[#allocation3 + $0x140] sm:$0xff] %vm635_vm0, %v1033_v54  ;;  %v1443_v59 = vadd.f32 %v1389_v57, %v1305_v47  ;;  %2018 = vmatmul.f32.gmra.mxu0 %v1926_v30 }
 0x1fe   : > { %v1799_v63 = vld [vmem:[#allocation3 + $0x130] sm:$0xff]  ;;  %2429 = vmatmul.f32.gmra.mxu1 %v2337_v32 }
 0x1ff   : > { %1497 = vst.msk [vmem:[#allocation3 + $0x138] sm:$0xff] %vm635_vm0, %v1443_v59  ;;  %v1853_v42 = vadd.f32 %v1799_v63, %v1713_v38  ;;  %v1719_v1 = vpop.f32.mrf.mxu3  ;;  %v2751_v38 = vld [vmem:[#allocation2 + $0x60] sm:$0xff] }
 0x200   : > { %2840 = vmatmul.f32.gmra.mxu2 %v2748_v55  ;;  %v2342_v59 = vld [vmem:[#allocation2 + $0x5a] sm:$0xff] }
 0x201   : > { %1907 = vst.msk [vmem:[#allocation3 + $0x130] sm:$0xff] %vm635_vm0, %v1853_v42 }
 0x202   : > { %v599_v2 = vpop.f32.mrf.mxu0  ;;  %v980_v4 = vld [vmem:[#allocation3 + $0x148] sm:$0xff] }
 0x203   : > { %678 = vst.msk [vmem:[#allocation3 + $0x150] sm:$0xff] %vm635_vm0, %v599_v2  ;;  %v1034_v50 = vadd.f32 %v980_v4, %v900_v39  ;;  %v903_v46 = vpop.f32.mrf.mxu1  ;;  %v1311_v10 = vpop.f32.mrf.mxu2  ;;  %v2753_v2 = vld [vmem:[#allocation2 + $0x70] sm:$0xff] }
 0x204   : > { %v1390_v9 = vld [vmem:[#allocation3 + $0x140] sm:$0xff]  ;;  %3251 = vmatmul.f32.gmra.mxu3 %v1929_v7 }
 0x205   : > { %1088 = vst.msk [vmem:[#allocation3 + $0x148] sm:$0xff] %vm635_vm0, %v1034_v50  ;;  %v1444_v56 = vadd.f32 %v1390_v9, %v1308_v60  ;;  %2021 = vmatmul.f32.gmra.mxu0 %v1927_v44  ;;  %v1933_v60 = vld [vmem:[#allocation2 + $0x69] sm:$0xff] }
 0x206   : > { %v1800_v11 = vld [vmem:[#allocation3 + $0x138] sm:$0xff]  ;;  %2432 = vmatmul.f32.gmra.mxu1 %v2338_v6 }
 0x207   : > { %1498 = vst.msk [vmem:[#allocation3 + $0x140] sm:$0xff] %vm635_vm0, %v1444_v56  ;;  %v1854_v13 = vadd.f32 %v1800_v11, %v1716_v51  ;;  %v1722_v15 = vpop.f32.mrf.mxu3  ;;  %v2343_v9 = vld [vmem:[#allocation2 + $0x62] sm:$0xff] }
 0x208   : > { %2843 = vmatmul.f32.gmra.mxu2 %v2749_v14 }
 0x209   : > { %1908 = vst.msk [vmem:[#allocation3 + $0x138] sm:$0xff] %vm635_vm0, %v1854_v13 }
 0x20a   : > { %v602_v58 = vpop.f32.mrf.mxu0  ;;  %v981_v17 = vld [vmem:[#allocation3 + $0x150] sm:$0xff] }
 0x20b   : > { %679 = vst.msk [vmem:[#allocation3 + $0x158] sm:$0xff] %vm635_vm0, %v602_v58  ;;  %v1035_v19 = vadd.f32 %v981_v17, %v903_v46  ;;  %v906_v21 = vpop.f32.mrf.mxu1  ;;  %v1314_v5 = vpop.f32.mrf.mxu2  ;;  %v3632_v17 = vld [vmem:[%s12748_s1 + $0x458] sm:$0xff] }
 0x20c   : > { %v1391_v3 = vld [vmem:[#allocation3 + $0x148] sm:$0xff]  ;;  %3254 = vmatmul.f32.gmra.mxu3 %v1930_v22  ;;  %3641 = vmatpush.msra.mxu0 %v3632_v17 }
 0x20d   : > { %1089 = vst.msk [vmem:[#allocation3 + $0x150] sm:$0xff] %vm635_vm0, %v1035_v19  ;;  %v1445_v53 = vadd.f32 %v1391_v3, %v1311_v10  ;;  %2024 = vmatmul.f32.gmra.mxu0 %v9694_v62  ;;  %v2344_v3 = vld [vmem:[#allocation2 + $0x6a] sm:$0xff] }
 0x20e   : > { %v1801_v24 = vld [vmem:[#allocation3 + $0x140] sm:$0xff]  ;;  %2435 = vmatmul.f32.gmra.mxu1 %v2339_v0 }
 0x20f   : > { %1499 = vst.msk [vmem:[#allocation3 + $0x148] sm:$0xff] %vm635_vm0, %v1445_v53  ;;  %v1855_v25 = vadd.f32 %v1801_v24, %v1719_v1  ;;  %v1725_v12 = vpop.f32.mrf.mxu3  ;;  %v1935_v53 = vld [vmem:[#allocation2 + $0x79] sm:$0xff] }
 0x210   : > { %2846 = vmatmul.f32.gmra.mxu2 %v2750_v26 }
 0x211   : > { %1909 = vst.msk [vmem:[#allocation3 + $0x140] sm:$0xff] %vm635_vm0, %v1855_v25 }
 0x212   : > { %v605_v8 = vpop.f32.mrf.mxu0  ;;  %v982_v28 = vld [vmem:[#allocation3 + $0x158] sm:$0xff] }
 0x213   : > { %680 = vst.msk [vmem:[#allocation3 + $0x160] sm:$0xff] %vm635_vm0, %v605_v8  ;;  %v1036_v29 = vadd.f32 %v982_v28, %v906_v21  ;;  %v909_v30 = vpop.f32.mrf.mxu1  ;;  %v1317_v36 = vpop.f32.mrf.mxu2  ;;  %v2755_v8 = vld [vmem:[#allocation2 + $0x80] sm:$0xff] }
 0x214   : > { %v1392_v33 = vld [vmem:[#allocation3 + $0x150] sm:$0xff]  ;;  %3257 = vmatmul.f32.gmra.mxu3 %v9694_v62 }
 0x215   : > { %1090 = vst.msk [vmem:[#allocation3 + $0x158] sm:$0xff] %vm635_vm0, %v1036_v29  ;;  %v1446_v35 = vadd.f32 %v1392_v33, %v1314_v5  ;;  %2027 = vmatmul.f32.gmra.mxu0 %v1929_v7 }
 0x216   : > { %v1802_v20 = vld [vmem:[#allocation3 + $0x148] sm:$0xff]  ;;  %2438 = vmatmul.f32.gmra.mxu1 %v2340_v16 }
 0x217   : > { %1500 = vst.msk [vmem:[#allocation3 + $0x150] sm:$0xff] %vm635_vm0, %v1446_v35  ;;  %v1856_v37 = vadd.f32 %v1802_v20, %v1722_v15  ;;  %v1728_v18 = vpop.f32.mrf.mxu3  ;;  %v2754_v15 = vld [vmem:[#allocation2 + $0x78] sm:$0xff] }
 0x218   : > { %2849 = vmatmul.f32.gmra.mxu2 %v2751_v38  ;;  %v2345_v35 = vld [vmem:[#allocation2 + $0x72] sm:$0xff] }
 0x219   : > { %1910 = vst.msk [vmem:[#allocation3 + $0x148] sm:$0xff] %vm635_vm0, %v1856_v37 }
 0x21a   : > { %v608_v41 = vpop.f32.mrf.mxu0  ;;  %v983_v43 = vld [vmem:[#allocation3 + $0x160] sm:$0xff] }
 0x21b   : > { %681 = vst.msk [vmem:[#allocation3 + $0x168] sm:$0xff] %vm635_vm0, %v608_v41  ;;  %v1037_v23 = vadd.f32 %v983_v43, %v909_v30  ;;  %v912_v44 = vpop.f32.mrf.mxu1  ;;  %v1320_v49 = vpop.f32.mrf.mxu2  ;;  %v2756_v41 = vld [vmem:[#allocation2 + $0x88] sm:$0xff] }
 0x21c   : > { %v1393_v47 = vld [vmem:[#allocation3 + $0x158] sm:$0xff]  ;;  %3260 = vmatmul.f32.gmra.mxu3 %v1932_v27 }
 0x21d   : > { %1091 = vst.msk [vmem:[#allocation3 + $0x160] sm:$0xff] %vm635_vm0, %v1037_v23  ;;  %v1447_v48 = vadd.f32 %v1393_v47, %v1317_v36  ;;  %2030 = vmatmul.f32.gmra.mxu0 %v1930_v22  ;;  %v1936_v36 = vld [vmem:[#allocation2 + $0x81] sm:$0xff] }
 0x21e   : > { %v1803_v31 = vld [vmem:[#allocation3 + $0x150] sm:$0xff]  ;;  %2441 = vmatmul.f32.gmra.mxu1 %v2341_v45 }
 0x21f   : > { %1501 = vst.msk [vmem:[#allocation3 + $0x158] sm:$0xff] %vm635_vm0, %v1447_v48  ;;  %v1857_v51 = vadd.f32 %v1803_v31, %v1725_v12  ;;  %v1731_v34 = vpop.f32.mrf.mxu3  ;;  %v2346_v47 = vld [vmem:[#allocation2 + $0x7a] sm:$0xff] }
 0x220   : > { %2852 = vmatmul.f32.gmra.mxu2 %v2752_v52 }
 0x221   : > { %1911 = vst.msk [vmem:[#allocation3 + $0x150] sm:$0xff] %vm635_vm0, %v1857_v51 }
 0x222   : > { %v611_v54 = vpop.f32.mrf.mxu0  ;;  %v984_v39 = vld [vmem:[#allocation3 + $0x168] sm:$0xff] }
 0x223   : > { %682 = vst.msk [vmem:[#allocation3 + $0x170] sm:$0xff] %vm635_vm0, %v611_v54  ;;  %v1038_v32 = vadd.f32 %v984_v39, %v912_v44  ;;  %v915_v57 = vpop.f32.mrf.mxu1  ;;  %v1323_v42 = vpop.f32.mrf.mxu2 }
 0x224   : > { %v1394_v61 = vld [vmem:[#allocation3 + $0x160] sm:$0xff]  ;;  %3263 = vmatmul.f32.gmra.mxu3 %v1933_v60 }
 0x225   : > { %1092 = vst.msk [vmem:[#allocation3 + $0x168] sm:$0xff] %vm635_vm0, %v1038_v32  ;;  %v1448_v63 = vadd.f32 %v1394_v61, %v1320_v49  ;;  %2033 = vmatmul.f32.gmra.mxu0 %v9694_v62  ;;  %v1938_v61 = vld [vmem:[#allocation2 + $0x91] sm:$0xff] }
 0x226   : > { %v1804_v55 = vld [vmem:[#allocation3 + $0x158] sm:$0xff]  ;;  %2444 = vmatmul.f32.gmra.mxu1 %v2342_v59 }
 0x227   : > { %1502 = vst.msk [vmem:[#allocation3 + $0x160] sm:$0xff] %vm635_vm0, %v1448_v63  ;;  %v1858_v1 = vadd.f32 %v1804_v55, %v1728_v18  ;;  %v1734_v4 = vpop.f32.mrf.mxu3 }
 0x228   : > { %2855 = vmatmul.f32.gmra.mxu2 %v2753_v2 }
 0x229   : > { %1912 = vst.msk [vmem:[#allocation3 + $0x158] sm:$0xff] %vm635_vm0, %v1858_v1 }
 0x22a   : > { %v614_v50 = vpop.f32.mrf.mxu0  ;;  %v985_v46 = vld [vmem:[#allocation3 + $0x170] sm:$0xff] }
 0x22b   : > { %683 = vst.msk [vmem:[#allocation3 + $0x178] sm:$0xff] %vm635_vm0, %v614_v50  ;;  %v1039_v6 = vadd.f32 %v985_v46, %v915_v57  ;;  %v918_v7 = vpop.f32.mrf.mxu1  ;;  %v1326_v11 = vpop.f32.mrf.mxu2  ;;  %v3631_v50 = vld [vmem:[%s12748_s1 + $0x450] sm:$0xff] }
 0x22c   : > { %v1395_v56 = vld [vmem:[#allocation3 + $0x168] sm:$0xff]  ;;  %3266 = vmatmul.f32.gmra.mxu3 %v9694_v62  ;;  %3642 = vmatpush.msra.mxu0 %v3631_v50 }
 0x22d   : > { %1093 = vst.msk [vmem:[#allocation3 + $0x170] sm:$0xff] %vm635_vm0, %v1039_v6  ;;  %v1449_v10 = vadd.f32 %v1395_v56, %v1323_v42  ;;  %2036 = vmatmul.f32.gmra.mxu0 %v1932_v27 }
 0x22e   : > { %v1805_v13 = vld [vmem:[#allocation3 + $0x160] sm:$0xff]  ;;  %2447 = vmatmul.f32.gmra.mxu1 %v2343_v9 }
 0x22f   : > { %1503 = vst.msk [vmem:[#allocation3 + $0x168] sm:$0xff] %vm635_vm0, %v1449_v10  ;;  %v1859_v14 = vadd.f32 %v1805_v13, %v1731_v34  ;;  %v1737_v58 = vpop.f32.mrf.mxu3  ;;  %v2757_v34 = vld [vmem:[#allocation2 + $0x90] sm:$0xff] }
 0x230   : > { %2858 = vmatmul.f32.gmra.mxu2 %v2754_v15  ;;  %v2348_v10 = vld [vmem:[#allocation2 + $0x8a] sm:$0xff] }
 0x231   : > { %1913 = vst.msk [vmem:[#allocation3 + $0x160] sm:$0xff] %vm635_vm0, %v1859_v14 }
 0x232   : > { %v617_v19 = vpop.f32.mrf.mxu0  ;;  %v986_v21 = vld [vmem:[#allocation3 + $0x178] sm:$0xff] }
 0x233   : > { %684 = vst.msk [vmem:[#allocation3 + $0x180] sm:$0xff] %vm635_vm0, %v617_v19  ;;  %v1040_v0 = vadd.f32 %v986_v21, %v918_v7  ;;  %v921_v22 = vpop.f32.mrf.mxu1  ;;  %v1329_v25 = vpop.f32.mrf.mxu2  ;;  %v2759_v19 = vld [vmem:[#allocation2 + $0xa0] sm:$0xff] }
 0x234   : > { %v1396_v5 = vld [vmem:[#allocation3 + $0x170] sm:$0xff]  ;;  %3269 = vmatmul.f32.gmra.mxu3 %v1935_v53 }
 0x235   : > { %1094 = vst.msk [vmem:[#allocation3 + $0x178] sm:$0xff] %vm635_vm0, %v1040_v0  ;;  %v1450_v24 = vadd.f32 %v1396_v5, %v1326_v11  ;;  %2039 = vmatmul.f32.gmra.mxu0 %v1933_v60  ;;  %v2347_v60 = vld [vmem:[#allocation2 + $0x82] sm:$0xff]  ;;  %v1939_v11 = vld [vmem:[#allocation2 + $0x99] sm:$0xff] }
 0x236   : > { %v1806_v26 = vld [vmem:[#allocation3 + $0x168] sm:$0xff]  ;;  %2450 = vmatmul.f32.gmra.mxu1 %v2344_v3 }
 0x237   : > { %1504 = vst.msk [vmem:[#allocation3 + $0x170] sm:$0xff] %vm635_vm0, %v1450_v24  ;;  %v1860_v12 = vadd.f32 %v1806_v26, %v1734_v4  ;;  %v1740_v28 = vpop.f32.mrf.mxu3  ;;  %v2758_v4 = vld [vmem:[#allocation2 + $0x98] sm:$0xff] }
 0x238   : > { %2861 = vmatmul.f32.gmra.mxu2 %v2755_v8  ;;  %v2349_v5 = vld [vmem:[#allocation2 + $0x92] sm:$0xff] }
 0x239   : > { %1914 = vst.msk [vmem:[#allocation3 + $0x168] sm:$0xff] %vm635_vm0, %v1860_v12 }
 0x23a   : > { %v620_v29 = vpop.f32.mrf.mxu0  ;;  %v987_v30 = vld [vmem:[#allocation3 + $0x180] sm:$0xff] }
 0x23b   : > { %685 = vst.msk [vmem:[#allocation3 + $0x188] sm:$0xff] %vm635_vm0, %v620_v29  ;;  %v1041_v16 = vadd.f32 %v987_v30, %v921_v22  ;;  %v924_v33 = vpop.f32.mrf.mxu1  ;;  %v1332_v38 = vpop.f32.mrf.mxu2 }
 0x23c   : > { %v1397_v20 = vld [vmem:[#allocation3 + $0x178] sm:$0xff]  ;;  %3272 = vmatmul.f32.gmra.mxu3 %v1936_v36 }
 0x23d   : > { %1095 = vst.msk [vmem:[#allocation3 + $0x180] sm:$0xff] %vm635_vm0, %v1041_v16  ;;  %v1451_v37 = vadd.f32 %v1397_v20, %v1329_v25  ;;  %2042 = vmatmul.f32.gmra.mxu0 %v9694_v62 }
 0x23e   : > { %v1807_v18 = vld [vmem:[#allocation3 + $0x170] sm:$0xff]  ;;  %2453 = vmatmul.f32.gmra.mxu1 %v2345_v35 }
 0x23f   : > { %1505 = vst.msk [vmem:[#allocation3 + $0x178] sm:$0xff] %vm635_vm0, %v1451_v37  ;;  %v1861_v40 = vadd.f32 %v1807_v18, %v1737_v58  ;;  %v1743_v43 = vpop.f32.mrf.mxu3  ;;  %v2350_v37 = vld [vmem:[#allocation2 + $0x9a] sm:$0xff] }
 0x240   : > { %2864 = vmatmul.f32.gmra.mxu2 %v2756_v41 }
 0x241   : > { %1915 = vst.msk [vmem:[#allocation3 + $0x170] sm:$0xff] %vm635_vm0, %v1861_v40 }
 0x242   : > { %v623_v23 = vpop.f32.mrf.mxu0  ;;  %v988_v44 = vld [vmem:[#allocation3 + $0x188] sm:$0xff] }
 0x243   : > { %686 = vst.msk [vmem:[#allocation3 + $0x190] sm:$0xff] %vm635_vm0, %v623_v23  ;;  %v1042_v45 = vadd.f32 %v988_v44, %v924_v33  ;;  %v927_v27 = vpop.f32.mrf.mxu1  ;;  %v1335_v31 = vpop.f32.mrf.mxu2  ;;  %v2172_v33 = vld [vmem:[#allocation3] sm:$0xff]  ;;  %v2761_v44 = vld [vmem:[#allocation2 + $0xb0] sm:$0xff] }
 0x244   : > { %v1398_v48 = vld [vmem:[#allocation3 + $0x180] sm:$0xff]  ;;  %3275 = vmatmul.f32.gmra.mxu3 %v9694_v62 }
 0x245   : > { %1096 = vst.msk [vmem:[#allocation3 + $0x188] sm:$0xff] %vm635_vm0, %v1042_v45  ;;  %v1452_v49 = vadd.f32 %v1398_v48, %v1332_v38  ;;  %2045 = vmatmul.f32.gmra.mxu0 %v1935_v53  ;;  %v1941_v38 = vld [vmem:[#allocation2 + $0xa9] sm:$0xff] }
 0x246   : > { %v1808_v51 = vld [vmem:[#allocation3 + $0x178] sm:$0xff]  ;;  %2456 = vmatmul.f32.gmra.mxu1 %v2346_v47  ;;  %v2173_v48 = vld [vmem:[#allocation3 + $0x8] sm:$0xff] }
 0x247   : > { %1506 = vst.msk [vmem:[#allocation3 + $0x180] sm:$0xff] %vm635_vm0, %v1452_v49  ;;  %v1862_v52 = vadd.f32 %v1808_v51, %v1740_v28  ;;  %v1746_v54 = vpop.f32.mrf.mxu3  ;;  %v2760_v28 = vld [vmem:[#allocation2 + $0xa8] sm:$0xff] }
 0x248   : > { %2867 = vmatmul.f32.gmra.mxu2 %v2757_v34  ;;  %v2351_v51 = vld [vmem:[#allocation2 + $0xa2] sm:$0xff] }
 0x249   : > { %1916 = vst.msk [vmem:[#allocation3 + $0x178] sm:$0xff] %vm635_vm0, %v1862_v52  ;;  %v1942_v52 = vld [vmem:[#allocation2 + $0xb1] sm:$0xff] }
 0x24a   : > { %v626_v39 = vpop.f32.mrf.mxu0  ;;  %v989_v32 = vld [vmem:[#allocation3 + $0x190] sm:$0xff] }
 0x24b   : > { %687 = vst.msk [vmem:[#allocation3 + $0x198] sm:$0xff] %vm635_vm0, %v626_v39  ;;  %v1043_v57 = vadd.f32 %v989_v32, %v927_v27  ;;  %v930_v59 = vpop.f32.mrf.mxu1  ;;  %v1338_v55 = vpop.f32.mrf.mxu2  ;;  %v3630_v27 = vld [vmem:[%s12748_s1 + $0x448] sm:$0xff] }
 0x24c   : > { %v1399_v63 = vld [vmem:[#allocation3 + $0x188] sm:$0xff]  ;;  %3278 = vmatmul.f32.gmra.mxu3 %v1938_v61  ;;  %3643 = vmatpush.msra.mxu0 %v3630_v27 }
 0x24d   : > { %1097 = vst.msk [vmem:[#allocation3 + $0x190] sm:$0xff] %vm635_vm0, %v1043_v57  ;;  %v1453_v42 = vadd.f32 %v1399_v63, %v1335_v31  ;;  %2048 = vmatmul.f32.gmra.mxu0 %v1936_v36 }
 0x24e   : > { %v1809_v1 = vld [vmem:[#allocation3 + $0x180] sm:$0xff]  ;;  %2459 = vmatmul.f32.gmra.mxu1 %v2347_v60 }
 0x24f   : > { %1507 = vst.msk [vmem:[#allocation3 + $0x188] sm:$0xff] %vm635_vm0, %v1453_v42  ;;  %v1863_v2 = vadd.f32 %v1809_v1, %v1743_v43  ;;  %v1749_v46 = vpop.f32.mrf.mxu3 }
 0x250   : > { %2870 = vmatmul.f32.gmra.mxu2 %v2758_v4 }
 0x251   : > { %1917 = vst.msk [vmem:[#allocation3 + $0x180] sm:$0xff] %vm635_vm0, %v1863_v2 }
 0x252   : > { %v629_v6 = vpop.f32.mrf.mxu0  ;;  %v990_v7 = vld [vmem:[#allocation3 + $0x198] sm:$0xff] }
 0x253   : > { %688 = vst.msk [vmem:[#allocation3 + $0x1a0] sm:$0xff] %vm635_vm0, %v629_v6  ;;  %v1044_v9 = vadd.f32 %v990_v7, %v930_v59  ;;  %v933_v56 = vpop.f32.mrf.mxu1  ;;  %v1341_v15 = vpop.f32.mrf.mxu2  ;;  %v9902_v7 = vld [vmem:[#allocation2] sm:$0xff] }
 0x254   : > { %v1400_v13 = vld [vmem:[#allocation3 + $0x190] sm:$0xff]  ;;  %3281 = vmatmul.f32.gmra.mxu3 %v1939_v11 }
 0x255   : > { %1098 = vst.msk [vmem:[#allocation3 + $0x198] sm:$0xff] %vm635_vm0, %v1044_v9  ;;  %v1454_v14 = vadd.f32 %v1400_v13, %v1338_v55  ;;  %2051 = vmatmul.f32.gmra.mxu0 %v9694_v62  ;;  %v2174_v55 = vld [vmem:[#allocation3 + $0x10] sm:$0xff] }
 0x256   : > { %v1810_v58 = vld [vmem:[#allocation3 + $0x188] sm:$0xff]  ;;  %2462 = vmatmul.f32.gmra.mxu1 %v2348_v10  ;;  %v2763_v10 = vld [vmem:[#allocation2 + $0xc0] sm:$0xff] }
 0x257   : > { %1508 = vst.msk [vmem:[#allocation3 + $0x190] sm:$0xff] %vm635_vm0, %v1454_v14  ;;  %v1864_v17 = vadd.f32 %v1810_v58, %v1746_v54  ;;  %v1752_v21 = vpop.f32.mrf.mxu3 }
 0x258   : > { %2873 = vmatmul.f32.gmra.mxu2 %v2759_v19  ;;  %v2353_v19 = vld [vmem:[#allocation2 + $0xb2] sm:$0xff] }
 0x259   : > { %1918 = vst.msk [vmem:[#allocation3 + $0x188] sm:$0xff] %vm635_vm0, %v1864_v17 }
 0x25a   : > { %v632_v0 = vpop.f32.mrf.mxu0  ;;  %v991_v22 = vld [vmem:[#allocation3 + $0x1a0] sm:$0xff] }
 0x25b   : > { %689 = vst.msk [vmem:[#allocation3 + $0x1a8] sm:$0xff] %vm635_vm0, %v632_v0  ;;  %v1045_v3 = vadd.f32 %v991_v22, %v933_v56  ;;  %v936_v53 = vpop.f32.mrf.mxu1  ;;  %v1344_v26 = vpop.f32.mrf.mxu2 }
 0x25c   : > { %v1401_v24 = vld [vmem:[#allocation3 + $0x198] sm:$0xff]  ;;  %3284 = vmatmul.f32.gmra.mxu3 %v9694_v62 }
 0x25d   : > { %1099 = vst.msk [vmem:[#allocation3 + $0x1a0] sm:$0xff] %vm635_vm0, %v1045_v3  ;;  %v1455_v25 = vadd.f32 %v1401_v24, %v1341_v15  ;;  %2054 = vmatmul.f32.gmra.mxu0 %v1938_v61  ;;  %v2762_v61 = vld [vmem:[#allocation2 + $0xb8] sm:$0xff]  ;;  %v2175_v15 = vld [vmem:[#allocation3 + $0x18] sm:$0xff]  ;;  %v2764_v24 = vld [vmem:[#allocation2 + $0xc8] sm:$0xff] }
 0x25e   : > { %v1811_v12 = vld [vmem:[#allocation3 + $0x190] sm:$0xff]  ;;  %2465 = vmatmul.f32.gmra.mxu1 %v2349_v5 }
 0x25f   : > { %1509 = vst.msk [vmem:[#allocation3 + $0x198] sm:$0xff] %vm635_vm0, %v1455_v25  ;;  %v1865_v8 = vadd.f32 %v1811_v12, %v1749_v46  ;;  %v1755_v29 = vpop.f32.mrf.mxu3 }
 0x260   : > { %2876 = vmatmul.f32.gmra.mxu2 %v2760_v28  ;;  %v2176_v28 = vld [vmem:[#allocation3 + $0x20] sm:$0xff] }
 0x261   : > { %1919 = vst.msk [vmem:[#allocation3 + $0x190] sm:$0xff] %vm635_vm0, %v1865_v8 }
 0x262   : > { %v992_v30 = vld [vmem:[#allocation3 + $0x1a8] sm:$0xff]  ;;  %v2010_v16 = vpop.f32.mrf.mxu0 }
 0x263   : > { %v1046_v35 = vadd.f32 %v992_v30, %v936_v53  ;;  %v2226_v36 = vadd.f32 %v2172_v33, %v2010_v16  ;;  %v2421_v20 = vpop.f32.mrf.mxu1  ;;  %v1347_v41 = vpop.f32.mrf.mxu2  ;;  %v2354_v16 = vld [vmem:[#allocation2 + $0xba] sm:$0xff]  ;;  %v1945_v33 = vld [vmem:[#allocation2 + $0xc9] sm:$0xff] }
 0x264   : > { %v1402_v18 = vld [vmem:[#allocation3 + $0x1a0] sm:$0xff]  ;;  %3287 = vmatmul.f32.gmra.mxu3 %v1941_v38 }
 0x265   : > { %1100 = vst.msk [vmem:[#allocation3 + $0x1a8] sm:$0xff] %vm635_vm0, %v1046_v35  ;;  %v1456_v40 = vadd.f32 %v1402_v18, %v1344_v26  ;;  %2057 = vmatmul.f32.gmra.mxu0 %v1939_v11 }
 0x266   : > { %2280 = vst.msk [vmem:[#allocation3] sm:$0xff] %vm635_vm0, %v2226_v36  ;;  %v1812_v43 = vld [vmem:[#allocation3 + $0x198] sm:$0xff]  ;;  %2468 = vmatmul.f32.gmra.mxu1 %v2350_v37 }
 0x267   : > { %1510 = vst.msk [vmem:[#allocation3 + $0x1a0] sm:$0xff] %vm635_vm0, %v1456_v40  ;;  %v1866_v23 = vadd.f32 %v1812_v43, %v1752_v21  ;;  %v1758_v45 = vpop.f32.mrf.mxu3  ;;  %v1944_v21 = vld [vmem:[#allocation2 + $0xc1] sm:$0xff]  ;;  %v2765_v40 = vld [vmem:[#allocation2 + $0xd0] sm:$0xff] }
 0x268   : > { %2879 = vmatmul.f32.gmra.mxu2 %v2761_v44  ;;  %v3629_v37 = vld [vmem:[%s12748_s1 + $0x440] sm:$0xff] }
 0x269   : > { %1920 = vst.msk [vmem:[#allocation3 + $0x198] sm:$0xff] %vm635_vm0, %v1866_v23  ;;  %3644 = vmatpush.msra.mxu0 %v3629_v37 }
 0x26a   : > { %v2013_v47 = vpop.f32.mrf.mxu0 }
 0x26b   : > { %v2227_v49 = vadd.f32 %v2173_v48, %v2013_v47  ;;  %v2424_v31 = vpop.f32.mrf.mxu1  ;;  %v2832_v32 = vpop.f32.mrf.mxu2  ;;  %v2355_v48 = vld [vmem:[#allocation2 + $0xc2] sm:$0xff] }
 0x26c   : > { %v1403_v34 = vld [vmem:[#allocation3 + $0x1a8] sm:$0xff]  ;;  %3290 = vmatmul.f32.gmra.mxu3 %v1942_v52 }
 0x26d   : > { %2281 = vst.msk [vmem:[#allocation3 + $0x8] sm:$0xff] %vm635_vm0, %v2227_v49  ;;  %v1457_v54 = vadd.f32 %v1403_v34, %v1347_v41  ;;  %v2583_v39 = vld [vmem:[#allocation3] sm:$0xff]  ;;  %2060 = vmatmul.f32.gmra.mxu0 %v9694_v62 }
 0x26e   : > { %v2637_v57 = vadd.f32 %v2583_v39, %v2421_v20  ;;  %v1813_v59 = vld [vmem:[#allocation3 + $0x1a0] sm:$0xff]  ;;  %2471 = vmatmul.f32.gmra.mxu1 %v2351_v51 }
 0x26f   : > { %1511 = vst.msk [vmem:[#allocation3 + $0x1a8] sm:$0xff] %vm635_vm0, %v1457_v54  ;;  %v1867_v60 = vadd.f32 %v1813_v59, %v1755_v29  ;;  %v3243_v63 = vpop.f32.mrf.mxu3  ;;  %v2352_v62 = vld [vmem:[#allocation2 + $0xaa] sm:$0xff]  ;;  %v2766_v54 = vld [vmem:[#allocation2 + $0xd8] sm:$0xff] }
 0x270   : > { %2691 = vst.msk [vmem:[#allocation3] sm:$0xff] %vm635_vm0, %v2637_v57  ;;  %2882 = vmatmul.f32.gmra.mxu2 %v2762_v61 }
 0x271   : > { %1921 = vst.msk [vmem:[#allocation3 + $0x1a0] sm:$0xff] %vm635_vm0, %v1867_v60  ;;  %v2178_v60 = vld [vmem:[#allocation3 + $0x30] sm:$0xff] }
 0x272   : > { %v2016_v42 = vpop.f32.mrf.mxu0 }
 0x273   : > { %v2228_v1 = vadd.f32 %v2174_v55, %v2016_v42  ;;  %v2427_v2 = vpop.f32.mrf.mxu1  ;;  %v2835_v46 = vpop.f32.mrf.mxu2  ;;  %v2356_v42 = vld [vmem:[#allocation2 + $0xca] sm:$0xff]  ;;  %v1947_v55 = vld [vmem:[#allocation2 + $0xd9] sm:$0xff] }
 0x274   : > { %v2584_v4 = vld [vmem:[#allocation3 + $0x8] sm:$0xff]  ;;  %3293 = vmatmul.f32.gmra.mxu3 %v9902_v7 }
 0x275   : > { %2282 = vst.msk [vmem:[#allocation3 + $0x10] sm:$0xff] %vm635_vm0, %v2228_v1  ;;  %v2638_v50 = vadd.f32 %v2584_v4, %v2424_v31  ;;  %2063 = vmatmul.f32.gmra.mxu0 %v1941_v38 }
 0x276   : > { %v1814_v6 = vld [vmem:[#allocation3 + $0x1a8] sm:$0xff]  ;;  %2474 = vmatmul.f32.gmra.mxu1 %v2352_v62 }
 0x277   : > { %2692 = vst.msk [vmem:[#allocation3 + $0x8] sm:$0xff] %vm635_vm0, %v2638_v50  ;;  %v1868_v9 = vadd.f32 %v1814_v6, %v1758_v45  ;;  %v2994_v56 = vld [vmem:[#allocation3] sm:$0xff]  ;;  %v3246_v13 = vpop.f32.mrf.mxu3  ;;  %v2177_v45 = vld [vmem:[#allocation3 + $0x28] sm:$0xff] }
 0x278   : > { %v3048_v11 = vadd.f32 %v2994_v56, %v2832_v32  ;;  %2885 = vmatmul.f32.gmra.mxu2 %v2763_v10 }
 0x279   : > { %1922 = vst.msk [vmem:[#allocation3 + $0x1a8] sm:$0xff] %vm635_vm0, %v1868_v9 }
 0x27a   : > { %3102 = vst.msk [vmem:[#allocation3] sm:$0xff] %vm635_vm0, %v3048_v11  ;;  %v2019_v14 = vpop.f32.mrf.mxu0  ;;  %v2179_v11 = vld [vmem:[#allocation3 + $0x38] sm:$0xff] }
 0x27b   : > { %v2229_v58 = vadd.f32 %v2175_v15, %v2019_v14  ;;  %v2430_v17 = vpop.f32.mrf.mxu1  ;;  %v2838_v3 = vpop.f32.mrf.mxu2  ;;  %v2357_v15 = vld [vmem:[#allocation2 + $0xd2] sm:$0xff] }
 0x27c   : > { %v2585_v0 = vld [vmem:[#allocation3 + $0x10] sm:$0xff]  ;;  %3296 = vmatmul.f32.gmra.mxu3 %v1944_v21 }
 0x27d   : > { %2283 = vst.msk [vmem:[#allocation3 + $0x18] sm:$0xff] %vm635_vm0, %v2229_v58  ;;  %v2639_v22 = vadd.f32 %v2585_v0, %v2427_v2  ;;  %2066 = vmatmul.f32.gmra.mxu0 %v1942_v52  ;;  %v1948_v58 = vld [vmem:[#allocation2 + $0xe1] sm:$0xff] }
 0x27e   : > { %v2995_v53 = vld [vmem:[#allocation3 + $0x8] sm:$0xff]  ;;  %2477 = vmatmul.f32.gmra.mxu1 %v2353_v19 }
 0x27f   : > { %2693 = vst.msk [vmem:[#allocation3 + $0x10] sm:$0xff] %vm635_vm0, %v2639_v22  ;;  %v3049_v5 = vadd.f32 %v2995_v53, %v2835_v46  ;;  %v3249_v26 = vpop.f32.mrf.mxu3  ;;  %v2767_v46 = vld [vmem:[#allocation2 + $0xe0] sm:$0xff]  ;;  %v3628_v53 = vld [vmem:[%s12748_s1 + $0x438] sm:$0xff] }
 0x280   : > { %2888 = vmatmul.f32.gmra.mxu2 %v2764_v24  ;;  %3645 = vmatpush.msra.mxu0 %v3628_v53 }
 0x281   : > { %3103 = vst.msk [vmem:[#allocation3 + $0x8] sm:$0xff] %vm635_vm0, %v3049_v5  ;;  %v3405_v25 = vld [vmem:[#allocation3] sm:$0xff] }
 0x282   : > { %v3459_v12 = vadd.f32 %v3405_v25, %v3243_v63  ;;  %v2022_v8 = vpop.f32.mrf.mxu0 }
 0x283   : > { %v2230_v29 = vadd.f32 %v2176_v28, %v2022_v8  ;;  %v2433_v30 = vpop.f32.mrf.mxu1  ;;  %v2841_v20 = vpop.f32.mrf.mxu2 }
 0x284   : > { %3513 = vst.msk [vmem:[#allocation3] sm:$0xff] %vm635_vm0, %v3459_v12  ;;  %v2586_v35 = vld [vmem:[#allocation3 + $0x18] sm:$0xff]  ;;  %3299 = vmatmul.f32.gmra.mxu3 %v1945_v33  ;;  %v2180_v12 = vld [vmem:[#allocation3 + $0x40] sm:$0xff] }
 0x285   : > { %2284 = vst.msk [vmem:[#allocation3 + $0x20] sm:$0xff] %vm635_vm0, %v2230_v29  ;;  %v2640_v36 = vadd.f32 %v2586_v35, %v2430_v17  ;;  %2069 = vmatmul.f32.gmra.mxu0 %v9902_v7  ;;  %v2358_v29 = vld [vmem:[#allocation2 + $0xda] sm:$0xff] }
 0x286   : > { %v2996_v38 = vld [vmem:[#allocation3 + $0x10] sm:$0xff]  ;;  %2480 = vmatmul.f32.gmra.mxu1 %v2354_v16 }
 0x287   : > { %2694 = vst.msk [vmem:[#allocation3 + $0x18] sm:$0xff] %vm635_vm0, %v2640_v36  ;;  %v3050_v18 = vadd.f32 %v2996_v38, %v2838_v3  ;;  %v3252_v23 = vpop.f32.mrf.mxu3  ;;  %v2768_v3 = vld [vmem:[#allocation2 + $0xe8] sm:$0xff] }
 0x288   : > { %v3406_v41 = vld [vmem:[#allocation3 + $0x8] sm:$0xff]  ;;  %2891 = vmatmul.f32.gmra.mxu2 %v2765_v40 }
 0x289   : > { %3104 = vst.msk [vmem:[#allocation3 + $0x10] sm:$0xff] %vm635_vm0, %v3050_v18  ;;  %v3460_v43 = vadd.f32 %v3406_v41, %v3246_v13  ;;  %v2181_v41 = vld [vmem:[#allocation3 + $0x48] sm:$0xff] }
 0x28a   : > { %v2025_v44 = vpop.f32.mrf.mxu0 }
 0x28b   : > { %3514 = vst.msk [vmem:[#allocation3 + $0x8] sm:$0xff] %vm635_vm0, %v3460_v43  ;;  %v2231_v27 = vadd.f32 %v2177_v45, %v2025_v44  ;;  %v2436_v47 = vpop.f32.mrf.mxu1  ;;  %v2844_v51 = vpop.f32.mrf.mxu2  ;;  %v2359_v44 = vld [vmem:[#allocation2 + $0xe2] sm:$0xff]  ;;  %v1950_v45 = vld [vmem:[#allocation2 + $0xf1] sm:$0xff] }
 0x28c   : > { %v2587_v49 = vld [vmem:[#allocation3 + $0x20] sm:$0xff]  ;;  %3302 = vmatmul.f32.gmra.mxu3 %v9902_v7 }
 0x28d   : > { %2285 = vst.msk [vmem:[#allocation3 + $0x28] sm:$0xff] %vm635_vm0, %v2231_v27  ;;  %v2641_v31 = vadd.f32 %v2587_v49, %v2433_v30  ;;  %2072 = vmatmul.f32.gmra.mxu0 %v1944_v21 }
 0x28e   : > { %v2997_v52 = vld [vmem:[#allocation3 + $0x18] sm:$0xff]  ;;  %2483 = vmatmul.f32.gmra.mxu1 %v2355_v48 }
 0x28f   : > { %2695 = vst.msk [vmem:[#allocation3 + $0x20] sm:$0xff] %vm635_vm0, %v2641_v31  ;;  %v3051_v34 = vadd.f32 %v2997_v52, %v2841_v20  ;;  %v3255_v57 = vpop.f32.mrf.mxu3  ;;  %v2769_v20 = vld [vmem:[#allocation2 + $0xf0] sm:$0xff] }
 0x290   : > { %v3407_v39 = vld [vmem:[#allocation3 + $0x10] sm:$0xff]  ;;  %2894 = vmatmul.f32.gmra.mxu2 %v2766_v54 }
 0x291   : > { %3105 = vst.msk [vmem:[#allocation3 + $0x18] sm:$0xff] %vm635_vm0, %v3051_v34  ;;  %v3461_v32 = vadd.f32 %v3407_v39, %v3249_v26 }
 0x292   : > { %v2028_v59 = vpop.f32.mrf.mxu0 }
 0x293   : > { %3515 = vst.msk [vmem:[#allocation3 + $0x10] sm:$0xff] %vm635_vm0, %v3461_v32  ;;  %v2232_v61 = vadd.f32 %v2178_v60, %v2028_v59  ;;  %v2439_v63 = vpop.f32.mrf.mxu1  ;;  %v2847_v62 = vpop.f32.mrf.mxu2  ;;  %v2182_v32 = vld [vmem:[#allocation3 + $0x50] sm:$0xff]  ;;  %v2360_v60 = vld [vmem:[#allocation2 + $0xea] sm:$0xff] }
 0x294   : > { %v2588_v1 = vld [vmem:[#allocation3 + $0x28] sm:$0xff]  ;;  %3305 = vmatmul.f32.gmra.mxu3 %v1947_v55 }
 0x295   : > { %2286 = vst.msk [vmem:[#allocation3 + $0x30] sm:$0xff] %vm635_vm0, %v2232_v61  ;;  %v2642_v2 = vadd.f32 %v2588_v1, %v2436_v47  ;;  %2075 = vmatmul.f32.gmra.mxu0 %v1945_v33  ;;  %v1951_v61 = vld [vmem:[#allocation2 + $0xf9] sm:$0xff] }
 0x296   : > { %v2998_v4 = vld [vmem:[#allocation3 + $0x20] sm:$0xff]  ;;  %2486 = vmatmul.f32.gmra.mxu1 %v2356_v42 }
 0x297   : > { %2696 = vst.msk [vmem:[#allocation3 + $0x28] sm:$0xff] %vm635_vm0, %v2642_v2  ;;  %v3052_v50 = vadd.f32 %v2998_v4, %v2844_v51  ;;  %v3258_v56 = vpop.f32.mrf.mxu3  ;;  %v2770_v51 = vld [vmem:[#allocation2 + $0xf8] sm:$0xff] }
 0x298   : > { %v3408_v6 = vld [vmem:[#allocation3 + $0x18] sm:$0xff]  ;;  %2897 = vmatmul.f32.gmra.mxu2 %v2767_v46 }
 0x299   : > { %3106 = vst.msk [vmem:[#allocation3 + $0x20] sm:$0xff] %vm635_vm0, %v3052_v50  ;;  %v3462_v9 = vadd.f32 %v3408_v6, %v3252_v23 }
 0x29a   : > { %v2031_v10 = vpop.f32.mrf.mxu0 }
 0x29b   : > { %3516 = vst.msk [vmem:[#allocation3 + $0x18] sm:$0xff] %vm635_vm0, %v3462_v9  ;;  %v2233_v13 = vadd.f32 %v2179_v11, %v2031_v10  ;;  %v2442_v14 = vpop.f32.mrf.mxu1  ;;  %v2850_v21 = vpop.f32.mrf.mxu2  ;;  %v2183_v9 = vld [vmem:[#allocation3 + $0x58] sm:$0xff]  ;;  %v2361_v11 = vld [vmem:[#allocation2 + $0xf2] sm:$0xff] }
 0x29c   : > { %v2589_v17 = vld [vmem:[#allocation3 + $0x30] sm:$0xff]  ;;  %3308 = vmatmul.f32.gmra.mxu3 %v1948_v58 }
 0x29d   : > { %2287 = vst.msk [vmem:[#allocation3 + $0x38] sm:$0xff] %vm635_vm0, %v2233_v13  ;;  %v2643_v19 = vadd.f32 %v2589_v17, %v2439_v63  ;;  %2078 = vmatmul.f32.gmra.mxu0 %v9902_v7  ;;  %v3627_v13 = vld [vmem:[%s12748_s1 + $0x430] sm:$0xff] }
 0x29e   : > { %v2999_v0 = vld [vmem:[#allocation3 + $0x28] sm:$0xff]  ;;  %2489 = vmatmul.f32.gmra.mxu1 %v2357_v15  ;;  %3646 = vmatpush.msra.mxu0 %v3627_v13 }
 0x29f   : > { %2697 = vst.msk [vmem:[#allocation3 + $0x30] sm:$0xff] %vm635_vm0, %v2643_v19  ;;  %v3053_v22 = vadd.f32 %v2999_v0, %v2847_v62  ;;  %v3261_v25 = vpop.f32.mrf.mxu3  ;;  %v2771_v62 = vld [vmem:[#allocation2 + $0x100] sm:$0xff] }
 0x2a0   : > { %v3409_v5 = vld [vmem:[#allocation3 + $0x20] sm:$0xff]  ;;  %2900 = vmatmul.f32.gmra.mxu2 %v2768_v3 }
 0x2a1   : > { %3107 = vst.msk [vmem:[#allocation3 + $0x28] sm:$0xff] %vm635_vm0, %v3053_v22  ;;  %v3463_v24 = vadd.f32 %v3409_v5, %v3255_v57  ;;  %v2184_v5 = vld [vmem:[#allocation3 + $0x60] sm:$0xff] }
 0x2a2   : > { %v2034_v26 = vpop.f32.mrf.mxu0 }
 0x2a3   : > { %3517 = vst.msk [vmem:[#allocation3 + $0x20] sm:$0xff] %vm635_vm0, %v3463_v24  ;;  %v2234_v8 = vadd.f32 %v2180_v12, %v2034_v26  ;;  %v2445_v28 = vpop.f32.mrf.mxu1  ;;  %v2853_v33 = vpop.f32.mrf.mxu2  ;;  %v2362_v26 = vld [vmem:[#allocation2 + $0xfa] sm:$0xff]  ;;  %v1953_v12 = vld [vmem:[#allocation2 + $0x109] sm:$0xff] }
 0x2a4   : > { %v2590_v30 = vld [vmem:[#allocation3 + $0x38] sm:$0xff]  ;;  %3311 = vmatmul.f32.gmra.mxu3 %v9902_v7 }
 0x2a5   : > { %2288 = vst.msk [vmem:[#allocation3 + $0x40] sm:$0xff] %vm635_vm0, %v2234_v8  ;;  %v2644_v16 = vadd.f32 %v2590_v30, %v2442_v14  ;;  %2081 = vmatmul.f32.gmra.mxu0 %v1947_v55 }
 0x2a6   : > { %v3000_v35 = vld [vmem:[#allocation3 + $0x30] sm:$0xff]  ;;  %2492 = vmatmul.f32.gmra.mxu1 %v2358_v29 }
 0x2a7   : > { %2698 = vst.msk [vmem:[#allocation3 + $0x38] sm:$0xff] %vm635_vm0, %v2644_v16  ;;  %v3054_v36 = vadd.f32 %v3000_v35, %v2850_v21  ;;  %v3264_v18 = vpop.f32.mrf.mxu3  ;;  %v2772_v21 = vld [vmem:[#allocation2 + $0x108] sm:$0xff] }
 0x2a8   : > { %v3410_v37 = vld [vmem:[#allocation3 + $0x28] sm:$0xff]  ;;  %2903 = vmatmul.f32.gmra.mxu2 %v2769_v20 }
 0x2a9   : > { %3108 = vst.msk [vmem:[#allocation3 + $0x30] sm:$0xff] %vm635_vm0, %v3054_v36  ;;  %v3464_v38 = vadd.f32 %v3410_v37, %v3258_v56 }
 0x2aa   : > { %v2037_v40 = vpop.f32.mrf.mxu0 }
 0x2ab   : > { %3518 = vst.msk [vmem:[#allocation3 + $0x28] sm:$0xff] %vm635_vm0, %v3464_v38  ;;  %v2235_v43 = vadd.f32 %v2181_v41, %v2037_v40  ;;  %v2448_v23 = vpop.f32.mrf.mxu1  ;;  %v2856_v48 = vpop.f32.mrf.mxu2  ;;  %v2185_v38 = vld [vmem:[#allocation3 + $0x68] sm:$0xff]  ;;  %v2363_v41 = vld [vmem:[#allocation2 + $0x102] sm:$0xff] }
 0x2ac   : > { %v2591_v27 = vld [vmem:[#allocation3 + $0x40] sm:$0xff]  ;;  %3314 = vmatmul.f32.gmra.mxu3 %v1950_v45 }
 0x2ad   : > { %2289 = vst.msk [vmem:[#allocation3 + $0x48] sm:$0xff] %vm635_vm0, %v2235_v43  ;;  %v2645_v47 = vadd.f32 %v2591_v27, %v2445_v28  ;;  %2084 = vmatmul.f32.gmra.mxu0 %v1948_v58  ;;  %v1954_v43 = vld [vmem:[#allocation2 + $0x111] sm:$0xff] }
 0x2ae   : > { %v3001_v49 = vld [vmem:[#allocation3 + $0x38] sm:$0xff]  ;;  %2495 = vmatmul.f32.gmra.mxu1 %v2359_v44 }
 0x2af   : > { %2699 = vst.msk [vmem:[#allocation3 + $0x40] sm:$0xff] %vm635_vm0, %v2645_v47  ;;  %v3055_v31 = vadd.f32 %v3001_v49, %v2853_v33  ;;  %v3267_v54 = vpop.f32.mrf.mxu3  ;;  %v2773_v33 = vld [vmem:[#allocation2 + $0x110] sm:$0xff] }
 0x2b0   : > { %v3411_v52 = vld [vmem:[#allocation3 + $0x30] sm:$0xff]  ;;  %2906 = vmatmul.f32.gmra.mxu2 %v2770_v51 }
 0x2b1   : > { %3109 = vst.msk [vmem:[#allocation3 + $0x38] sm:$0xff] %vm635_vm0, %v3055_v31  ;;  %v3465_v34 = vadd.f32 %v3411_v52, %v3261_v25 }
 0x2b2   : > { %v2040_v39 = vpop.f32.mrf.mxu0 }
 0x2b3   : > { %3519 = vst.msk [vmem:[#allocation3 + $0x30] sm:$0xff] %vm635_vm0, %v3465_v34  ;;  %v2236_v57 = vadd.f32 %v2182_v32, %v2040_v39  ;;  %v2451_v59 = vpop.f32.mrf.mxu1  ;;  %v2859_v55 = vpop.f32.mrf.mxu2  ;;  %v2186_v34 = vld [vmem:[#allocation3 + $0x70] sm:$0xff]  ;;  %v2364_v32 = vld [vmem:[#allocation2 + $0x10a] sm:$0xff] }
 0x2b4   : > { %v2592_v63 = vld [vmem:[#allocation3 + $0x48] sm:$0xff]  ;;  %3317 = vmatmul.f32.gmra.mxu3 %v1951_v61 }
 0x2b5   : > { %2290 = vst.msk [vmem:[#allocation3 + $0x50] sm:$0xff] %vm635_vm0, %v2236_v57  ;;  %v2646_v42 = vadd.f32 %v2592_v63, %v2448_v23  ;;  %2087 = vmatmul.f32.gmra.mxu0 %v9902_v7 }
 0x2b6   : > { %v3002_v1 = vld [vmem:[#allocation3 + $0x40] sm:$0xff]  ;;  %2498 = vmatmul.f32.gmra.mxu1 %v2360_v60 }
 0x2b7   : > { %2700 = vst.msk [vmem:[#allocation3 + $0x48] sm:$0xff] %vm635_vm0, %v2646_v42  ;;  %v3056_v2 = vadd.f32 %v3002_v1, %v2856_v48  ;;  %v3270_v46 = vpop.f32.mrf.mxu3  ;;  %v2774_v48 = vld [vmem:[#allocation2 + $0x118] sm:$0xff] }
 0x2b8   : > { %v3412_v4 = vld [vmem:[#allocation3 + $0x38] sm:$0xff]  ;;  %2909 = vmatmul.f32.gmra.mxu2 %v2771_v62 }
 0x2b9   : > { %3110 = vst.msk [vmem:[#allocation3 + $0x40] sm:$0xff] %vm635_vm0, %v3056_v2  ;;  %v3466_v50 = vadd.f32 %v3412_v4, %v3264_v18 }
 0x2ba   : > { %v2043_v6 = vpop.f32.mrf.mxu0 }
 0x2bb   : > { %3520 = vst.msk [vmem:[#allocation3 + $0x38] sm:$0xff] %vm635_vm0, %v3466_v50  ;;  %v2237_v56 = vadd.f32 %v2183_v9, %v2043_v6  ;;  %v2454_v10 = vpop.f32.mrf.mxu1  ;;  %v2862_v58 = vpop.f32.mrf.mxu2  ;;  %v2187_v50 = vld [vmem:[#allocation3 + $0x78] sm:$0xff]  ;;  %v2365_v9 = vld [vmem:[#allocation2 + $0x112] sm:$0xff] }
 0x2bc   : > { %v2593_v14 = vld [vmem:[#allocation3 + $0x50] sm:$0xff]  ;;  %3320 = vmatmul.f32.gmra.mxu3 %v9902_v7 }
 0x2bd   : > { %2291 = vst.msk [vmem:[#allocation3 + $0x58] sm:$0xff] %vm635_vm0, %v2237_v56  ;;  %v2647_v15 = vadd.f32 %v2593_v14, %v2451_v59  ;;  %2090 = vmatmul.f32.gmra.mxu0 %v1950_v45  ;;  %v1956_v56 = vld [vmem:[#allocation2 + $0x121] sm:$0xff] }
 0x2be   : > { %v3003_v17 = vld [vmem:[#allocation3 + $0x48] sm:$0xff]  ;;  %2501 = vmatmul.f32.gmra.mxu1 %v2361_v11 }
 0x2bf   : > { %2701 = vst.msk [vmem:[#allocation3 + $0x50] sm:$0xff] %vm635_vm0, %v2647_v15  ;;  %v3057_v19 = vadd.f32 %v3003_v17, %v2859_v55  ;;  %v3273_v3 = vpop.f32.mrf.mxu3  ;;  %v2775_v55 = vld [vmem:[#allocation2 + $0x120] sm:$0xff] }
 0x2c0   : > { %v3413_v0 = vld [vmem:[#allocation3 + $0x40] sm:$0xff]  ;;  %2912 = vmatmul.f32.gmra.mxu2 %v2772_v21 }
 0x2c1   : > { %3111 = vst.msk [vmem:[#allocation3 + $0x48] sm:$0xff] %vm635_vm0, %v3057_v19  ;;  %v3467_v22 = vadd.f32 %v3413_v0, %v3267_v54 }
 0x2c2   : > { %v2046_v53 = vpop.f32.mrf.mxu0 }
 0x2c3   : > { %3521 = vst.msk [vmem:[#allocation3 + $0x40] sm:$0xff] %vm635_vm0, %v3467_v22  ;;  %v2238_v24 = vadd.f32 %v2184_v5, %v2046_v53  ;;  %v2457_v25 = vpop.f32.mrf.mxu1  ;;  %v2865_v29 = vpop.f32.mrf.mxu2  ;;  %v2188_v22 = vld [vmem:[#allocation3 + $0x80] sm:$0xff]  ;;  %v2366_v5 = vld [vmem:[#allocation2 + $0x11a] sm:$0xff] }
 0x2c4   : > { %v2594_v8 = vld [vmem:[#allocation3 + $0x58] sm:$0xff]  ;;  %3323 = vmatmul.f32.gmra.mxu3 %v1953_v12 }
 0x2c5   : > { %2292 = vst.msk [vmem:[#allocation3 + $0x60] sm:$0xff] %vm635_vm0, %v2238_v24  ;;  %v2648_v28 = vadd.f32 %v2594_v8, %v2454_v10  ;;  %2093 = vmatmul.f32.gmra.mxu0 %v1951_v61  ;;  %v3626_v61 = vld [vmem:[%s12748_s1 + $0x428] sm:$0xff] }
 0x2c6   : > { %v3004_v30 = vld [vmem:[#allocation3 + $0x50] sm:$0xff]  ;;  %2504 = vmatmul.f32.gmra.mxu1 %v2362_v26  ;;  %3647 = vmatpush.msra.mxu0 %v3626_v61  ;;  %v1957_v24 = vld [vmem:[#allocation2 + $0x129] sm:$0xff]  ;;  %v2779_v61 = vld [vmem:[#allocation2 + $0x140] sm:$0xff] }
 0x2c7   : > { %2702 = vst.msk [vmem:[#allocation3 + $0x58] sm:$0xff] %vm635_vm0, %v2648_v28  ;;  %v3058_v16 = vadd.f32 %v3004_v30, %v2862_v58  ;;  %v3276_v20 = vpop.f32.mrf.mxu3  ;;  %v2776_v58 = vld [vmem:[#allocation2 + $0x128] sm:$0xff] }
 0x2c8   : > { %v3414_v35 = vld [vmem:[#allocation3 + $0x48] sm:$0xff]  ;;  %2915 = vmatmul.f32.gmra.mxu2 %v2773_v33 }
 0x2c9   : > { %3112 = vst.msk [vmem:[#allocation3 + $0x50] sm:$0xff] %vm635_vm0, %v3058_v16  ;;  %v3468_v36 = vadd.f32 %v3414_v35, %v3270_v46 }
 0x2ca   : > { %v2049_v37 = vpop.f32.mrf.mxu0 }
 0x2cb   : > { %3522 = vst.msk [vmem:[#allocation3 + $0x48] sm:$0xff] %vm635_vm0, %v3468_v36  ;;  %v2239_v18 = vadd.f32 %v2185_v38, %v2049_v37  ;;  %v2460_v40 = vpop.f32.mrf.mxu1  ;;  %v2868_v45 = vpop.f32.mrf.mxu2  ;;  %v2189_v36 = vld [vmem:[#allocation3 + $0x88] sm:$0xff]  ;;  %v2367_v38 = vld [vmem:[#allocation2 + $0x122] sm:$0xff] }
 0x2cc   : > { %v2595_v23 = vld [vmem:[#allocation3 + $0x60] sm:$0xff]  ;;  %3326 = vmatmul.f32.gmra.mxu3 %v1954_v43 }
 0x2cd   : > { %2293 = vst.msk [vmem:[#allocation3 + $0x68] sm:$0xff] %vm635_vm0, %v2239_v18  ;;  %v2649_v44 = vadd.f32 %v2595_v23, %v2457_v25  ;;  %2096 = vmatmul.f32.gmra.mxu0 %v9902_v7 }
 0x2ce   : > { %v3005_v27 = vld [vmem:[#allocation3 + $0x58] sm:$0xff]  ;;  %2507 = vmatmul.f32.gmra.mxu1 %v2363_v41 }
 0x2cf   : > { %2703 = vst.msk [vmem:[#allocation3 + $0x60] sm:$0xff] %vm635_vm0, %v2649_v44  ;;  %v3059_v47 = vadd.f32 %v3005_v27, %v2865_v29  ;;  %v3279_v51 = vpop.f32.mrf.mxu3  ;;  %v2777_v29 = vld [vmem:[#allocation2 + $0x130] sm:$0xff]  ;;  %v2778_v44 = vld [vmem:[#allocation2 + $0x138] sm:$0xff] }
 0x2d0   : > { %v3415_v49 = vld [vmem:[#allocation3 + $0x50] sm:$0xff]  ;;  %2918 = vmatmul.f32.gmra.mxu2 %v2774_v48  ;;  %v3625_v48 = vld [vmem:[%s12748_s1 + $0x420] sm:$0xff] }
 0x2d1   : > { %3113 = vst.msk [vmem:[#allocation3 + $0x58] sm:$0xff] %vm635_vm0, %v3059_v47  ;;  %v3469_v31 = vadd.f32 %v3415_v49, %v3273_v3  ;;  %3648 = vmatpush.msra.mxu0 %v3625_v48 }
 0x2d2   : > { %v2052_v52 = vpop.f32.mrf.mxu0 }
 0x2d3   : > { %3523 = vst.msk [vmem:[#allocation3 + $0x50] sm:$0xff] %vm635_vm0, %v3469_v31  ;;  %v2240_v54 = vadd.f32 %v2186_v34, %v2052_v52  ;;  %v2463_v39 = vpop.f32.mrf.mxu1  ;;  %v2871_v60 = vpop.f32.mrf.mxu2  ;;  %v2190_v31 = vld [vmem:[#allocation3 + $0x90] sm:$0xff]  ;;  %v2368_v34 = vld [vmem:[#allocation2 + $0x12a] sm:$0xff] }
 0x2d4   : > { %v2596_v57 = vld [vmem:[#allocation3 + $0x68] sm:$0xff]  ;;  %3329 = vmatmul.f32.gmra.mxu3 %v9902_v7 }
 0x2d5   : > { %2294 = vst.msk [vmem:[#allocation3 + $0x70] sm:$0xff] %vm635_vm0, %v2240_v54  ;;  %v2650_v59 = vadd.f32 %v2596_v57, %v2460_v40  ;;  %2099 = vmatmul.f32.gmra.mxu0 %v1953_v12  ;;  %v1959_v54 = vld [vmem:[#allocation2 + $0x139] sm:$0xff] }
 0x2d6   : > { %v3006_v63 = vld [vmem:[#allocation3 + $0x60] sm:$0xff]  ;;  %2510 = vmatmul.f32.gmra.mxu1 %v2364_v32 }
 0x2d7   : > { %2704 = vst.msk [vmem:[#allocation3 + $0x68] sm:$0xff] %vm635_vm0, %v2650_v59  ;;  %v3060_v42 = vadd.f32 %v3006_v63, %v2868_v45  ;;  %v3282_v62 = vpop.f32.mrf.mxu3 }
 0x2d8   : > { %v3416_v1 = vld [vmem:[#allocation3 + $0x58] sm:$0xff]  ;;  %2921 = vmatmul.f32.gmra.mxu2 %v2775_v55 }
 0x2d9   : > { %3114 = vst.msk [vmem:[#allocation3 + $0x60] sm:$0xff] %vm635_vm0, %v3060_v42  ;;  %v3470_v2 = vadd.f32 %v3416_v1, %v3276_v20 }
 0x2da   : > { %v2055_v4 = vpop.f32.mrf.mxu0 }
 0x2db   : > { %3524 = vst.msk [vmem:[#allocation3 + $0x58] sm:$0xff] %vm635_vm0, %v3470_v2  ;;  %v2241_v46 = vadd.f32 %v2187_v50, %v2055_v4  ;;  %v2466_v6 = vpop.f32.mrf.mxu1  ;;  %v2874_v13 = vpop.f32.mrf.mxu2  ;;  %v2191_v2 = vld [vmem:[#allocation3 + $0x98] sm:$0xff]  ;;  %v2369_v50 = vld [vmem:[#allocation2 + $0x132] sm:$0xff] }
 0x2dc   : > { %v2597_v10 = vld [vmem:[#allocation3 + $0x70] sm:$0xff]  ;;  %3332 = vmatmul.f32.gmra.mxu3 %v1956_v56 }
 0x2dd   : > { %2295 = vst.msk [vmem:[#allocation3 + $0x78] sm:$0xff] %vm635_vm0, %v2241_v46  ;;  %v2651_v11 = vadd.f32 %v2597_v10, %v2463_v39  ;;  %2102 = vmatmul.f32.gmra.mxu0 %v1954_v43  ;;  %v1960_v46 = vld [vmem:[#allocation2 + $0x141] sm:$0xff] }
 0x2de   : > { %v3007_v14 = vld [vmem:[#allocation3 + $0x68] sm:$0xff]  ;;  %2513 = vmatmul.f32.gmra.mxu1 %v2365_v9 }
 0x2df   : > { %2705 = vst.msk [vmem:[#allocation3 + $0x70] sm:$0xff] %vm635_vm0, %v2651_v11  ;;  %v3061_v15 = vadd.f32 %v3007_v14, %v2871_v60  ;;  %v3285_v21 = vpop.f32.mrf.mxu3 }
 0x2e0   : > { %v3417_v17 = vld [vmem:[#allocation3 + $0x60] sm:$0xff]  ;;  %2924 = vmatmul.f32.gmra.mxu2 %v2776_v58 }
 0x2e1   : > { %3115 = vst.msk [vmem:[#allocation3 + $0x68] sm:$0xff] %vm635_vm0, %v3061_v15  ;;  %v3471_v19 = vadd.f32 %v3417_v17, %v3279_v51 }
 0x2e2   : > { %v2058_v0 = vpop.f32.mrf.mxu0 }
 0x2e3   : > { %3525 = vst.msk [vmem:[#allocation3 + $0x60] sm:$0xff] %vm635_vm0, %v3471_v19  ;;  %v2242_v3 = vadd.f32 %v2188_v22, %v2058_v0  ;;  %v2469_v53 = vpop.f32.mrf.mxu1  ;;  %v2877_v12 = vpop.f32.mrf.mxu2  ;;  %v2192_v19 = vld [vmem:[#allocation3 + $0xa0] sm:$0xff]  ;;  %v2370_v22 = vld [vmem:[#allocation2 + $0x13a] sm:$0xff] }
 0x2e4   : > { %v2598_v25 = vld [vmem:[#allocation3 + $0x78] sm:$0xff]  ;;  %3335 = vmatmul.f32.gmra.mxu3 %v1957_v24 }
 0x2e5   : > { %2296 = vst.msk [vmem:[#allocation3 + $0x80] sm:$0xff] %vm635_vm0, %v2242_v3  ;;  %v2652_v26 = vadd.f32 %v2598_v25, %v2466_v6  ;;  %2105 = vmatmul.f32.gmra.mxu0 %v9902_v7 }
 0x2e6   : > { %v3008_v8 = vld [vmem:[#allocation3 + $0x70] sm:$0xff]  ;;  %2516 = vmatmul.f32.gmra.mxu1 %v2366_v5 }
 0x2e7   : > { %2706 = vst.msk [vmem:[#allocation3 + $0x78] sm:$0xff] %vm635_vm0, %v2652_v26  ;;  %v3062_v28 = vadd.f32 %v3008_v8, %v2874_v13  ;;  %v3288_v33 = vpop.f32.mrf.mxu3  ;;  %v2780_v13 = vld [vmem:[#allocation2 + $0x148] sm:$0xff]  ;;  %v2781_v26 = vld [vmem:[#allocation2 + $0x150] sm:$0xff] }
 0x2e8   : > { %v3418_v30 = vld [vmem:[#allocation3 + $0x68] sm:$0xff]  ;;  %2927 = vmatmul.f32.gmra.mxu2 %v2777_v29 }
 0x2e9   : > { %3116 = vst.msk [vmem:[#allocation3 + $0x70] sm:$0xff] %vm635_vm0, %v3062_v28  ;;  %v3472_v16 = vadd.f32 %v3418_v30, %v3282_v62  ;;  %v2193_v30 = vld [vmem:[#allocation3 + $0xa8] sm:$0xff] }
 0x2ea   : > { %v2061_v35 = vpop.f32.mrf.mxu0 }
 0x2eb   : > { %3526 = vst.msk [vmem:[#allocation3 + $0x68] sm:$0xff] %vm635_vm0, %v3472_v16  ;;  %v2243_v20 = vadd.f32 %v2189_v36, %v2061_v35  ;;  %v2472_v37 = vpop.f32.mrf.mxu1  ;;  %v2880_v41 = vpop.f32.mrf.mxu2  ;;  %v2371_v35 = vld [vmem:[#allocation2 + $0x142] sm:$0xff]  ;;  %v1962_v36 = vld [vmem:[#allocation2 + $0x151] sm:$0xff] }
 0x2ec   : > { %v2599_v18 = vld [vmem:[#allocation3 + $0x80] sm:$0xff]  ;;  %3338 = vmatmul.f32.gmra.mxu3 %v9902_v7 }
 0x2ed   : > { %2297 = vst.msk [vmem:[#allocation3 + $0x88] sm:$0xff] %vm635_vm0, %v2243_v20  ;;  %v2653_v40 = vadd.f32 %v2599_v18, %v2469_v53  ;;  %2108 = vmatmul.f32.gmra.mxu0 %v1956_v56  ;;  %v3624_v20 = vld [vmem:[%s12748_s1 + $0x418] sm:$0xff] }
 0x2ee   : > { %v3009_v43 = vld [vmem:[#allocation3 + $0x78] sm:$0xff]  ;;  %2519 = vmatmul.f32.gmra.mxu1 %v2367_v38  ;;  %3649 = vmatpush.msra.mxu0 %v3624_v20 }
 0x2ef   : > { %2707 = vst.msk [vmem:[#allocation3 + $0x80] sm:$0xff] %vm635_vm0, %v2653_v40  ;;  %v3063_v23 = vadd.f32 %v3009_v43, %v2877_v12  ;;  %v3291_v47 = vpop.f32.mrf.mxu3  ;;  %v2782_v43 = vld [vmem:[#allocation2 + $0x158] sm:$0xff] }
 0x2f0   : > { %v3419_v45 = vld [vmem:[#allocation3 + $0x70] sm:$0xff]  ;;  %2930 = vmatmul.f32.gmra.mxu2 %v2778_v44 }
 0x2f1   : > { %3117 = vst.msk [vmem:[#allocation3 + $0x78] sm:$0xff] %vm635_vm0, %v3063_v23  ;;  %v3473_v27 = vadd.f32 %v3419_v45, %v3285_v21 }
 0x2f2   : > { %v2064_v49 = vpop.f32.mrf.mxu0 }
 0x2f3   : > { %3527 = vst.msk [vmem:[#allocation3 + $0x70] sm:$0xff] %vm635_vm0, %v3473_v27  ;;  %v2244_v51 = vadd.f32 %v2190_v31, %v2064_v49  ;;  %v2475_v52 = vpop.f32.mrf.mxu1  ;;  %v2883_v57 = vpop.f32.mrf.mxu2  ;;  %v2372_v31 = vld [vmem:[#allocation2 + $0x14a] sm:$0xff] }
 0x2f4   : > { %v2600_v39 = vld [vmem:[#allocation3 + $0x88] sm:$0xff]  ;;  %3341 = vmatmul.f32.gmra.mxu3 %v1959_v54 }
 0x2f5   : > { %2298 = vst.msk [vmem:[#allocation3 + $0x90] sm:$0xff] %vm635_vm0, %v2244_v51  ;;  %v2654_v32 = vadd.f32 %v2600_v39, %v2472_v37  ;;  %2111 = vmatmul.f32.gmra.mxu0 %v1957_v24  ;;  %v1963_v51 = vld [vmem:[#allocation2 + $0x159] sm:$0xff] }
 0x2f6   : > { %v3010_v59 = vld [vmem:[#allocation3 + $0x80] sm:$0xff]  ;;  %2522 = vmatmul.f32.gmra.mxu1 %v2368_v34 }
 0x2f7   : > { %2708 = vst.msk [vmem:[#allocation3 + $0x88] sm:$0xff] %vm635_vm0, %v2654_v32  ;;  %v3064_v60 = vadd.f32 %v3010_v59, %v2880_v41  ;;  %v3294_v55 = vpop.f32.mrf.mxu3 }
 0x2f8   : > { %v3420_v63 = vld [vmem:[#allocation3 + $0x78] sm:$0xff]  ;;  %2933 = vmatmul.f32.gmra.mxu2 %v2779_v61 }
 0x2f9   : > { %3118 = vst.msk [vmem:[#allocation3 + $0x80] sm:$0xff] %vm635_vm0, %v3064_v60  ;;  %v3474_v42 = vadd.f32 %v3420_v63, %v3288_v33 }
 0x2fa   : > { %v2067_v1 = vpop.f32.mrf.mxu0 }
 0x2fb   : > { %3528 = vst.msk [vmem:[#allocation3 + $0x78] sm:$0xff] %vm635_vm0, %v3474_v42  ;;  %v2245_v62 = vadd.f32 %v2191_v2, %v2067_v1  ;;  %v2478_v4 = vpop.f32.mrf.mxu1  ;;  %v2886_v56 = vpop.f32.mrf.mxu2  ;;  %v2195_v42 = vld [vmem:[#allocation3 + $0xb8] sm:$0xff]  ;;  %v2373_v2 = vld [vmem:[#allocation2 + $0x152] sm:$0xff] }
 0x2fc   : > { %v2601_v6 = vld [vmem:[#allocation3 + $0x90] sm:$0xff]  ;;  %3344 = vmatmul.f32.gmra.mxu3 %v1960_v46 }
 0x2fd   : > { %2299 = vst.msk [vmem:[#allocation3 + $0x98] sm:$0xff] %vm635_vm0, %v2245_v62  ;;  %v2655_v9 = vadd.f32 %v2601_v6, %v2475_v52  ;;  %2114 = vmatmul.f32.gmra.mxu0 %v9902_v7 }
 0x2fe   : > { %v3011_v10 = vld [vmem:[#allocation3 + $0x88] sm:$0xff]  ;;  %2525 = vmatmul.f32.gmra.mxu1 %v2369_v50 }
 0x2ff   : > { %2709 = vst.msk [vmem:[#allocation3 + $0x90] sm:$0xff] %vm635_vm0, %v2655_v9  ;;  %v3065_v11 = vadd.f32 %v3011_v10, %v2883_v57  ;;  %v3297_v58 = vpop.f32.mrf.mxu3  ;;  %v2783_v57 = vld [vmem:[#allocation2 + $0x160] sm:$0xff]  ;;  %v2784_v9 = vld [vmem:[#allocation2 + $0x168] sm:$0xff] }
 0x300   : > { %v3421_v14 = vld [vmem:[#allocation3 + $0x80] sm:$0xff]  ;;  %2936 = vmatmul.f32.gmra.mxu2 %v2780_v13 }
 0x301   : > { %3119 = vst.msk [vmem:[#allocation3 + $0x88] sm:$0xff] %vm635_vm0, %v3065_v11  ;;  %v3475_v15 = vadd.f32 %v3421_v14, %v3291_v47  ;;  %v2194_v47 = vld [vmem:[#allocation3 + $0xb0] sm:$0xff]  ;;  %v2196_v14 = vld [vmem:[#allocation3 + $0xc0] sm:$0xff] }
 0x302   : > { %v2070_v17 = vpop.f32.mrf.mxu0 }
 0x303   : > { %3529 = vst.msk [vmem:[#allocation3 + $0x80] sm:$0xff] %vm635_vm0, %v3475_v15  ;;  %v2246_v21 = vadd.f32 %v2192_v19, %v2070_v17  ;;  %v2481_v0 = vpop.f32.mrf.mxu1  ;;  %v2889_v5 = vpop.f32.mrf.mxu2  ;;  %v2374_v17 = vld [vmem:[#allocation2 + $0x15a] sm:$0xff]  ;;  %v1965_v19 = vld [vmem:[#allocation2 + $0x169] sm:$0xff] }
 0x304   : > { %v2602_v3 = vld [vmem:[#allocation3 + $0x98] sm:$0xff]  ;;  %3347 = vmatmul.f32.gmra.mxu3 %v9902_v7 }
 0x305   : > { %2300 = vst.msk [vmem:[#allocation3 + $0xa0] sm:$0xff] %vm635_vm0, %v2246_v21  ;;  %v2656_v53 = vadd.f32 %v2602_v3, %v2478_v4  ;;  %2117 = vmatmul.f32.gmra.mxu0 %v1959_v54 }
 0x306   : > { %v3012_v24 = vld [vmem:[#allocation3 + $0x90] sm:$0xff]  ;;  %2528 = vmatmul.f32.gmra.mxu1 %v2370_v22 }
 0x307   : > { %2710 = vst.msk [vmem:[#allocation3 + $0x98] sm:$0xff] %vm635_vm0, %v2656_v53  ;;  %v3066_v25 = vadd.f32 %v3012_v24, %v2886_v56  ;;  %v3300_v28 = vpop.f32.mrf.mxu3  ;;  %v2785_v53 = vld [vmem:[#allocation2 + $0x170] sm:$0xff] }
 0x308   : > { %v3422_v12 = vld [vmem:[#allocation3 + $0x88] sm:$0xff]  ;;  %2939 = vmatmul.f32.gmra.mxu2 %v2781_v26 }
 0x309   : > { %3120 = vst.msk [vmem:[#allocation3 + $0x90] sm:$0xff] %vm635_vm0, %v3066_v25  ;;  %v3476_v8 = vadd.f32 %v3422_v12, %v3294_v55 }
 0x30a   : > { %v2073_v29 = vpop.f32.mrf.mxu0 }
 0x30b   : > { %3530 = vst.msk [vmem:[#allocation3 + $0x88] sm:$0xff] %vm635_vm0, %v3476_v8  ;;  %v2247_v16 = vadd.f32 %v2193_v30, %v2073_v29  ;;  %v2484_v33 = vpop.f32.mrf.mxu1  ;;  %v2892_v18 = vpop.f32.mrf.mxu2  ;;  %v2197_v8 = vld [vmem:[#allocation3 + $0xc8] sm:$0xff]  ;;  %v2375_v30 = vld [vmem:[#allocation2 + $0x162] sm:$0xff] }
 0x30c   : > { %v2603_v37 = vld [vmem:[#allocation3 + $0xa0] sm:$0xff]  ;;  %3350 = vmatmul.f32.gmra.mxu3 %v1962_v36 }
 0x30d   : > { %2301 = vst.msk [vmem:[#allocation3 + $0xa8] sm:$0xff] %vm635_vm0, %v2247_v16  ;;  %v2657_v38 = vadd.f32 %v2603_v37, %v2481_v0  ;;  %2120 = vmatmul.f32.gmra.mxu0 %v1960_v46  ;;  %v1966_v16 = vld [vmem:[#allocation2 + $0x171] sm:$0xff] }
 0x30e   : > { %v3013_v40 = vld [vmem:[#allocation3 + $0x98] sm:$0xff]  ;;  %2531 = vmatmul.f32.gmra.mxu1 %v2371_v35 }
 0x30f   : > { %2711 = vst.msk [vmem:[#allocation3 + $0xa0] sm:$0xff] %vm635_vm0, %v2657_v38  ;;  %v3067_v41 = vadd.f32 %v3013_v40, %v2889_v5  ;;  %v3303_v45 = vpop.f32.mrf.mxu3  ;;  %v3623_v5 = vld [vmem:[%s12748_s1 + $0x410] sm:$0xff] }
 0x310   : > { %v3423_v23 = vld [vmem:[#allocation3 + $0x90] sm:$0xff]  ;;  %2942 = vmatmul.f32.gmra.mxu2 %v2782_v43  ;;  %3650 = vmatpush.msra.mxu0 %v3623_v5 }
 0x311   : > { %3121 = vst.msk [vmem:[#allocation3 + $0x98] sm:$0xff] %vm635_vm0, %v3067_v41  ;;  %v3477_v44 = vadd.f32 %v3423_v23, %v3297_v58 }
 0x312   : > { %v2076_v27 = vpop.f32.mrf.mxu0 }
 0x313   : > { %3531 = vst.msk [vmem:[#allocation3 + $0x90] sm:$0xff] %vm635_vm0, %v3477_v44  ;;  %v2248_v48 = vadd.f32 %v2194_v47, %v2076_v27  ;;  %v2487_v49 = vpop.f32.mrf.mxu1  ;;  %v2895_v54 = vpop.f32.mrf.mxu2  ;;  %v2198_v44 = vld [vmem:[#allocation3 + $0xd0] sm:$0xff]  ;;  %v2376_v47 = vld [vmem:[#allocation2 + $0x16a] sm:$0xff] }
 0x314   : > { %v2604_v52 = vld [vmem:[#allocation3 + $0xa8] sm:$0xff]  ;;  %3353 = vmatmul.f32.gmra.mxu3 %v1963_v51 }
 0x315   : > { %2302 = vst.msk [vmem:[#allocation3 + $0xb0] sm:$0xff] %vm635_vm0, %v2248_v48  ;;  %v2658_v34 = vadd.f32 %v2604_v52, %v2484_v33  ;;  %2123 = vmatmul.f32.gmra.mxu0 %v9902_v7 }
 0x316   : > { %v3014_v39 = vld [vmem:[#allocation3 + $0xa0] sm:$0xff]  ;;  %2534 = vmatmul.f32.gmra.mxu1 %v2372_v31 }
 0x317   : > { %2712 = vst.msk [vmem:[#allocation3 + $0xa8] sm:$0xff] %vm635_vm0, %v2658_v34  ;;  %v3068_v32 = vadd.f32 %v3014_v39, %v2892_v18  ;;  %v3306_v61 = vpop.f32.mrf.mxu3  ;;  %v2786_v18 = vld [vmem:[#allocation2 + $0x178] sm:$0xff]  ;;  %v2787_v34 = vld [vmem:[#allocation2 + $0x180] sm:$0xff] }
 0x318   : > { %v3424_v59 = vld [vmem:[#allocation3 + $0x98] sm:$0xff]  ;;  %2945 = vmatmul.f32.gmra.mxu2 %v2783_v57 }
 0x319   : > { %3122 = vst.msk [vmem:[#allocation3 + $0xa0] sm:$0xff] %vm635_vm0, %v3068_v32  ;;  %v3478_v60 = vadd.f32 %v3424_v59, %v3300_v28  ;;  %v2199_v59 = vld [vmem:[#allocation3 + $0xd8] sm:$0xff] }
 0x31a   : > { %v2079_v63 = vpop.f32.mrf.mxu0 }
 0x31b   : > { %3532 = vst.msk [vmem:[#allocation3 + $0x98] sm:$0xff] %vm635_vm0, %v3478_v60  ;;  %v2249_v55 = vadd.f32 %v2195_v42, %v2079_v63  ;;  %v2490_v1 = vpop.f32.mrf.mxu1  ;;  %v2898_v50 = vpop.f32.mrf.mxu2  ;;  %v2377_v63 = vld [vmem:[#allocation2 + $0x172] sm:$0xff]  ;;  %v1968_v42 = vld [vmem:[#allocation2 + $0x181] sm:$0xff] }
 0x31c   : > { %v2605_v62 = vld [vmem:[#allocation3 + $0xb0] sm:$0xff]  ;;  %3356 = vmatmul.f32.gmra.mxu3 %v9902_v7 }
 0x31d   : > { %2303 = vst.msk [vmem:[#allocation3 + $0xb8] sm:$0xff] %vm635_vm0, %v2249_v55  ;;  %v2659_v4 = vadd.f32 %v2605_v62, %v2487_v49  ;;  %2126 = vmatmul.f32.gmra.mxu0 %v1962_v36  ;;  %v10032_v36 = vld [vmem:[#allocation2] sm:$0xff] }
 0x31e   : > { %v3015_v46 = vld [vmem:[#allocation3 + $0xa8] sm:$0xff]  ;;  %2537 = vmatmul.f32.gmra.mxu1 %v2373_v2 }
 0x31f   : > { %2713 = vst.msk [vmem:[#allocation3 + $0xb0] sm:$0xff] %vm635_vm0, %v2659_v4  ;;  %v3069_v6 = vadd.f32 %v3015_v46, %v2895_v54  ;;  %v3309_v11 = vpop.f32.mrf.mxu3 }
 0x320   : > { %v3425_v56 = vld [vmem:[#allocation3 + $0xa0] sm:$0xff]  ;;  %2948 = vmatmul.f32.gmra.mxu2 %v2784_v9 }
 0x321   : > { %3123 = vst.msk [vmem:[#allocation3 + $0xa8] sm:$0xff] %vm635_vm0, %v3069_v6  ;;  %v3479_v10 = vadd.f32 %v3425_v56, %v3303_v45  ;;  %v3622_v56 = vld [vmem:[%s12748_s1 + $0x408] sm:$0xff] }
 0x322   : > { %v2082_v13 = vpop.f32.mrf.mxu0  ;;  %3651 = vmatpush.msra.mxu0 %v3622_v56  ;;  %v2382_v56 = vld [vmem:[#allocation2 + $0x19a] sm:$0xff] }
 0x323   : > { %3533 = vst.msk [vmem:[#allocation3 + $0xa0] sm:$0xff] %vm635_vm0, %v3479_v10  ;;  %v2250_v15 = vadd.f32 %v2196_v14, %v2082_v13  ;;  %v2493_v58 = vpop.f32.mrf.mxu1  ;;  %v2901_v0 = vpop.f32.mrf.mxu2 }
 0x324   : > { %v2606_v21 = vld [vmem:[#allocation3 + $0xb8] sm:$0xff]  ;;  %3359 = vmatmul.f32.gmra.mxu3 %v1965_v19 }
 0x325   : > { %2304 = vst.msk [vmem:[#allocation3 + $0xc0] sm:$0xff] %vm635_vm0, %v2250_v15  ;;  %v2660_v7 = vadd.f32 %v2606_v21, %v2490_v1  ;;  %2129 = vmatmul.f32.gmra.mxu0 %v1963_v51  ;;  %v2378_v15 = vld [vmem:[#allocation2 + $0x17a] sm:$0xff] }
 0x326   : > { %v3016_v22 = vld [vmem:[#allocation3 + $0xb0] sm:$0xff]  ;;  %2540 = vmatmul.f32.gmra.mxu1 %v2374_v17 }
 0x327   : > { %2714 = vst.msk [vmem:[#allocation3 + $0xb8] sm:$0xff] %vm635_vm0, %v2660_v7  ;;  %v3070_v3 = vadd.f32 %v3016_v22, %v2898_v50  ;;  %v3312_v26 = vpop.f32.mrf.mxu3  ;;  %v2788_v50 = vld [vmem:[#allocation2 + $0x188] sm:$0xff]  ;;  %v2789_v22 = vld [vmem:[#allocation2 + $0x190] sm:$0xff] }
 0x328   : > { %v3426_v24 = vld [vmem:[#allocation3 + $0xa8] sm:$0xff]  ;;  %2951 = vmatmul.f32.gmra.mxu2 %v2785_v53 }
 0x329   : > { %3124 = vst.msk [vmem:[#allocation3 + $0xb0] sm:$0xff] %vm635_vm0, %v3070_v3  ;;  %v3480_v25 = vadd.f32 %v3426_v24, %v3306_v61 }
 0x32a   : > { %v2085_v12 = vpop.f32.mrf.mxu0 }
 0x32b   : > { %3534 = vst.msk [vmem:[#allocation3 + $0xa8] sm:$0xff] %vm635_vm0, %v3480_v25  ;;  %v2251_v28 = vadd.f32 %v2197_v8, %v2085_v12  ;;  %v2496_v29 = vpop.f32.mrf.mxu1  ;;  %v2904_v20 = vpop.f32.mrf.mxu2  ;;  %v2201_v25 = vld [vmem:[#allocation3 + $0xe8] sm:$0xff]  ;;  %v2379_v8 = vld [vmem:[#allocation2 + $0x182] sm:$0xff] }
 0x32c   : > { %v2607_v33 = vld [vmem:[#allocation3 + $0xc0] sm:$0xff]  ;;  %3362 = vmatmul.f32.gmra.mxu3 %v1966_v16 }
 0x32d   : > { %2305 = vst.msk [vmem:[#allocation3 + $0xc8] sm:$0xff] %vm635_vm0, %v2251_v28  ;;  %v2661_v35 = vadd.f32 %v2607_v33, %v2493_v58  ;;  %2132 = vmatmul.f32.gmra.mxu0 %v10032_v36  ;;  %v1969_v58 = vld [vmem:[#allocation2 + $0x189] sm:$0xff] }
 0x32e   : > { %v3017_v37 = vld [vmem:[#allocation3 + $0xb8] sm:$0xff]  ;;  %2543 = vmatmul.f32.gmra.mxu1 %v2375_v30 }
 0x32f   : > { %2715 = vst.msk [vmem:[#allocation3 + $0xc0] sm:$0xff] %vm635_vm0, %v2661_v35  ;;  %v3071_v38 = vadd.f32 %v3017_v37, %v2901_v0  ;;  %v3315_v43 = vpop.f32.mrf.mxu3  ;;  %v2790_v35 = vld [vmem:[#allocation2 + $0x198] sm:$0xff] }
 0x330   : > { %v3427_v40 = vld [vmem:[#allocation3 + $0xb0] sm:$0xff]  ;;  %2954 = vmatmul.f32.gmra.mxu2 %v2786_v18 }
 0x331   : > { %3125 = vst.msk [vmem:[#allocation3 + $0xb8] sm:$0xff] %vm635_vm0, %v3071_v38  ;;  %v3481_v41 = vadd.f32 %v3427_v40, %v3309_v11  ;;  %v2200_v11 = vld [vmem:[#allocation3 + $0xe0] sm:$0xff]  ;;  %v2202_v40 = vld [vmem:[#allocation3 + $0xf0] sm:$0xff] }
 0x332   : > { %v2088_v23 = vpop.f32.mrf.mxu0 }
 0x333   : > { %3535 = vst.msk [vmem:[#allocation3 + $0xb0] sm:$0xff] %vm635_vm0, %v3481_v41  ;;  %v2252_v45 = vadd.f32 %v2198_v44, %v2088_v23  ;;  %v2499_v27 = vpop.f32.mrf.mxu1  ;;  %v2907_v31 = vpop.f32.mrf.mxu2  ;;  %v2380_v23 = vld [vmem:[#allocation2 + $0x18a] sm:$0xff] }
 0x334   : > { %v2608_v48 = vld [vmem:[#allocation3 + $0xc8] sm:$0xff]  ;;  %3365 = vmatmul.f32.gmra.mxu3 %v10032_v36 }
 0x335   : > { %2306 = vst.msk [vmem:[#allocation3 + $0xd0] sm:$0xff] %vm635_vm0, %v2252_v45  ;;  %v2662_v49 = vadd.f32 %v2608_v48, %v2496_v29  ;;  %2135 = vmatmul.f32.gmra.mxu0 %v1965_v19 }
 0x336   : > { %v3018_v51 = vld [vmem:[#allocation3 + $0xc0] sm:$0xff]  ;;  %2546 = vmatmul.f32.gmra.mxu1 %v2376_v47 }
 0x337   : > { %2716 = vst.msk [vmem:[#allocation3 + $0xc8] sm:$0xff] %vm635_vm0, %v2662_v49  ;;  %v3072_v52 = vadd.f32 %v3018_v51, %v2904_v20  ;;  %v3318_v32 = vpop.f32.mrf.mxu3  ;;  %v2791_v49 = vld [vmem:[#allocation2 + $0x1a0] sm:$0xff] }
 0x338   : > { %v3428_v54 = vld [vmem:[#allocation3 + $0xb8] sm:$0xff]  ;;  %2957 = vmatmul.f32.gmra.mxu2 %v2787_v34 }
 0x339   : > { %3126 = vst.msk [vmem:[#allocation3 + $0xc0] sm:$0xff] %vm635_vm0, %v3072_v52  ;;  %v3482_v39 = vadd.f32 %v3428_v54, %v3312_v26  ;;  %v2203_v54 = vld [vmem:[#allocation3 + $0xf8] sm:$0xff] }
 0x33a   : > { %v2091_v57 = vpop.f32.mrf.mxu0 }
 0x33b   : > { %3536 = vst.msk [vmem:[#allocation3 + $0xb8] sm:$0xff] %vm635_vm0, %v3482_v39  ;;  %v2253_v60 = vadd.f32 %v2199_v59, %v2091_v57  ;;  %v2502_v61 = vpop.f32.mrf.mxu1  ;;  %v2910_v2 = vpop.f32.mrf.mxu2  ;;  %v2381_v57 = vld [vmem:[#allocation2 + $0x192] sm:$0xff] }
 0x33c   : > { %v2609_v55 = vld [vmem:[#allocation3 + $0xd0] sm:$0xff]  ;;  %3368 = vmatmul.f32.gmra.mxu3 %v1968_v42 }
 0x33d   : > { %2307 = vst.msk [vmem:[#allocation3 + $0xd8] sm:$0xff] %vm635_vm0, %v2253_v60  ;;  %v2663_v1 = vadd.f32 %v2609_v55, %v2499_v27  ;;  %2138 = vmatmul.f32.gmra.mxu0 %v1966_v16 }
 0x33e   : > { %v3019_v62 = vld [vmem:[#allocation3 + $0xc8] sm:$0xff]  ;;  %2549 = vmatmul.f32.gmra.mxu1 %v2377_v63  ;;  %v3621_v63 = vld [vmem:[%s12748_s1 + $0x400] sm:$0xff] }
 0x33f   : > { %2717 = vst.msk [vmem:[#allocation3 + $0xd0] sm:$0xff] %vm635_vm0, %v2663_v1  ;;  %v3073_v4 = vadd.f32 %v3019_v62, %v2907_v31  ;;  %v3321_v9 = vpop.f32.mrf.mxu3  ;;  %v2792_v1 = vld [vmem:[#allocation2 + $0x1a8] sm:$0xff]  ;;  %3652 = vmatpush.msra.mxu0 %v3621_v63 }
 0x340   : > { %v3429_v46 = vld [vmem:[#allocation3 + $0xc0] sm:$0xff]  ;;  %2960 = vmatmul.f32.gmra.mxu2 %v2788_v50 }
 0x341   : > { %3127 = vst.msk [vmem:[#allocation3 + $0xc8] sm:$0xff] %vm635_vm0, %v3073_v4  ;;  %v3483_v6 = vadd.f32 %v3429_v46, %v3315_v43  ;;  %v2204_v46 = vld [vmem:[#allocation3 + $0x100] sm:$0xff] }
 0x342   : > { %v2094_v10 = vpop.f32.mrf.mxu0 }
 0x343   : > { %3537 = vst.msk [vmem:[#allocation3 + $0xc0] sm:$0xff] %vm635_vm0, %v3483_v6  ;;  %v2254_v13 = vadd.f32 %v2200_v11, %v2094_v10  ;;  %v2505_v14 = vpop.f32.mrf.mxu1  ;;  %v2913_v21 = vpop.f32.mrf.mxu2  ;;  %v1973_v10 = vld [vmem:[#allocation2 + $0x1a9] sm:$0xff] }
 0x344   : > { %v2610_v17 = vld [vmem:[#allocation3 + $0xd8] sm:$0xff]  ;;  %3371 = vmatmul.f32.gmra.mxu3 %v1969_v58 }
 0x345   : > { %2308 = vst.msk [vmem:[#allocation3 + $0xe0] sm:$0xff] %vm635_vm0, %v2254_v13  ;;  %v2664_v19 = vadd.f32 %v2610_v17, %v2502_v61  ;;  %2141 = vmatmul.f32.gmra.mxu0 %v10032_v36 }
 0x346   : > { %v3020_v7 = vld [vmem:[#allocation3 + $0xd0] sm:$0xff]  ;;  %2552 = vmatmul.f32.gmra.mxu1 %v2378_v15 }
 0x347   : > { %2718 = vst.msk [vmem:[#allocation3 + $0xd8] sm:$0xff] %vm635_vm0, %v2664_v19  ;;  %v3074_v0 = vadd.f32 %v3020_v7, %v2910_v2  ;;  %v3324_v5 = vpop.f32.mrf.mxu3 }
 0x348   : > { %v3430_v3 = vld [vmem:[#allocation3 + $0xc8] sm:$0xff]  ;;  %2963 = vmatmul.f32.gmra.mxu2 %v2789_v22 }
 0x349   : > { %3128 = vst.msk [vmem:[#allocation3 + $0xd0] sm:$0xff] %vm635_vm0, %v3074_v0  ;;  %v3484_v53 = vadd.f32 %v3430_v3, %v3318_v32  ;;  %v2205_v0 = vld [vmem:[#allocation3 + $0x108] sm:$0xff] }
 0x34a   : > { %v2097_v24 = vpop.f32.mrf.mxu0 }
 0x34b   : > { %3538 = vst.msk [vmem:[#allocation3 + $0xc8] sm:$0xff] %vm635_vm0, %v3484_v53  ;;  %v2255_v26 = vadd.f32 %v2201_v25, %v2097_v24  ;;  %v2508_v12 = vpop.f32.mrf.mxu1  ;;  %v2916_v30 = vpop.f32.mrf.mxu2  ;;  %v2383_v53 = vld [vmem:[#allocation2 + $0x1a2] sm:$0xff] }
 0x34c   : > { %v2611_v28 = vld [vmem:[#allocation3 + $0xe0] sm:$0xff]  ;;  %3374 = vmatmul.f32.gmra.mxu3 %v10032_v36 }
 0x34d   : > { %2309 = vst.msk [vmem:[#allocation3 + $0xe8] sm:$0xff] %vm635_vm0, %v2255_v26  ;;  %v2665_v29 = vadd.f32 %v2611_v28, %v2505_v14  ;;  %2144 = vmatmul.f32.gmra.mxu0 %v1968_v42 }
 0x34e   : > { %v3021_v16 = vld [vmem:[#allocation3 + $0xd8] sm:$0xff]  ;;  %2555 = vmatmul.f32.gmra.mxu1 %v2379_v8 }
 0x34f   : > { %2719 = vst.msk [vmem:[#allocation3 + $0xe0] sm:$0xff] %vm635_vm0, %v2665_v29  ;;  %v3075_v33 = vadd.f32 %v3021_v16, %v2913_v21  ;;  %v3327_v38 = vpop.f32.mrf.mxu3 }
 0x350   : > { %v3431_v20 = vld [vmem:[#allocation3 + $0xd0] sm:$0xff]  ;;  %2966 = vmatmul.f32.gmra.mxu2 %v2790_v35 }
 0x351   : > { %3129 = vst.msk [vmem:[#allocation3 + $0xd8] sm:$0xff] %vm635_vm0, %v3075_v33  ;;  %v3485_v37 = vadd.f32 %v3431_v20, %v3321_v9  ;;  %v2206_v33 = vld [vmem:[#allocation3 + $0x110] sm:$0xff] }
 0x352   : > { %v2100_v18 = vpop.f32.mrf.mxu0 }
 0x353   : > { %3539 = vst.msk [vmem:[#allocation3 + $0xd0] sm:$0xff] %vm635_vm0, %v3485_v37  ;;  %v2256_v41 = vadd.f32 %v2202_v40, %v2100_v18  ;;  %v2511_v43 = vpop.f32.mrf.mxu1  ;;  %v2919_v27 = vpop.f32.mrf.mxu2  ;;  %v2384_v37 = vld [vmem:[#allocation2 + $0x1aa] sm:$0xff] }
 0x354   : > { %v2612_v44 = vld [vmem:[#allocation3 + $0xe8] sm:$0xff]  ;;  %3377 = vmatmul.f32.gmra.mxu3 %v10032_v36 }
 0x355   : > { %2310 = vst.msk [vmem:[#allocation3 + $0xf0] sm:$0xff] %vm635_vm0, %v2256_v41  ;;  %v2666_v45 = vadd.f32 %v2612_v44, %v2508_v12  ;;  %2147 = vmatmul.f32.gmra.mxu0 %v1969_v58 }
 0x356   : > { %v3022_v47 = vld [vmem:[#allocation3 + $0xe0] sm:$0xff]  ;;  %2558 = vmatmul.f32.gmra.mxu1 %v2380_v23 }
 0x357   : > { %2720 = vst.msk [vmem:[#allocation3 + $0xe8] sm:$0xff] %vm635_vm0, %v2666_v45  ;;  %v3076_v48 = vadd.f32 %v3022_v47, %v2916_v30  ;;  %v3330_v52 = vpop.f32.mrf.mxu3 }
 0x358   : > { %v3432_v31 = vld [vmem:[#allocation3 + $0xd8] sm:$0xff]  ;;  %2969 = vmatmul.f32.gmra.mxu2 %v2791_v49 }
 0x359   : > { %3130 = vst.msk [vmem:[#allocation3 + $0xe0] sm:$0xff] %vm635_vm0, %v3076_v48  ;;  %v3486_v51 = vadd.f32 %v3432_v31, %v3324_v5  ;;  %v1974_v5 = vld [vmem:[#allocation2 + $0x1b1] sm:$0xff]  ;;  %v2207_v48 = vld [vmem:[#allocation3 + $0x118] sm:$0xff] }
 0x35a   : > { %v2103_v34 = vpop.f32.mrf.mxu0 }
 0x35b   : > { %3540 = vst.msk [vmem:[#allocation3 + $0xd8] sm:$0xff] %vm635_vm0, %v3486_v51  ;;  %v2257_v39 = vadd.f32 %v2203_v54, %v2103_v34  ;;  %v2514_v32 = vpop.f32.mrf.mxu1  ;;  %v2922_v61 = vpop.f32.mrf.mxu2  ;;  %v2385_v51 = vld [vmem:[#allocation2 + $0x1b2] sm:$0xff] }
 0x35c   : > { %v2613_v59 = vld [vmem:[#allocation3 + $0xf0] sm:$0xff]  ;;  %3380 = vmatmul.f32.gmra.mxu3 %v10032_v36 }
 0x35d   : > { %2311 = vst.msk [vmem:[#allocation3 + $0xf8] sm:$0xff] %vm635_vm0, %v2257_v39  ;;  %v2667_v60 = vadd.f32 %v2613_v59, %v2511_v43  ;;  %2150 = vmatmul.f32.gmra.mxu0 %v10032_v36 }
 0x35e   : > { %v3023_v42 = vld [vmem:[#allocation3 + $0xe8] sm:$0xff]  ;;  %2561 = vmatmul.f32.gmra.mxu1 %v2381_v57 }
 0x35f   : > { %2721 = vst.msk [vmem:[#allocation3 + $0xf0] sm:$0xff] %vm635_vm0, %v2667_v60  ;;  %v3077_v55 = vadd.f32 %v3023_v42, %v2919_v27  ;;  %v3333_v4 = vpop.f32.mrf.mxu3  ;;  %v2208_v42 = vld [vmem:[#allocation3 + $0x120] sm:$0xff] }
 0x360   : > { %v3433_v2 = vld [vmem:[#allocation3 + $0xe0] sm:$0xff]  ;;  %2972 = vmatmul.f32.gmra.mxu2 %v2792_v1 }
 0x361   : > { %3131 = vst.msk [vmem:[#allocation3 + $0xe8] sm:$0xff] %vm635_vm0, %v3077_v55  ;;  %v3487_v62 = vadd.f32 %v3433_v2, %v3327_v38  ;;  %v1975_v38 = vld [vmem:[#allocation2 + $0x1b9] sm:$0xff] }
 0x362   : > { %v2106_v50 = vpop.f32.mrf.mxu0  ;;  %v2386_v2 = vld [vmem:[#allocation2 + $0x1ba] sm:$0xff] }
 0x363   : > { %3541 = vst.msk [vmem:[#allocation3 + $0xe0] sm:$0xff] %vm635_vm0, %v3487_v62  ;;  %v2258_v6 = vadd.f32 %v2204_v46, %v2106_v50  ;;  %v2517_v9 = vpop.f32.mrf.mxu1  ;;  %v2925_v14 = vpop.f32.mrf.mxu2  ;;  %v3207_v62 = vld [vmem:[#allocation2 + $0x1c9] sm:$0xff] }
 0x364   : > { %v2614_v11 = vld [vmem:[#allocation3 + $0xf8] sm:$0xff]  ;;  %3383 = vmatmul.f32.gmra.mxu3 %v1973_v10 }
 0x365   : > { %2312 = vst.msk [vmem:[#allocation3 + $0x100] sm:$0xff] %vm635_vm0, %v2258_v6  ;;  %v2668_v13 = vadd.f32 %v2614_v11, %v2514_v32  ;;  %2153 = vmatmul.f32.gmra.mxu0 %v10032_v36 }
 0x366   : > { %v3024_v15 = vld [vmem:[#allocation3 + $0xf0] sm:$0xff]  ;;  %2564 = vmatmul.f32.gmra.mxu1 %v2382_v56 }
 0x367   : > { %2722 = vst.msk [vmem:[#allocation3 + $0xf8] sm:$0xff] %vm635_vm0, %v2668_v13  ;;  %v3078_v58 = vadd.f32 %v3024_v15, %v2922_v61  ;;  %v3336_v21 = vpop.f32.mrf.mxu3 }
 0x368   : > { %v3434_v17 = vld [vmem:[#allocation3 + $0xe8] sm:$0xff]  ;;  %2975 = vmatmul.f32.gmra.mxu2 %v10032_v36 }
 0x369   : > { %3132 = vst.msk [vmem:[#allocation3 + $0xf0] sm:$0xff] %vm635_vm0, %v3078_v58  ;;  %v3488_v19 = vadd.f32 %v3434_v17, %v3330_v52  ;;  %v1976_v52 = vld [vmem:[#allocation2 + $0x1c1] sm:$0xff] }
 0x36a   : > { %v2109_v7 = vpop.f32.mrf.mxu0  ;;  %v2387_v17 = vld [vmem:[#allocation2 + $0x1c2] sm:$0xff] }
 0x36b   : > { %3542 = vst.msk [vmem:[#allocation3 + $0xe8] sm:$0xff] %vm635_vm0, %v3488_v19  ;;  %v2259_v22 = vadd.f32 %v2205_v0, %v2109_v7  ;;  %v2520_v3 = vpop.f32.mrf.mxu1  ;;  %v2928_v26 = vpop.f32.mrf.mxu2  ;;  %v3208_v19 = vld [vmem:[#allocation2 + $0x1d1] sm:$0xff] }
 0x36c   : > { %v2615_v24 = vld [vmem:[#allocation3 + $0x100] sm:$0xff]  ;;  %3386 = vmatmul.f32.gmra.mxu3 %v1974_v5 }
 0x36d   : > { %2313 = vst.msk [vmem:[#allocation3 + $0x108] sm:$0xff] %vm635_vm0, %v2259_v22  ;;  %v2669_v25 = vadd.f32 %v2615_v24, %v2517_v9  ;;  %2156 = vmatmul.f32.gmra.mxu0 %v10032_v36 }
 0x36e   : > { %v3025_v12 = vld [vmem:[#allocation3 + $0xf8] sm:$0xff]  ;;  %2567 = vmatmul.f32.gmra.mxu1 %v2383_v53 }
 0x36f   : > { %2723 = vst.msk [vmem:[#allocation3 + $0x100] sm:$0xff] %vm635_vm0, %v2669_v25  ;;  %v3079_v8 = vadd.f32 %v3025_v12, %v2925_v14  ;;  %v3339_v30 = vpop.f32.mrf.mxu3  ;;  %v2209_v14 = vld [vmem:[#allocation3 + $0x128] sm:$0xff] }
 0x370   : > { %v3435_v28 = vld [vmem:[#allocation3 + $0xf0] sm:$0xff]  ;;  %2978 = vmatmul.f32.gmra.mxu2 %v10032_v36 }
 0x371   : > { %3133 = vst.msk [vmem:[#allocation3 + $0xf8] sm:$0xff] %vm635_vm0, %v3079_v8  ;;  %v3489_v29 = vadd.f32 %v3435_v28, %v3333_v4  ;;  %v3567_v12 = vld [vmem:[#allocation2 + $0x32] sm:$0xff] }
 0x372   : > { %v2112_v16 = vpop.f32.mrf.mxu0 }
 0x373   : > { %3543 = vst.msk [vmem:[#allocation3 + $0xf0] sm:$0xff] %vm635_vm0, %v3489_v29  ;;  %v2260_v35 = vadd.f32 %v2206_v33, %v2112_v16  ;;  %v2523_v20 = vpop.f32.mrf.mxu1  ;;  %v2931_v41 = vpop.f32.mrf.mxu2  ;;  %v3209_v29 = vld [vmem:[#allocation2 + $0x1d9] sm:$0xff] }
 0x374   : > { %v2616_v18 = vld [vmem:[#allocation3 + $0x108] sm:$0xff]  ;;  %3389 = vmatmul.f32.gmra.mxu3 %v1975_v38 }
 0x375   : > { %2314 = vst.msk [vmem:[#allocation3 + $0x110] sm:$0xff] %vm635_vm0, %v2260_v35  ;;  %v2670_v40 = vadd.f32 %v2616_v18, %v2520_v3  ;;  %2159 = vmatmul.f32.gmra.mxu0 %v1973_v10 }
 0x376   : > { %v3026_v43 = vld [vmem:[#allocation3 + $0x100] sm:$0xff]  ;;  %2570 = vmatmul.f32.gmra.mxu1 %v2384_v37 }
 0x377   : > { %2724 = vst.msk [vmem:[#allocation3 + $0x108] sm:$0xff] %vm635_vm0, %v2670_v40  ;;  %v3080_v23 = vadd.f32 %v3026_v43, %v2928_v26  ;;  %v3342_v27 = vpop.f32.mrf.mxu3  ;;  %v2210_v26 = vld [vmem:[#allocation3 + $0x130] sm:$0xff]  ;;  %v2211_v40 = vld [vmem:[#allocation3 + $0x138] sm:$0xff] }
 0x378   : > { %v3436_v44 = vld [vmem:[#allocation3 + $0xf8] sm:$0xff]  ;;  %2981 = vmatmul.f32.gmra.mxu2 %v10032_v36 }
 0x379   : > { %3134 = vst.msk [vmem:[#allocation3 + $0x100] sm:$0xff] %vm635_vm0, %v3080_v23  ;;  %v3490_v45 = vadd.f32 %v3436_v44, %v3336_v21 }
 0x37a   : > { %v2115_v47 = vpop.f32.mrf.mxu0 }
 0x37b   : > { %3544 = vst.msk [vmem:[#allocation3 + $0xf8] sm:$0xff] %vm635_vm0, %v3490_v45  ;;  %v2261_v49 = vadd.f32 %v2207_v48, %v2115_v47  ;;  %v2526_v31 = vpop.f32.mrf.mxu1  ;;  %v2934_v39 = vpop.f32.mrf.mxu2 }
 0x37c   : > { %v2617_v34 = vld [vmem:[#allocation3 + $0x110] sm:$0xff]  ;;  %3392 = vmatmul.f32.gmra.mxu3 %v1976_v52 }
 0x37d   : > { %2315 = vst.msk [vmem:[#allocation3 + $0x118] sm:$0xff] %vm635_vm0, %v2261_v49  ;;  %v2671_v54 = vadd.f32 %v2617_v34, %v2523_v20  ;;  %2162 = vmatmul.f32.gmra.mxu0 %v1974_v5  ;;  %v2212_v34 = vld [vmem:[#allocation3 + $0x140] sm:$0xff] }
 0x37e   : > { %v3027_v32 = vld [vmem:[#allocation3 + $0x108] sm:$0xff]  ;;  %2573 = vmatmul.f32.gmra.mxu1 %v2385_v51 }
 0x37f   : > { %2725 = vst.msk [vmem:[#allocation3 + $0x110] sm:$0xff] %vm635_vm0, %v2671_v54  ;;  %v3081_v57 = vadd.f32 %v3027_v32, %v2931_v41  ;;  %v3345_v61 = vpop.f32.mrf.mxu3  ;;  %v3568_v41 = vld [vmem:[#allocation2 + $0x3a] sm:$0xff]  ;;  %v3569_v54 = vld [vmem:[#allocation2 + $0x42] sm:$0xff] }
 0x380   : > { %v3437_v59 = vld [vmem:[#allocation3 + $0x100] sm:$0xff]  ;;  %2984 = vmatmul.f32.gmra.mxu2 %v10032_v36 }
 0x381   : > { %3135 = vst.msk [vmem:[#allocation3 + $0x108] sm:$0xff] %vm635_vm0, %v3081_v57  ;;  %v3491_v60 = vadd.f32 %v3437_v59, %v3339_v30 }
 0x382   : > { %v2118_v63 = vpop.f32.mrf.mxu0 }
 0x383   : > { %3545 = vst.msk [vmem:[#allocation3 + $0x100] sm:$0xff] %vm635_vm0, %v3491_v60  ;;  %v2262_v55 = vadd.f32 %v2208_v42, %v2118_v63  ;;  %v2529_v1 = vpop.f32.mrf.mxu1  ;;  %v2937_v46 = vpop.f32.mrf.mxu2 }
 0x384   : > { %v2618_v4 = vld [vmem:[#allocation3 + $0x118] sm:$0xff]  ;;  %3395 = vmatmul.f32.gmra.mxu3 %v3207_v62  ;;  %v2213_v62 = vld [vmem:[#allocation3 + $0x148] sm:$0xff] }
 0x385   : > { %2316 = vst.msk [vmem:[#allocation3 + $0x120] sm:$0xff] %vm635_vm0, %v2262_v55  ;;  %v2672_v50 = vadd.f32 %v2618_v4, %v2526_v31  ;;  %2165 = vmatmul.f32.gmra.mxu0 %v1975_v38  ;;  %v3570_v4 = vld [vmem:[#allocation2 + $0x4a] sm:$0xff] }
 0x386   : > { %v3028_v6 = vld [vmem:[#allocation3 + $0x110] sm:$0xff]  ;;  %2576 = vmatmul.f32.gmra.mxu1 %v2386_v2 }
 0x387   : > { %2726 = vst.msk [vmem:[#allocation3 + $0x118] sm:$0xff] %vm635_vm0, %v2672_v50  ;;  %v3082_v9 = vadd.f32 %v3028_v6, %v2934_v39  ;;  %v3348_v11 = vpop.f32.mrf.mxu3 }
 0x388   : > { %v3438_v56 = vld [vmem:[#allocation3 + $0x108] sm:$0xff]  ;;  %2987 = vmatmul.f32.gmra.mxu2 %v10032_v36 }
 0x389   : > { %3136 = vst.msk [vmem:[#allocation3 + $0x110] sm:$0xff] %vm635_vm0, %v3082_v9  ;;  %v3492_v10 = vadd.f32 %v3438_v56, %v3342_v27 }
 0x38a   : > { %v2121_v13 = vpop.f32.mrf.mxu0 }
 0x38b   : > { %3546 = vst.msk [vmem:[#allocation3 + $0x108] sm:$0xff] %vm635_vm0, %v3492_v10  ;;  %v2263_v15 = vadd.f32 %v2209_v14, %v2121_v13  ;;  %v2532_v58 = vpop.f32.mrf.mxu1  ;;  %v2940_v0 = vpop.f32.mrf.mxu2 }
 0x38c   : > { %v2619_v21 = vld [vmem:[#allocation3 + $0x120] sm:$0xff]  ;;  %3398 = vmatmul.f32.gmra.mxu3 %v3208_v19  ;;  %v3571_v19 = vld [vmem:[#allocation2 + $0x52] sm:$0xff] }
 0x38d   : > { %2317 = vst.msk [vmem:[#allocation3 + $0x128] sm:$0xff] %vm635_vm0, %v2263_v15  ;;  %v2673_v7 = vadd.f32 %v2619_v21, %v2529_v1  ;;  %2168 = vmatmul.f32.gmra.mxu0 %v1976_v52 }
 0x38e   : > { %v3029_v22 = vld [vmem:[#allocation3 + $0x118] sm:$0xff]  ;;  %2579 = vmatmul.f32.gmra.mxu1 %v2387_v17  ;;  %v2214_v17 = vld [vmem:[#allocation3 + $0x150] sm:$0xff] }
 0x38f   : > { %2727 = vst.msk [vmem:[#allocation3 + $0x120] sm:$0xff] %vm635_vm0, %v2673_v7  ;;  %v3083_v3 = vadd.f32 %v3029_v22, %v2937_v46  ;;  %v3351_v24 = vpop.f32.mrf.mxu3 }
 0x390   : > { %v3439_v53 = vld [vmem:[#allocation3 + $0x110] sm:$0xff]  ;;  %2990 = vmatmul.f32.gmra.mxu2 %v10032_v36 }
 0x391   : > { %3137 = vst.msk [vmem:[#allocation3 + $0x118] sm:$0xff] %vm635_vm0, %v3083_v3  ;;  %v3493_v5 = vadd.f32 %v3439_v53, %v3345_v61 }
 0x392   : > { %v2124_v25 = vpop.f32.mrf.mxu0 }
 0x393   : > { %3547 = vst.msk [vmem:[#allocation3 + $0x110] sm:$0xff] %vm635_vm0, %v3493_v5  ;;  %v2264_v8 = vadd.f32 %v2210_v26, %v2124_v25  ;;  %v2535_v28 = vpop.f32.mrf.mxu1  ;;  %v2943_v33 = vpop.f32.mrf.mxu2 }
 0x394   : > { %v2620_v30 = vld [vmem:[#allocation3 + $0x128] sm:$0xff]  ;;  %3401 = vmatmul.f32.gmra.mxu3 %v3209_v29 }
 0x395   : > { %2318 = vst.msk [vmem:[#allocation3 + $0x130] sm:$0xff] %vm635_vm0, %v2264_v8  ;;  %v2674_v16 = vadd.f32 %v2620_v30, %v2532_v58  ;;  %3653 = vmatmul.f32.vlgmr.msra.gmra.mxu0 %v3567_v12  ;;  %v2215_v8 = vld [vmem:[#allocation3 + $0x158] sm:$0xff] }
 0x396   : > { %v3030_v35 = vld [vmem:[#allocation3 + $0x120] sm:$0xff] }
 0x397   : > { %2728 = vst.msk [vmem:[#allocation3 + $0x128] sm:$0xff] %vm635_vm0, %v2674_v16  ;;  %v3084_v20 = vadd.f32 %v3030_v35, %v2940_v0  ;;  %v3354_v38 = vpop.f32.mrf.mxu3 }
 0x398   : > { %v3440_v37 = vld [vmem:[#allocation3 + $0x118] sm:$0xff] }
 0x399   : > { %3138 = vst.msk [vmem:[#allocation3 + $0x120] sm:$0xff] %vm635_vm0, %v3084_v20  ;;  %v3494_v36 = vadd.f32 %v3440_v37, %v3348_v11 }
 0x39a   : > { %v2127_v18 = vpop.f32.mrf.mxu0 }
 0x39b   : > { %3548 = vst.msk [vmem:[#allocation3 + $0x118] sm:$0xff] %vm635_vm0, %v3494_v36  ;;  %v2265_v43 = vadd.f32 %v2211_v40, %v2127_v18  ;;  %v2538_v23 = vpop.f32.mrf.mxu1  ;;  %v2946_v27 = vpop.f32.mrf.mxu2 }
 0x39c   : > { %v2621_v44 = vld [vmem:[#allocation3 + $0x130] sm:$0xff] }
 0x39d   : > { %2319 = vst.msk [vmem:[#allocation3 + $0x138] sm:$0xff] %vm635_vm0, %v2265_v43  ;;  %v2675_v45 = vadd.f32 %v2621_v44, %v2535_v28  ;;  %3656 = vmatmul.f32.gmra.mxu0 %v3568_v41  ;;  %v3572_v28 = vld [vmem:[#allocation2 + $0x5a] sm:$0xff]  ;;  %v2216_v41 = vld [vmem:[#allocation3 + $0x160] sm:$0xff] }
 0x39e   : > { %v3031_v47 = vld [vmem:[#allocation3 + $0x128] sm:$0xff]  ;;  %v3573_v43 = vld [vmem:[#allocation2 + $0x62] sm:$0xff] }
 0x39f   : > { %2729 = vst.msk [vmem:[#allocation3 + $0x130] sm:$0xff] %vm635_vm0, %v2675_v45  ;;  %v3085_v48 = vadd.f32 %v3031_v47, %v2943_v33  ;;  %v3357_v51 = vpop.f32.mrf.mxu3 }
 0x3a0   : > { %v3441_v49 = vld [vmem:[#allocation3 + $0x120] sm:$0xff] }
 0x3a1   : > { %3139 = vst.msk [vmem:[#allocation3 + $0x128] sm:$0xff] %vm635_vm0, %v3085_v48  ;;  %v3495_v31 = vadd.f32 %v3441_v49, %v3351_v24 }
 0x3a2   : > { %v2130_v52 = vpop.f32.mrf.mxu0 }
 0x3a3   : > { %3549 = vst.msk [vmem:[#allocation3 + $0x120] sm:$0xff] %vm635_vm0, %v3495_v31  ;;  %v2266_v39 = vadd.f32 %v2212_v34, %v2130_v52  ;;  %v2541_v32 = vpop.f32.mrf.mxu1  ;;  %v2949_v60 = vpop.f32.mrf.mxu2 }
 0x3a4   : > { %v2622_v57 = vld [vmem:[#allocation3 + $0x138] sm:$0xff] }
 0x3a5   : > { %2320 = vst.msk [vmem:[#allocation3 + $0x140] sm:$0xff] %vm635_vm0, %v2266_v39  ;;  %v2676_v59 = vadd.f32 %v2622_v57, %v2538_v23  ;;  %3659 = vmatmul.f32.gmra.mxu0 %v3569_v54  ;;  %v2217_v54 = vld [vmem:[#allocation3 + $0x168] sm:$0xff] }
 0x3a6   : > { %v3032_v61 = vld [vmem:[#allocation3 + $0x130] sm:$0xff]  ;;  %v3574_v39 = vld [vmem:[#allocation2 + $0x6a] sm:$0xff] }
 0x3a7   : > { %2730 = vst.msk [vmem:[#allocation3 + $0x138] sm:$0xff] %vm635_vm0, %v2676_v59  ;;  %v3086_v63 = vadd.f32 %v3032_v61, %v2946_v27  ;;  %v3360_v1 = vpop.f32.mrf.mxu3 }
 0x3a8   : > { %v3442_v42 = vld [vmem:[#allocation3 + $0x128] sm:$0xff] }
 0x3a9   : > { %3140 = vst.msk [vmem:[#allocation3 + $0x130] sm:$0xff] %vm635_vm0, %v3086_v63  ;;  %v3496_v55 = vadd.f32 %v3442_v42, %v3354_v38 }
 0x3aa   : > { %v2133_v2 = vpop.f32.mrf.mxu0 }
 0x3ab   : > { %3550 = vst.msk [vmem:[#allocation3 + $0x128] sm:$0xff] %vm635_vm0, %v3496_v55  ;;  %v2267_v50 = vadd.f32 %v2213_v62, %v2133_v2  ;;  %v2544_v46 = vpop.f32.mrf.mxu1  ;;  %v2952_v56 = vpop.f32.mrf.mxu2 }
 0x3ac   : > { %v2623_v6 = vld [vmem:[#allocation3 + $0x140] sm:$0xff] }
 0x3ad   : > { %2321 = vst.msk [vmem:[#allocation3 + $0x148] sm:$0xff] %vm635_vm0, %v2267_v50  ;;  %v2677_v9 = vadd.f32 %v2623_v6, %v2541_v32  ;;  %3662 = vmatmul.f32.gmra.mxu0 %v3570_v4  ;;  %v2218_v4 = vld [vmem:[#allocation3 + $0x170] sm:$0xff] }
 0x3ae   : > { %v3033_v10 = vld [vmem:[#allocation3 + $0x138] sm:$0xff]  ;;  %v3575_v50 = vld [vmem:[#allocation2 + $0x72] sm:$0xff] }
 0x3af   : > { %2731 = vst.msk [vmem:[#allocation3 + $0x140] sm:$0xff] %vm635_vm0, %v2677_v9  ;;  %v3087_v11 = vadd.f32 %v3033_v10, %v2949_v60  ;;  %v3363_v15 = vpop.f32.mrf.mxu3 }
 0x3b0   : > { %v3443_v13 = vld [vmem:[#allocation3 + $0x130] sm:$0xff] }
 0x3b1   : > { %3141 = vst.msk [vmem:[#allocation3 + $0x138] sm:$0xff] %vm635_vm0, %v3087_v11  ;;  %v3497_v14 = vadd.f32 %v3443_v13, %v3357_v51 }
 0x3b2   : > { %v2136_v58 = vpop.f32.mrf.mxu0 }
 0x3b3   : > { %3551 = vst.msk [vmem:[#allocation3 + $0x130] sm:$0xff] %vm635_vm0, %v3497_v14  ;;  %v2268_v21 = vadd.f32 %v2214_v17, %v2136_v58  ;;  %v2547_v7 = vpop.f32.mrf.mxu1  ;;  %v2955_v3 = vpop.f32.mrf.mxu2 }
 0x3b4   : > { %v2624_v0 = vld [vmem:[#allocation3 + $0x148] sm:$0xff] }
 0x3b5   : > { %2322 = vst.msk [vmem:[#allocation3 + $0x150] sm:$0xff] %vm635_vm0, %v2268_v21  ;;  %v2678_v22 = vadd.f32 %v2624_v0, %v2544_v46  ;;  %3665 = vmatmul.f32.gmra.mxu0 %v3571_v19  ;;  %v2219_v19 = vld [vmem:[#allocation3 + $0x178] sm:$0xff] }
 0x3b6   : > { %v3034_v53 = vld [vmem:[#allocation3 + $0x140] sm:$0xff]  ;;  %v3576_v21 = vld [vmem:[#allocation2 + $0x7a] sm:$0xff] }
 0x3b7   : > { %2732 = vst.msk [vmem:[#allocation3 + $0x148] sm:$0xff] %vm635_vm0, %v2678_v22  ;;  %v3088_v5 = vadd.f32 %v3034_v53, %v2952_v56  ;;  %v3366_v26 = vpop.f32.mrf.mxu3 }
 0x3b8   : > { %v3444_v24 = vld [vmem:[#allocation3 + $0x138] sm:$0xff] }
 0x3b9   : > { %3142 = vst.msk [vmem:[#allocation3 + $0x140] sm:$0xff] %vm635_vm0, %v3088_v5  ;;  %v3498_v25 = vadd.f32 %v3444_v24, %v3360_v1 }
 0x3ba   : > { %v2139_v12 = vpop.f32.mrf.mxu0 }
 0x3bb   : > { %3552 = vst.msk [vmem:[#allocation3 + $0x138] sm:$0xff] %vm635_vm0, %v3498_v25  ;;  %v2269_v29 = vadd.f32 %v2215_v8, %v2139_v12  ;;  %v2550_v30 = vpop.f32.mrf.mxu1  ;;  %v2958_v35 = vpop.f32.mrf.mxu2 }
 0x3bc   : > { %v2625_v16 = vld [vmem:[#allocation3 + $0x150] sm:$0xff] }
 0x3bd   : > { %2323 = vst.msk [vmem:[#allocation3 + $0x158] sm:$0xff] %vm635_vm0, %v2269_v29  ;;  %v2679_v33 = vadd.f32 %v2625_v16, %v2547_v7  ;;  %3668 = vmatmul.f32.gmra.mxu0 %v3572_v28  ;;  %v2220_v28 = vld [vmem:[#allocation3 + $0x180] sm:$0xff] }
 0x3be   : > { %v3035_v20 = vld [vmem:[#allocation3 + $0x148] sm:$0xff]  ;;  %v3577_v29 = vld [vmem:[#allocation2 + $0x82] sm:$0xff] }
 0x3bf   : > { %2733 = vst.msk [vmem:[#allocation3 + $0x150] sm:$0xff] %vm635_vm0, %v2679_v33  ;;  %v3089_v37 = vadd.f32 %v3035_v20, %v2955_v3  ;;  %v3369_v18 = vpop.f32.mrf.mxu3 }
 0x3c0   : > { %v3445_v36 = vld [vmem:[#allocation3 + $0x140] sm:$0xff] }
 0x3c1   : > { %3143 = vst.msk [vmem:[#allocation3 + $0x148] sm:$0xff] %vm635_vm0, %v3089_v37  ;;  %v3499_v38 = vadd.f32 %v3445_v36, %v3363_v15 }
 0x3c2   : > { %v2142_v40 = vpop.f32.mrf.mxu0 }
 0x3c3   : > { %3553 = vst.msk [vmem:[#allocation3 + $0x140] sm:$0xff] %vm635_vm0, %v3499_v38  ;;  %v2270_v23 = vadd.f32 %v2216_v41, %v2142_v40  ;;  %v2553_v44 = vpop.f32.mrf.mxu1  ;;  %v2961_v47 = vpop.f32.mrf.mxu2 }
 0x3c4   : > { %v2626_v45 = vld [vmem:[#allocation3 + $0x158] sm:$0xff] }
 0x3c5   : > { %2324 = vst.msk [vmem:[#allocation3 + $0x160] sm:$0xff] %vm635_vm0, %v2270_v23  ;;  %v2680_v27 = vadd.f32 %v2626_v45, %v2550_v30  ;;  %3671 = vmatmul.f32.gmra.mxu0 %v3573_v43  ;;  %v2221_v43 = vld [vmem:[#allocation3 + $0x188] sm:$0xff] }
 0x3c6   : > { %v3036_v48 = vld [vmem:[#allocation3 + $0x150] sm:$0xff]  ;;  %v3578_v23 = vld [vmem:[#allocation2 + $0x8a] sm:$0xff] }
 0x3c7   : > { %2734 = vst.msk [vmem:[#allocation3 + $0x158] sm:$0xff] %vm635_vm0, %v2680_v27  ;;  %v3090_v49 = vadd.f32 %v3036_v48, %v2958_v35  ;;  %v3372_v52 = vpop.f32.mrf.mxu3 }
 0x3c8   : > { %v3446_v31 = vld [vmem:[#allocation3 + $0x148] sm:$0xff] }
 0x3c9   : > { %3144 = vst.msk [vmem:[#allocation3 + $0x150] sm:$0xff] %vm635_vm0, %v3090_v49  ;;  %v3500_v51 = vadd.f32 %v3446_v31, %v3366_v26 }
 0x3ca   : > { %v2145_v34 = vpop.f32.mrf.mxu0 }
 0x3cb   : > { %3554 = vst.msk [vmem:[#allocation3 + $0x148] sm:$0xff] %vm635_vm0, %v3500_v51  ;;  %v2271_v32 = vadd.f32 %v2217_v54, %v2145_v34  ;;  %v2556_v57 = vpop.f32.mrf.mxu1  ;;  %v2964_v61 = vpop.f32.mrf.mxu2  ;;  %v2222_v54 = vld [vmem:[#allocation3 + $0x190] sm:$0xff] }
 0x3cc   : > { %v2627_v59 = vld [vmem:[#allocation3 + $0x160] sm:$0xff] }
 0x3cd   : > { %2325 = vst.msk [vmem:[#allocation3 + $0x168] sm:$0xff] %vm635_vm0, %v2271_v32  ;;  %v2681_v60 = vadd.f32 %v2627_v59, %v2553_v44  ;;  %3674 = vmatmul.f32.gmra.mxu0 %v3574_v39  ;;  %v3579_v39 = vld [vmem:[#allocation2 + $0x92] sm:$0xff] }
 0x3ce   : > { %v3037_v63 = vld [vmem:[#allocation3 + $0x158] sm:$0xff] }
 0x3cf   : > { %2735 = vst.msk [vmem:[#allocation3 + $0x160] sm:$0xff] %vm635_vm0, %v2681_v60  ;;  %v3091_v42 = vadd.f32 %v3037_v63, %v2961_v47  ;;  %v3375_v2 = vpop.f32.mrf.mxu3 }
 0x3d0   : > { %v3447_v55 = vld [vmem:[#allocation3 + $0x150] sm:$0xff] }
 0x3d1   : > { %3145 = vst.msk [vmem:[#allocation3 + $0x158] sm:$0xff] %vm635_vm0, %v3091_v42  ;;  %v3501_v1 = vadd.f32 %v3447_v55, %v3369_v18 }
 0x3d2   : > { %v2148_v62 = vpop.f32.mrf.mxu0 }
 0x3d3   : > { %3555 = vst.msk [vmem:[#allocation3 + $0x150] sm:$0xff] %vm635_vm0, %v3501_v1  ;;  %v2272_v46 = vadd.f32 %v2218_v4, %v2148_v62  ;;  %v2559_v6 = vpop.f32.mrf.mxu1  ;;  %v2967_v10 = vpop.f32.mrf.mxu2  ;;  %v2223_v4 = vld [vmem:[#allocation3 + $0x198] sm:$0xff] }
 0x3d4   : > { %v2628_v9 = vld [vmem:[#allocation3 + $0x168] sm:$0xff] }
 0x3d5   : > { %2326 = vst.msk [vmem:[#allocation3 + $0x170] sm:$0xff] %vm635_vm0, %v2272_v46  ;;  %v2682_v56 = vadd.f32 %v2628_v9, %v2556_v57  ;;  %3677 = vmatmul.f32.gmra.mxu0 %v3575_v50  ;;  %v3580_v50 = vld [vmem:[#allocation2 + $0x9a] sm:$0xff] }
 0x3d6   : > { %v3038_v11 = vld [vmem:[#allocation3 + $0x160] sm:$0xff] }
 0x3d7   : > { %2736 = vst.msk [vmem:[#allocation3 + $0x168] sm:$0xff] %vm635_vm0, %v2682_v56  ;;  %v3092_v13 = vadd.f32 %v3038_v11, %v2964_v61  ;;  %v3378_v58 = vpop.f32.mrf.mxu3 }
 0x3d8   : > { %v3448_v14 = vld [vmem:[#allocation3 + $0x158] sm:$0xff] }
 0x3d9   : > { %3146 = vst.msk [vmem:[#allocation3 + $0x160] sm:$0xff] %vm635_vm0, %v3092_v13  ;;  %v3502_v15 = vadd.f32 %v3448_v14, %v3372_v52 }
 0x3da   : > { %v2151_v17 = vpop.f32.mrf.mxu0 }
 0x3db   : > { %3556 = vst.msk [vmem:[#allocation3 + $0x158] sm:$0xff] %vm635_vm0, %v3502_v15  ;;  %v2273_v7 = vadd.f32 %v2219_v19, %v2151_v17  ;;  %v2562_v0 = vpop.f32.mrf.mxu1  ;;  %v2970_v53 = vpop.f32.mrf.mxu2  ;;  %v2224_v19 = vld [vmem:[#allocation3 + $0x1a0] sm:$0xff] }
 0x3dc   : > { %v2629_v22 = vld [vmem:[#allocation3 + $0x170] sm:$0xff] }
 0x3dd   : > { %2327 = vst.msk [vmem:[#allocation3 + $0x178] sm:$0xff] %vm635_vm0, %v2273_v7  ;;  %v2683_v3 = vadd.f32 %v2629_v22, %v2559_v6  ;;  %3680 = vmatmul.f32.gmra.mxu0 %v3576_v21  ;;  %v3581_v21 = vld [vmem:[#allocation2 + $0xa2] sm:$0xff] }
 0x3de   : > { %v3039_v5 = vld [vmem:[#allocation3 + $0x168] sm:$0xff] }
 0x3df   : > { %2737 = vst.msk [vmem:[#allocation3 + $0x170] sm:$0xff] %vm635_vm0, %v2683_v3  ;;  %v3093_v24 = vadd.f32 %v3039_v5, %v2967_v10  ;;  %v3381_v12 = vpop.f32.mrf.mxu3 }
 0x3e0   : > { %v3449_v25 = vld [vmem:[#allocation3 + $0x160] sm:$0xff] }
 0x3e1   : > { %3147 = vst.msk [vmem:[#allocation3 + $0x168] sm:$0xff] %vm635_vm0, %v3093_v24  ;;  %v3503_v26 = vadd.f32 %v3449_v25, %v3375_v2 }
 0x3e2   : > { %v2154_v8 = vpop.f32.mrf.mxu0 }
 0x3e3   : > { %3557 = vst.msk [vmem:[#allocation3 + $0x160] sm:$0xff] %vm635_vm0, %v3503_v26  ;;  %v2274_v30 = vadd.f32 %v2220_v28, %v2154_v8  ;;  %v2565_v16 = vpop.f32.mrf.mxu1  ;;  %v2973_v20 = vpop.f32.mrf.mxu2  ;;  %v2225_v28 = vld [vmem:[#allocation3 + $0x1a8] sm:$0xff] }
 0x3e4   : > { %v2630_v33 = vld [vmem:[#allocation3 + $0x178] sm:$0xff] }
 0x3e5   : > { %2328 = vst.msk [vmem:[#allocation3 + $0x180] sm:$0xff] %vm635_vm0, %v2274_v30  ;;  %v2684_v35 = vadd.f32 %v2630_v33, %v2562_v0  ;;  %3683 = vmatmul.f32.gmra.mxu0 %v3577_v29  ;;  %v3582_v29 = vld [vmem:[#allocation2 + $0xaa] sm:$0xff] }
 0x3e6   : > { %v3040_v37 = vld [vmem:[#allocation3 + $0x170] sm:$0xff] }
 0x3e7   : > { %2738 = vst.msk [vmem:[#allocation3 + $0x178] sm:$0xff] %vm635_vm0, %v2684_v35  ;;  %v3094_v36 = vadd.f32 %v3040_v37, %v2970_v53  ;;  %v3384_v40 = vpop.f32.mrf.mxu3 }
 0x3e8   : > { %v3450_v38 = vld [vmem:[#allocation3 + $0x168] sm:$0xff] }
 0x3e9   : > { %3148 = vst.msk [vmem:[#allocation3 + $0x170] sm:$0xff] %vm635_vm0, %v3094_v36  ;;  %v3504_v18 = vadd.f32 %v3450_v38, %v3378_v58 }
 0x3ea   : > { %v2157_v41 = vpop.f32.mrf.mxu0 }
 0x3eb   : > { %3558 = vst.msk [vmem:[#allocation3 + $0x168] sm:$0xff] %vm635_vm0, %v3504_v18  ;;  %v2275_v44 = vadd.f32 %v2221_v43, %v2157_v41  ;;  %v2568_v45 = vpop.f32.mrf.mxu1  ;;  %v2976_v48 = vpop.f32.mrf.mxu2  ;;  %v3816_v41 = vld [vmem:[#allocation3] sm:$0xff]  ;;  %v3583_v43 = vld [vmem:[#allocation2 + $0xb2] sm:$0xff] }
 0x3ec   : > { %v2631_v27 = vld [vmem:[#allocation3 + $0x180] sm:$0xff] }
 0x3ed   : > { %2329 = vst.msk [vmem:[#allocation3 + $0x188] sm:$0xff] %vm635_vm0, %v2275_v44  ;;  %v2685_v47 = vadd.f32 %v2631_v27, %v2565_v16  ;;  %3686 = vmatmul.f32.gmra.mxu0 %v3578_v23 }
 0x3ee   : > { %v3041_v49 = vld [vmem:[#allocation3 + $0x178] sm:$0xff] }
 0x3ef   : > { %2739 = vst.msk [vmem:[#allocation3 + $0x180] sm:$0xff] %vm635_vm0, %v2685_v47  ;;  %v3095_v31 = vadd.f32 %v3041_v49, %v2973_v20  ;;  %v3387_v59 = vpop.f32.mrf.mxu3 }
 0x3f0   : > { %v3451_v51 = vld [vmem:[#allocation3 + $0x170] sm:$0xff] }
 0x3f1   : > { %3149 = vst.msk [vmem:[#allocation3 + $0x178] sm:$0xff] %vm635_vm0, %v3095_v31  ;;  %v3505_v52 = vadd.f32 %v3451_v51, %v3381_v12 }
 0x3f2   : > { %v2160_v34 = vpop.f32.mrf.mxu0 }
 0x3f3   : > { %3559 = vst.msk [vmem:[#allocation3 + $0x170] sm:$0xff] %vm635_vm0, %v3505_v52  ;;  %v2276_v32 = vadd.f32 %v2222_v54, %v2160_v34  ;;  %v2571_v57 = vpop.f32.mrf.mxu1  ;;  %v2979_v63 = vpop.f32.mrf.mxu2  ;;  %v3817_v52 = vld [vmem:[#allocation3 + $0x8] sm:$0xff]  ;;  %v3584_v34 = vld [vmem:[#allocation2 + $0xba] sm:$0xff] }
 0x3f4   : > { %v2632_v60 = vld [vmem:[#allocation3 + $0x188] sm:$0xff] }
 0x3f5   : > { %2330 = vst.msk [vmem:[#allocation3 + $0x190] sm:$0xff] %vm635_vm0, %v2276_v32  ;;  %v2686_v61 = vadd.f32 %v2632_v60, %v2568_v45  ;;  %3689 = vmatmul.f32.gmra.mxu0 %v3579_v39 }
 0x3f6   : > { %v3042_v42 = vld [vmem:[#allocation3 + $0x180] sm:$0xff] }
 0x3f7   : > { %2740 = vst.msk [vmem:[#allocation3 + $0x188] sm:$0xff] %vm635_vm0, %v2686_v61  ;;  %v3096_v55 = vadd.f32 %v3042_v42, %v2976_v48  ;;  %v3390_v10 = vpop.f32.mrf.mxu3  ;;  %v3818_v42 = vld [vmem:[#allocation3 + $0x10] sm:$0xff] }
 0x3f8   : > { %v3452_v1 = vld [vmem:[#allocation3 + $0x178] sm:$0xff] }
 0x3f9   : > { %3150 = vst.msk [vmem:[#allocation3 + $0x180] sm:$0xff] %vm635_vm0, %v3096_v55  ;;  %v3506_v2 = vadd.f32 %v3452_v1, %v3384_v40  ;;  %v3585_v55 = vld [vmem:[#allocation2 + $0xc2] sm:$0xff] }
 0x3fa   : > { %v2163_v62 = vpop.f32.mrf.mxu0 }
 0x3fb   : > { %3560 = vst.msk [vmem:[#allocation3 + $0x178] sm:$0xff] %vm635_vm0, %v3506_v2  ;;  %v2277_v46 = vadd.f32 %v2223_v4, %v2163_v62  ;;  %v2574_v56 = vpop.f32.mrf.mxu1  ;;  %v2982_v13 = vpop.f32.mrf.mxu2 }
 0x3fc   : > { %v2633_v6 = vld [vmem:[#allocation3 + $0x190] sm:$0xff] }
 0x3fd   : > { %2331 = vst.msk [vmem:[#allocation3 + $0x198] sm:$0xff] %vm635_vm0, %v2277_v46  ;;  %v2687_v9 = vadd.f32 %v2633_v6, %v2571_v57  ;;  %3692 = vmatmul.f32.gmra.mxu0 %v3580_v50  ;;  %v3819_v46 = vld [vmem:[#allocation3 + $0x18] sm:$0xff]  ;;  %v3586_v6 = vld [vmem:[#allocation2 + $0xca] sm:$0xff] }
 0x3fe   : > { %v3043_v11 = vld [vmem:[#allocation3 + $0x188] sm:$0xff] }
 0x3ff   : > { %2741 = vst.msk [vmem:[#allocation3 + $0x190] sm:$0xff] %vm635_vm0, %v2687_v9  ;;  %v3097_v14 = vadd.f32 %v3043_v11, %v2979_v63  ;;  %v3393_v24 = vpop.f32.mrf.mxu3 }
 0x400   : > { %v3453_v15 = vld [vmem:[#allocation3 + $0x180] sm:$0xff] }
 0x401   : > { %3151 = vst.msk [vmem:[#allocation3 + $0x188] sm:$0xff] %vm635_vm0, %v3097_v14  ;;  %v3507_v58 = vadd.f32 %v3453_v15, %v3387_v59  ;;  %v3587_v14 = vld [vmem:[#allocation2 + $0xd2] sm:$0xff] }
 0x402   : > { %v2166_v17 = vpop.f32.mrf.mxu0 }
 0x403   : > { %3561 = vst.msk [vmem:[#allocation3 + $0x180] sm:$0xff] %vm635_vm0, %v3507_v58  ;;  %v2278_v7 = vadd.f32 %v2224_v19, %v2166_v17  ;;  %v2577_v5 = vpop.f32.mrf.mxu1  ;;  %v2985_v26 = vpop.f32.mrf.mxu2  ;;  %v6219_v58 = vld [vmem:[%s12750_s3 + $0xb8] sm:$0xff]  ;;  %v3821_v19 = vld [vmem:[#allocation3 + $0x28] sm:$0xff] }
 0x404   : > { %v2634_v0 = vld [vmem:[#allocation3 + $0x198] sm:$0xff]  ;;  %8775 = vmatpush.msra.mxu3 %v6219_v58 }
 0x405   : > { %2332 = vst.msk [vmem:[#allocation3 + $0x1a0] sm:$0xff] %vm635_vm0, %v2278_v7  ;;  %v2688_v22 = vadd.f32 %v2634_v0, %v2574_v56  ;;  %3695 = vmatmul.f32.gmra.mxu0 %v3581_v21  ;;  %v5808_v56 = vld [vmem:[%s12750_s3 + $0x38] sm:$0xff] }
 0x406   : > { %v3044_v3 = vld [vmem:[#allocation3 + $0x190] sm:$0xff]  ;;  %8759 = vmatpush.msra.mxu1 %v5808_v56  ;;  %5877 = vmatpush.msrb.mxu0 %v5808_v56 }
 0x407   : > { %2742 = vst.msk [vmem:[#allocation3 + $0x198] sm:$0xff] %vm635_vm0, %v2688_v22  ;;  %v3098_v53 = vadd.f32 %v3044_v3, %v2982_v13  ;;  %v3396_v18 = vpop.f32.mrf.mxu3  ;;  %v3820_v13 = vld [vmem:[#allocation3 + $0x20] sm:$0xff]  ;;  %v3588_v21 = vld [vmem:[#allocation2 + $0xda] sm:$0xff] }
 0x408   : > { %v3454_v25 = vld [vmem:[#allocation3 + $0x188] sm:$0xff]  ;;  %v3589_v22 = vld [vmem:[#allocation2 + $0xe2] sm:$0xff] }
 0x409   : > { %3152 = vst.msk [vmem:[#allocation3 + $0x190] sm:$0xff] %vm635_vm0, %v3098_v53  ;;  %v3508_v12 = vadd.f32 %v3454_v25, %v3390_v10  ;;  %v5994_v10 = vld [vmem:[%s12750_s3 + $0x78] sm:$0xff]  ;;  %v3590_v53 = vld [vmem:[#allocation2 + $0xea] sm:$0xff] }
 0x40a   : > { %v2169_v8 = vpop.f32.mrf.mxu0  ;;  %8767 = vmatpush.msra.mxu2 %v5994_v10 }
 0x40b   : > { %3562 = vst.msk [vmem:[#allocation3 + $0x188] sm:$0xff] %vm635_vm0, %v3508_v12  ;;  %v2279_v30 = vadd.f32 %v2225_v28, %v2169_v8  ;;  %v2580_v38 = vpop.f32.mrf.mxu1  ;;  %v2988_v23 = vpop.f32.mrf.mxu2  ;;  %v3824_v8 = vld [vmem:[#allocation3 + $0x40] sm:$0xff]  ;;  %v3591_v28 = vld [vmem:[#allocation2 + $0xf2] sm:$0xff] }
 0x40c   : > { %v2635_v16 = vld [vmem:[#allocation3 + $0x1a0] sm:$0xff] }
 0x40d   : > { %2333 = vst.msk [vmem:[#allocation3 + $0x1a8] sm:$0xff] %vm635_vm0, %v2279_v30  ;;  %v2689_v33 = vadd.f32 %v2635_v16, %v2577_v5  ;;  %3698 = vmatmul.f32.gmra.mxu0 %v3582_v29  ;;  %v3822_v5 = vld [vmem:[#allocation3 + $0x30] sm:$0xff]  ;;  %v3825_v16 = vld [vmem:[#allocation3 + $0x48] sm:$0xff] }
 0x40e   : > { %v3045_v35 = vld [vmem:[#allocation3 + $0x198] sm:$0xff] }
 0x40f   : > { %2743 = vst.msk [vmem:[#allocation3 + $0x1a0] sm:$0xff] %vm635_vm0, %v2689_v33  ;;  %v3099_v20 = vadd.f32 %v3045_v35, %v2985_v26  ;;  %v3399_v32 = vpop.f32.mrf.mxu3  ;;  %v3592_v33 = vld [vmem:[#allocation2 + $0xfa] sm:$0xff] }
 0x410   : > { %v3455_v37 = vld [vmem:[#allocation3 + $0x190] sm:$0xff] }
 0x411   : > { %3153 = vst.msk [vmem:[#allocation3 + $0x198] sm:$0xff] %vm635_vm0, %v3099_v20  ;;  %v3509_v36 = vadd.f32 %v3455_v37, %v3393_v24  ;;  %v3823_v24 = vld [vmem:[#allocation3 + $0x38] sm:$0xff]  ;;  %v3826_v37 = vld [vmem:[#allocation3 + $0x50] sm:$0xff] }
 0x412   : > { %v3654_v40 = vpop.f32.mrf.mxu0 }
 0x413   : > { %3563 = vst.msk [vmem:[#allocation3 + $0x190] sm:$0xff] %vm635_vm0, %v3509_v36  ;;  %v3870_v44 = vadd.f32 %v3816_v41, %v3654_v40  ;;  %v2991_v39 = vpop.f32.mrf.mxu2  ;;  %v3593_v36 = vld [vmem:[#allocation2 + $0x102] sm:$0xff]  ;;  %v5993_v40 = vld [vmem:[%s12750_s3 + $0x70] sm:$0xff] }
 0x414   : > { %v2636_v45 = vld [vmem:[#allocation3 + $0x1a8] sm:$0xff]  ;;  %8768 = vmatpush.msra.mxu2 %v5993_v40 }
 0x415   : > { %3924 = vst.msk [vmem:[#allocation3] sm:$0xff] %vm635_vm0, %v3870_v44  ;;  %v2690_v27 = vadd.f32 %v2636_v45, %v2580_v38  ;;  %3701 = vmatmul.f32.gmra.mxu0 %v3583_v43  ;;  %v6218_v41 = vld [vmem:[%s12750_s3 + $0xb0] sm:$0xff] }
 0x416   : > { %v3046_v47 = vld [vmem:[#allocation3 + $0x1a0] sm:$0xff]  ;;  %8776 = vmatpush.msra.mxu3 %v6218_v41 }
 0x417   : > { %2744 = vst.msk [vmem:[#allocation3 + $0x1a8] sm:$0xff] %vm635_vm0, %v2690_v27  ;;  %v3100_v48 = vadd.f32 %v3046_v47, %v2988_v23  ;;  %v3402_v2 = vpop.f32.mrf.mxu3  ;;  %v3827_v23 = vld [vmem:[#allocation3 + $0x58] sm:$0xff]  ;;  %v3594_v44 = vld [vmem:[#allocation2 + $0x10a] sm:$0xff] }
 0x418   : > { %v3456_v49 = vld [vmem:[#allocation3 + $0x198] sm:$0xff] }
 0x419   : > { %3154 = vst.msk [vmem:[#allocation3 + $0x1a0] sm:$0xff] %vm635_vm0, %v3100_v48  ;;  %v3510_v31 = vadd.f32 %v3456_v49, %v3396_v18  ;;  %v5807_v18 = vld [vmem:[%s12750_s3 + $0x30] sm:$0xff] }
 0x41a   : > { %v3657_v51 = vpop.f32.mrf.mxu0  ;;  %8760 = vmatpush.msra.mxu1 %v5807_v18  ;;  %5878 = vmatpush.msrb.mxu0 %v5807_v18 }
 0x41b   : > { %3564 = vst.msk [vmem:[#allocation3 + $0x198] sm:$0xff] %vm635_vm0, %v3510_v31  ;;  %v3871_v54 = vadd.f32 %v3817_v52, %v3657_v51  ;;  %v3595_v31 = vld [vmem:[#allocation2 + $0x112] sm:$0xff] }
 0x41c   : > { %v3979_v47 = vld [vmem:[#allocation3] sm:$0xff] }
 0x41d   : > { %3925 = vst.msk [vmem:[#allocation3 + $0x8] sm:$0xff] %vm635_vm0, %v3871_v54  ;;  %3704 = vmatmul.f32.gmra.mxu0 %v3584_v34  ;;  %v4043_v51 = vrot.slane %v3979_v47, 2  ;;  %v4044_v54 = vrot.slane %v3979_v47, 4 }
 0x41e   : > { %v3047_v57 = vld [vmem:[#allocation3 + $0x1a8] sm:$0xff] }
 0x41f   : > { %v3101_v59 = vadd.f32 %v3047_v57, %v2991_v39  ;;  %v4245_v39 = vsel %vm4235_vm1, %v4043_v51, -inf }
 0x420   : > { %v3457_v60 = vld [vmem:[#allocation3 + $0x1a0] sm:$0xff] }
 0x421   : > { %3155 = vst.msk [vmem:[#allocation3 + $0x1a8] sm:$0xff] %vm635_vm0, %v3101_v59  ;;  %v3511_v61 = vadd.f32 %v3457_v60, %v3399_v32 }
 0x422   : > { %v3660_v63 = vpop.f32.mrf.mxu0 }
 0x423   : > { %3565 = vst.msk [vmem:[#allocation3 + $0x1a0] sm:$0xff] %vm635_vm0, %v3511_v61  ;;  %v3872_v1 = vadd.f32 %v3818_v42, %v3660_v63  ;;  %v4045_v61 = vrot.slane %v3979_v47, 6  ;;  %v4254_v63 = vsel %vm4235_vm1, %v4044_v54, -inf }
 0x425   : > { %3926 = vst.msk [vmem:[#allocation3 + $0x10] sm:$0xff] %vm635_vm0, %v3872_v1  ;;  %3707 = vmatmul.f32.gmra.mxu0 %v3585_v55  ;;  %v3596_v55 = vld [vmem:[#allocation2 + $0x11a] sm:$0xff]  ;;  %v4236_v1 = vsel %vm4235_vm1, %v3979_v47, -inf  ;;  %v3598_v47 = vld [vmem:[#allocation2 + $0x12a] sm:$0xff] }
 0x428   : > { %v3458_v62 = vld [vmem:[#allocation3 + $0x1a8] sm:$0xff] }
 0x429   : > { %v3512_v4 = vadd.f32 %v3458_v62, %v3402_v2 }
 0x42a   : > { %v3663_v50 = vpop.f32.mrf.mxu0 }
 0x42b   : > { %3566 = vst.msk [vmem:[#allocation3 + $0x1a8] sm:$0xff] %vm635_vm0, %v3512_v4  ;;  %v3873_v9 = vadd.f32 %v3819_v46, %v3663_v50  ;;  %v4263_v46 = vsel %vm4235_vm1, %v4045_v61, -inf }
 0x42d   : > { %3927 = vst.msk [vmem:[#allocation3 + $0x18] sm:$0xff] %vm635_vm0, %v3873_v9  ;;  %3710 = vmatmul.f32.gmra.mxu0 %v3586_v6  ;;  %v3828_v6 = vld [vmem:[#allocation3 + $0x60] sm:$0xff] }
 0x432   : > { %v3666_v11 = vpop.f32.mrf.mxu0 }
 0x433   : > { %v3874_v15 = vadd.f32 %v3820_v13, %v3666_v11  ;;  %v3829_v13 = vld [vmem:[#allocation3 + $0x68] sm:$0xff] }
 0x434   : > { %v3981_v27 = vld [vmem:[#allocation3 + $0x18] sm:$0xff] }
 0x435   : > { %3928 = vst.msk [vmem:[#allocation3 + $0x20] sm:$0xff] %vm635_vm0, %v3874_v15  ;;  %3713 = vmatmul.f32.gmra.mxu0 %v3587_v14  ;;  %v4049_v48 = vrot.slane %v3981_v27, 2  ;;  %v4050_v52 = vrot.slane %v3981_v27, 4  ;;  %v4051_v32 = vrot.slane %v3981_v27, 6  ;;  %v4237_v60 = vsel %vm4235_vm1, %v3981_v27, -inf  ;;  %v3831_v27 = vld [vmem:[#allocation3 + $0x78] sm:$0xff] }
 0x436   : > { %v4238_v62 = vmax.f32 %v4236_v1, %v4237_v60 }
 0x437   : > { %v4246_v34 = vsel %vm4235_vm1, %v4049_v48, -inf  ;;  %v4255_v59 = vsel %vm4235_vm1, %v4050_v52, -inf  ;;  %v4264_v50 = vsel %vm4235_vm1, %v4051_v32, -inf }
 0x438   : > { %v4247_v57 = vmax.f32 %v4245_v39, %v4246_v34  ;;  %v4256_v2 = vmax.f32 %v4254_v63, %v4255_v59  ;;  %v4265_v56 = vmax.f32 %v4263_v46, %v4264_v50  ;;  %v4239_v14 = vrot.slane %v4238_v62, 4  ;;  %v3832_v50 = vld [vmem:[#allocation3 + $0x80] sm:$0xff]  ;;  %v3599_v46 = vld [vmem:[#allocation2 + $0x132] sm:$0xff] }
 0x43a   : > { %v3669_v17 = vpop.f32.mrf.mxu0  ;;  %v4248_v4 = vrot.slane %v4247_v57, 4  ;;  %v4257_v9 = vrot.slane %v4256_v2, 4 }
 0x43b   : > { %v3875_v7 = vadd.f32 %v3821_v19, %v3669_v17  ;;  %v3980_v17 = vld [vmem:[#allocation3 + $0x8] sm:$0xff] }
 0x43c   : > { %v3982_v10 = vld [vmem:[#allocation3 + $0x20] sm:$0xff]  ;;  %v4249_v15 = vmax.f32 %v4247_v57, %v4248_v4 }
 0x43d   : > { %3929 = vst.msk [vmem:[#allocation3 + $0x28] sm:$0xff] %vm635_vm0, %v3875_v7  ;;  %3716 = vmatmul.f32.gmra.mxu0 %v3588_v21  ;;  %v4052_v19 = vrot.slane %v3982_v10, 2  ;;  %v4273_v21 = vsel %vm4235_vm1, %v3982_v10, -inf }
 0x442   : > { %v3672_v0 = vpop.f32.mrf.mxu0 }
 0x443   : > { %v3876_v25 = vadd.f32 %v3822_v5, %v3672_v0  ;;  %v3597_v0 = vld [vmem:[#allocation2 + $0x122] sm:$0xff]  ;;  %v4046_v5 = vrot.slane %v3980_v17, 2 }
 0x445   : > { %3719 = vmatmul.f32.gmra.mxu0 %v3589_v22  ;;  %3930 = vst.msk [vmem:[#allocation3 + $0x30] sm:$0xff] %vm635_vm0, %v3876_v25  ;;  %v4258_v22 = vmax.f32 %v4256_v2, %v4257_v9  ;;  %v4240_v25 = vmax.f32 %v4238_v62, %v4239_v14  ;;  %v10229_v2 = vld [vmem:[%s12749_s2] ss:$0 sm:$0xff] }
 0x44a   : > { %v3675_v3 = vpop.f32.mrf.mxu0 }
 0x44b   : > { %v3877_v26 = vadd.f32 %v3823_v24, %v3675_v3  ;;  %v4266_v3 = vrot.slane %v4265_v56, 4  ;;  %v4272_v24 = vsel %vm4235_vm1, %v3980_v17, -inf }
 0x44d   : > { %3722 = vmatmul.f32.gmra.mxu0 %v3590_v53  ;;  %3931 = vst.msk [vmem:[#allocation3 + $0x38] sm:$0xff] %vm635_vm0, %v3877_v26  ;;  %v4053_v53 = vrot.slane %v3982_v10, 4  ;;  %v4250_v26 = vrot.slane %v4249_v15, 2 }
 0x44f   : > { %v4251_v18 = vmax.f32 %v4249_v15, %v4250_v26 }
 0x451   : > { %v4252_v34 = vrot.slane %v4251_v18, 1 }
 0x452   : > { %v3678_v12 = vpop.f32.mrf.mxu0 }
 0x453   : > { %v3878_v29 = vadd.f32 %v3824_v8, %v3678_v12  ;;  %v3830_v12 = vld [vmem:[#allocation3 + $0x70] sm:$0xff]  ;;  %v4047_v8 = vrot.slane %v3980_v17, 4  ;;  %v4253_v63 = vmax.f32 %v4251_v18, %v4252_v34 }
 0x455   : > { %3932 = vst.msk [vmem:[#allocation3 + $0x40] sm:$0xff] %vm635_vm0, %v3878_v29  ;;  %3725 = vmatmul.f32.gmra.mxu0 %v3591_v28  ;;  %v4274_v28 = vmax.f32 %v4272_v24, %v4273_v21  ;;  %v4290_v40 = vsel %vm4235_vm1, %v4047_v8, -inf  ;;  %v5992_v24 = vld [vmem:[%s12750_s3 + $0x68] sm:$0xff]  ;;  %v3600_v8 = vld [vmem:[#allocation2 + $0x13a] sm:$0xff] }
 0x456   : > { %8769 = vmatpush.msra.mxu2 %v5992_v24 }
 0x457   : > { %v4275_v41 = vrot.slane %v4274_v28, 4 }
 0x459   : > { %v4276_v54 = vmax.f32 %v4274_v28, %v4275_v41 }
 0x45a   : > { %v3681_v30 = vpop.f32.mrf.mxu0 }
 0x45b   : > { %v3879_v35 = vadd.f32 %v3825_v16, %v3681_v30  ;;  %v4054_v30 = vrot.slane %v3982_v10, 6  ;;  %v4282_v16 = vsel %vm4235_vm1, %v4052_v19, -inf }
 0x45d   : > { %3933 = vst.msk [vmem:[#allocation3 + $0x48] sm:$0xff] %vm635_vm0, %v3879_v35  ;;  %3728 = vmatmul.f32.gmra.mxu0 %v3592_v33  ;;  %v4259_v33 = vrot.slane %v4258_v22, 2  ;;  %v4267_v35 = vmax.f32 %v4265_v56, %v4266_v3 }
 0x45f   : > { %v4260_v48 = vmax.f32 %v4258_v22, %v4259_v33  ;;  %v6217_v33 = vld [vmem:[%s12750_s3 + $0xa8] sm:$0xff] }
 0x460   : > { %8777 = vmatpush.msra.mxu3 %v6217_v33 }
 0x461   : > { %v4261_v59 = vrot.slane %v4260_v48, 1 }
 0x462   : > { %v3684_v20 = vpop.f32.mrf.mxu0 }
 0x463   : > { %v3880_v38 = vadd.f32 %v3826_v37, %v3684_v20  ;;  %v4291_v20 = vsel %vm4235_vm1, %v4053_v53, -inf  ;;  %v4048_v37 = vrot.slane %v3980_v17, 6 }
 0x464   : > { %v3985_v53 = vld [vmem:[#allocation3 + $0x48] sm:$0xff] }
 0x465   : > { %3934 = vst.msk [vmem:[#allocation3 + $0x50] sm:$0xff] %vm635_vm0, %v3880_v38  ;;  %3731 = vmatmul.f32.gmra.mxu0 %v3593_v36  ;;  %v4281_v36 = vsel %vm4235_vm1, %v4046_v5, -inf  ;;  %v4241_v38 = vrot.slane %v4240_v25, 2  ;;  %v4299_v51 = vsel %vm4235_vm1, %v4048_v37, -inf  ;;  %v5806_v5 = vld [vmem:[%s12750_s3 + $0x28] sm:$0xff]  ;;  %v4061_v37 = vrot.slane %v3985_v53, 2 }
 0x466   : > { %8761 = vmatpush.msra.mxu1 %v5806_v5  ;;  %5879 = vmatpush.msrb.mxu0 %v5806_v5  ;;  %v4063_v41 = vrot.slane %v3985_v53, 6 }
 0x467   : > { %v4242_v52 = vmax.f32 %v4240_v25, %v4241_v38 }
 0x469   : > { %v4243_v61 = vrot.slane %v4242_v52, 1 }
 0x46a   : > { %v3687_v43 = vpop.f32.mrf.mxu0 }
 0x46b   : > { %v3881_v45 = vadd.f32 %v3827_v23, %v3687_v43  ;;  %v4283_v43 = vmax.f32 %v4281_v36, %v4282_v16  ;;  %v4292_v23 = vmax.f32 %v4290_v40, %v4291_v20  ;;  %v4244_v10 = vmax.f32 %v4242_v52, %v4243_v61 }
 0x46c   : > { %v4062_v36 = vrot.slane %v3985_v53, 4  ;;  %v4318_v52 = vsel %vm4235_vm1, %v4061_v37, -inf  ;;  %v3986_v37 = vld [vmem:[#allocation3 + $0x50] sm:$0xff] }
 0x46d   : > { %3935 = vst.msk [vmem:[#allocation3 + $0x58] sm:$0xff] %vm635_vm0, %v3881_v45  ;;  %3734 = vmatmul.f32.gmra.mxu0 %v3594_v44  ;;  %v4300_v44 = vsel %vm4235_vm1, %v4054_v30, -inf  ;;  %v4284_v39 = vrot.slane %v4283_v43, 4  ;;  %v4293_v57 = vrot.slane %v4292_v23, 4  ;;  %v4815_v21 = vadd.f32 %v10229_v2, %v4244_v10  ;;  %v3983_v30 = vld [vmem:[#allocation3 + $0x30] sm:$0xff] }
 0x46e   : > { %v4301_v32 = vmax.f32 %v4299_v51, %v4300_v44  ;;  %v4056_v44 = vrot.slane %v3983_v30, 4  ;;  %v4308_v51 = vsel %vm4235_vm1, %v3983_v30, -inf  ;;  %v4327_v34 = vsel %vm4235_vm1, %v4062_v36, -inf }
 0x46f   : > { %v4294_v62 = vmax.f32 %v4292_v23, %v4293_v57  ;;  %v4055_v23 = vrot.slane %v3983_v30, 2  ;;  %v4336_v57 = vsel %vm4235_vm1, %v4063_v41, -inf }
 0x470   : > { %v4302_v1 = vrot.slane %v4301_v32, 4 }
 0x471   : > { %v4317_v61 = vsel %vm4235_vm1, %v4055_v23, -inf }
 0x472   : > { %v3690_v49 = vpop.f32.mrf.mxu0  ;;  %v4303_v15 = vmax.f32 %v4301_v32, %v4302_v1 }
 0x473   : > { %v3882_v11 = vadd.f32 %v3828_v6, %v3690_v49  ;;  %v4268_v49 = vrot.slane %v4267_v35, 2  ;;  %v4262_v6 = vmax.f32 %v4260_v48, %v4261_v59 }
 0x474   : > { %v4304_v3 = vrot.slane %v4303_v15, 2 }
 0x475   : > { %3737 = vmatmul.f32.gmra.mxu0 %v3595_v31  ;;  %3936 = vst.msk [vmem:[#allocation3 + $0x60] sm:$0xff] %vm635_vm0, %v3882_v11  ;;  %v4269_v60 = vmax.f32 %v4267_v35, %v4268_v49  ;;  %v4816_v11 = vadd.f32 %v10229_v2, %v4253_v63  ;;  %v4817_v19 = vadd.f32 %v10229_v2, %v4262_v6  ;;  %v10249_v35 = vmax.f32 %v4815_v21, 0.0 }
 0x476   : > { %v4305_v40 = vmax.f32 %v4303_v15, %v4304_v3  ;;  %v4057_v49 = vrot.slane %v3983_v30, 6  ;;  %v4326_v63 = vsel %vm4235_vm1, %v4056_v44, -inf }
 0x477   : > { %v4270_v9 = vrot.slane %v4269_v60, 1  ;;  %v5155_v1 = vmul.f32 %v10249_v35, %v10249_v35 }
 0x479   : > { %v4271_v17 = vmax.f32 %v4269_v60, %v4270_v9 }
 0x47a   : > { %v3693_v42 = vpop.f32.mrf.mxu0 }
 0x47b   : > { %v3883_v58 = vadd.f32 %v3829_v13, %v3693_v42  ;;  %v4277_v42 = vrot.slane %v4276_v54, 2  ;;  %v4818_v28 = vadd.f32 %v10229_v2, %v4271_v17 }
 0x47d   : > { %3740 = vmatmul.f32.gmra.mxu0 %v3596_v55  ;;  %3937 = vst.msk [vmem:[#allocation3 + $0x68] sm:$0xff] %vm635_vm0, %v3883_v58  ;;  %v4285_v55 = vmax.f32 %v4283_v43, %v4284_v39  ;;  %v4278_v13 = vmax.f32 %v4276_v54, %v4277_v42  ;;  %v4295_v58 = vrot.slane %v4294_v62, 2  ;;  %v4306_v54 = vrot.slane %v4305_v40, 1 }
 0x47f   : > { %v4286_v14 = vrot.slane %v4285_v55, 2  ;;  %v4296_v25 = vmax.f32 %v4294_v62, %v4295_v58  ;;  %v4335_v62 = vsel %vm4235_vm1, %v4057_v49, -inf }
 0x481   : > { %v4287_v22 = vmax.f32 %v4285_v55, %v4286_v14  ;;  %v4297_v43 = vrot.slane %v4296_v25, 1  ;;  %v3601_v55 = vld [vmem:[#allocation2 + $0x142] sm:$0xff]  ;;  %v4307_v14 = vmax.f32 %v4305_v40, %v4306_v54 }
 0x482   : > { %v3696_v7 = vpop.f32.mrf.mxu0 }
 0x483   : > { %v3884_v29 = vadd.f32 %v3830_v12, %v3696_v7  ;;  %v10235_v7 = vmax.f32 %v4816_v11, 0.0  ;;  %v3833_v12 = vld [vmem:[#allocation3 + $0x88] sm:$0xff]  ;;  %v4288_v18 = vrot.slane %v4287_v22, 1  ;;  %v4298_v60 = vmax.f32 %v4296_v25, %v4297_v43  ;;  %v3984_v43 = vld [vmem:[#allocation3 + $0x38] sm:$0xff] }
 0x484   : > { %v4822_v25 = vadd.f32 %v10229_v2, %v4307_v14 }
 0x485   : > { %3743 = vmatmul.f32.gmra.mxu0 %v3597_v0  ;;  %3938 = vst.msk [vmem:[#allocation3 + $0x70] sm:$0xff] %vm635_vm0, %v3884_v29  ;;  %v4279_v0 = vrot.slane %v4278_v13, 1  ;;  %v10244_v29 = vmax.f32 %v4817_v19, 0.0  ;;  %v5156_v20 = vmul.f32 %v10235_v7, %v10235_v7  ;;  %v4289_v59 = vmax.f32 %v4287_v22, %v4288_v18 }
 0x486   : > { %v4821_v17 = vadd.f32 %v10229_v2, %v4298_v60  ;;  %v10294_v44 = vmax.f32 %v4822_v25, 0.0 }
 0x487   : > { %v4280_v38 = vmax.f32 %v4278_v13, %v4279_v0  ;;  %v5157_v48 = vmul.f32 %v10244_v29, %v10244_v29  ;;  %v5010_v6 = vrot.slane %v10244_v29, 6  ;;  %v4820_v58 = vadd.f32 %v10229_v2, %v4289_v59 }
 0x488   : > { %v4066_v59 = vrot.slane %v3986_v37, 6 }
 0x489   : > { %v4819_v39 = vadd.f32 %v10229_v2, %v4280_v38  ;;  %v5285_v9 = vrot.slane %v5157_v48, 6  ;;  %v10287_v30 = vmax.f32 %v4820_v58, 0.0  ;;  %v3834_v48 = vld [vmem:[#allocation3 + $0x90] sm:$0xff] }
 0x48a   : > { %v3699_v45 = vpop.f32.mrf.mxu0  ;;  %v4372_v58 = vsel %vm4235_vm1, %v4066_v59, -inf }
 0x48b   : > { %v3885_v31 = vadd.f32 %v3831_v27, %v3699_v45  ;;  %v4309_v45 = vsel %vm4235_vm1, %v3985_v53, -inf  ;;  %v10255_v27 = vmax.f32 %v4818_v28, 0.0  ;;  %v10274_v11 = vmax.f32 %v4819_v39, 0.0  ;;  %v3602_v28 = vld [vmem:[#allocation2 + $0x14a] sm:$0xff]  ;;  %v3835_v39 = vld [vmem:[#allocation3 + $0x98] sm:$0xff] }
 0x48c   : > { %v4310_v32 = vmax.f32 %v4308_v51, %v4309_v45  ;;  %v4064_v45 = vrot.slane %v3986_v37, 2  ;;  %v5019_v49 = vrot.slane %v10287_v30, 3 }
 0x48d   : > { %3939 = vst.msk [vmem:[#allocation3 + $0x78] sm:$0xff] %vm635_vm0, %v3885_v31  ;;  %3746 = vmatmul.f32.gmra.mxu0 %v3598_v47  ;;  %v5007_v47 = vrot.slane %v10235_v7, 7  ;;  %v5283_v31 = vrot.slane %v5156_v20, 7  ;;  %v5158_v15 = vmul.f32 %v10255_v27, %v10255_v27  ;;  %v5016_v53 = vrot.slane %v10274_v11, 4 }
 0x48e   : > { %v4311_v13 = vrot.slane %v4310_v32, 4  ;;  %v5159_v5 = vmul.f32 %v10274_v11, %v10274_v11 }
 0x48f   : > { %v5284_v10 = vsel %vm5008_vm2, %v5283_v31, %v5155_v1  ;;  %v5160_v1 = vmul.f32 %v10287_v30, %v10287_v30 }
 0x490   : > { %v5286_v22 = vsel %vm5011_vm3, %v5285_v9, %v5284_v10  ;;  %v4312_v24 = vmax.f32 %v4310_v32, %v4311_v13  ;;  %v5289_v41 = vrot.slane %v5159_v5, 4  ;;  %v4058_v32 = vrot.slane %v3984_v43, 2 }
 0x492   : > { %v3702_v4 = vpop.f32.mrf.mxu0  ;;  %v4313_v23 = vrot.slane %v4312_v24, 2  ;;  %v4353_v14 = vsel %vm4235_vm1, %v4058_v32, -inf }
 0x493   : > { %v3886_v56 = vadd.f32 %v3832_v50, %v3702_v4  ;;  %v4319_v4 = vmax.f32 %v4317_v61, %v4318_v52  ;;  %v4328_v50 = vmax.f32 %v4326_v63, %v4327_v34  ;;  %v4345_v34 = vsel %vm4235_vm1, %v3986_v37, -inf }
 0x494   : > { %v4059_v61 = vrot.slane %v3984_v43, 4  ;;  %v4344_v63 = vsel %vm4235_vm1, %v3984_v43, -inf }
 0x495   : > { %3940 = vst.msk [vmem:[#allocation3 + $0x80] sm:$0xff] %vm635_vm0, %v3886_v56  ;;  %3749 = vmatmul.f32.gmra.mxu0 %v3599_v46  ;;  %v5009_v46 = vsel %vm5008_vm2, %v5007_v47, %v10249_v35  ;;  %v4337_v56 = vmax.f32 %v4335_v62, %v4336_v57  ;;  %v4320_v19 = vrot.slane %v4319_v4, 4  ;;  %v4329_v21 = vrot.slane %v4328_v50, 4 }
 0x496   : > { %v5012_v0 = vsel %vm5011_vm3, %v5010_v6, %v5009_v46  ;;  %v4065_v47 = vrot.slane %v3986_v37, 4  ;;  %v3603_v6 = vld [vmem:[#allocation2 + $0x152] sm:$0xff] }
 0x497   : > { %v4338_v3 = vrot.slane %v4337_v56, 4  ;;  %v4321_v33 = vmax.f32 %v4319_v4, %v4320_v19  ;;  %v4330_v20 = vmax.f32 %v4328_v50, %v4329_v21  ;;  %v4060_v4 = vrot.slane %v3984_v43, 6 }
 0x498   : > { %v4346_v50 = vmax.f32 %v4344_v63, %v4345_v34  ;;  %v4363_v10 = vsel %vm4235_vm1, %v4065_v47, -inf  ;;  %v4362_v21 = vsel %vm4235_vm1, %v4059_v61, -inf }
 0x499   : > { %v4339_v18 = vmax.f32 %v4337_v56, %v4338_v3  ;;  %v4322_v51 = vrot.slane %v4321_v33, 2  ;;  %v4331_v52 = vrot.slane %v4330_v20, 2  ;;  %v3989_v3 = vld [vmem:[#allocation3 + $0x78] sm:$0xff]  ;;  %v4371_v5 = vsel %vm4235_vm1, %v4060_v4, -inf }
 0x49a   : > { %v3705_v26 = vpop.f32.mrf.mxu0  ;;  %v4364_v25 = vmax.f32 %v4362_v21, %v4363_v10  ;;  %v4074_v59 = vrot.slane %v3989_v3, 4 }
 0x49b   : > { %v3887_v16 = vadd.f32 %v3833_v12, %v3705_v26  ;;  %v5013_v26 = vrot.slane %v10255_v27, 5  ;;  %v5287_v12 = vrot.slane %v5158_v15, 5  ;;  %v4340_v57 = vrot.slane %v4339_v18, 2 }
 0x49c   : > { %v4323_v9 = vmax.f32 %v4321_v33, %v4322_v51  ;;  %v4332_v56 = vmax.f32 %v4330_v20, %v4331_v52  ;;  %v3987_v33 = vld [vmem:[#allocation3 + $0x60] sm:$0xff]  ;;  %v10317_v20 = vmul.f32 %v10294_v44, %v10294_v44 }
 0x49d   : > { %3941 = vst.msk [vmem:[#allocation3 + $0x88] sm:$0xff] %vm635_vm0, %v3887_v16  ;;  %3752 = vmatmul.f32.gmra.mxu0 %v3600_v8  ;;  %v10289_v16 = vmax.f32 %v4821_v17, 0.0  ;;  %v5015_v36 = vsel %vm5014_vm4, %v5013_v26, %v5012_v0  ;;  %v5288_v38 = vsel %vm5014_vm4, %v5287_v12, %v5286_v22  ;;  %v4341_v15 = vmax.f32 %v4339_v18, %v4340_v57  ;;  %v3836_v17 = vld [vmem:[#allocation3 + $0xa0] sm:$0xff] }
 0x49e   : > { %v5018_v40 = vsel %vm5017_vm5, %v5016_v53, %v5015_v36  ;;  %v5290_v62 = vsel %vm5017_vm5, %v5289_v41, %v5288_v38  ;;  %v5291_v26 = vrot.slane %v5160_v1, 3  ;;  %v4324_v12 = vrot.slane %v4323_v9, 1 }
 0x49f   : > { %v5022_v31 = vrot.slane %v10289_v16, 2  ;;  %v5161_v13 = vmul.f32 %v10289_v16, %v10289_v16  ;;  %v5021_v19 = vsel %vm5020_vm6, %v5019_v49, %v5018_v40  ;;  %v4342_v37 = vrot.slane %v4341_v15, 1  ;;  %v3604_v49 = vld [vmem:[#allocation2 + $0x15a] sm:$0xff] }
 0x4a0   : > { %v4073_v36 = vrot.slane %v3989_v3, 2  ;;  %v5025_v38 = vrot.slane %v10294_v44, 1  ;;  %v4067_v47 = vrot.slane %v3987_v33, 2  ;;  %v5292_v51 = vsel %vm5020_vm6, %v5291_v26, %v5290_v62 }
 0x4a1   : > { %v5024_v41 = vsel %vm5023_vm7, %v5022_v31, %v5021_v19  ;;  %v5293_v43 = vrot.slane %v5161_v13, 2  ;;  %v4325_v52 = vmax.f32 %v4323_v9, %v4324_v12  ;;  %v5295_v32 = vrot.slane %v10317_v20, 1 }
 0x4a2   : > { %v3708_v42 = vpop.f32.mrf.mxu0  ;;  %v4343_v57 = vmax.f32 %v4341_v15, %v4342_v37  ;;  %v4381_v1 = vsel %vm4235_vm1, %v3989_v3, -inf  ;;  %v4399_v15 = vsel %vm4235_vm1, %v4074_v59, -inf }
 0x4a3   : > { %v3888_v54 = vadd.f32 %v3834_v48, %v3708_v42  ;;  %v4354_v42 = vsel %vm4235_vm1, %v4064_v45, -inf  ;;  %v4365_v45 = vrot.slane %v4364_v25, 4  ;;  %v4824_v10 = vadd.f32 %v10229_v2, %v4325_v52 }
 0x4a4   : > { %v4355_v22 = vmax.f32 %v4353_v14, %v4354_v42  ;;  %v4389_v42 = vsel %vm4235_vm1, %v4067_v47, -inf }
 0x4a5   : > { %3755 = vmatmul.f32.gmra.mxu0 %v3601_v55  ;;  %v4314_v55 = vmax.f32 %v4312_v24, %v4313_v23  ;;  %3942 = vst.msk [vmem:[#allocation3 + $0x90] sm:$0xff] %vm635_vm0, %v3888_v54  ;;  %v4347_v24 = vrot.slane %v4346_v50, 4  ;;  %v4366_v4 = vmax.f32 %v4364_v25, %v4365_v45  ;;  %v3605_v25 = vld [vmem:[#allocation2 + $0x162] sm:$0xff]  ;;  %v10349_v45 = vsel %vm5026_vm8, %v5025_v38, %v5024_v41 }
 0x4a6   : > { %v4356_v40 = vrot.slane %v4355_v22, 4 }
 0x4a7   : > { %v4315_v0 = vrot.slane %v4314_v55, 1  ;;  %v4348_v23 = vmax.f32 %v4346_v50, %v4347_v24  ;;  %v4068_v50 = vrot.slane %v3987_v33, 4  ;;  %v3838_v24 = vld [vmem:[#allocation3 + $0xb0] sm:$0xff] }
 0x4a8   : > { %v4357_v63 = vmax.f32 %v4355_v22, %v4356_v40 }
 0x4a9   : > { %v4316_v18 = vmax.f32 %v4314_v55, %v4315_v0  ;;  %v4075_v55 = vrot.slane %v3989_v3, 6  ;;  %v4349_v62 = vrot.slane %v4348_v23, 2  ;;  %v4367_v3 = vrot.slane %v4366_v4, 2 }
 0x4aa   : > { %v3711_v8 = vpop.f32.mrf.mxu0  ;;  %v4358_v19 = vrot.slane %v4357_v63, 2 }
 0x4ab   : > { %v3889_v60 = vadd.f32 %v3835_v39, %v3711_v8  ;;  %v4333_v8 = vrot.slane %v4332_v56, 1  ;;  %v3837_v39 = vld [vmem:[#allocation3 + $0xa8] sm:$0xff]  ;;  %v4823_v61 = vadd.f32 %v10229_v2, %v4316_v18  ;;  %v4408_v21 = vsel %vm4235_vm1, %v4075_v55, -inf }
 0x4ac   : > { %v4350_v22 = vmax.f32 %v4348_v23, %v4349_v62  ;;  %v4359_v40 = vmax.f32 %v4357_v63, %v4358_v19 }
 0x4ad   : > { %3758 = vmatmul.f32.gmra.mxu0 %v3602_v28  ;;  %3943 = vst.msk [vmem:[#allocation3 + $0x98] sm:$0xff] %vm635_vm0, %v3889_v60  ;;  %v4373_v28 = vmax.f32 %v4371_v5, %v4372_v58  ;;  %v4334_v34 = vmax.f32 %v4332_v56, %v4333_v8  ;;  %v4390_v60 = vsel %vm4235_vm1, %v4073_v36, -inf  ;;  %v5294_v56 = vsel %vm5023_vm7, %v5293_v43, %v5292_v51 }
 0x4ae   : > { %v4391_v9 = vmax.f32 %v4389_v42, %v4390_v60  ;;  %v10335_v0 = vmax.f32 %v4823_v61, 0.0  ;;  %v4351_v23 = vrot.slane %v4350_v22, 1  ;;  %v10352_v47 = vsel %vm5026_vm8, %v5295_v32, %v5294_v56  ;;  %v5805_v56 = vld [vmem:[%s12750_s3 + $0x20] sm:$0xff] }
 0x4af   : > { %v4374_v54 = vrot.slane %v4373_v28, 4  ;;  %v4825_v58 = vadd.f32 %v10229_v2, %v4334_v34  ;;  %v3990_v34 = vld [vmem:[#allocation3 + $0x80] sm:$0xff]  ;;  %8762 = vmatpush.msra.mxu1 %v5805_v56  ;;  %5880 = vmatpush.msrb.mxu0 %v5805_v56 }
 0x4b0   : > { %12833 = vst [vmem:[#allocation11_spill] sm:$0xff] %v10335_v0  ;;  %v4392_v12 = vrot.slane %v4391_v9, 4  ;;  %v4352_v63 = vmax.f32 %v4350_v22, %v4351_v23  ;;  %v4076_v55 = vrot.slane %v3990_v34, 2 }
 0x4b1   : > { %v4375_v13 = vmax.f32 %v4373_v28, %v4374_v54  ;;  %v10341_v18 = vmax.f32 %v4825_v58, 0.0  ;;  %v5991_v58 = vld [vmem:[%s12750_s3 + $0x60] sm:$0xff] }
 0x4b2   : > { %v3714_v46 = vpop.f32.mrf.mxu0  ;;  %v4393_v51 = vmax.f32 %v4391_v9, %v4392_v12  ;;  %v3839_v9 = vld [vmem:[#allocation3 + $0xb8] sm:$0xff]  ;;  %8770 = vmatpush.msra.mxu2 %v5991_v58 }
 0x4b3   : > { %v3890_v53 = vadd.f32 %v3836_v17, %v3714_v46  ;;  %v4069_v46 = vrot.slane %v3987_v33, 6  ;;  %v4826_v17 = vadd.f32 %v10229_v2, %v4343_v57  ;;  %v4376_v20 = vrot.slane %v4375_v13, 2  ;;  %12835 = vst [vmem:[#allocation13_spill] sm:$0xff] %v10341_v18  ;;  %v10359_v57 = vld [vmem:[#allocation3 + $0x68] sm:$0xff] }
 0x4b4   : > { %v5030_v38 = vrot.slane %v10341_v18, 6  ;;  %v10366_v32 = vmul.f32 %v10341_v18, %v10341_v18  ;;  %v4071_v42 = vrot.slane %v10359_v57, 4 }
 0x4b5   : > { %3761 = vmatmul.f32.gmra.mxu0 %v3603_v6  ;;  %3944 = vst.msk [vmem:[#allocation3 + $0xa0] sm:$0xff] %vm635_vm0, %v3890_v53  ;;  %v4380_v6 = vsel %vm4235_vm1, %v3987_v33, -inf  ;;  %v4398_v53 = vsel %vm4235_vm1, %v4068_v50, -inf  ;;  %v4407_v26 = vsel %vm4235_vm1, %v4069_v46, -inf  ;;  %v10339_v33 = vmax.f32 %v4824_v10, 0.0 }
 0x4b6   : > { %v4382_v14 = vmax.f32 %v4380_v6, %v4381_v1  ;;  %v4400_v8 = vmax.f32 %v4398_v53, %v4399_v15  ;;  %v4409_v36 = vmax.f32 %v4407_v26, %v4408_v21  ;;  %v10344_v43 = vmax.f32 %v4826_v17, 0.0 }
 0x4b7   : > { %12834 = vst [vmem:[#allocation12_spill] sm:$0xff] %v10339_v33  ;;  %v5028_v54 = vrot.slane %v10339_v33, 7  ;;  %v5164_v41 = vmul.f32 %v10339_v33, %v10339_v33  ;;  %v4077_v1 = vrot.slane %v3990_v34, 4  ;;  %v4070_v50 = vrot.slane %v10359_v57, 2 }
 0x4b8   : > { %v4383_v37 = vrot.slane %v4382_v14, 4  ;;  %12836 = vst [vmem:[#allocation14_spill] sm:$0xff] %v10344_v43  ;;  %v4401_v52 = vrot.slane %v4400_v8, 4  ;;  %v4410_v60 = vrot.slane %v4409_v36, 4  ;;  %v10370_v61 = vmul.f32 %v10344_v43, %v10344_v43 }
 0x4b9   : > { %v4394_v46 = vrot.slane %v4393_v51, 2  ;;  %v5297_v17 = vrot.slane %v5164_v41, 7  ;;  %v4078_v53 = vrot.slane %v3990_v34, 6  ;;  %v4072_v26 = vrot.slane %v10359_v57, 6 }
 0x4ba   : > { %v3717_v48 = vpop.f32.mrf.mxu0  ;;  %v4384_v59 = vmax.f32 %v4382_v14, %v4383_v37  ;;  %v4402_v6 = vmax.f32 %v4400_v8, %v4401_v52  ;;  %v4417_v14 = vsel %vm4235_vm1, %v3990_v34, -inf  ;;  %v4434_v37 = vsel %vm4235_vm1, %v4071_v42, -inf }
 0x4bb   : > { %v3891_v31 = vadd.f32 %v3837_v39, %v3717_v48  ;;  %v10356_v48 = vmul.f32 %v10335_v0, %v10335_v0  ;;  %v4377_v39 = vmax.f32 %v4375_v13, %v4376_v20  ;;  %v4411_v13 = vmax.f32 %v4409_v36, %v4410_v60 }
 0x4bc   : > { %v4385_v10 = vrot.slane %v4384_v59, 2  ;;  %v4395_v12 = vmax.f32 %v4393_v51, %v4394_v46  ;;  %v4403_v8 = vrot.slane %v4402_v6, 2  ;;  %v4425_v20 = vsel %vm4235_vm1, %v4070_v50, -inf }
 0x4bd   : > { %3764 = vmatmul.f32.gmra.mxu0 %v3604_v49  ;;  %3945 = vst.msk [vmem:[#allocation3 + $0xa8] sm:$0xff] %vm635_vm0, %v3891_v31  ;;  %v4368_v49 = vmax.f32 %v4366_v4, %v4367_v3  ;;  %v4360_v31 = vrot.slane %v4359_v40, 1  ;;  %v3606_v4 = vld [vmem:[#allocation2 + $0x16a] sm:$0xff]  ;;  %v4378_v22 = vrot.slane %v4377_v39, 1  ;;  %v4416_v3 = vsel %vm4235_vm1, %v10359_v57, -inf }
 0x4be   : > { %v4386_v36 = vmax.f32 %v4384_v59, %v4385_v10  ;;  %v5029_v23 = vsel %vm5008_vm2, %v5028_v54, %v10335_v0  ;;  %v5299_v41 = vrot.slane %v10366_v32, 6  ;;  %v4827_v51 = vadd.f32 %v10229_v2, %v4352_v63 }
 0x4bf   : > { %v4361_v19 = vmax.f32 %v4359_v40, %v4360_v31  ;;  %v4369_v21 = vrot.slane %v4368_v49, 1  ;;  %v4412_v40 = vrot.slane %v4411_v13, 2  ;;  %v4379_v31 = vmax.f32 %v4377_v39, %v4378_v22 }
 0x4c0   : > { %v4444_v57 = vsel %vm4235_vm1, %v4078_v53, -inf  ;;  %v5298_v59 = vsel %vm5008_vm2, %v5297_v17, %v10356_v48  ;;  %v4443_v54 = vsel %vm4235_vm1, %v4072_v26, -inf  ;;  %v4387_v42 = vrot.slane %v4386_v36, 1 }
 0x4c1   : > { %v4370_v52 = vmax.f32 %v4368_v49, %v4369_v21  ;;  %v4828_v49 = vadd.f32 %v10229_v2, %v4361_v19  ;;  %v4413_v32 = vmax.f32 %v4411_v13, %v4412_v40  ;;  %v5031_v56 = vsel %vm5011_vm3, %v5030_v38, %v5029_v23 }
 0x4c2   : > { %v3720_v5 = vpop.f32.mrf.mxu0  ;;  %v5032_v48 = vrot.slane %v10344_v43, 5  ;;  %v10409_v10 = vmax.f32 %v4827_v51, 0.0  ;;  %v5301_v17 = vrot.slane %v10370_v61, 5  ;;  %v4388_v21 = vmax.f32 %v4386_v36, %v4387_v42  ;;  %v3608_v61 = vld [vmem:[#allocation2 + $0x17a] sm:$0xff] }
 0x4c3   : > { %v3892_v28 = vadd.f32 %v3838_v24, %v3720_v5  ;;  %v4426_v5 = vsel %vm4235_vm1, %v4076_v55, -inf  ;;  %v4435_v24 = vsel %vm4235_vm1, %v4077_v1, -inf  ;;  %v3607_v1 = vld [vmem:[#allocation2 + $0x172] sm:$0xff]  ;;  %v4829_v39 = vadd.f32 %v10229_v2, %v4370_v52 }
 0x4c4   : > { %v4427_v34 = vmax.f32 %v4425_v20, %v4426_v5  ;;  %v4436_v60 = vmax.f32 %v4434_v37, %v4435_v24  ;;  %12837 = vst [vmem:[#allocation15_spill] sm:$0xff] %v10409_v10  ;;  %v10413_v19 = vmax.f32 %v4828_v49, 0.0  ;;  %v4414_v22 = vrot.slane %v4413_v32, 1  ;;  %v3993_v42 = vld [vmem:[#allocation3 + $0xa8] sm:$0xff] }
 0x4c5   : > { %3946 = vst.msk [vmem:[#allocation3 + $0xb0] sm:$0xff] %vm635_vm0, %v3892_v28  ;;  %3767 = vmatmul.f32.gmra.mxu0 %v3605_v25  ;;  %v6216_v25 = vld [vmem:[%s12750_s3 + $0xa0] sm:$0xff]  ;;  %v4418_v28 = vmax.f32 %v4416_v3, %v4417_v14  ;;  %v5300_v14 = vsel %vm5011_vm3, %v5299_v41, %v5298_v59  ;;  %v10415_v3 = vmax.f32 %v4829_v39, 0.0  ;;  %v5033_v24 = vsel %vm5014_vm4, %v5032_v48, %v5031_v56  ;;  %v3841_v56 = vld [vmem:[#allocation3 + $0xc8] sm:$0xff] }
 0x4c6   : > { %8778 = vmatpush.msra.mxu3 %v6216_v25  ;;  %v4428_v63 = vrot.slane %v4427_v34, 4  ;;  %v4437_v46 = vrot.slane %v4436_v60, 4  ;;  %12838 = vst [vmem:[#allocation16_spill] sm:$0xff] %v10413_v19  ;;  %v5302_v25 = vsel %vm5014_vm4, %v5301_v17, %v5300_v14  ;;  %v5036_v40 = vrot.slane %v10413_v19, 3 }
 0x4c7   : > { %v4419_v50 = vrot.slane %v4418_v28, 4  ;;  %12839 = vst [vmem:[#allocation17_spill] sm:$0xff] %v10415_v3  ;;  %v10428_v23 = vmul.f32 %v10413_v19, %v10413_v19  ;;  %v4415_v52 = vmax.f32 %v4413_v32, %v4414_v22  ;;  %v3840_v32 = vld [vmem:[#allocation3 + $0xc0] sm:$0xff]  ;;  %v4085_v22 = vrot.slane %v3993_v42, 2 }
 0x4c8   : > { %v4429_v38 = vmax.f32 %v4427_v34, %v4428_v63  ;;  %v4438_v53 = vmax.f32 %v4436_v60, %v4437_v46  ;;  %v4831_v34 = vadd.f32 %v10229_v2, %v4388_v21  ;;  %v5038_v60 = vrot.slane %v10415_v3, 2 }
 0x4c9   : > { %v4420_v58 = vmax.f32 %v4418_v28, %v4419_v50  ;;  %v5034_v28 = vrot.slane %v10409_v10, 4  ;;  %v5305_v39 = vrot.slane %v10428_v23, 3  ;;  %v4834_v63 = vadd.f32 %v10229_v2, %v4415_v52 }
 0x4ca   : > { %v3723_v62 = vpop.f32.mrf.mxu0  ;;  %v4430_v41 = vrot.slane %v4429_v38, 2  ;;  %v10447_v46 = vmax.f32 %v4831_v34, 0.0 }
 0x4cb   : > { %v3893_v15 = vadd.f32 %v3839_v9, %v3723_v62  ;;  %v4396_v62 = vrot.slane %v4395_v12, 1  ;;  %v4445_v9 = vmax.f32 %v4443_v54, %v4444_v57  ;;  %v4421_v36 = vrot.slane %v4420_v58, 2 }
 0x4cc   : > { %12842 = vst [vmem:[#allocation20_spill] sm:$0xff] %v10447_v46  ;;  %v4431_v48 = vmax.f32 %v4429_v38, %v4430_v41  ;;  %v4453_v41 = vsel %vm4235_vm1, %v3993_v42, -inf }
 0x4cd   : > { %3770 = vmatmul.f32.gmra.mxu0 %v3606_v4  ;;  %3947 = vst.msk [vmem:[#allocation3 + $0xb8] sm:$0xff] %vm635_vm0, %v3893_v15  ;;  %v4404_v4 = vmax.f32 %v4402_v6, %v4403_v8  ;;  %v4830_v6 = vadd.f32 %v10229_v2, %v4379_v31  ;;  %v4397_v15 = vmax.f32 %v4395_v12, %v4396_v62  ;;  %v4446_v5 = vrot.slane %v4445_v9, 4 }
 0x4ce   : > { %v5167_v12 = vmul.f32 %v10409_v10, %v10409_v10  ;;  %v4439_v31 = vrot.slane %v4438_v53, 2  ;;  %v4422_v54 = vmax.f32 %v4420_v58, %v4421_v36  ;;  %v4432_v36 = vrot.slane %v4431_v48, 1 }
 0x4cf   : > { %v4405_v13 = vrot.slane %v4404_v4, 1  ;;  %v10419_v26 = vmax.f32 %v4830_v6, 0.0  ;;  %v4832_v37 = vadd.f32 %v10229_v2, %v4397_v15  ;;  %v4447_v51 = vmax.f32 %v4445_v9, %v4446_v5  ;;  %v3991_v15 = vld [vmem:[#allocation3 + $0x90] sm:$0xff] }
 0x4d0   : > { %v5303_v62 = vrot.slane %v5167_v12, 4  ;;  %v4440_v6 = vmax.f32 %v4438_v53, %v4439_v31  ;;  %v3609_v12 = vld [vmem:[#allocation2 + $0x182] sm:$0xff]  ;;  %v4423_v53 = vrot.slane %v4422_v54, 1  ;;  %v4080_v52 = vrot.slane %v3991_v15, 4 }
 0x4d1   : > { %12840 = vst [vmem:[#allocation18_spill] sm:$0xff] %v10419_v26  ;;  %v4406_v20 = vmax.f32 %v4404_v4, %v4405_v13  ;;  %v10439_v59 = vmul.f32 %v10419_v26, %v10419_v26  ;;  %v5035_v4 = vsel %vm5017_vm5, %v5034_v28, %v5033_v24  ;;  %v10443_v49 = vmax.f32 %v4832_v37, 0.0  ;;  %v3842_v24 = vld [vmem:[#allocation3 + $0xd0] sm:$0xff] }
 0x4d2   : > { %v10397_v55 = vpop.f32.mrf.mxu0  ;;  %v4448_v14 = vrot.slane %v4447_v51, 2  ;;  %v10451_v17 = vsel %vm5020_vm6, %v5036_v40, %v5035_v4  ;;  %v5304_v58 = vsel %vm5017_vm5, %v5303_v62, %v5302_v25  ;;  %v4079_v25 = vrot.slane %v3991_v15, 2 }
 0x4d3   : > { %v4833_v50 = vadd.f32 %v10229_v2, %v4406_v20  ;;  %12841 = vst [vmem:[#allocation19_spill] sm:$0xff] %v10443_v49  ;;  %v3894_v9 = vadd.f32 %v3840_v32, %v10397_v55  ;;  %v5172_v38 = vmul.f32 %v10443_v49, %v10443_v49  ;;  %v4086_v28 = vrot.slane %v3993_v42, 4 }
 0x4d4   : > { %v4087_v20 = vrot.slane %v3993_v42, 6  ;;  %v5171_v37 = vmul.f32 %v10447_v46, %v10447_v46  ;;  %v4441_v40 = vrot.slane %v4440_v6, 1  ;;  %v4449_v23 = vmax.f32 %v4447_v51, %v4448_v14 }
 0x4d5   : > { %3773 = vmatmul.f32.gmra.mxu0 %v3607_v1  ;;  %v10435_v1 = vmul.f32 %v10415_v3, %v10415_v3  ;;  %3948 = vst.msk [vmem:[#allocation3 + $0xc0] sm:$0xff] %vm635_vm0, %v3894_v9  ;;  %v10456_v55 = vmax.f32 %v4833_v50, 0.0  ;;  %v4081_v34 = vrot.slane %v3991_v15, 6  ;;  %v4462_v31 = vsel %vm4235_vm1, %v4085_v22, -inf }
 0x4d6   : > { %v5042_v62 = vrot.slane %v10443_v49, 7  ;;  %v5311_v50 = vrot.slane %v5172_v38, 7  ;;  %v4424_v32 = vmax.f32 %v4422_v54, %v4423_v53  ;;  %v4461_v51 = vsel %vm4235_vm1, %v4079_v25, -inf  ;;  %v3610_v53 = vld [vmem:[#allocation2 + $0x18a] sm:$0xff] }
 0x4d7   : > { %v5307_v21 = vrot.slane %v10435_v1, 2  ;;  %12843 = vst [vmem:[#allocation21_spill] sm:$0xff] %v10456_v55  ;;  %v5173_v4 = vmul.f32 %v10456_v55, %v10456_v55  ;;  %v4471_v9 = vsel %vm4235_vm1, %v4086_v28, -inf  ;;  %v5044_v14 = vrot.slane %v10456_v55, 6  ;;  %v3611_v1 = vld [vmem:[#allocation2 + $0x192] sm:$0xff] }
 0x4d8   : > { %v4433_v42 = vmax.f32 %v4431_v48, %v4432_v36  ;;  %v4463_v22 = vmax.f32 %v4461_v51, %v4462_v31  ;;  %v4479_v38 = vsel %vm4235_vm1, %v4081_v34, -inf  ;;  %v4835_v36 = vadd.f32 %v10229_v2, %v4424_v32  ;;  %v3994_v51 = vld [vmem:[#allocation3 + $0xb0] sm:$0xff] }
 0x4da   : > { %v3729_v8 = vpop.f32.mrf.mxu0 }
 0x4db   : > { %v3895_v13 = vadd.f32 %v3841_v56, %v3729_v8  ;;  %v4480_v56 = vsel %vm4235_vm1, %v4087_v20, -inf  ;;  %v5306_v20 = vsel %vm5020_vm6, %v5305_v39, %v5304_v58 }
 0x4dc   : > { %v4481_v28 = vmax.f32 %v4479_v38, %v4480_v56  ;;  %v10492_v56 = vmax.f32 %v4835_v36, 0.0 }
 0x4dd   : > { %3776 = vmatmul.f32.gmra.mxu0 %v3608_v61  ;;  %3949 = vst.msk [vmem:[#allocation3 + $0xc8] sm:$0xff] %vm635_vm0, %v3895_v13  ;;  %v10461_v61 = vmax.f32 %v4834_v63, 0.0  ;;  %v4452_v63 = vsel %vm4235_vm1, %v3991_v15, -inf  ;;  %v5043_v15 = vsel %vm5008_vm2, %v5042_v62, %v10447_v46 }
 0x4de   : > { %v4454_v13 = vmax.f32 %v4452_v63, %v4453_v41  ;;  %v4464_v41 = vrot.slane %v4463_v22, 4  ;;  %v4482_v32 = vrot.slane %v4481_v28, 4  ;;  %12845 = vst [vmem:[#allocation23_spill] sm:$0xff] %v10492_v56  ;;  %v5048_v36 = vrot.slane %v10492_v56, 4 }
 0x4df   : > { %12844 = vst [vmem:[#allocation22_spill] sm:$0xff] %v10461_v61  ;;  %v5174_v48 = vmul.f32 %v10461_v61, %v10461_v61  ;;  %v5046_v58 = vrot.slane %v10461_v61, 5 }
 0x4e0   : > { %v4455_v34 = vrot.slane %v4454_v13, 4  ;;  %v4465_v38 = vmax.f32 %v4463_v22, %v4464_v41  ;;  %v4090_v41 = vrot.slane %v3994_v51, 6 }
 0x4e2   : > { %v3732_v5 = vpop.f32.mrf.mxu0 }
 0x4e3   : > { %v3896_v8 = vadd.f32 %v3842_v24, %v3732_v5  ;;  %v4442_v5 = vmax.f32 %v4440_v6, %v4441_v40  ;;  %v4450_v24 = vrot.slane %v4449_v23, 1  ;;  %v5312_v6 = vsel %vm5008_vm2, %v5311_v50, %v5171_v37  ;;  %v3843_v40 = vld [vmem:[#allocation3 + $0xd8] sm:$0xff] }
 0x4e5   : > { %3950 = vst.msk [vmem:[#allocation3 + $0xd0] sm:$0xff] %vm635_vm0, %v3896_v8  ;;  %3779 = vmatmul.f32.gmra.mxu0 %v3609_v12  ;;  %v4470_v12 = vsel %vm4235_vm1, %v4080_v52, -inf  ;;  %v5313_v8 = vrot.slane %v5173_v4, 6  ;;  %v4836_v52 = vadd.f32 %v10229_v2, %v4433_v42  ;;  %v5045_v4 = vsel %vm5011_vm3, %v5044_v14, %v5043_v15 }
 0x4e6   : > { %v4472_v25 = vmax.f32 %v4470_v12, %v4471_v9  ;;  %v4451_v63 = vmax.f32 %v4449_v23, %v4450_v24  ;;  %v4837_v39 = vadd.f32 %v10229_v2, %v4442_v5  ;;  %v5315_v9 = vrot.slane %v5174_v48, 5  ;;  %v3992_v24 = vld [vmem:[#allocation3 + $0x98] sm:$0xff] }
 0x4e7   : > { %v5314_v37 = vsel %vm5011_vm3, %v5313_v8, %v5312_v6  ;;  %v10498_v14 = vsel %vm5023_vm7, %v5038_v60, %v10451_v17  ;;  %v10503_v23 = vsel %vm5023_vm7, %v5307_v21, %v5306_v20  ;;  %v5047_v42 = vsel %vm5014_vm4, %v5046_v58, %v5045_v4  ;;  %v3844_v8 = vld [vmem:[#allocation3 + $0xe0] sm:$0xff] }
 0x4e8   : > { %v4473_v50 = vrot.slane %v4472_v25, 4  ;;  %v10506_v5 = vmax.f32 %v4836_v52, 0.0  ;;  %v4456_v12 = vmax.f32 %v4454_v13, %v4455_v34  ;;  %v10510_v15 = vmax.f32 %v4837_v39, 0.0 }
 0x4e9   : > { %v4088_v60 = vrot.slane %v3994_v51, 2  ;;  %v4483_v21 = vmax.f32 %v4481_v28, %v4482_v32  ;;  %v4089_v20 = vrot.slane %v3994_v51, 4  ;;  %v4083_v52 = vrot.slane %v3992_v24, 4 }
 0x4ea   : > { %v3735_v54 = vpop.f32.mrf.mxu0  ;;  %12846 = vst [vmem:[#allocation24_spill] sm:$0xff] %v10506_v5  ;;  %v4474_v48 = vmax.f32 %v4472_v25, %v4473_v50  ;;  %v4489_v13 = vsel %vm4235_vm1, %v3994_v51, -inf  ;;  %v5050_v22 = vrot.slane %v10506_v5, 3  ;;  %v4457_v34 = vrot.slane %v4456_v12, 2 }
 0x4eb   : > { %v3897_v31 = vadd.f32 %v3843_v40, %v3735_v54  ;;  %v5316_v54 = vsel %vm5014_vm4, %v5315_v9, %v5314_v37  ;;  %12847 = vst [vmem:[#allocation25_spill] sm:$0xff] %v10510_v15  ;;  %v4082_v40 = vrot.slane %v3992_v24, 2  ;;  %v5175_v25 = vmul.f32 %v10492_v56, %v10492_v56 }
 0x4ec   : > { %v4084_v28 = vrot.slane %v3992_v24, 6  ;;  %v4498_v4 = vsel %vm4235_vm1, %v4088_v60, -inf  ;;  %v4484_v39 = vrot.slane %v4483_v21, 2  ;;  %v4507_v37 = vsel %vm4235_vm1, %v4089_v20, -inf }
 0x4ed   : > { %3782 = vmatmul.f32.gmra.mxu0 %v3610_v53  ;;  %3951 = vst.msk [vmem:[#allocation3 + $0xd8] sm:$0xff] %vm635_vm0, %v3897_v31  ;;  %v4838_v53 = vadd.f32 %v10229_v2, %v4451_v63  ;;  %v4466_v2 = vrot.slane %v4465_v38, 2  ;;  %v4488_v31 = vsel %vm4235_vm1, %v3992_v24, -inf  ;;  %v4475_v63 = vrot.slane %v4474_v48, 2 }
 0x4ee   : > { %v4490_v58 = vmax.f32 %v4488_v31, %v4489_v13  ;;  %v5049_v50 = vsel %vm5017_vm5, %v5048_v36, %v5047_v42  ;;  %v5176_v32 = vmul.f32 %v10506_v5, %v10506_v5  ;;  %v4497_v51 = vsel %vm4235_vm1, %v4082_v40, -inf  ;;  %v3845_v42 = vld [vmem:[#allocation3 + $0xe8] sm:$0xff]  ;;  %v3612_v36 = vld [vmem:[#allocation2 + $0x19a] sm:$0xff] }
 0x4ef   : > { %v4506_v9 = vsel %vm4235_vm1, %v4083_v52, -inf  ;;  %v4516_v24 = vsel %vm4235_vm1, %v4090_v41, -inf  ;;  %v5052_v60 = vrot.slane %v10510_v15, 2  ;;  %v4515_v13 = vsel %vm4235_vm1, %v4084_v28, -inf  ;;  %v6215_v28 = vld [vmem:[%s12750_s3 + $0x98] sm:$0xff] }
 0x4f0   : > { %v4508_v20 = vmax.f32 %v4506_v9, %v4507_v37  ;;  %v4476_v62 = vmax.f32 %v4474_v48, %v4475_v63  ;;  %v4485_v57 = vmax.f32 %v4483_v21, %v4484_v39  ;;  %v4491_v5 = vrot.slane %v4490_v58, 4  ;;  %v5804_v48 = vld [vmem:[%s12750_s3 + $0x18] sm:$0xff]  ;;  %8779 = vmatpush.msra.mxu3 %v6215_v28 }
 0x4f1   : > { %v10529_v56 = vmax.f32 %v4838_v53, 0.0  ;;  %v4517_v52 = vmax.f32 %v4515_v13, %v4516_v24  ;;  %8763 = vmatpush.msra.mxu1 %v5804_v48  ;;  %v12850_v39 = vrot.slane %v10439_v59, 1  ;;  %5881 = vmatpush.msrb.mxu0 %v5804_v48 }
 0x4f2   : > { %v3738_v17 = vpop.f32.mrf.mxu0  ;;  %v4509_v21 = vrot.slane %v4508_v20, 4 }
 0x4f3   : > { %v3898_v6 = vadd.f32 %v3844_v8, %v3738_v17  ;;  %v4458_v17 = vmax.f32 %v4456_v12, %v4457_v34  ;;  %v4467_v8 = vmax.f32 %v4465_v38, %v4466_v2  ;;  %12848 = vst [vmem:[#allocation26_spill] sm:$0xff] %v10529_v56  ;;  %v5051_v12 = vsel %vm5020_vm6, %v5050_v22, %v5049_v50  ;;  %v5990_v22 = vld [vmem:[%s12750_s3 + $0x58] sm:$0xff] }
 0x4f4   : > { %v5177_v38 = vmul.f32 %v10510_v15, %v10510_v15  ;;  %v5319_v34 = vrot.slane %v5176_v32, 3  ;;  %v5053_v37 = vsel %vm5023_vm7, %v5052_v60, %v5051_v12  ;;  %v4477_v50 = vrot.slane %v4476_v62, 1  ;;  %8771 = vmatpush.msra.mxu2 %v5990_v22  ;;  %v3613_v60 = vld [vmem:[#allocation2 + $0x1a2] sm:$0xff] }
 0x4f5   : > { %3952 = vst.msk [vmem:[#allocation3 + $0xe0] sm:$0xff] %vm635_vm0, %v3898_v6  ;;  %3785 = vmatmul.f32.gmra.mxu0 %v3611_v1  ;;  %v4499_v1 = vmax.f32 %v4497_v51, %v4498_v4  ;;  %v5317_v6 = vrot.slane %v5175_v25, 4  ;;  %v4459_v2 = vrot.slane %v4458_v17, 1  ;;  %v4468_v41 = vrot.slane %v4467_v8, 1 }
 0x4f6   : > { %v12849_v4 = vrot.slane %v10419_v26, 1  ;;  %v4486_v32 = vrot.slane %v4485_v57, 1  ;;  %v4492_v51 = vmax.f32 %v4490_v58, %v4491_v5  ;;  %v5054_v9 = vrot.slane %v10529_v56, 1 }
 0x4f7   : > { %v4500_v25 = vrot.slane %v4499_v1, 4  ;;  %v5318_v53 = vsel %vm5017_vm5, %v5317_v6, %v5316_v54  ;;  %v5310_v54 = vsel %vm5026_vm8, %v12850_v39, %v10503_v23  ;;  %v5178_v24 = vmul.f32 %v10529_v56, %v10529_v56 }
 0x4f8   : > { %v5041_v63 = vsel %vm5026_vm8, %v12849_v4, %v10498_v14  ;;  %v5321_v6 = vrot.slane %v5177_v38, 2  ;;  %v4518_v14 = vrot.slane %v4517_v52, 4  ;;  %v5320_v13 = vsel %vm5020_vm6, %v5319_v34, %v5318_v53  ;;  %v10571_v34 = vld [vmem:[%s12749_s2] ss:$0 sm:$0xff]  ;;  %v3995_v4 = vld [vmem:[#allocation3 + $0xc0] sm:$0xff] }
 0x4f9   : > { %v4460_v59 = vmax.f32 %v4458_v17, %v4459_v2  ;;  %v4501_v23 = vmax.f32 %v4499_v1, %v4500_v25  ;;  %v5055_v5 = vsel %vm5026_vm8, %v5054_v9, %v5053_v37  ;;  %v5134_v58 = vsel %vm635_vm0, %v10349_v45, 0.0  ;;  %v3997_v2 = vld [vmem:[#allocation3 + $0xd8] sm:$0xff] }
 0x4fa   : > { %v3741_v31 = vpop.f32.mrf.mxu0  ;;  %v4478_v12 = vmax.f32 %v4476_v62, %v4477_v50  ;;  %v4487_v48 = vmax.f32 %v4485_v57, %v4486_v32  ;;  %v4493_v38 = vrot.slane %v4492_v51, 2  ;;  %v5404_v22 = vsel %vm635_vm0, %v5310_v54, 0.0 }
 0x4fb   : > { %v3899_v40 = vadd.f32 %v3845_v42, %v3741_v31  ;;  %v4469_v31 = vmax.f32 %v4467_v8, %v4468_v41  ;;  %v4510_v42 = vmax.f32 %v4508_v20, %v4509_v21  ;;  %v5322_v17 = vsel %vm5023_vm7, %v5321_v6, %v5320_v13 }
 0x4fc   : > { %v5323_v8 = vrot.slane %v5178_v24, 1  ;;  %v4519_v1 = vmax.f32 %v4517_v52, %v4518_v14  ;;  %v5403_v20 = vsel %vm635_vm0, %v10352_v47, 0.0  ;;  %v4839_v45 = vadd.f32 %v10571_v34, %v4460_v59 }
 0x4fd   : > { %3953 = vst.msk [vmem:[#allocation3 + $0xe8] sm:$0xff] %vm635_vm0, %v3899_v40  ;;  %3788 = vmatmul.f32.gmra.mxu0 %v3612_v36  ;;  %v5135_v40 = vsel %vm635_vm0, %v5041_v63, 0.0  ;;  %v4840_v62 = vadd.f32 %v10571_v34, %v4469_v31  ;;  %v4502_v57 = vrot.slane %v4501_v23, 2  ;;  %v5137_v41 = vsel %vm635_vm0, %v5055_v5, 0.0 }
 0x4fe   : > { %v4511_v25 = vrot.slane %v4510_v42, 2  ;;  %v5136_v53 = vadd.f32 %v5135_v40, %v5134_v58  ;;  %v10576_v52 = vadd.f32 %v5404_v22, %v5403_v20  ;;  %v4841_v47 = vadd.f32 %v10571_v34, %v4478_v12 }
 0x4ff   : > { %v4842_v21 = vadd.f32 %v10571_v34, %v4487_v48  ;;  %v4494_v28 = vmax.f32 %v4492_v51, %v4493_v38  ;;  %v10581_v63 = vsel %vm5026_vm8, %v5323_v8, %v5322_v17  ;;  %v4520_v39 = vrot.slane %v4519_v1, 2 }
 0x500   : > { %v4097_v54 = vrot.slane %v3997_v2, 2  ;;  %v4098_v37 = vrot.slane %v3997_v2, 4  ;;  %v10583_v50 = vadd.f32 %v5137_v41, %v5136_v53  ;;  %v10585_v32 = vmax.f32 %v4839_v45, 0.0 }
 0x501   : > { %v10587_v9 = vmax.f32 %v4840_v62, 0.0  ;;  %v4503_v24 = vmax.f32 %v4501_v23, %v4502_v57  ;;  %v4099_v6 = vrot.slane %v3997_v2, 6  ;;  %v4512_v14 = vmax.f32 %v4510_v42, %v4511_v25 }
 0x502   : > { %v10558_v36 = vpop.f32.mrf.mxu0  ;;  %12851 = vst [vmem:[#allocation27_spill] sm:$0xff] %v10585_v32  ;;  %v4091_v13 = vrot.slane %v3995_v4, 2  ;;  %v4092_v59 = vrot.slane %v3995_v4, 4  ;;  %v4525_v51 = vsel %vm4235_vm1, %v3997_v2, -inf  ;;  %v10590_v5 = vmax.f32 %v4841_v47, 0.0 }
 0x503   : > { %12852 = vst [vmem:[#allocation28_spill] sm:$0xff] %v10587_v9  ;;  %v10592_v58 = vmax.f32 %v4842_v21, 0.0  ;;  %v4495_v40 = vrot.slane %v4494_v28, 1  ;;  %v4093_v12 = vrot.slane %v3995_v4, 6  ;;  %v4521_v48 = vmax.f32 %v4519_v1, %v4520_v39 }
 0x504   : > { %12853 = vst [vmem:[#allocation29_spill] sm:$0xff] %v10590_v5  ;;  %v4524_v38 = vsel %vm4235_vm1, %v3995_v4, -inf  ;;  %v4534_v22 = vsel %vm4235_vm1, %v4097_v54, -inf  ;;  %v4543_v23 = vsel %vm4235_vm1, %v4098_v37, -inf  ;;  %v5056_v42 = vrot.slane %v10587_v9, 7  ;;  %v3846_v54 = vld [vmem:[#allocation3 + $0xf0] sm:$0xff] }
 0x505   : > { %3791 = vmatmul.f32.gmra.mxu0 %v3613_v60  ;;  %v3614_v60 = vld [vmem:[#allocation2 + $0x1aa] sm:$0xff]  ;;  %12854 = vst [vmem:[#allocation30_spill] sm:$0xff] %v10592_v58  ;;  %v5180_v17 = vmul.f32 %v10587_v9, %v10587_v9  ;;  %v4526_v8 = vmax.f32 %v4524_v38, %v4525_v51  ;;  %v4552_v20 = vsel %vm4235_vm1, %v4099_v6, -inf  ;;  %v4504_v45 = vrot.slane %v4503_v24, 1  ;;  %v3847_v51 = vld [vmem:[#allocation3 + $0xf8] sm:$0xff] }
 0x506   : > { %v4513_v62 = vrot.slane %v4512_v14, 1  ;;  %v4533_v57 = vsel %vm4235_vm1, %v4091_v13, -inf  ;;  %v4542_v1 = vsel %vm4235_vm1, %v4092_v59, -inf  ;;  %v5058_v2 = vrot.slane %v10590_v5, 6 }
 0x507   : > { %v4551_v41 = vsel %vm4235_vm1, %v4093_v12, -inf  ;;  %v4535_v25 = vmax.f32 %v4533_v57, %v4534_v22  ;;  %v4544_v53 = vmax.f32 %v4542_v1, %v4543_v23  ;;  %v10607_v47 = vmul.f32 %v10590_v5, %v10590_v5  ;;  %v3615_v57 = vld [vmem:[#allocation2 + $0x1b2] sm:$0xff] }
 0x508   : > { %v10611_v21 = vmul.f32 %v10592_v58, %v10592_v58  ;;  %v4496_v4 = vmax.f32 %v4494_v28, %v4495_v40  ;;  %v4553_v39 = vmax.f32 %v4551_v41, %v4552_v20  ;;  %v5057_v37 = vsel %vm5008_vm2, %v5056_v42, %v10585_v32  ;;  %v3998_v41 = vld [vmem:[#allocation3 + $0xe0] sm:$0xff] }
 0x509   : > { %v5325_v6 = vrot.slane %v5180_v17, 7  ;;  %v4527_v13 = vrot.slane %v4526_v8, 4  ;;  %v3900_v59 = vadd.f32 %v3846_v54, %v10558_v36  ;;  %v4514_v12 = vmax.f32 %v4512_v14, %v4513_v62  ;;  %v3996_v62 = vld [vmem:[#allocation3 + $0xc8] sm:$0xff] }
 0x50a   : > { %v3747_v31 = vpop.f32.mrf.mxu0  ;;  %v4522_v38 = vrot.slane %v4521_v48, 1  ;;  %v5060_v1 = vrot.slane %v10592_v58, 5  ;;  %v5179_v28 = vmul.f32 %v10585_v32, %v10585_v32  ;;  %v4536_v40 = vrot.slane %v4535_v25, 4 }
 0x50b   : > { %v3901_v22 = vadd.f32 %v3847_v51, %v3747_v31  ;;  %v4545_v20 = vrot.slane %v4544_v53, 4  ;;  %3954 = vst.msk [vmem:[#allocation3 + $0xf0] sm:$0xff] %vm635_vm0, %v3900_v59  ;;  %v5059_v42 = vsel %vm5011_vm3, %v5058_v2, %v5057_v37  ;;  %v5327_v36 = vrot.slane %v10607_v47, 6  ;;  %v3848_v31 = vld [vmem:[#allocation3 + $0x100] sm:$0xff] }
 0x50c   : > { %v4554_v14 = vrot.slane %v4553_v39, 4  ;;  %v5326_v17 = vsel %vm5008_vm2, %v5325_v6, %v5179_v28  ;;  %v4528_v54 = vmax.f32 %v4526_v8, %v4527_v13  ;;  %v4523_v58 = vmax.f32 %v4521_v48, %v4522_v38 }
 0x50d   : > { %3794 = vmatmul.f32.gmra.mxu0 %v3614_v60  ;;  %v4505_v60 = vmax.f32 %v4503_v24, %v4504_v45  ;;  %v4843_v24 = vadd.f32 %v10571_v34, %v4496_v4  ;;  %3955 = vst.msk [vmem:[#allocation3 + $0xf8] sm:$0xff] %vm635_vm0, %v3901_v22  ;;  %v4845_v2 = vadd.f32 %v10571_v34, %v4514_v12  ;;  %v4561_v47 = vsel %vm4235_vm1, %v3998_v41, -inf  ;;  %v3849_v45 = vld [vmem:[#allocation3 + $0x108] sm:$0xff] }
 0x50e   : > { %v4537_v4 = vmax.f32 %v4535_v25, %v4536_v40  ;;  %v4546_v37 = vmax.f32 %v4544_v53, %v4545_v20  ;;  %v4100_v5 = vrot.slane %v3998_v41, 2  ;;  %v4101_v22 = vrot.slane %v3998_v41, 4  ;;  %v3616_v20 = vld [vmem:[#allocation2 + $0x1ba] sm:$0xff] }
 0x50f   : > { %v4844_v59 = vadd.f32 %v10571_v34, %v4505_v60  ;;  %v10630_v6 = vmax.f32 %v4843_v24, 0.0  ;;  %v4560_v28 = vsel %vm4235_vm1, %v3996_v62, -inf  ;;  %v4555_v8 = vmax.f32 %v4553_v39, %v4554_v14 }
 0x510   : > { %v4102_v13 = vrot.slane %v3998_v41, 6  ;;  %v4095_v48 = vrot.slane %v3996_v62, 4  ;;  %v4529_v38 = vrot.slane %v4528_v54, 2  ;;  %v4562_v60 = vmax.f32 %v4560_v28, %v4561_v47 }
 0x511   : > { %12855 = vst [vmem:[#allocation31_spill] sm:$0xff] %v10630_v6  ;;  %v4846_v12 = vadd.f32 %v10571_v34, %v4523_v58  ;;  %v10636_v25 = vmax.f32 %v4845_v2, 0.0  ;;  %v4096_v53 = vrot.slane %v3996_v62, 6  ;;  %v4547_v24 = vrot.slane %v4546_v37, 2 }
 0x512   : > { %v3750_v23 = vpop.f32.mrf.mxu0  ;;  %v4579_v39 = vsel %vm4235_vm1, %v4101_v22, -inf  ;;  %v5062_v41 = vrot.slane %v10630_v6, 4  ;;  %v5183_v14 = vmul.f32 %v10630_v6, %v10630_v6  ;;  %v4556_v47 = vrot.slane %v4555_v8, 2 }
 0x513   : > { %v3902_v51 = vadd.f32 %v3848_v31, %v3750_v23  ;;  %v4094_v23 = vrot.slane %v3996_v62, 2  ;;  %12857 = vst [vmem:[#allocation33_spill] sm:$0xff] %v10636_v25  ;;  %v4538_v31 = vrot.slane %v4537_v4, 2  ;;  %v4588_v58 = vsel %vm4235_vm1, %v4102_v13, -inf }
 0x514   : > { %v4578_v62 = vsel %vm4235_vm1, %v4095_v48, -inf  ;;  %v4530_v2 = vmax.f32 %v4528_v54, %v4529_v38  ;;  %v4563_v28 = vrot.slane %v4562_v60, 4  ;;  %v5061_v56 = vsel %vm5014_vm4, %v5060_v1, %v5059_v42 }
 0x515   : > { %3797 = vmatmul.f32.gmra.mxu0 %v3615_v57  ;;  %3956 = vst.msk [vmem:[#allocation3 + $0x100] sm:$0xff] %vm635_vm0, %v3902_v51  ;;  %v10634_v57 = vmax.f32 %v4844_v59, 0.0  ;;  %v4570_v51 = vsel %vm4235_vm1, %v4100_v5, -inf  ;;  %v4569_v59 = vsel %vm4235_vm1, %v4094_v23, -inf  ;;  %v4587_v5 = vsel %vm4235_vm1, %v4096_v53, -inf }
 0x516   : > { %v4571_v9 = vmax.f32 %v4569_v59, %v4570_v51  ;;  %v4580_v22 = vmax.f32 %v4578_v62, %v4579_v39  ;;  %v4539_v15 = vmax.f32 %v4537_v4, %v4538_v31  ;;  %v4548_v6 = vmax.f32 %v4546_v37, %v4547_v24 }
 0x517   : > { %12856 = vst [vmem:[#allocation32_spill] sm:$0xff] %v10634_v57  ;;  %v4589_v61 = vmax.f32 %v4587_v5, %v4588_v58  ;;  %v5328_v13 = vsel %vm5011_vm3, %v5327_v36, %v5326_v17  ;;  %v10649_v55 = vmax.f32 %v4846_v12, 0.0  ;;  %v5064_v23 = vrot.slane %v10634_v57, 3  ;;  %v3850_v12 = vld [vmem:[#allocation3 + $0x110] sm:$0xff] }
 0x518   : > { %v4557_v54 = vmax.f32 %v4555_v8, %v4556_v47  ;;  %v10655_v48 = vmul.f32 %v10634_v57, %v10634_v57  ;;  %v4531_v1 = vrot.slane %v4530_v2, 1  ;;  %v4564_v42 = vmax.f32 %v4562_v60, %v4563_v28  ;;  %v3617_v8 = vld [vmem:[#allocation2 + $0x1c2] sm:$0xff] }
 0x519   : > { %12858 = vst [vmem:[#allocation34_spill] sm:$0xff] %v10649_v55  ;;  %v5063_v4 = vsel %vm5017_vm5, %v5062_v41, %v5061_v56  ;;  %v5331_v36 = vrot.slane %v5183_v14, 4  ;;  %v4572_v17 = vrot.slane %v4571_v9, 4  ;;  %v4581_v37 = vrot.slane %v4580_v22, 4 }
 0x51a   : > { %v3753_v40 = vpop.f32.mrf.mxu0  ;;  %v4540_v53 = vrot.slane %v4539_v15, 1  ;;  %v12859_v31 = vrot.slane %v10611_v21, 5  ;;  %v4558_v39 = vrot.slane %v4557_v54, 1  ;;  %v10668_v56 = vsel %vm635_vm0, %v10581_v63, 0.0  ;;  %v3999_v63 = vld [vmem:[#allocation3 + $0xf0] sm:$0xff] }
 0x51b   : > { %v3903_v32 = vadd.f32 %v3849_v45, %v3753_v40  ;;  %v10659_v45 = vmul.f32 %v10636_v25, %v10636_v25  ;;  %v4590_v40 = vrot.slane %v4589_v61, 4  ;;  %v10672_v60 = vmul.f32 %v10649_v55, %v10649_v55 }
 0x51c   : > { %v5330_v24 = vsel %vm5014_vm4, %v12859_v31, %v5328_v13  ;;  %v5333_v41 = vrot.slane %v10655_v48, 3  ;;  %v4532_v14 = vmax.f32 %v4530_v2, %v4531_v1  ;;  %v4565_v47 = vrot.slane %v4564_v42, 2 }
 0x51d   : > { %3800 = vmatmul.f32.gmra.mxu0 %v3616_v20  ;;  %3957 = vst.msk [vmem:[#allocation3 + $0x108] sm:$0xff] %vm635_vm0, %v3903_v32  ;;  %v4549_v32 = vrot.slane %v4548_v6, 1  ;;  %v10677_v21 = vsel %vm5020_vm6, %v5064_v23, %v5063_v4  ;;  %v4573_v59 = vmax.f32 %v4571_v9, %v4572_v17  ;;  %v4582_v62 = vmax.f32 %v4580_v22, %v4581_v37  ;;  %v3851_v37 = vld [vmem:[#allocation3 + $0x118] sm:$0xff] }
 0x51e   : > { %v5332_v28 = vsel %vm5017_vm5, %v5331_v36, %v5330_v24  ;;  %v4541_v5 = vmax.f32 %v4539_v15, %v4540_v53  ;;  %v4559_v48 = vmax.f32 %v4557_v54, %v4558_v39  ;;  %v4103_v23 = vrot.slane %v3999_v63, 2  ;;  %v3618_v36 = vld [vmem:[#allocation2 + $0x1ca] sm:$0xff] }
 0x51f   : > { %v4550_v13 = vmax.f32 %v4548_v6, %v4549_v32  ;;  %v4104_v4 = vrot.slane %v3999_v63, 4  ;;  %v4574_v51 = vrot.slane %v4573_v59, 2  ;;  %v4583_v58 = vrot.slane %v4582_v62, 2 }
 0x520   : > { %v4105_v9 = vrot.slane %v3999_v63, 6  ;;  %v4848_v15 = vadd.f32 %v10571_v34, %v4541_v5  ;;  %v4850_v24 = vadd.f32 %v10571_v34, %v4559_v48  ;;  %v4605_v39 = vsel %vm4235_vm1, %v4103_v23, -inf  ;;  %v5803_v48 = vld [vmem:[%s12750_s3 + $0x10] sm:$0xff] }
 0x521   : > { %v4849_v53 = vadd.f32 %v10571_v34, %v4550_v13  ;;  %v5334_v5 = vsel %vm5020_vm6, %v5333_v41, %v5332_v28  ;;  %v10703_v23 = vld [vmem:[%s12750_s3 + $0x50] sm:$0xff]  ;;  %8764 = vmatpush.msra.mxu1 %v5803_v48  ;;  %5882 = vmatpush.msrb.mxu0 %v5803_v48 }
 0x522   : > { %v3756_v38 = vpop.f32.mrf.mxu0  ;;  %v6214_v41 = vld [vmem:[%s12750_s3 + $0x90] sm:$0xff]  ;;  %v10708_v28 = vmax.f32 %v4848_v15, 0.0  ;;  %8772 = vmatpush.msra.mxu2 %v10703_v23  ;;  %v12864_v15 = vrot.slane %v10636_v25, 2 }
 0x523   : > { %v3904_v20 = vadd.f32 %v3850_v12, %v3756_v38  ;;  %v4591_v38 = vmax.f32 %v4589_v61, %v4590_v40  ;;  %8780 = vmatpush.msra.mxu3 %v6214_v41 }
 0x524   : > { %v4001_v12 = vld [vmem:[#allocation3 + $0x108] sm:$0xff]  ;;  %12861 = vst [vmem:[#allocation36_spill] sm:$0xff] %v10708_v28 }
 0x525   : > { %3958 = vst.msk [vmem:[#allocation3 + $0x110] sm:$0xff] %vm635_vm0, %v3904_v20  ;;  %3803 = vmatmul.f32.gmra.mxu0 %v3617_v8  ;;  %v4109_v2 = vrot.slane %v4001_v12, 2  ;;  %v4110_v1 = vrot.slane %v4001_v12, 4  ;;  %v4111_v31 = vrot.slane %v4001_v12, 6  ;;  %v4847_v8 = vadd.f32 %v10571_v34, %v4532_v14 }
 0x526   : > { %v4566_v20 = vmax.f32 %v4564_v42, %v4565_v47  ;;  %v4597_v22 = vsel %vm4235_vm1, %v4001_v12, -inf  ;;  %v4592_v61 = vrot.slane %v4591_v38, 2  ;;  %v4596_v42 = vsel %vm4235_vm1, %v3999_v63, -inf }
 0x527   : > { %v4606_v6 = vsel %vm4235_vm1, %v4109_v2, -inf  ;;  %v4615_v54 = vsel %vm4235_vm1, %v4110_v1, -inf  ;;  %v4624_v32 = vsel %vm4235_vm1, %v4111_v31, -inf  ;;  %v4614_v14 = vsel %vm4235_vm1, %v4104_v4, -inf }
 0x528   : > { %v4598_v47 = vmax.f32 %v4596_v42, %v4597_v22  ;;  %v4623_v12 = vsel %vm4235_vm1, %v4105_v9, -inf  ;;  %v4607_v2 = vmax.f32 %v4605_v39, %v4606_v6  ;;  %v4616_v1 = vmax.f32 %v4614_v14, %v4615_v54 }
 0x529   : > { %v10695_v63 = vmax.f32 %v4847_v8, 0.0  ;;  %v4567_v13 = vrot.slane %v4566_v20, 1  ;;  %v4575_v31 = vmax.f32 %v4573_v59, %v4574_v51  ;;  %v10710_v8 = vmax.f32 %v4849_v53, 0.0  ;;  %v3619_v53 = vld [vmem:[#allocation2 + $0x1d2] sm:$0xff] }
 0x52a   : > { %v3759_v17 = vpop.f32.mrf.mxu0  ;;  %v10712_v4 = vmax.f32 %v4582_v62, %v4583_v58  ;;  %v10714_v51 = vmax.f32 %v4591_v38, %v4592_v61  ;;  %v10719_v22 = vmax.f32 %v4850_v24, 0.0  ;;  %v10725_v58 = vsel %vm5023_vm7, %v12864_v15, %v10677_v21 }
 0x52b   : > { %v3905_v40 = vadd.f32 %v3851_v37, %v3759_v17  ;;  %12860 = vst [vmem:[#allocation35_spill] sm:$0xff] %v10695_v63  ;;  %v4625_v17 = vmax.f32 %v4623_v12, %v4624_v32  ;;  %v12865_v62 = vrot.slane %v10659_v45, 2  ;;  %v4608_v61 = vrot.slane %v4607_v2, 4 }
 0x52c   : > { %12862 = vst [vmem:[#allocation37_spill] sm:$0xff] %v10710_v8  ;;  %v4617_v6 = vrot.slane %v4616_v1, 4  ;;  %v4002_v54 = vld [vmem:[#allocation3 + $0x110] sm:$0xff]  ;;  %v10736_v42 = vmul.f32 %v10695_v63, %v10695_v63  ;;  %v4568_v32 = vmax.f32 %v4566_v20, %v4567_v13  ;;  %v5070_v21 = vrot.slane %v10708_v28, 7 }
 0x52d   : > { %3806 = vmatmul.f32.gmra.mxu0 %v3618_v36  ;;  %3959 = vst.msk [vmem:[#allocation3 + $0x118] sm:$0xff] %vm635_vm0, %v3905_v40  ;;  %v4599_v36 = vrot.slane %v4598_v47, 4  ;;  %v10730_v38 = vsel %vm5023_vm7, %v12865_v62, %v5334_v5  ;;  %v4576_v40 = vrot.slane %v4575_v31, 1  ;;  %v4626_v24 = vrot.slane %v4625_v17, 4  ;;  %v4000_v5 = vld [vmem:[#allocation3 + $0xf8] sm:$0xff] }
 0x52e   : > { %12863 = vst [vmem:[#allocation38_spill] sm:$0xff] %v10719_v22  ;;  %v5072_v45 = vrot.slane %v10710_v8, 6  ;;  %v4585_v39 = vrot.slane %v10712_v4, 1  ;;  %v4594_v14 = vrot.slane %v10714_v51, 1  ;;  %v5074_v12 = vrot.slane %v10719_v22, 5 }
 0x52f   : > { %v4600_v48 = vmax.f32 %v4598_v47, %v4599_v36  ;;  %v4112_v41 = vrot.slane %v4002_v54, 2  ;;  %v4113_v15 = vrot.slane %v4002_v54, 4  ;;  %v4609_v62 = vmax.f32 %v4607_v2, %v4608_v61 }
 0x530   : > { %v4618_v9 = vmax.f32 %v4616_v1, %v4617_v6  ;;  %v4114_v20 = vrot.slane %v4002_v54, 6  ;;  %v4633_v13 = vsel %vm4235_vm1, %v4002_v54, -inf  ;;  %v5188_v59 = vmul.f32 %v10708_v28, %v10708_v28 }
 0x531   : > { %v10748_v25 = vmul.f32 %v10710_v8, %v10710_v8  ;;  %v4106_v57 = vrot.slane %v4000_v5, 2  ;;  %v4627_v49 = vmax.f32 %v4625_v17, %v4626_v24  ;;  %v10752_v47 = vmul.f32 %v10719_v22, %v10719_v22  ;;  %v3620_v22 = vld [vmem:[#allocation2 + $0x1da] sm:$0xff] }
 0x532   : > { %v10732_v37 = vpop.f32.mrf.mxu0  ;;  %v4107_v36 = vrot.slane %v4000_v5, 4  ;;  %v4632_v2 = vsel %vm4235_vm1, %v4000_v5, -inf  ;;  %v5071_v1 = vsel %vm5008_vm2, %v5070_v21, %v10695_v63  ;;  %v4601_v61 = vrot.slane %v4600_v48, 2 }
 0x533   : > { %v4634_v6 = vmax.f32 %v4632_v2, %v4633_v13  ;;  %v4642_v54 = vsel %vm4235_vm1, %v4112_v41, -inf  ;;  %v4610_v28 = vrot.slane %v4609_v62, 2  ;;  %v4619_v8 = vrot.slane %v4618_v9, 2 }
 0x534   : > { %v4651_v46 = vsel %vm4235_vm1, %v4113_v15, -inf  ;;  %v4660_v17 = vsel %vm4235_vm1, %v4114_v20, -inf  ;;  %v4577_v26 = vmax.f32 %v4575_v31, %v4576_v40  ;;  %v4851_v3 = vadd.f32 %v10571_v34, %v4568_v32 }
 0x535   : > { %3809 = vmatmul.f32.gmra.mxu0 %v3619_v53  ;;  %v4108_v53 = vrot.slane %v4000_v5, 6  ;;  %v4641_v5 = vsel %vm4235_vm1, %v4106_v57, -inf  ;;  %v4628_v19 = vrot.slane %v4627_v49, 2  ;;  %v5073_v21 = vsel %vm5011_vm3, %v5072_v45, %v5071_v1 }
 0x536   : > { %v4650_v13 = vsel %vm4235_vm1, %v4107_v36, -inf  ;;  %v4643_v2 = vmax.f32 %v4641_v5, %v4642_v54  ;;  %v4602_v63 = vmax.f32 %v4600_v48, %v4601_v61  ;;  %v4635_v10 = vrot.slane %v4634_v6, 4 }
 0x537   : > { %v4659_v41 = vsel %vm4235_vm1, %v4108_v53, -inf  ;;  %v4652_v15 = vmax.f32 %v4650_v13, %v4651_v46  ;;  %v5339_v20 = vrot.slane %v5188_v59, 7  ;;  %v4586_v31 = vmax.f32 %v10712_v4, %v4585_v39 }
 0x538   : > { %v4661_v43 = vmax.f32 %v4659_v41, %v4660_v17  ;;  %v4611_v40 = vmax.f32 %v4609_v62, %v4610_v28  ;;  %v4620_v32 = vmax.f32 %v4618_v9, %v4619_v8  ;;  %v5341_v57 = vrot.slane %v10748_v25, 6  ;;  %v3852_v28 = vld [vmem:[#allocation3 + $0x120] sm:$0xff] }
 0x539   : > { %v4595_v18 = vmax.f32 %v10714_v51, %v4594_v14  ;;  %v4852_v45 = vadd.f32 %v10571_v34, %v4577_v26  ;;  %v4629_v36 = vmax.f32 %v4627_v49, %v4628_v19  ;;  %v5075_v53 = vsel %vm5014_vm4, %v5074_v12, %v5073_v21  ;;  %v3853_v26 = vld [vmem:[#allocation3 + $0x128] sm:$0xff] }
 0x53a   : > { %v3765_v24 = vpop.f32.mrf.mxu0  ;;  %v5343_v48 = vrot.slane %v10752_v47, 5  ;;  %v10771_v1 = vmax.f32 %v4851_v3, 0.0  ;;  %v4644_v46 = vrot.slane %v4643_v2, 4  ;;  %v4636_v59 = vmax.f32 %v4634_v6, %v4635_v10 }
 0x53b   : > { %v4653_v61 = vrot.slane %v4652_v15, 4  ;;  %v4662_v4 = vrot.slane %v4661_v43, 4  ;;  %v4853_v8 = vadd.f32 %v10571_v34, %v4586_v31  ;;  %v4612_v25 = vrot.slane %v4611_v40, 1 }
 0x53c   : > { %12866 = vst [vmem:[#allocation39_spill] sm:$0xff] %v10771_v1  ;;  %v4621_v9 = vrot.slane %v4620_v32, 1  ;;  %v3906_v51 = vadd.f32 %v3852_v28, %v10732_v37  ;;  %v4854_v49 = vadd.f32 %v10571_v34, %v4595_v18  ;;  %v10776_v39 = vmax.f32 %v4852_v45, 0.0  ;;  %v3854_v18 = vld [vmem:[#allocation3 + $0x130] sm:$0xff] }
 0x53d   : > { %3812 = vmatmul.f32.gmra.mxu0 %v3620_v22  ;;  %v4603_v22 = vrot.slane %v4602_v63, 1  ;;  %v4630_v3 = vrot.slane %v4629_v36, 1  ;;  %v3907_v14 = vadd.f32 %v3853_v26, %v3765_v24  ;;  %v5340_v10 = vsel %vm5008_vm2, %v5339_v20, %v10736_v42 }
 0x53e   : > { %12867 = vst [vmem:[#allocation40_spill] sm:$0xff] %v10776_v39  ;;  %v5076_v12 = vrot.slane %v10771_v1, 4  ;;  %v5191_v62 = vmul.f32 %v10771_v1, %v10771_v1  ;;  %v4645_v47 = vmax.f32 %v4643_v2, %v4644_v46  ;;  %v4637_v6 = vrot.slane %v4636_v59, 2 }
 0x53f   : > { %3960 = vst.msk [vmem:[#allocation3 + $0x120] sm:$0xff] %vm635_vm0, %v3906_v51  ;;  %v4604_v37 = vmax.f32 %v4602_v63, %v4603_v22  ;;  %v4654_v54 = vmax.f32 %v4652_v15, %v4653_v61  ;;  %v4663_v17 = vmax.f32 %v4661_v43, %v4662_v4  ;;  %v10785_v5 = vmax.f32 %v4853_v8, 0.0  ;;  %v3855_v4 = vld [vmem:[#allocation3 + $0x138] sm:$0xff] }
 0x540   : > { %3961 = vst.msk [vmem:[#allocation3 + $0x128] sm:$0xff] %vm635_vm0, %v3907_v14  ;;  %v4613_v24 = vmax.f32 %v4611_v40, %v4612_v25  ;;  %v4622_v21 = vmax.f32 %v4620_v32, %v4621_v9  ;;  %v5342_v13 = vsel %vm5011_vm3, %v5341_v57, %v5340_v10  ;;  %v10788_v41 = vmax.f32 %v4854_v49, 0.0 }
 0x541   : > { %12868 = vst [vmem:[#allocation41_spill] sm:$0xff] %v10785_v5  ;;  %v5078_v2 = vrot.slane %v10776_v39, 3  ;;  %v4631_v20 = vmax.f32 %v4629_v36, %v4630_v3  ;;  %v5077_v63 = vsel %vm5017_vm5, %v5076_v12, %v5075_v53  ;;  %v5192_v43 = vmul.f32 %v10776_v39, %v10776_v39 }
 0x542   : > { %v3768_v19 = vpop.f32.mrf.mxu0  ;;  %v5345_v15 = vrot.slane %v5191_v62, 4  ;;  %v4646_v31 = vrot.slane %v4645_v47, 2  ;;  %v4855_v40 = vadd.f32 %v10571_v34, %v4604_v37  ;;  %v4638_v32 = vmax.f32 %v4636_v59, %v4637_v6 }
 0x543   : > { %v3908_v42 = vadd.f32 %v3854_v18, %v3768_v19  ;;  %v4655_v45 = vrot.slane %v4654_v54, 2  ;;  %v4664_v46 = vrot.slane %v4663_v17, 2  ;;  %v5344_v57 = vsel %vm5014_vm4, %v5343_v48, %v5342_v13 }
 0x544   : > { %v5080_v22 = vrot.slane %v10785_v5, 2  ;;  %v4856_v36 = vadd.f32 %v10571_v34, %v4613_v24  ;;  %v4857_v53 = vadd.f32 %v10571_v34, %v4622_v21  ;;  %v10802_v28 = vmul.f32 %v10785_v5, %v10785_v5 }
 0x545   : > { %3962 = vst.msk [vmem:[#allocation3 + $0x130] sm:$0xff] %vm635_vm0, %v3908_v42  ;;  %v10806_v8 = vmul.f32 %v10788_v41, %v10788_v41  ;;  %v4858_v59 = vadd.f32 %v10571_v34, %v4631_v20  ;;  %v5079_v48 = vsel %vm5020_vm6, %v5078_v2, %v5077_v63  ;;  %v5346_v9 = vsel %vm5017_vm5, %v5345_v15, %v5344_v57  ;;  %v3857_v63 = vld [vmem:[#allocation3 + $0x148] sm:$0xff] }
 0x546   : > { %v5347_v51 = vrot.slane %v5192_v43, 3  ;;  %v4647_v26 = vmax.f32 %v4645_v47, %v4646_v31  ;;  %v10811_v19 = vmax.f32 %v4855_v40, 0.0  ;;  %v4639_v49 = vrot.slane %v4638_v32, 1  ;;  %v4003_v24 = vld [vmem:[#allocation3 + $0x120] sm:$0xff] }
 0x547   : > { %v4656_v3 = vmax.f32 %v4654_v54, %v4655_v45  ;;  %v10813_v14 = vmax.f32 %v4663_v17, %v4664_v46  ;;  %v12870_v10 = vrot.slane %v10649_v55, 1  ;;  %v10822_v62 = vmax.f32 %v4856_v36, 0.0  ;;  %v3856_v40 = vld [vmem:[#allocation3 + $0x140] sm:$0xff] }
 0x548   : > { %12869 = vst [vmem:[#allocation42_spill] sm:$0xff] %v10811_v19  ;;  %v10824_v37 = vmax.f32 %v4857_v53, 0.0  ;;  %v10828_v47 = vadd.f32 %v10668_v56, %v10576_v52  ;;  %v12872_v6 = vrot.slane %v10672_v60, 1  ;;  %v10841_v21 = vsel %vm5023_vm7, %v5080_v22, %v5079_v48 }
 0x549   : > { %v10820_v12 = vsel %vm5026_vm8, %v12870_v10, %v10725_v58  ;;  %12871 = vst [vmem:[#allocation43_spill] sm:$0xff] %v10822_v62  ;;  %v10838_v58 = vmax.f32 %v4858_v59, 0.0  ;;  %v10844_v42 = vsel %vm5020_vm6, %v5347_v51, %v5346_v9  ;;  %v4648_v56 = vrot.slane %v4647_v26, 1 }
 0x54a   : > { %v3771_v61 = vpop.f32.mrf.mxu0  ;;  %v10834_v54 = vsel %vm5026_vm8, %v12872_v6, %v10730_v38  ;;  %v10849_v60 = vmul.f32 %v10811_v19, %v10811_v19  ;;  %v10851_v38 = vmax.f32 %v4638_v32, %v4639_v49  ;;  %v4657_v13 = vrot.slane %v4656_v3, 1  ;;  %v4004_v32 = vld [vmem:[#allocation3 + $0x128] sm:$0xff] }
 0x54b   : > { %v3909_v25 = vadd.f32 %v3855_v4, %v3771_v61  ;;  %v5084_v20 = vrot.slane %v10822_v62, 7  ;;  %v4115_v43 = vrot.slane %v4003_v24, 2  ;;  %v4116_v15 = vrot.slane %v4003_v24, 4 }
 0x54c   : > { %v10859_v46 = vmul.f32 %v10822_v62, %v10822_v62  ;;  %v4117_v57 = vrot.slane %v4003_v24, 6  ;;  %v10863_v36 = vmul.f32 %v10824_v37, %v10824_v37  ;;  %v10867_v53 = vmul.f32 %v10838_v58, %v10838_v58 }
 0x54d   : > { %3963 = vst.msk [vmem:[#allocation3 + $0x138] sm:$0xff] %vm635_vm0, %v3909_v25  ;;  %v10869_v61 = vmax.f32 %v4647_v26, %v4648_v56  ;;  %v4668_v4 = vsel %vm4235_vm1, %v4003_v24, -inf  ;;  %v4677_v49 = vsel %vm4235_vm1, %v4115_v43, -inf  ;;  %v4686_v10 = vsel %vm4235_vm1, %v4116_v15, -inf }
 0x54e   : > { %v4118_v6 = vrot.slane %v4004_v32, 2  ;;  %v5353_v43 = vrot.slane %v10859_v46, 7  ;;  %v10885_v15 = vmax.f32 %v4656_v3, %v4657_v13 }
 0x552   : > { %v3774_v31 = vpop.f32.mrf.mxu0 }
 0x553   : > { %v3910_v22 = vadd.f32 %v3856_v40, %v3774_v31  ;;  %v4695_v40 = vsel %vm4235_vm1, %v4117_v57, -inf }
 0x554   : > { %v4005_v59 = vld [vmem:[#allocation3 + $0x138] sm:$0xff] }
 0x555   : > { %v4121_v25 = vrot.slane %v4005_v59, 2  ;;  %v4122_v48 = vrot.slane %v4005_v59, 4  ;;  %v4123_v9 = vrot.slane %v4005_v59, 6  ;;  %v4669_v51 = vsel %vm4235_vm1, %v4005_v59, -inf  ;;  %3964 = vst.msk [vmem:[#allocation3 + $0x140] sm:$0xff] %vm635_vm0, %v3910_v22 }
 0x556   : > { %v4670_v31 = vmax.f32 %v4668_v4, %v4669_v51  ;;  %v10882_v22 = vsel %vm5008_vm2, %v5084_v20, %v10811_v19  ;;  %v4119_v4 = vrot.slane %v4004_v32, 4 }
 0x557   : > { %v4678_v26 = vsel %vm4235_vm1, %v4121_v25, -inf  ;;  %v4687_v24 = vsel %vm4235_vm1, %v4122_v48, -inf  ;;  %v4696_v56 = vsel %vm4235_vm1, %v4123_v9, -inf  ;;  %v4120_v9 = vrot.slane %v4004_v32, 6 }
 0x558   : > { %v4671_v52 = vrot.slane %v4670_v31, 4  ;;  %v4679_v18 = vmax.f32 %v4677_v49, %v4678_v26  ;;  %v4688_v17 = vmax.f32 %v4686_v10, %v4687_v24  ;;  %v4697_v59 = vmax.f32 %v4695_v40, %v4696_v56 }
 0x559   : > { %v4704_v49 = vsel %vm4235_vm1, %v4004_v32, -inf  ;;  %v4713_v10 = vsel %vm4235_vm1, %v4118_v6, -inf }
 0x55a   : > { %v4672_v57 = vmax.f32 %v4670_v31, %v4671_v52  ;;  %v4680_v51 = vrot.slane %v4679_v18, 4  ;;  %v4689_v25 = vrot.slane %v4688_v17, 4  ;;  %v4698_v45 = vrot.slane %v4697_v59, 4  ;;  %v3777_v48 = vpop.f32.mrf.mxu0 }
 0x55b   : > { %v3911_v40 = vadd.f32 %v3857_v63, %v3777_v48  ;;  %v5802_v63 = vld [vmem:[%s12750_s3 + $0x8] sm:$0xff] }
 0x55c   : > { %v4673_v26 = vrot.slane %v4672_v57, 2  ;;  %v4681_v20 = vmax.f32 %v4679_v18, %v4680_v51  ;;  %v4690_v24 = vmax.f32 %v4688_v17, %v4689_v25  ;;  %v4699_v56 = vmax.f32 %v4697_v59, %v4698_v45  ;;  %v4006_v46 = vld [vmem:[#allocation3 + $0x140] sm:$0xff]  ;;  %8765 = vmatpush.msra.mxu1 %v5802_v63  ;;  %5883 = vmatpush.msrb.mxu0 %v5802_v63 }
 0x55d   : > { %v4124_v3 = vrot.slane %v4006_v46, 2  ;;  %v4125_v13 = vrot.slane %v4006_v46, 4  ;;  %v4126_v2 = vrot.slane %v4006_v46, 6  ;;  %v4705_v52 = vsel %vm4235_vm1, %v4006_v46, -inf  ;;  %3965 = vst.msk [vmem:[#allocation3 + $0x148] sm:$0xff] %vm635_vm0, %v3911_v40  ;;  %v10897_v17 = vld [vmem:[%s12750_s3 + $0x48] sm:$0xff] }
 0x55e   : > { %v4674_v31 = vmax.f32 %v4672_v57, %v4673_v26  ;;  %v4682_v62 = vrot.slane %v4681_v20, 2  ;;  %v4691_v5 = vrot.slane %v4690_v24, 2  ;;  %v4700_v39 = vrot.slane %v4699_v56, 2  ;;  %8773 = vmatpush.msra.mxu2 %v10897_v17 }
 0x55f   : > { %v4706_v18 = vmax.f32 %v4704_v49, %v4705_v52  ;;  %v4714_v45 = vsel %vm4235_vm1, %v4124_v3, -inf  ;;  %v4723_v32 = vsel %vm4235_vm1, %v4125_v13, -inf  ;;  %v4732_v6 = vsel %vm4235_vm1, %v4126_v2, -inf }
 0x560   : > { %v4722_v59 = vsel %vm4235_vm1, %v4119_v4, -inf  ;;  %v4731_v57 = vsel %vm4235_vm1, %v4120_v9, -inf  ;;  %v4683_v51 = vmax.f32 %v4681_v20, %v4682_v62  ;;  %v4692_v25 = vmax.f32 %v4690_v24, %v4691_v5 }
 0x561   : > { %v4707_v48 = vrot.slane %v4706_v18, 4  ;;  %v4715_v40 = vmax.f32 %v4713_v10, %v4714_v45  ;;  %v4724_v26 = vmax.f32 %v4722_v59, %v4723_v32  ;;  %v4733_v49 = vmax.f32 %v4731_v57, %v4732_v6 }
 0x562   : > { %v4675_v46 = vrot.slane %v4674_v31, 1  ;;  %v4684_v3 = vrot.slane %v4683_v51, 1  ;;  %v4693_v52 = vrot.slane %v4692_v25, 1  ;;  %v4701_v13 = vmax.f32 %v4699_v56, %v4700_v39  ;;  %v3780_v1 = vpop.f32.mrf.mxu0 }
 0x563   : > { %v4708_v2 = vmax.f32 %v4706_v18, %v4707_v48  ;;  %v4716_v55 = vrot.slane %v4715_v40, 4  ;;  %v4725_v33 = vrot.slane %v4724_v26, 4  ;;  %v4734_v0 = vrot.slane %v4733_v49, 4 }
 0x564   : > { %v12873_v4 = vrot.slane %v10813_v14, 1  ;;  %v4859_v5 = vadd.f32 %v10571_v34, %v10851_v38  ;;  %v4685_v62 = vmax.f32 %v4683_v51, %v4684_v3  ;;  %v4694_v10 = vmax.f32 %v4692_v25, %v4693_v52 }
 0x565   : > { %v4709_v20 = vrot.slane %v4708_v2, 2  ;;  %v4717_v24 = vmax.f32 %v4715_v40, %v4716_v55  ;;  %v4726_v63 = vmax.f32 %v4724_v26, %v4725_v33  ;;  %v4735_v45 = vmax.f32 %v4733_v49, %v4734_v0 }
 0x566   : > { %v4667_v9 = vmax.f32 %v10813_v14, %v12873_v4  ;;  %v5354_v39 = vsel %vm5008_vm2, %v5353_v43, %v10849_v60  ;;  %v5355_v56 = vrot.slane %v10863_v36, 6  ;;  %v4702_v18 = vrot.slane %v4701_v13, 1 }
 0x567   : > { %v4864_v32 = vadd.f32 %v10571_v34, %v4685_v62  ;;  %v4676_v6 = vmax.f32 %v4674_v31, %v4675_v46  ;;  %v4710_v59 = vmax.f32 %v4708_v2, %v4709_v20  ;;  %v4718_v14 = vrot.slane %v4717_v24, 2 }
 0x568   : > { %v4727_v57 = vrot.slane %v4726_v63, 2  ;;  %v12874_v38 = vrot.slane %v10824_v37, 6  ;;  %v4860_v0 = vadd.f32 %v10571_v34, %v10869_v61  ;;  %v4861_v33 = vadd.f32 %v10571_v34, %v10885_v15 }
 0x569   : > { %v4736_v55 = vrot.slane %v4735_v45, 2  ;;  %v4865_v60 = vadd.f32 %v10571_v34, %v4694_v10  ;;  %v4711_v36 = vrot.slane %v4710_v59, 1  ;;  %v4719_v43 = vmax.f32 %v4717_v24, %v4718_v14 }
 0x56a   : > { %v5087_v51 = vsel %vm5011_vm3, %v12874_v38, %v10882_v22  ;;  %v4728_v31 = vmax.f32 %v4726_v63, %v4727_v57  ;;  %v5356_v25 = vsel %vm5011_vm3, %v5355_v56, %v5354_v39  ;;  %v10924_v48 = vmax.f32 %v4859_v5, 0.0  ;;  %v3783_v22 = vpop.f32.mrf.mxu0  ;;  %v3858_v56 = vld [vmem:[#allocation3 + $0x150] sm:$0xff] }
 0x56b   : > { %v4703_v40 = vmax.f32 %v4701_v13, %v4702_v18  ;;  %v10926_v26 = vmax.f32 %v4864_v32, 0.0  ;;  %v5357_v49 = vrot.slane %v10867_v53, 5  ;;  %v4863_v61 = vadd.f32 %v10571_v34, %v4676_v6  ;;  %v3859_v6 = vld [vmem:[#allocation3 + $0x158] sm:$0xff] }
 0x56c   : > { %12875 = vst [vmem:[#allocation44_spill] sm:$0xff] %v10924_v48  ;;  %v4712_v46 = vmax.f32 %v4710_v59, %v4711_v36  ;;  %v4720_v15 = vrot.slane %v4719_v43, 1  ;;  %v12876_v3 = vrot.slane %v10838_v58, 5  ;;  %v4862_v2 = vadd.f32 %v10571_v34, %v4667_v9 }
 0x56d   : > { %v4729_v4 = vrot.slane %v4728_v31, 1  ;;  %v4737_v62 = vmax.f32 %v4735_v45, %v4736_v55  ;;  %v5358_v5 = vsel %vm5014_vm4, %v5357_v49, %v5356_v25  ;;  %v10935_v13 = vmax.f32 %v4860_v0, 0.0 }
 0x56e   : > { %v5089_v52 = vsel %vm5014_vm4, %v12876_v3, %v5087_v51  ;;  %v10937_v10 = vmax.f32 %v4865_v60, 0.0  ;;  %v4721_v20 = vmax.f32 %v4719_v43, %v4720_v15  ;;  %v10939_v53 = vmax.f32 %v4861_v33, 0.0 }
 0x56f   : > { %v5090_v24 = vrot.slane %v10924_v48, 4  ;;  %v4866_v63 = vadd.f32 %v10571_v34, %v4703_v40  ;;  %v5098_v39 = vrot.slane %v10926_v26, 7  ;;  %v10944_v18 = vmax.f32 %v4863_v61, 0.0 }
 0x570   : > { %v4730_v9 = vmax.f32 %v4728_v31, %v4729_v4  ;;  %v4867_v45 = vadd.f32 %v10571_v34, %v4712_v46  ;;  %v3912_v32 = vadd.f32 %v3858_v56, %v3780_v1  ;;  %v5204_v59 = vmul.f32 %v10926_v26, %v10926_v26 }
 0x571   : > { %12877 = vst [vmem:[#allocation45_spill] sm:$0xff] %v10944_v18  ;;  %v4738_v14 = vrot.slane %v4737_v62, 1  ;;  %v4868_v57 = vadd.f32 %v10571_v34, %v4721_v20  ;;  %v3913_v38 = vadd.f32 %v3859_v6, %v3783_v22  ;;  %v10950_v51 = vmax.f32 %v4862_v2, 0.0  ;;  %v10973_v22 = vld [vmem:[%s12749_s2] ss:$0 sm:$0xff] }
 0x572   : > { %v5199_v0 = vmul.f32 %v10924_v48, %v10924_v48  ;;  %v5100_v33 = vrot.slane %v10937_v10, 6  ;;  %v10955_v55 = vmax.f32 %v4867_v45, 0.0  ;;  %3966 = vst.msk [vmem:[#allocation3 + $0x150] sm:$0xff] %vm635_vm0, %v3912_v32  ;;  %v5092_v1 = vrot.slane %v10935_v13, 3  ;;  %v3786_v43 = vpop.f32.mrf.mxu0 }
 0x573   : > { %v5200_v60 = vmul.f32 %v10935_v13, %v10935_v13  ;;  %v10961_v36 = vmax.f32 %v4866_v63, 0.0  ;;  %v5099_v34 = vsel %vm5008_vm2, %v5098_v39, %v10944_v18  ;;  %3967 = vst.msk [vmem:[#allocation3 + $0x158] sm:$0xff] %vm635_vm0, %v3913_v38  ;;  %v5091_v31 = vsel %vm5017_vm5, %v5090_v24, %v5089_v52  ;;  %v3860_v52 = vld [vmem:[#allocation3 + $0x160] sm:$0xff] }
 0x574   : > { %v5094_v25 = vrot.slane %v10939_v53, 2  ;;  %v5205_v40 = vmul.f32 %v10937_v10, %v10937_v10  ;;  %v4869_v49 = vadd.f32 %v10973_v22, %v4730_v9  ;;  %v5201_v61 = vmul.f32 %v10939_v53, %v10939_v53 }
 0x575   : > { %v5367_v46 = vrot.slane %v5204_v59, 7  ;;  %v4739_v15 = vmax.f32 %v4737_v62, %v4738_v14  ;;  %v10978_v3 = vmax.f32 %v4868_v57, 0.0  ;;  %v5359_v2 = vrot.slane %v5199_v0, 4 }
 0x576   : > { %v5101_v4 = vsel %vm5011_vm3, %v5100_v33, %v5099_v34  ;;  %v5104_v20 = vrot.slane %v10955_v55, 4  ;;  %v3914_v24 = vadd.f32 %v3860_v52, %v3786_v43  ;;  %v5093_v63 = vsel %vm5020_vm6, %v5092_v1, %v5091_v31 }
 0x577   : > { %v5361_v39 = vrot.slane %v5200_v60, 3  ;;  %v5102_v56 = vrot.slane %v10961_v36, 5  ;;  %v5203_v9 = vmul.f32 %v10944_v18, %v10944_v18  ;;  %v5206_v62 = vmul.f32 %v10961_v36, %v10961_v36 }
 0x578   : > { %v5369_v45 = vrot.slane %v5205_v40, 6  ;;  %v10988_v32 = vmax.f32 %v4869_v49, 0.0  ;;  %v5207_v6 = vmul.f32 %v10955_v55, %v10955_v55  ;;  %3968 = vst.msk [vmem:[#allocation3 + $0x160] sm:$0xff] %vm635_vm0, %v3914_v24  ;;  %v4870_v57 = vadd.f32 %v10973_v22, %v4739_v15  ;;  %v3861_v24 = vld [vmem:[#allocation3 + $0x168] sm:$0xff] }
 0x579   : > { %v5103_v59 = vsel %vm5014_vm4, %v5102_v56, %v5101_v4  ;;  %v5368_v14 = vsel %vm5008_vm2, %v5367_v46, %v5203_v9  ;;  %v5106_v38 = vrot.slane %v10978_v3, 3  ;;  %v12878_v0 = vrot.slane %v10788_v41, 1 }
 0x57a   : > { %v12879_v1 = vrot.slane %v10802_v28, 2  ;;  %v5360_v34 = vsel %vm5017_vm5, %v5359_v2, %v5358_v5  ;;  %v5105_v43 = vsel %vm5017_vm5, %v5104_v20, %v5103_v59  ;;  %v5096_v31 = vrot.slane %v10950_v51, 1  ;;  %v3789_v15 = vpop.f32.mrf.mxu0 }
 0x57b   : > { %v5083_v33 = vsel %vm5026_vm8, %v12878_v0, %v10841_v21  ;;  %v5202_v40 = vmul.f32 %v10950_v51, %v10950_v51  ;;  %v5363_v49 = vrot.slane %v5201_v61, 2  ;;  %v5208_v46 = vmul.f32 %v10978_v3, %v10978_v3 }
 0x57c   : > { %v5350_v60 = vsel %vm5023_vm7, %v12879_v1, %v10844_v42  ;;  %v5095_v21 = vsel %vm5023_vm7, %v5094_v25, %v5093_v63  ;;  %v5370_v28 = vsel %vm5011_vm3, %v5369_v45, %v5368_v14  ;;  %v5108_v42 = vrot.slane %v10988_v32, 2 }
 0x57d   : > { %v5373_v52 = vrot.slane %v5207_v6, 4  ;;  %v5362_v5 = vsel %vm5020_vm6, %v5361_v39, %v5360_v34  ;;  %v5371_v2 = vrot.slane %v5206_v62, 5  ;;  %v11016_v4 = vmax.f32 %v4870_v57, 0.0  ;;  %v4007_v34 = vld [vmem:[#allocation3 + $0x150] sm:$0xff] }
 0x57e   : > { %v5107_v20 = vsel %vm5020_vm6, %v5106_v38, %v5105_v43  ;;  %v12880_v61 = vrot.slane %v10806_v8, 1  ;;  %v5209_v25 = vmul.f32 %v10988_v32, %v10988_v32  ;;  %v3915_v63 = vadd.f32 %v3861_v24, %v3789_v15  ;;  %v3862_v15 = vld [vmem:[#allocation3 + $0x170] sm:$0xff] }
 0x57f   : > { %v5139_v9 = vsel %vm635_vm0, %v10820_v12, 0.0  ;;  %v5097_v45 = vsel %vm5026_vm8, %v5096_v31, %v5095_v21  ;;  %v5372_v39 = vsel %vm5014_vm4, %v5371_v2, %v5370_v28  ;;  %v5375_v62 = vrot.slane %v5208_v46, 3  ;;  %v4008_v28 = vld [vmem:[#allocation3 + $0x158] sm:$0xff] }
 0x580   : > { %v5352_v56 = vsel %vm5026_vm8, %v12880_v61, %v5350_v60  ;;  %v5408_v6 = vsel %vm635_vm0, %v10834_v54, 0.0  ;;  %v5141_v59 = vsel %vm635_vm0, %v5083_v33, 0.0  ;;  %v5364_v8 = vsel %vm5023_vm7, %v5363_v49, %v5362_v5  ;;  %3969 = vst.msk [vmem:[#allocation3 + $0x168] sm:$0xff] %vm635_vm0, %v3915_v63 }
 0x581   : > { %v5109_v14 = vsel %vm5023_vm7, %v5108_v42, %v5107_v20  ;;  %v5374_v57 = vsel %vm5017_vm5, %v5373_v52, %v5372_v39  ;;  %v5410_v12 = vsel %vm635_vm0, %v5352_v56, 0.0  ;;  %v5365_v38 = vrot.slane %v5202_v40, 1 }
 0x582   : > { %v5110_v0 = vrot.slane %v11016_v4, 1  ;;  %v5140_v1 = vadd.f32 %v5139_v9, %v10583_v50  ;;  %v5143_v60 = vsel %vm635_vm0, %v5097_v45, 0.0  ;;  %v11041_v54 = vmul.f32 %v11016_v4, %v11016_v4  ;;  %v6213_v50 = vld [vmem:[%s12750_s3 + $0x88] sm:$0xff]  ;;  %v3792_v46 = vpop.f32.mrf.mxu0 }
 0x583   : > { %v5377_v33 = vrot.slane %v5209_v25, 2  ;;  %v5409_v43 = vadd.f32 %v5408_v6, %v10828_v47  ;;  %v5366_v31 = vsel %vm5026_vm8, %v5365_v38, %v5364_v8  ;;  %v5376_v40 = vsel %vm5020_vm6, %v5375_v62, %v5374_v57  ;;  %8781 = vmatpush.msra.mxu3 %v6213_v50 }
 0x584   : > { %v5111_v49 = vsel %vm5026_vm8, %v5110_v0, %v5109_v14  ;;  %v5142_v21 = vadd.f32 %v5141_v59, %v5140_v1  ;;  %v3916_v42 = vadd.f32 %v3862_v15, %v3792_v46  ;;  %v4127_v5 = vrot.slane %v4007_v34, 2  ;;  %v3863_v46 = vld [vmem:[#allocation3 + $0x178] sm:$0xff] }
 0x585   : > { %v11050_v52 = vadd.f32 %v5410_v12, %v5409_v43  ;;  %v4128_v47 = vrot.slane %v4007_v34, 4  ;;  %v4129_v2 = vrot.slane %v4007_v34, 6  ;;  %v11055_v24 = vsel %vm635_vm0, %v5366_v31, 0.0 }
 0x586   : > { %v11052_v20 = vadd.f32 %v5143_v60, %v5142_v21  ;;  %v11058_v61 = vsel %vm635_vm0, %v5111_v49, 0.0  ;;  %v11061_v56 = vsel %vm5023_vm7, %v5377_v33, %v5376_v40  ;;  %v5379_v25 = vrot.slane %v11041_v54, 1  ;;  %3970 = vst.msk [vmem:[#allocation3 + $0x170] sm:$0xff] %vm635_vm0, %v3916_v42 }
 0x587   : > { %v4740_v63 = vsel %vm4235_vm1, %v4007_v34, -inf  ;;  %v4130_v9 = vrot.slane %v4008_v28, 2  ;;  %v4131_v45 = vrot.slane %v4008_v28, 4  ;;  %v4132_v39 = vrot.slane %v4008_v28, 6  ;;  %v4009_v62 = vld [vmem:[#allocation3 + $0x168] sm:$0xff] }
 0x588   : > { %v4133_v6 = vrot.slane %v4009_v62, 2  ;;  %v4134_v59 = vrot.slane %v4009_v62, 4  ;;  %v4135_v8 = vrot.slane %v4009_v62, 6  ;;  %v4741_v14 = vsel %vm4235_vm1, %v4009_v62, -inf }
 0x589   : > { %v4749_v57 = vsel %vm4235_vm1, %v4127_v5, -inf  ;;  %v4758_v12 = vsel %vm4235_vm1, %v4128_v47, -inf  ;;  %v4767_v38 = vsel %vm4235_vm1, %v4129_v2, -inf  ;;  %v4742_v0 = vmax.f32 %v4740_v63, %v4741_v14 }
 0x58a   : > { %v4776_v1 = vsel %vm4235_vm1, %v4008_v28, -inf  ;;  %v4750_v60 = vsel %vm4235_vm1, %v4133_v6, -inf  ;;  %v4759_v33 = vsel %vm4235_vm1, %v4134_v59, -inf  ;;  %v4768_v34 = vsel %vm4235_vm1, %v4135_v8, -inf  ;;  %v3795_v50 = vpop.f32.mrf.mxu0  ;;  %v5801_v28 = vld [vmem:[%s12750_s3] sm:$0xff] }
 0x58b   : > { %v4743_v43 = vrot.slane %v4742_v0, 4  ;;  %v4751_v31 = vmax.f32 %v4749_v57, %v4750_v60  ;;  %v4760_v49 = vmax.f32 %v4758_v12, %v4759_v33  ;;  %v4769_v40 = vmax.f32 %v4767_v38, %v4768_v34  ;;  %8766 = vmatpush.msra.mxu1 %v5801_v28  ;;  %5884 = vmatpush.msrb.mxu0 %v5801_v28 }
 0x58c   : > { %v4785_v15 = vsel %vm4235_vm1, %v4130_v9, -inf  ;;  %v4794_v21 = vsel %vm4235_vm1, %v4131_v45, -inf  ;;  %v4803_v42 = vsel %vm4235_vm1, %v4132_v39, -inf  ;;  %v3917_v5 = vadd.f32 %v3863_v46, %v3795_v50  ;;  %v11085_v45 = vld [vmem:[%s12750_s3 + $0x40] sm:$0xff]  ;;  %v8846_v39 = vld [vmem:[%s12750_s3 + $0x78] sm:$0xff]  ;;  %v8847_v50 = vld [vmem:[%s12750_s3 + $0x70] sm:$0xff] }
 0x58d   : > { %v4744_v47 = vmax.f32 %v4742_v0, %v4743_v43  ;;  %v4752_v2 = vrot.slane %v4751_v31, 4  ;;  %v4761_v63 = vrot.slane %v4760_v49, 4  ;;  %v4770_v62 = vrot.slane %v4769_v40, 4  ;;  %v4010_v6 = vld [vmem:[#allocation3 + $0x170] sm:$0xff]  ;;  %6063 = vmatpush.msra.mxu0 %v8846_v39  ;;  %8774 = vmatpush.msra.mxu2 %v11085_v45 }
 0x58e   : > { %v4136_v59 = vrot.slane %v4010_v6, 2  ;;  %v4137_v8 = vrot.slane %v4010_v6, 4  ;;  %v4138_v14 = vrot.slane %v4010_v6, 6  ;;  %v4777_v9 = vsel %vm4235_vm1, %v4010_v6, -inf  ;;  %3971 = vst.msk [vmem:[#allocation3 + $0x178] sm:$0xff] %vm635_vm0, %v3917_v5 }
 0x58f   : > { %v4745_v57 = vrot.slane %v4744_v47, 2  ;;  %v4753_v12 = vmax.f32 %v4751_v31, %v4752_v2  ;;  %v4762_v38 = vmax.f32 %v4760_v49, %v4761_v63  ;;  %v4771_v0 = vmax.f32 %v4769_v40, %v4770_v62  ;;  %6064 = vmatpush.msra.mxu0 %v8847_v50 }
 0x590   : > { %v4778_v60 = vmax.f32 %v4776_v1, %v4777_v9  ;;  %v4786_v33 = vsel %vm4235_vm1, %v4136_v59, -inf  ;;  %v4795_v34 = vsel %vm4235_vm1, %v4137_v8, -inf  ;;  %v4804_v43 = vsel %vm4235_vm1, %v4138_v14, -inf  ;;  %v8848_v1 = vld [vmem:[%s12750_s3 + $0x68] sm:$0xff] }
 0x591   : > { %v4746_v46 = vmax.f32 %v4744_v47, %v4745_v57  ;;  %v4754_v5 = vrot.slane %v4753_v12, 2  ;;  %v4763_v28 = vrot.slane %v4762_v38, 2  ;;  %v4772_v31 = vrot.slane %v4771_v0, 2  ;;  %6065 = vmatpush.msra.mxu0 %v8848_v1 }
 0x592   : > { %v4779_v49 = vrot.slane %v4778_v60, 4  ;;  %v4787_v40 = vmax.f32 %v4785_v15, %v4786_v33  ;;  %v4796_v2 = vmax.f32 %v4794_v21, %v4795_v34  ;;  %v4805_v63 = vmax.f32 %v4803_v42, %v4804_v43  ;;  %v11100_v14 = vpop.f32.mrf.mxu0  ;;  %v8849_v15 = vld [vmem:[%s12750_s3 + $0x60] sm:$0xff] }
 0x593   : > { %v4747_v62 = vrot.slane %v4746_v46, 1  ;;  %v4755_v6 = vmax.f32 %v4753_v12, %v4754_v5  ;;  %v4764_v59 = vmax.f32 %v4762_v38, %v4763_v28  ;;  %v4773_v8 = vmax.f32 %v4771_v0, %v4772_v31  ;;  %6066 = vmatpush.msra.mxu0 %v8849_v15  ;;  %v6212_v0 = vld [vmem:[%s12750_s3 + $0x80] sm:$0xff] }
 0x594   : > { %v4780_v9 = vmax.f32 %v4778_v60, %v4779_v49  ;;  %v4788_v47 = vrot.slane %v4787_v40, 4  ;;  %v4797_v39 = vrot.slane %v4796_v2, 4  ;;  %v4806_v57 = vrot.slane %v4805_v63, 4  ;;  %v8850_v60 = vld [vmem:[%s12750_s3 + $0x58] sm:$0xff]  ;;  %8782 = vmatpush.msra.mxu3 %v6212_v0 }
 0x595   : > { %v4748_v21 = vmax.f32 %v4746_v46, %v4747_v62  ;;  %v4756_v42 = vrot.slane %v4755_v6, 1  ;;  %v4765_v33 = vrot.slane %v4764_v59, 1  ;;  %v4774_v34 = vrot.slane %v4773_v8, 1  ;;  %6067 = vmatpush.msra.mxu0 %v8850_v60 }
 0x596   : > { %v4781_v43 = vrot.slane %v4780_v9, 2  ;;  %v4789_v50 = vmax.f32 %v4787_v40, %v4788_v47  ;;  %v4798_v12 = vmax.f32 %v4796_v2, %v4797_v39  ;;  %v4807_v38 = vmax.f32 %v4805_v63, %v4806_v57 }
 0x597   : > { %v4757_v5 = vmax.f32 %v4755_v6, %v4756_v42  ;;  %v4766_v28 = vmax.f32 %v4764_v59, %v4765_v33  ;;  %v4775_v31 = vmax.f32 %v4773_v8, %v4774_v34  ;;  %v4871_v46 = vadd.f32 %v10973_v22, %v4748_v21  ;;  %6068 = vmatpush.msra.mxu0 %v10703_v23 }
 0x598   : > { %v4782_v49 = vmax.f32 %v4780_v9, %v4781_v43  ;;  %v4790_v1 = vrot.slane %v4789_v50, 2  ;;  %v4799_v40 = vrot.slane %v4798_v12, 2  ;;  %v4808_v2 = vrot.slane %v4807_v38, 2 }
 0x599   : > { %v4872_v63 = vadd.f32 %v10973_v22, %v4757_v5  ;;  %v4873_v62 = vadd.f32 %v10973_v22, %v4766_v28  ;;  %v4874_v47 = vadd.f32 %v10973_v22, %v4775_v31  ;;  %v11116_v39 = vmax.f32 %v4871_v46, 0.0  ;;  %6069 = vmatpush.msra.mxu0 %v10897_v17  ;;  %v5782_v5 = vld [vmem:[#allocation4 + $0x8] sm:$0xff]  ;;  %v6669_v28 = vld [vmem:[%s12750_s3 + $0x138] sm:$0xff] }
 0x59a   : > { %v4783_v6 = vrot.slane %v4782_v49, 1  ;;  %v4791_v59 = vmax.f32 %v4789_v50, %v4790_v1  ;;  %v4800_v8 = vmax.f32 %v4798_v12, %v4799_v40  ;;  %v4809_v57 = vmax.f32 %v4807_v38, %v4808_v2  ;;  %v3801_v42 = vpop.f32.mrf.mxu0  ;;  %8577 = vmatmul.msk.f32.vlgmr.msra.gmra.mxu1 %vm635_vm0, %v5782_v5  ;;  %6738 = vmatpush.msrb.mxu2 %v6669_v28 }
 0x59b   : > { %12881 = vst [vmem:[#allocation46_spill] sm:$0xff] %v11116_v39  ;;  %v11123_v9 = vsel %vm5026_vm8, %v5379_v25, %v11061_v56  ;;  %v11125_v23 = vmax.f32 %v4872_v63, 0.0  ;;  %v11127_v15 = vmax.f32 %v4873_v62, 0.0  ;;  %v11129_v21 = vmax.f32 %v4874_v47, 0.0  ;;  %6070 = vmatpush.msra.mxu0 %v11085_v45  ;;  %v6444_v45 = vld [vmem:[%s12750_s3 + $0xf8] sm:$0xff] }
 0x59c   : > { %v4784_v33 = vmax.f32 %v4782_v49, %v4783_v6  ;;  %v4792_v34 = vrot.slane %v4791_v59, 1  ;;  %v4801_v43 = vrot.slane %v4800_v8, 1  ;;  %v4810_v50 = vrot.slane %v4809_v57, 1  ;;  %6513 = vmatpush.msrb.mxu1 %v6444_v45 }
 0x59d   : > { %v5112_v17 = vrot.slane %v11125_v23, 7  ;;  %v5114_v54 = vrot.slane %v11127_v15, 6  ;;  %v5211_v56 = vmul.f32 %v11116_v39, %v11116_v39  ;;  %v5212_v25 = vmul.f32 %v11125_v23, %v11125_v23 }
 0x59e   : > { %v5213_v12 = vmul.f32 %v11127_v15, %v11127_v15  ;;  %v5214_v38 = vmul.f32 %v11129_v21, %v11129_v21  ;;  %v4793_v0 = vmax.f32 %v4791_v59, %v4792_v34  ;;  %v4802_v60 = vmax.f32 %v4800_v8, %v4801_v43 }
 0x59f   : > { %v5113_v31 = vsel %vm5008_vm2, %v5112_v17, %v11116_v39  ;;  %v5381_v46 = vrot.slane %v5212_v25, 7  ;;  %v4811_v49 = vmax.f32 %v4809_v57, %v4810_v50  ;;  %v4875_v1 = vadd.f32 %v10973_v22, %v4784_v33  ;;  %v3864_v57 = vld [vmem:[#allocation3 + $0x180] sm:$0xff]  ;;  %v3865_v17 = vld [vmem:[#allocation3 + $0x188] sm:$0xff] }
 0x5a0   : > { %v5115_v40 = vsel %vm5011_vm3, %v5114_v54, %v5113_v31  ;;  %v5116_v2 = vrot.slane %v11129_v21, 5  ;;  %v5383_v63 = vrot.slane %v5213_v12, 6  ;;  %v4876_v62 = vadd.f32 %v10973_v22, %v4793_v0  ;;  %v3866_v31 = vld [vmem:[#allocation3 + $0x190] sm:$0xff]  ;;  %v12914_v39 = vld [vmem:[#allocation38_spill] sm:$0xff] }
 0x5a1   : > { %v5382_v47 = vsel %vm5008_vm2, %v5381_v46, %v5211_v56  ;;  %v5385_v6 = vrot.slane %v5214_v38, 5  ;;  %v4877_v59 = vadd.f32 %v10973_v22, %v4802_v60  ;;  %v4878_v8 = vadd.f32 %v10973_v22, %v4811_v49 }
 0x5a2   : > { %v5384_v33 = vsel %vm5011_vm3, %v5383_v63, %v5382_v47  ;;  %v11159_v34 = vmax.f32 %v4875_v1, 0.0  ;;  %v11161_v43 = vmax.f32 %v4876_v62, 0.0  ;;  %v3918_v50 = vadd.f32 %v3864_v57, %v11100_v14  ;;  %v3804_v38 = vpop.f32.mrf.mxu0 }
 0x5a3   : > { %v5117_v54 = vsel %vm5014_vm4, %v5116_v2, %v5115_v40  ;;  %v11165_v25 = vmax.f32 %v4877_v59, 0.0  ;;  %v11167_v56 = vmax.f32 %v4878_v8, 0.0  ;;  %v3919_v12 = vadd.f32 %v3865_v17, %v3801_v42  ;;  %v11195_v17 = vld [vmem:[#allocation2] sm:$0xff] }
 0x5a4   : > { %12882 = vst [vmem:[#allocation47_spill] sm:$0xff] %v11159_v34  ;;  %v5118_v22 = vrot.slane %v11159_v34, 4  ;;  %v5120_v0 = vrot.slane %v11161_v43, 3  ;;  %v5215_v60 = vmul.f32 %v11159_v34, %v11159_v34  ;;  %v5216_v5 = vmul.f32 %v11161_v43, %v11161_v43 }
 0x5a5   : > { %12883 = vst [vmem:[#allocation48_spill] sm:$0xff] %v11161_v43  ;;  %v5386_v14 = vsel %vm5014_vm4, %v5385_v6, %v5384_v33  ;;  %v5122_v45 = vrot.slane %v11165_v25, 2  ;;  %v5217_v42 = vmul.f32 %v11165_v25, %v11165_v25  ;;  %v5218_v28 = vmul.f32 %v11167_v56, %v11167_v56 }
 0x5a6   : > { %12884 = vst [vmem:[#allocation49_spill] sm:$0xff] %v11165_v25  ;;  %v5119_v46 = vsel %vm5017_vm5, %v5118_v22, %v5117_v54  ;;  %v5387_v49 = vrot.slane %v5215_v60, 4  ;;  %v5389_v1 = vrot.slane %v5216_v5, 3  ;;  %v3920_v40 = vadd.f32 %v3866_v31, %v3804_v38  ;;  %v6443_v25 = vld [vmem:[%s12750_s3 + $0xf0] sm:$0xff] }
 0x5a7   : > { %12885 = vst [vmem:[#allocation50_spill] sm:$0xff] %v11167_v56  ;;  %v5121_v2 = vsel %vm5020_vm6, %v5120_v0, %v5119_v46  ;;  %v5124_v63 = vrot.slane %v11167_v56, 1  ;;  %v5391_v62 = vrot.slane %v5217_v42, 2  ;;  %v5414_v47 = vsel %vm635_vm0, %v11123_v9, 0.0  ;;  %6514 = vmatpush.msrb.mxu1 %v6443_v25 }
 0x5a8   : > { %3972 = vst.msk [vmem:[#allocation3 + $0x180] sm:$0xff] %vm635_vm0, %v3918_v50  ;;  %v5123_v6 = vsel %vm5023_vm7, %v5122_v45, %v5121_v2  ;;  %v5388_v59 = vsel %vm5017_vm5, %v5387_v49, %v5386_v14  ;;  %v5413_v8 = vadd.f32 %v11055_v24, %v11050_v52  ;;  %v5393_v50 = vrot.slane %v5218_v28, 1  ;;  %v3867_v52 = vld [vmem:[#allocation3 + $0x198] sm:$0xff]  ;;  %v3868_v49 = vld [vmem:[#allocation3 + $0x1a0] sm:$0xff] }
 0x5a9   : > { %3973 = vst.msk [vmem:[#allocation3 + $0x188] sm:$0xff] %vm635_vm0, %v3919_v12  ;;  %v5125_v57 = vsel %vm5026_vm8, %v5124_v63, %v5123_v6  ;;  %v5390_v33 = vsel %vm5020_vm6, %v5389_v1, %v5388_v59  ;;  %v5146_v9 = vadd.f32 %v11058_v61, %v11052_v20  ;;  %vm8193_vm1 = vcmask 253952  }
 0x5aa   : > { %3974 = vst.msk [vmem:[#allocation3 + $0x190] sm:$0xff] %vm635_vm0, %v3920_v40  ;;  %v5147_v54 = vsel %vm635_vm0, %v5125_v57, 0.0  ;;  %v5392_v12 = vsel %vm5023_vm7, %v5391_v62, %v5390_v33  ;;  %v3807_v22 = vpop.f32.mrf.mxu0  ;;  %v5415_v0 = vadd.f32 %v5414_v47, %v5413_v8  ;;  %v3869_v33 = vld [vmem:[#allocation3 + $0x1a8] sm:$0xff] }
 0x5ab   : > { %12886 = vst [vmem:[#allocation51_spill] sm:$0xff] %v11195_v17  ;;  %v5394_v38 = vsel %vm5026_vm8, %v5393_v50, %v5392_v12  ;;  %v5148_v24 = vadd.f32 %v5147_v54, %v5146_v9  ;;  %v3921_v5 = vadd.f32 %v3867_v52, %v3807_v22  ;;  %v12902_v52 = vld [vmem:[#allocation26_spill] sm:$0xff] }
 0x5ac   : > { %5572 = vst.msk [vmem:[#allocation4 + $0x10] sm:$0x1] %vm5571_vm9, %v11195_v17  ;;  %v5416_v60 = vsel %vm635_vm0, %v5394_v38, 0.0  ;;  %vm8413_vm9 = vcmask 1041408  }
 0x5ad   : > { %v5149_v14 = vrot.slane %v5148_v24, 4  ;;  %v5417_v45 = vadd.f32 %v5416_v60, %v5415_v0  ;;  %3975 = vst.msk [vmem:[#allocation3 + $0x198] sm:$0xff] %vm635_vm0, %v3921_v5  ;;  %v12903_v60 = vld [vmem:[#allocation27_spill] sm:$0xff]  ;;  %v12904_v0 = vld [vmem:[#allocation28_spill] sm:$0xff] }
 0x5ae   : > { %v12915_v5 = vld [vmem:[#allocation39_spill] sm:$0xff] }
 0x5af   : > { %v5150_v42 = vadd.f32 %v5149_v14, %v5148_v24  ;;  %v5418_v28 = vrot.slane %v5417_v45, 4  ;;  %v12901_v14 = vld [vmem:[#allocation25_spill] sm:$0xff] }
 0x5b0   : > { %v12905_v24 = vld [vmem:[#allocation29_spill] sm:$0xff] }
 0x5b1   : > { %v5151_v61 = vrot.slane %v5150_v42, 2  ;;  %v5419_v31 = vadd.f32 %v5418_v28, %v5417_v45  ;;  %v6894_v28 = vld [vmem:[%s12750_s3 + $0x178] sm:$0xff]  ;;  %v12907_v45 = vld [vmem:[#allocation31_spill] sm:$0xff] }
 0x5b2   : > { %v3810_v46 = vpop.f32.mrf.mxu0  ;;  %6963 = vmatpush.msrb.mxu3 %v6894_v28 }
 0x5b3   : > { %v5968_v20 = vld [vmem:[#allocation4 + $0x9] sm:$0xff]  ;;  %v5152_v1 = vadd.f32 %v5151_v61, %v5150_v42  ;;  %v5420_v40 = vrot.slane %v5419_v31, 2  ;;  %v3922_v2 = vadd.f32 %v3868_v49, %v3810_v46  ;;  %v12888_v49 = vld [vmem:[#allocation12_spill] sm:$0xff]  ;;  %v12911_v46 = vld [vmem:[#allocation35_spill] sm:$0xff] }
 0x5b4   : > { %8597 = vmatmul.msk.f32.vlgmr.msra.gmra.mxu2 %vm635_vm0, %v5968_v20  ;;  %v12895_v61 = vld [vmem:[#allocation20_spill] sm:$0xff]  ;;  %v12918_v42 = vld [vmem:[#allocation43_spill] sm:$0xff] }
 0x5b5   : > { %v5153_v63 = vrot.slane %v5152_v1, 1  ;;  %v5421_v62 = vadd.f32 %v5420_v40, %v5419_v31  ;;  %3976 = vst.msk [vmem:[#allocation3 + $0x1a0] sm:$0xff] %vm635_vm0, %v3922_v2  ;;  %v12887_v31 = vld [vmem:[#allocation11_spill] sm:$0xff]  ;;  %v12889_v2 = vld [vmem:[#allocation13_spill] sm:$0xff]  ;;  %v12900_v20 = vld [vmem:[#allocation24_spill] sm:$0xff] }
 0x5b7   : > { %v5154_v47 = vadd.f32 %v5153_v63, %v5152_v1  ;;  %v5422_v6 = vrot.slane %v5421_v62, 1  ;;  %v12898_v1 = vld [vmem:[#allocation22_spill] sm:$0xff]  ;;  %v12917_v63 = vld [vmem:[#allocation41_spill] sm:$0xff] }
 0x5b9   : > { %v5423_v59 = vadd.f32 %v5422_v6, %v5421_v62  ;;  %v5424_v8 = vmul.f32 0.015625, %v5154_v47  ;;  %v12890_v62 = vld [vmem:[#allocation14_spill] sm:$0xff]  ;;  %v12891_v6 = vld [vmem:[#allocation15_spill] sm:$0xff]  ;;  %v12916_v47 = vld [vmem:[#allocation40_spill] sm:$0xff] }
 0x5ba   : > { %v3813_v57 = vpop.f32.mrf.mxu0 }
 0x5bb   : > { %v5425_v50 = vmul.f32 0.015625, %v5423_v59  ;;  %v5426_v9 = vmul.f32 %v5424_v8, %v5424_v8  ;;  %v3923_v54 = vadd.f32 %v3869_v33, %v3813_v57  ;;  %v11208_v38 = vperm.slane %v5424_v8, 0  ;;  %v12892_v8 = vld [vmem:[#allocation16_spill] sm:$0xff]  ;;  %v12896_v59 = vld [vmem:[#allocation19_spill] sm:$0xff]  ;;  %v12897_v57 = vld [vmem:[#allocation21_spill] sm:$0xff] }
 0x5bd   : > { %v5427_v12 = vsub.f32 %v5425_v50, %v5426_v9  ;;  %3977 = vst.msk [vmem:[#allocation3 + $0x1a8] sm:$0xff] %vm635_vm0, %v3923_v54  ;;  %v12893_v50 = vld [vmem:[#allocation17_spill] sm:$0xff]  ;;  %v12894_v54 = vld [vmem:[#allocation18_spill] sm:$0xff]  ;;  %v12899_v9 = vld [vmem:[#allocation23_spill] sm:$0xff]  ;;  %v12921_v25 = vsub.f32 %v10255_v27, %v11208_v38 }
 0x5bf   : > { %v5493_v22 = vadd.f32 1e-05, %v5427_v12 }
 0x5c1   : > { %8836 = vrsqrt.f32 %v5493_v22  ;;  %vm5500_vm10 = vweird.f32 %v5493_v22 }
 0x5c7   : > { %v8837_v40 = vpop.eup %8836 }
 0x5c8   : > { %v5495_v33 = vmul.f32 %v8837_v40, %v5493_v22  ;;  %vm5501_vm11 = vweird.f32 %v8837_v40  ;;  %v12920_v22 = vsub.f32 %v10244_v29, %v11208_v38 }
 0x5c9   : > { %vm5502_vm12 = vmor %vm5500_vm10, %vm5501_vm11  ;;  %vm8470_vm10 = vcmask 24576  }
 0x5ca   : > { %v5496_v12 = vmul.f32 %v8837_v40, %v5495_v33  ;;  %v6668_v33 = vld [vmem:[%s12750_s3 + $0x130] sm:$0xff] }
 0x5cb   : > { %6739 = vmatpush.msrb.mxu2 %v6668_v33 }
 0x5cc   : > { %v5497_v17 = vmul.f32 0.5, %v5496_v12 }
 0x5ce   : > { %v5498_v28 = vsub.f32 1.5, %v5497_v17 }
 0x5d0   : > { %v5499_v17 = vmul.f32 %v8837_v40, %v5498_v28 }
 0x5d2   : > { %v5503_v56 = vsel %vm5502_vm12, %v8837_v40, %v5499_v17  ;;  %v12919_v17 = vsub.f32 %v10235_v7, %v11208_v38 }
 0x5d3   : > { %v11326_v48 = vperm.slane %v5503_v56, 0  ;;  %v12922_v56 = vsub.f32 %v10249_v35, %v11208_v38  ;;  %v12926_v35 = vsub.f32 %v10294_v44, %v11208_v38 }
 0x5d5   : > { %v5506_v18 = vmul.f32 %v11326_v48, %v12919_v17  ;;  %v5507_v12 = vmul.f32 %v11326_v48, %v12920_v22  ;;  %v5508_v40 = vmul.f32 %v11326_v48, %v12921_v25  ;;  %v5505_v7 = vmul.f32 %v11326_v48, %v12922_v56 }
 0x5d6   : > { %v12923_v17 = vsub.f32 %v10274_v11, %v11208_v38  ;;  %v12924_v22 = vsub.f32 %v10287_v30, %v11208_v38  ;;  %v12925_v25 = vsub.f32 %v10289_v16, %v11208_v38  ;;  %v5512_v56 = vmul.f32 %v11326_v48, %v12926_v35 }
 0x5d7   : > { %v5597_v19 = vrot.slane %v5506_v18, 7  ;;  %v5599_v43 = vrot.slane %v5507_v12, 6  ;;  %v5601_v11 = vrot.slane %v5508_v40, 5  ;;  %v12927_v30 = vsub.f32 %v12887_v31, %v11208_v38 }
 0x5d8   : > { %v5509_v29 = vmul.f32 %v11326_v48, %v12923_v17  ;;  %v5510_v27 = vmul.f32 %v11326_v48, %v12924_v22  ;;  %v5511_v33 = vmul.f32 %v11326_v48, %v12925_v25  ;;  %v12928_v25 = vsub.f32 %v12888_v49, %v11208_v38 }
 0x5d9   : > { %v5513_v22 = vmul.f32 %v11326_v48, %v12927_v30  ;;  %v5598_v16 = vsel %vm5008_vm2, %v5597_v19, %v5505_v7  ;;  %v12929_v18 = vsub.f32 %v12889_v2, %v11208_v38  ;;  %v12930_v40 = vsub.f32 %v12890_v62, %v11208_v38 }
 0x5da   : > { %v5603_v28 = vrot.slane %v5509_v29, 4  ;;  %v5605_v17 = vrot.slane %v5510_v27, 3  ;;  %v5607_v34 = vrot.slane %v5511_v33, 2  ;;  %v5514_v44 = vmul.f32 %v11326_v48, %v12928_v25 }
 0x5db   : > { %v5515_v12 = vmul.f32 %v11326_v48, %v12929_v18  ;;  %v5516_v33 = vmul.f32 %v11326_v48, %v12930_v40  ;;  %v5600_v31 = vsel %vm5011_vm3, %v5599_v43, %v5598_v16  ;;  %v12931_v19 = vsub.f32 %v12891_v6, %v11208_v38 }
 0x5dc   : > { %v12932_v49 = vsub.f32 %v12892_v8, %v11208_v38  ;;  %v12933_v2 = vsub.f32 %v12893_v50, %v11208_v38  ;;  %v5602_v62 = vsel %vm5014_vm4, %v5601_v11, %v5600_v31  ;;  %v12934_v43 = vsub.f32 %v12894_v54, %v11208_v38 }
 0x5dd   : > { %v5517_v7 = vmul.f32 %v11326_v48, %v12931_v19  ;;  %v5621_v6 = vrot.slane %v5514_v44, 7  ;;  %v5623_v30 = vrot.slane %v5515_v12, 6  ;;  %v5604_v16 = vsel %vm5017_vm5, %v5603_v28, %v5602_v62 }
 0x5de   : > { %v5518_v29 = vmul.f32 %v11326_v48, %v12932_v49  ;;  %v5519_v27 = vmul.f32 %v11326_v48, %v12933_v2  ;;  %v5520_v35 = vmul.f32 %v11326_v48, %v12934_v43  ;;  %v5609_v25 = vrot.slane %v5512_v56, 1  ;;  %v6893_v43 = vld [vmem:[%s12750_s3 + $0x170] sm:$0xff] }
 0x5df   : > { %v5625_v8 = vrot.slane %v5516_v33, 5  ;;  %v5627_v18 = vrot.slane %v5517_v7, 4  ;;  %v5606_v40 = vsel %vm5020_vm6, %v5605_v17, %v5604_v16  ;;  %v5622_v50 = vsel %vm5008_vm2, %v5621_v6, %v5513_v22  ;;  %6964 = vmatpush.msrb.mxu3 %v6893_v43 }
 0x5e0   : > { %v5629_v19 = vrot.slane %v5518_v29, 3  ;;  %v5631_v49 = vrot.slane %v5519_v27, 2  ;;  %v5608_v11 = vsel %vm5023_vm7, %v5607_v34, %v5606_v40  ;;  %v5624_v31 = vsel %vm5011_vm3, %v5623_v30, %v5622_v50 }
 0x5e1   : > { %v5633_v54 = vrot.slane %v5520_v35, 1  ;;  %v12935_v44 = vsub.f32 %v12896_v59, %v11208_v38  ;;  %v5610_v28 = vsel %vm5026_vm8, %v5609_v25, %v5608_v11  ;;  %v5626_v56 = vsel %vm5014_vm4, %v5625_v8, %v5624_v31 }
 0x5e2   : > { %v12936_v17 = vsub.f32 %v12897_v57, %v11208_v38  ;;  %v12937_v34 = vsub.f32 %v12898_v1, %v11208_v38  ;;  %5612 = vst.msk [vmem:[#allocation4 + $0x11] sm:$0xff] %vm635_vm0, %v5610_v28  ;;  %v5628_v59 = vsel %vm5017_vm5, %v5627_v18, %v5626_v56  ;;  %v12938_v7 = vsub.f32 %v12899_v9, %v11208_v38  ;;  %v6442_v9 = vld [vmem:[%s12750_s3 + $0xe8] sm:$0xff] }
 0x5e3   : > { %v5522_v12 = vmul.f32 %v11326_v48, %v12935_v44  ;;  %v12939_v2 = vsub.f32 %v12900_v20, %v11208_v38  ;;  %v12940_v27 = vsub.f32 %v12901_v14, %v11208_v38  ;;  %v5630_v62 = vsel %vm5020_vm6, %v5629_v19, %v5628_v59  ;;  %6515 = vmatpush.msrb.mxu1 %v6442_v9  ;;  %v12946_v56 = vld [vmem:[#allocation30_spill] sm:$0xff] }
 0x5e4   : > { %v5523_v22 = vmul.f32 %v11326_v48, %v12936_v17  ;;  %v5524_v33 = vmul.f32 %v11326_v48, %v12937_v34  ;;  %v5525_v29 = vmul.f32 %v11326_v48, %v12938_v7  ;;  %v12941_v20 = vsub.f32 %v12895_v61, %v11208_v38  ;;  %v12951_v7 = vld [vmem:[#allocation33_spill] sm:$0xff] }
 0x5e5   : > { %v5526_v57 = vmul.f32 %v11326_v48, %v12939_v2  ;;  %v5527_v1 = vmul.f32 %v11326_v48, %v12940_v27  ;;  %v5645_v6 = vrot.slane %v5522_v12, 7  ;;  %v5632_v14 = vsel %vm5023_vm7, %v5631_v49, %v5630_v62 }
 0x5e6   : > { %v5521_v35 = vmul.f32 %v11326_v48, %v12941_v20  ;;  %v5647_v30 = vrot.slane %v5523_v22, 6  ;;  %v12942_v16 = vsub.f32 %v12902_v52, %v11208_v38  ;;  %v5649_v8 = vrot.slane %v5524_v33, 5 }
 0x5e7   : > { %v5651_v18 = vrot.slane %v5525_v29, 4  ;;  %v5634_v40 = vsel %vm5026_vm8, %v5633_v54, %v5632_v14  ;;  %v5653_v61 = vrot.slane %v5526_v57, 3  ;;  %v5655_v19 = vrot.slane %v5527_v1, 2  ;;  %v12953_v57 = vld [vmem:[#allocation34_spill] sm:$0xff] }
 0x5e8   : > { %v5528_v25 = vmul.f32 %v11326_v48, %v12942_v16  ;;  %v5646_v50 = vsel %vm5008_vm2, %v5645_v6, %v5521_v35  ;;  %5636 = vst.msk [vmem:[#allocation4 + $0x21] sm:$0xff] %vm635_vm0, %v5634_v40  ;;  %v12943_v49 = vsub.f32 %v12903_v60, %v11208_v38  ;;  %v12944_v52 = vsub.f32 %v12904_v0, %v11208_v38  ;;  %v12949_v0 = vld [vmem:[#allocation32_spill] sm:$0xff] }
 0x5e9   : > { %v5648_v11 = vsel %vm5011_vm3, %v5647_v30, %v5646_v50  ;;  %v12945_v54 = vsub.f32 %v12905_v24, %v11208_v38  ;;  %v12947_v17 = vsub.f32 %v12946_v56, %v11208_v38  ;;  %v12948_v60 = vsub.f32 %v12907_v45, %v11208_v38  ;;  %v11498_v62 = vld [vmem:[#allocation4 + $0x10] sm:$0xff] }
 0x5ea   : > { %v5529_v31 = vmul.f32 %v11326_v48, %v12943_v49  ;;  %v5530_v44 = vmul.f32 %v11326_v48, %v12944_v52  ;;  %v5650_v28 = vsel %vm5014_vm4, %v5649_v8, %v5648_v11  ;;  %v12950_v33 = vsub.f32 %v12949_v0, %v11208_v38  ;;  %v11500_v43 = vld [vmem:[#allocation4 + $0x11] sm:$0xff]  ;;  %8578 = vmatmul.msk.f32.gmra.mxu1 %vm635_vm0, %v11498_v62  ;;  %v12956_v52 = vld [vmem:[#allocation36_spill] sm:$0xff] }
 0x5eb   : > { %v5531_v12 = vmul.f32 %v11326_v48, %v12945_v54  ;;  %v5532_v22 = vmul.f32 %v11326_v48, %v12947_v17  ;;  %v5533_v34 = vmul.f32 %v11326_v48, %v12948_v60  ;;  %v5652_v24 = vsel %vm5017_vm5, %v5651_v18, %v5650_v28  ;;  %v6193_v9 = vld [vmem:[#allocation4 + $0xa] sm:$0xff]  ;;  %8598 = vmatmul.msk.f32.gmra.mxu2 %vm635_vm0, %v11500_v43 }
 0x5ec   : > { %v5534_v59 = vmul.f32 %v11326_v48, %v12950_v33  ;;  %v12952_v29 = vsub.f32 %v12951_v7, %v11208_v38  ;;  %v12954_v27 = vsub.f32 %v12953_v57, %v11208_v38  ;;  %v5669_v45 = vrot.slane %v5530_v44, 7  ;;  %8617 = vmatmul.msk.f32.vlgmr.msra.gmra.mxu3 %vm635_vm0, %v6193_v9 }
 0x5ed   : > { %v5654_v20 = vsel %vm5020_vm6, %v5653_v61, %v5652_v24  ;;  %v5657_v35 = vrot.slane %v5528_v25, 1  ;;  %v5671_v6 = vrot.slane %v5531_v12, 6  ;;  %v5673_v30 = vrot.slane %v5532_v22, 5  ;;  %v6667_v25 = vld [vmem:[%s12750_s3 + $0x128] sm:$0xff]  ;;  %v12958_v12 = vld [vmem:[#allocation37_spill] sm:$0xff] }
 0x5ee   : > { %v5535_v2 = vmul.f32 %v11326_v48, %v12952_v29  ;;  %v5536_v1 = vmul.f32 %v11326_v48, %v12954_v27  ;;  %v5656_v14 = vsel %vm5023_vm7, %v5655_v19, %v5654_v20  ;;  %v5670_v16 = vsel %vm5008_vm2, %v5669_v45, %v5529_v31  ;;  %6740 = vmatpush.msrb.mxu2 %v6667_v25  ;;  %v12965_v27 = vld [vmem:[#allocation48_spill] sm:$0xff]  ;;  %v12966_v45 = vld [vmem:[#allocation49_spill] sm:$0xff] }
 0x5ef   : > { %v5675_v8 = vrot.slane %v5533_v34, 4  ;;  %v5677_v18 = vrot.slane %v5534_v59, 3  ;;  %v5658_v40 = vsel %vm5026_vm8, %v5657_v35, %v5656_v14  ;;  %v5672_v50 = vsel %vm5011_vm3, %v5671_v6, %v5670_v16  ;;  %v11560_v6 = vld [vmem:[#allocation4 + $0x18] sm:$0xff] }
 0x5f0   : > { %v5679_v61 = vrot.slane %v5535_v2, 2  ;;  %v12955_v11 = vsub.f32 %v12911_v46, %v11208_v38  ;;  %5660 = vst.msk [vmem:[#allocation4 + $0x31] sm:$0xff] %vm635_vm0, %v5658_v40  ;;  %v5674_v49 = vsel %vm5014_vm4, %v5673_v30, %v5672_v50  ;;  %v5681_v31 = vrot.slane %v5536_v1, 1  ;;  %v11551_v2 = vld [vmem:[#allocation4 + $0x19] sm:$0xff] }
 0x5f1   : > { %v12957_v44 = vsub.f32 %v12956_v52, %v11208_v38  ;;  %v12959_v28 = vsub.f32 %v12958_v12, %v11208_v38  ;;  %v5676_v46 = vsel %vm5017_vm5, %v5675_v8, %v5674_v49  ;;  %v12960_v17 = vsub.f32 %v12914_v39, %v11208_v38  ;;  %v11572_v40 = vld [vmem:[#allocation4 + $0x12] sm:$0xff] }
 0x5f2   : > { %v5537_v19 = vmul.f32 %v11326_v48, %v12955_v11  ;;  %v12961_v60 = vsub.f32 %v12915_v5, %v11208_v38  ;;  %v12962_v0 = vsub.f32 %v12916_v47, %v11208_v38  ;;  %v5678_v59 = vsel %vm5020_vm6, %v5677_v18, %v5676_v46  ;;  %8579 = vmatmul.msk.f32.gmra.mxu1 %vm635_vm0, %v11560_v6  ;;  %v12974_v46 = vld [vmem:[#allocation42_spill] sm:$0xff] }
 0x5f3   : > { %v5538_v54 = vmul.f32 %v11326_v48, %v12957_v44  ;;  %v5539_v56 = vmul.f32 %v11326_v48, %v12959_v28  ;;  %v5540_v22 = vmul.f32 %v11326_v48, %v12960_v17  ;;  %v12963_v24 = vsub.f32 %v12917_v63, %v11208_v38  ;;  %8599 = vmatmul.msk.f32.gmra.mxu2 %vm635_vm0, %v11551_v2  ;;  %v6892_v28 = vld [vmem:[%s12750_s3 + $0x168] sm:$0xff] }
 0x5f4   : > { %v5541_v34 = vmul.f32 %v11326_v48, %v12961_v60  ;;  %v5542_v33 = vmul.f32 %v11326_v48, %v12962_v0  ;;  %v12964_v39 = vsub.f32 %v10788_v41, %v11208_v38  ;;  %v5680_v57 = vsel %vm5023_vm7, %v5679_v61, %v5678_v59  ;;  %8618 = vmatmul.msk.f32.gmra.mxu3 %vm635_vm0, %v11572_v40  ;;  %v12977_v59 = vld [vmem:[#allocation50_spill] sm:$0xff] }
 0x5f5   : > { %v5543_v7 = vmul.f32 %v11326_v48, %v12963_v24  ;;  %v5693_v5 = vrot.slane %v5538_v54, 7  ;;  %v5695_v47 = vrot.slane %v5539_v56, 6  ;;  %v5490_v1 = vsub.f32 %v12965_v27, %v11208_v38  ;;  %6965 = vmatpush.msrb.mxu3 %v6892_v28 }
 0x5f6   : > { %v5544_v29 = vmul.f32 %v11326_v48, %v12964_v39  ;;  %v5491_v9 = vsub.f32 %v12966_v45, %v11208_v38  ;;  %v5682_v63 = vsel %vm5026_vm8, %v5681_v31, %v5680_v57  ;;  %v5697_v35 = vrot.slane %v5540_v22, 5  ;;  %v12970_v31 = vld [vmem:[#allocation44_spill] sm:$0xff] }
 0x5f7   : > { %v5694_v20 = vsel %vm5008_vm2, %v5693_v5, %v5537_v19  ;;  %v5699_v41 = vrot.slane %v5541_v34, 4  ;;  %5684 = vst.msk [vmem:[#allocation4 + $0x41] sm:$0xff] %vm635_vm0, %v5682_v63  ;;  %v5701_v14 = vrot.slane %v5542_v33, 3  ;;  %v5703_v16 = vrot.slane %v5543_v7, 2 }
 0x5f8   : > { %v5696_v30 = vsel %vm5011_vm3, %v5695_v47, %v5694_v20  ;;  %v12967_v8 = vsub.f32 %v12918_v42, %v11208_v38  ;;  %v5705_v50 = vrot.slane %v5544_v29, 1  ;;  %v12968_v61 = vsub.f32 %v10824_v37, %v11208_v38 }
 0x5f9   : > { %v5698_v25 = vsel %vm5014_vm4, %v5697_v35, %v5696_v30  ;;  %v12969_v42 = vsub.f32 %v10838_v58, %v11208_v38  ;;  %v12971_v52 = vsub.f32 %v12970_v31, %v11208_v38  ;;  %v12972_v37 = vsub.f32 %v10935_v13, %v11208_v38 }
 0x5fa   : > { %v5546_v18 = vmul.f32 %v11326_v48, %v12967_v8  ;;  %v5547_v11 = vmul.f32 %v11326_v48, %v12968_v61  ;;  %v5700_v49 = vsel %vm5017_vm5, %v5699_v41, %v5698_v25  ;;  %v12973_v58 = vsub.f32 %v10939_v53, %v11208_v38  ;;  %v11640_v25 = vld [vmem:[#allocation4 + $0x21] sm:$0xff] }
 0x5fb   : > { %v5548_v19 = vmul.f32 %v11326_v48, %v12969_v42  ;;  %v5549_v44 = vmul.f32 %v11326_v48, %v12971_v52  ;;  %v5550_v54 = vmul.f32 %v11326_v48, %v12972_v37  ;;  %v5702_v56 = vsel %vm5020_vm6, %v5701_v14, %v5700_v49  ;;  %v12983_v61 = vld [vmem:[#allocation45_spill] sm:$0xff]  ;;  %8600 = vmatmul.msk.f32.gmra.mxu2 %vm635_vm0, %v11640_v25 }
 0x5fc   : > { %v5551_v12 = vmul.f32 %v11326_v48, %v12973_v58  ;;  %v12975_v17 = vsub.f32 %v12974_v46, %v11208_v38  ;;  %v5717_v60 = vrot.slane %v5546_v18, 7  ;;  %v5719_v13 = vrot.slane %v5547_v11, 6  ;;  %v6441_v37 = vld [vmem:[%s12750_s3 + $0xe0] sm:$0xff] }
 0x5fd   : > { %v5704_v34 = vsel %vm5023_vm7, %v5703_v16, %v5702_v56  ;;  %v12976_v53 = vsub.f32 %v10950_v51, %v11208_v38  ;;  %v5721_v33 = vrot.slane %v5548_v19, 5  ;;  %v5492_v24 = vsub.f32 %v12977_v59, %v11208_v38  ;;  %6516 = vmatpush.msrb.mxu1 %v6441_v37  ;;  %v6665_v37 = vld [vmem:[%s12750_s3 + $0x118] sm:$0xff] }
 0x5fe   : > { %v5545_v22 = vmul.f32 %v11326_v48, %v12975_v17  ;;  %v5706_v7 = vsel %vm5026_vm8, %v5705_v50, %v5704_v34  ;;  %v5723_v29 = vrot.slane %v5549_v44, 4  ;;  %v5725_v5 = vrot.slane %v5550_v54, 3  ;;  %v6666_v54 = vld [vmem:[%s12750_s3 + $0x120] sm:$0xff] }
 0x5ff   : > { %v5552_v0 = vmul.f32 %v11326_v48, %v12976_v53  ;;  %5708 = vst.msk [vmem:[#allocation4 + $0x51] sm:$0xff] %vm635_vm0, %v5706_v7  ;;  %v5727_v47 = vrot.slane %v5551_v12, 2  ;;  %v12978_v51 = vsub.f32 %v10926_v26, %v11208_v38  ;;  %v12979_v20 = vsub.f32 %v10937_v10, %v11208_v38  ;;  %v11638_v10 = vld [vmem:[#allocation4 + $0x20] sm:$0xff]  ;;  %6741 = vmatpush.msrb.mxu2 %v6666_v54 }
 0x600   : > { %v5718_v39 = vsel %vm5008_vm2, %v5717_v60, %v5545_v22  ;;  %v12980_v30 = vsub.f32 %v10961_v36, %v11208_v38  ;;  %v12981_v16 = vsub.f32 %v10955_v55, %v11208_v38  ;;  %v12982_v26 = vsub.f32 %v10978_v3, %v11208_v38  ;;  %8580 = vmatmul.msk.f32.gmra.mxu1 %vm635_vm0, %v11638_v10  ;;  %v11655_v3 = vld [vmem:[#allocation4 + $0x1a] sm:$0xff] }
 0x601   : > { %v5720_v57 = vsel %vm5011_vm3, %v5719_v13, %v5718_v39  ;;  %v5554_v63 = vmul.f32 %v11326_v48, %v12978_v51  ;;  %v5555_v35 = vmul.f32 %v11326_v48, %v12979_v20  ;;  %v12984_v36 = vsub.f32 %v12983_v61, %v11208_v38  ;;  %8619 = vmatmul.msk.f32.gmra.mxu3 %vm635_vm0, %v11655_v3  ;;  %v11697_v51 = vld [vmem:[#allocation4 + $0x29] sm:$0xff]  ;;  %v11763_v54 = vld [vmem:[#allocation4 + $0x40] sm:$0xff] }
 0x602   : > { %v5722_v41 = vsel %vm5014_vm4, %v5721_v33, %v5720_v57  ;;  %v5556_v14 = vmul.f32 %v11326_v48, %v12980_v30  ;;  %v5557_v8 = vmul.f32 %v11326_v48, %v12981_v16  ;;  %v5558_v18 = vmul.f32 %v11326_v48, %v12982_v26  ;;  %v12992_v57 = vld [vmem:[#allocation47_spill] sm:$0xff]  ;;  %6742 = vmatpush.msrb.mxu2 %v6665_v37 }
 0x603   : > { %v5724_v50 = vsel %vm5017_vm5, %v5723_v29, %v5722_v41  ;;  %v5553_v11 = vmul.f32 %v11326_v48, %v12984_v36  ;;  %v12985_v55 = vsub.f32 %v10988_v32, %v11208_v38  ;;  %v5741_v19 = vrot.slane %v5554_v63, 7  ;;  %v12990_v29 = vld [vmem:[#allocation46_spill] sm:$0xff]  ;;  %8601 = vmatmul.msk.f32.gmra.mxu2 %vm635_vm0, %v11697_v51 }
 0x604   : > { %v5726_v49 = vsel %vm5020_vm6, %v5725_v5, %v5724_v50  ;;  %v5729_v31 = vrot.slane %v5552_v0, 1  ;;  %v12986_v52 = vsub.f32 %v11016_v4, %v11208_v38  ;;  %v5743_v32 = vrot.slane %v5555_v35, 6 }
 0x605   : > { %v5559_v42 = vmul.f32 %v11326_v48, %v12985_v55  ;;  %v5728_v58 = vsel %vm5023_vm7, %v5727_v47, %v5726_v49  ;;  %v5742_v12 = vsel %vm5008_vm2, %v5741_v19, %v5553_v11  ;;  %v5745_v28 = vrot.slane %v5556_v14, 5  ;;  %v11709_v14 = vld [vmem:[#allocation4 + $0x28] sm:$0xff]  ;;  %v11735_v19 = vld [vmem:[#allocation4 + $0x31] sm:$0xff] }
 0x606   : > { %v5560_v44 = vmul.f32 %v11326_v48, %v12986_v52  ;;  %v5747_v4 = vrot.slane %v5557_v8, 4  ;;  %v5730_v56 = vsel %vm5026_vm8, %v5729_v31, %v5728_v58  ;;  %v5744_v46 = vsel %vm5011_vm3, %v5743_v32, %v5742_v12  ;;  %v11741_v49 = vld [vmem:[#allocation4 + $0x2a] sm:$0xff]  ;;  %v6440_v31 = vld [vmem:[%s12750_s3 + $0xd8] sm:$0xff]  ;;  %v11756_v32 = vld [vmem:[#allocation4 + $0x32] sm:$0xff] }
 0x607   : > { %v5749_v17 = vrot.slane %v5558_v18, 3  ;;  %v5751_v22 = vrot.slane %v5559_v42, 2  ;;  %5732 = vst.msk [vmem:[#allocation4 + $0x61] sm:$0xff] %vm635_vm0, %v5730_v56  ;;  %v5746_v60 = vsel %vm5014_vm4, %v5745_v28, %v5744_v46  ;;  %v12987_v13 = vsub.f32 %v11125_v23, %v11208_v38  ;;  %v11733_v42 = vld [vmem:[#allocation4 + $0x30] sm:$0xff]  ;;  %6517 = vmatpush.msrb.mxu1 %v6440_v31  ;;  %v11748_v52 = vld [vmem:[#allocation4 + $0x39] sm:$0xff]  ;;  %v11765_v58 = vld [vmem:[#allocation4 + $0x41] sm:$0xff] }
 0x608   : > { %v12988_v53 = vsub.f32 %v11127_v15, %v11208_v38  ;;  %v12989_v33 = vsub.f32 %v11129_v21, %v11208_v38  ;;  %v5748_v7 = vsel %vm5017_vm5, %v5747_v4, %v5746_v60  ;;  %v5753_v39 = vrot.slane %v5560_v44, 1  ;;  %8581 = vmatmul.msk.f32.gmra.mxu1 %vm635_vm0, %v11709_v14  ;;  %v11750_v44 = vld [vmem:[#allocation4 + $0x38] sm:$0xff]  ;;  %v6890_v28 = vld [vmem:[%s12750_s3 + $0x158] sm:$0xff]  ;;  %v11781_v56 = vld [vmem:[#allocation4 + $0x49] sm:$0xff] }
 0x609   : > { %v5562_v34 = vmul.f32 %v11326_v48, %v12987_v13  ;;  %v12991_v5 = vsub.f32 %v12990_v29, %v11208_v38  ;;  %v12993_v47 = vsub.f32 %v12992_v57, %v11208_v38  ;;  %v5750_v63 = vsel %vm5020_vm6, %v5749_v17, %v5748_v7  ;;  %v11771_v12 = vld [vmem:[#allocation4 + $0x3a] sm:$0xff]  ;;  %v11783_v46 = vld [vmem:[#allocation4 + $0x48] sm:$0xff]  ;;  %v11796_v60 = vld [vmem:[#allocation4 + $0x50] sm:$0xff] }
 0x60a   : > { %v5563_v0 = vmul.f32 %v11326_v48, %v12988_v53  ;;  %v5564_v59 = vmul.f32 %v11326_v48, %v12989_v33  ;;  %v5566_v21 = vmul.f32 %v11326_v48, %v5490_v1  ;;  %v5752_v41 = vsel %vm5023_vm7, %v5751_v22, %v5750_v63  ;;  %v11718_v1 = vld [vmem:[#allocation4 + $0x22] sm:$0xff]  ;;  %v6439_v4 = vld [vmem:[%s12750_s3 + $0xd0] sm:$0xff]  ;;  %v6438_v7 = vld [vmem:[%s12750_s3 + $0xc8] sm:$0xff] }
 0x60b   : > { %v5561_v23 = vmul.f32 %v11326_v48, %v12991_v5  ;;  %v5565_v15 = vmul.f32 %v11326_v48, %v12993_v47  ;;  %v5765_v20 = vrot.slane %v5562_v34, 7  ;;  %v5567_v30 = vmul.f32 %v11326_v48, %v5491_v9  ;;  %8620 = vmatmul.msk.f32.gmra.mxu3 %vm635_vm0, %v11718_v1  ;;  %8602 = vmatmul.msk.f32.gmra.mxu2 %vm635_vm0, %v11735_v19  ;;  %v11789_v17 = vld [vmem:[#allocation4 + $0x42] sm:$0xff]  ;;  %v6664_v22 = vld [vmem:[%s12750_s3 + $0x110] sm:$0xff]  ;;  %v11804_v34 = vld [vmem:[#allocation4 + $0x4a] sm:$0xff] }
 0x60c   : > { %v5767_v35 = vrot.slane %v5563_v0, 6  ;;  %v5754_v16 = vsel %vm5026_vm8, %v5753_v39, %v5752_v41  ;;  %v5568_v8 = vmul.f32 %v11326_v48, %v5492_v24  ;;  %v5769_v27 = vrot.slane %v5564_v59, 5  ;;  %v6891_v48 = vld [vmem:[%s12750_s3 + $0x160] sm:$0xff]  ;;  %6518 = vmatpush.msrb.mxu1 %v6439_v4  ;;  %6743 = vmatpush.msrb.mxu2 %v6664_v22  ;;  %v11798_v13 = vld [vmem:[#allocation4 + $0x51] sm:$0xff]  ;;  %v11811_v0 = vld [vmem:[#allocation4 + $0x59] sm:$0xff] }
 0x60d   : > { %v5766_v26 = vsel %vm5008_vm2, %v5765_v20, %v5561_v23  ;;  %5756 = vst.msk [vmem:[#allocation4 + $0x71] sm:$0xff] %vm635_vm0, %v5754_v16  ;;  %v5771_v45 = vrot.slane %v5565_v15, 4  ;;  %v5773_v24 = vrot.slane %v5566_v21, 3  ;;  %6966 = vmatpush.msrb.mxu3 %v6891_v48  ;;  %v5775_v50 = vrot.slane %v5567_v30, 2  ;;  %v6889_v53 = vld [vmem:[%s12750_s3 + $0x150] sm:$0xff]  ;;  %v6663_v39 = vld [vmem:[%s12750_s3 + $0x108] sm:$0xff] }
 0x60e   : > { %v5768_v38 = vsel %vm5011_vm3, %v5767_v35, %v5766_v26  ;;  %v5777_v36 = vrot.slane %v5568_v8, 1  ;;  %v11813_v33 = vld [vmem:[#allocation4 + $0x58] sm:$0xff]  ;;  %6519 = vmatpush.msrb.mxu1 %v6438_v7  ;;  %6744 = vmatpush.msrb.mxu2 %v6663_v39  ;;  %v11829_v29 = vld [vmem:[#allocation4 + $0x60] sm:$0xff]  ;;  %v11850_v21 = vld [vmem:[#allocation4 + $0x69] sm:$0xff] }
 0x60f   : > { %v5770_v9 = vsel %vm5014_vm4, %v5769_v27, %v5768_v38  ;;  %6967 = vmatpush.msrb.mxu3 %v6890_v28  ;;  %v11819_v59 = vld [vmem:[#allocation4 + $0x52] sm:$0xff]  ;;  %v11831_v5 = vld [vmem:[#allocation4 + $0x61] sm:$0xff] }
 0x610   : > { %v5772_v18 = vsel %vm5017_vm5, %v5771_v45, %v5770_v9  ;;  %8582 = vmatmul.msk.f32.gmra.mxu1 %vm635_vm0, %v11733_v42  ;;  %v11837_v23 = vld [vmem:[#allocation4 + $0x5a] sm:$0xff]  ;;  %v12994_v15 = vld [vmem:[#allocation51_spill] sm:$0xff]  ;;  %v11857_v35 = vld [vmem:[#allocation4 + $0x68] sm:$0xff] }
 0x611   : > { %v5774_v61 = vsel %vm5020_vm6, %v5773_v24, %v5772_v18  ;;  %6968 = vmatpush.msrb.mxu3 %v6889_v53  ;;  %v5781_v47 = vld [vmem:[#allocation4] sm:$0xff]  ;;  %8192 = vst.msk [vmem:[#allocation6] sm:$0xff] %vm5946_vm13, %v12994_v15  ;;  %v8853_v20 = vld [vmem:[%s12750_s3 + $0xb0] sm:$0xff]  ;;  %v8854_v41 = vld [vmem:[%s12750_s3 + $0xa8] sm:$0xff] }
 0x612   : > { %v5776_v11 = vsel %vm5023_vm7, %v5775_v50, %v5774_v61  ;;  %8576 = vmatmul.msk.f32.vlgmr.msrb.gmra.mxu0 %vm635_vm0, %v5781_v47  ;;  %v8852_v63 = vld [vmem:[%s12750_s3 + $0xb8] sm:$0xff]  ;;  %8198 = vst.msk [vmem:[#allocation6 + $0x25] sm:$0xff] %vm5946_vm13, %v12994_v15  ;;  %v6888_v16 = vld [vmem:[%s12750_s3 + $0x148] sm:$0xff]  ;;  %v8855_v38 = vld [vmem:[%s12750_s3 + $0xa0] sm:$0xff] }
 0x613   : > { %v5778_v55 = vsel %vm5026_vm8, %v5777_v36, %v5776_v11  ;;  %8621 = vmatmul.msk.f32.gmra.mxu3 %vm635_vm0, %v11741_v49  ;;  %8603 = vmatmul.msk.f32.gmra.mxu2 %vm635_vm0, %v11748_v52  ;;  %8201 = vst.msk [vmem:[#allocation6 + $0x30] sm:$0xff] %vm5946_vm13, %v12994_v15  ;;  %v11866_v30 = vld [vmem:[#allocation4 + $0x62] sm:$0xff]  ;;  %v8857_v9 = vld [vmem:[%s12750_s3 + $0x90] sm:$0xff]  ;;  %v8858_v61 = vld [vmem:[%s12750_s3 + $0x88] sm:$0xff]  ;;  %vm8199_vm8 = vcmask 256000  }
 0x614   : > { %5780 = vst.msk [vmem:[#allocation4 + $0x81] sm:$0xff] %vm635_vm0, %v5778_v55  ;;  %6288 = vmatpush.msrb.mxu0 %v8852_v63  ;;  %v5967_v27 = vld [vmem:[#allocation4 + $0x1] sm:$0xff]  ;;  %6969 = vmatpush.msrb.mxu3 %v6888_v16  ;;  %v11887_v18 = vld [vmem:[#allocation4 + $0x70] sm:$0xff]  ;;  %v11908_v31 = vld [vmem:[#allocation4 + $0x79] sm:$0xff] }
 0x615   : > { %v8856_v48 = vld [vmem:[%s12750_s3 + $0x98] sm:$0xff]  ;;  %v6437_v24 = vld [vmem:[%s12750_s3 + $0xc0] sm:$0xff]  ;;  %v11889_v50 = vld [vmem:[#allocation4 + $0x71] sm:$0xff]  ;;  %5583 = vst.msk [vmem:[#allocation4 + $0x99] sm:$0x7f] %vm5582_vm14, %v12994_v15 }
 0x616   : > { %6289 = vmatpush.msrb.mxu0 %v8853_v20  ;;  %6520 = vmatpush.msrb.mxu1 %v6437_v24  ;;  %v11898_v36 = vld [vmem:[#allocation4 + $0x6a] sm:$0xff]  ;;  %v11910_v37 = vld [vmem:[#allocation4 + $0x78] sm:$0xff]  ;;  %v6192_v4 = vld [vmem:[#allocation4 + $0x2] sm:$0xff] }
 0x617   : > { %v5889_v57 = vpop.f32.mrf.mxu1  ;;  %v6662_v11 = vld [vmem:[%s12750_s3 + $0x100] sm:$0xff]  ;;  %v11916_v28 = vld [vmem:[#allocation4 + $0x72] sm:$0xff]  ;;  %v7344_v20 = vld [vmem:[%s12750_s3 + $0x1f8] sm:$0xff] }
 0x618   : > { %8583 = vmatmul.msk.f32.gmra.mxu1 %vm635_vm0, %v11750_v44  ;;  %5948 = vst.msk [vmem:[#allocation5 + $0x8] sm:$0xff] %vm5946_vm13, %v5889_v57  ;;  %6290 = vmatpush.msrb.mxu0 %v8854_v41  ;;  %v8859_v55 = vld [vmem:[%s12750_s3 + $0x80] sm:$0xff]  ;;  %v7119_v57 = vld [vmem:[%s12750_s3 + $0x1b8] sm:$0xff]  ;;  %v11955_v16 = vld [vmem:[#allocation4 + $0x90] sm:$0xff] }
 0x619   : > { %6745 = vmatpush.msrb.mxu2 %v6662_v11  ;;  %v6887_v39 = vld [vmem:[%s12750_s3 + $0x140] sm:$0xff]  ;;  %7188 = vmatpush.msra.mxu1 %v7119_v57  ;;  %v7118_v57 = vld [vmem:[%s12750_s3 + $0x1b0] sm:$0xff] }
 0x61a   : > { %6291 = vmatpush.msrb.mxu0 %v8855_v38  ;;  %6970 = vmatpush.msrb.mxu3 %v6887_v39  ;;  %v11940_v47 = vld [vmem:[#allocation4 + $0x89] sm:$0xff]  ;;  %v7569_v38 = vld [vmem:[%s12750_s3 + $0x238] sm:$0xff] }
 0x61b   : > { %8622 = vmatmul.msk.f32.gmra.mxu3 %vm635_vm0, %v11756_v32  ;;  %8604 = vmatmul.msk.f32.gmra.mxu2 %vm635_vm0, %v11765_v58  ;;  %v11922_v22 = vld [vmem:[#allocation4 + $0x80] sm:$0xff]  ;;  %v11942_v15 = vld [vmem:[#allocation4 + $0x88] sm:$0xff] }
 0x61c   : > { %8596 = vmatmul.msk.f32.vlgmr.msra.gmra.mxu0 %vm635_vm0, %v5967_v27  ;;  %v11924_v53 = vld [vmem:[#allocation4 + $0x81] sm:$0xff]  ;;  %7413 = vmatpush.msra.mxu2 %v7344_v20  ;;  %v11971_v11 = vld [vmem:[#allocation4 + $0x98] sm:$0xff] }
 0x61d   : > { %6292 = vmatpush.msrb.mxu0 %v8856_v48  ;;  %v11930_v7 = vld [vmem:[#allocation4 + $0x7a] sm:$0xff]  ;;  %v11948_v63 = vld [vmem:[#allocation4 + $0x82] sm:$0xff]  ;;  %7638 = vmatpush.msra.mxu3 %v7569_v38  ;;  %v11976_v39 = vld [vmem:[#allocation4 + $0x92] sm:$0xff] }
 0x61e   : > { %v7343_v20 = vld [vmem:[%s12750_s3 + $0x1f0] sm:$0xff]  ;;  %7189 = vmatpush.msra.mxu1 %v7118_v57 }
 0x61f   : > { %v6133_v26 = vld [vmem:[#allocation5 + $0x8] sm:$0xff]  ;;  %6293 = vmatpush.msrb.mxu0 %v8857_v9  ;;  %7414 = vmatpush.msra.mxu2 %v7343_v20 }
 0x620   : > { %8584 = vmatmul.msk.f32.gmra.mxu1 %vm635_vm0, %v11763_v54 }
 0x621   : > { %6294 = vmatpush.msrb.mxu0 %v8858_v61 }
 0x623   : > { %8623 = vmatmul.msk.f32.gmra.mxu3 %vm635_vm0, %v11771_v12  ;;  %8605 = vmatmul.msk.f32.gmra.mxu2 %vm635_vm0, %v11781_v56 }
 0x624   : > { %6295 = vmatpush.msrb.mxu0 %v8859_v55  ;;  %v11973_v55 = vld [vmem:[#allocation4 + $0x99] sm:$0xff] }
 0x625   : > { %8616 = vmatmul.msk.f32.vlgmr.msrb.gmra.mxu0 %vm635_vm0, %v6192_v4 }
 0x628   : > { %8585 = vmatmul.msk.f32.gmra.mxu1 %vm635_vm0, %v11783_v46 }
 0x62b   : > { %8624 = vmatmul.msk.f32.gmra.mxu3 %vm635_vm0, %v11789_v17  ;;  %8606 = vmatmul.msk.f32.gmra.mxu2 %vm635_vm0, %v11798_v13 }
 0x630   : > { %8586 = vmatmul.msk.f32.gmra.mxu1 %vm635_vm0, %v11796_v60 }
 0x633   : > { %8625 = vmatmul.msk.f32.gmra.mxu3 %vm635_vm0, %v11804_v34  ;;  %8607 = vmatmul.msk.f32.gmra.mxu2 %vm635_vm0, %v11811_v0 }
 0x637   : > { %v6075_v8 = vpop.f32.mrf.mxu2 }
 0x638   : > { %8587 = vmatmul.msk.f32.gmra.mxu1 %vm635_vm0, %v11813_v33  ;;  %v6153_v45 = vadd.f32 %v6133_v26, %v6075_v8  ;;  %v11957_v8 = vld [vmem:[#allocation4 + $0x91] sm:$0xff] }
 0x639   : > { %v11960_v26 = vld [vmem:[#allocation4 + $0x8a] sm:$0xff] }
 0x63a   : > { %6173 = vst.msk [vmem:[#allocation5 + $0x8] sm:$0xff] %vm5946_vm13, %v6153_v45 }
 0x63b   : > { %8626 = vmatmul.msk.f32.gmra.mxu3 %vm635_vm0, %v11819_v59  ;;  %8608 = vmatmul.msk.f32.gmra.mxu2 %vm635_vm0, %v11831_v5 }
 0x640   : > { %8588 = vmatmul.msk.f32.gmra.mxu1 %vm635_vm0, %v11829_v29 }
 0x641   : > { %v6358_v27 = vld [vmem:[#allocation5 + $0x8] sm:$0xff] }
 0x643   : > { %8627 = vmatmul.msk.f32.gmra.mxu3 %vm635_vm0, %v11837_v23  ;;  %8609 = vmatmul.msk.f32.gmra.mxu2 %vm635_vm0, %v11850_v21 }
 0x648   : > { %8589 = vmatmul.msk.f32.gmra.mxu1 %vm635_vm0, %v11857_v35 }
 0x64b   : > { %8628 = vmatmul.msk.f32.gmra.mxu3 %vm635_vm0, %v11866_v30  ;;  %8610 = vmatmul.msk.f32.gmra.mxu2 %vm635_vm0, %v11889_v50 }
 0x650   : > { %8590 = vmatmul.msk.f32.gmra.mxu1 %vm635_vm0, %v11887_v18 }
 0x653   : > { %8629 = vmatmul.msk.f32.gmra.mxu3 %vm635_vm0, %v11898_v36  ;;  %8611 = vmatmul.msk.f32.gmra.mxu2 %vm635_vm0, %v11908_v31 }
 0x658   : > { %8591 = vmatmul.msk.f32.gmra.mxu1 %vm635_vm0, %v11910_v37 }
 0x65b   : > { %8630 = vmatmul.msk.f32.gmra.mxu3 %vm635_vm0, %v11916_v28  ;;  %8612 = vmatmul.msk.f32.gmra.mxu2 %vm635_vm0, %v11924_v53 }
 0x660   : > { %8592 = vmatmul.msk.f32.gmra.mxu1 %vm635_vm0, %v11922_v22 }
 0x663   : > { %8631 = vmatmul.msk.f32.gmra.mxu3 %vm635_vm0, %v11930_v7  ;;  %8613 = vmatmul.msk.f32.gmra.mxu2 %vm635_vm0, %v11940_v47 }
 0x667   : > { %v5892_v41 = vpop.f32.mrf.mxu1 }
 0x668   : > { %8593 = vmatmul.msk.f32.gmra.mxu1 %vm635_vm0, %v11942_v15  ;;  %5949 = vst.msk [vmem:[#allocation5 + $0x10] sm:$0xff] %vm5946_vm13, %v5892_v41 }
 0x66b   : > { %8632 = vmatmul.msk.f32.gmra.mxu3 %vm635_vm0, %v11948_v63  ;;  %8614 = vmatmul.msk.f32.gmra.mxu2 %vm635_vm0, %v11957_v8 }
 0x66e   : > { %v6078_v45 = vpop.f32.mrf.mxu2 }
 0x66f   : > { %v6300_v48 = vpop.f32.mrf.mxu3  ;;  %v6134_v9 = vld [vmem:[#allocation5 + $0x10] sm:$0xff]  ;;  %v5895_v61 = vpop.f32.mrf.mxu1 }
 0x670   : > { %8594 = vmatmul.msk.f32.gmra.mxu1 %vm635_vm0, %v11955_v16  ;;  %v6378_v24 = vadd.f32 %v6358_v27, %v6300_v48  ;;  %v6154_v4 = vadd.f32 %v6134_v9, %v6078_v45  ;;  %5950 = vst.msk [vmem:[#allocation5 + $0x18] sm:$0xff] %vm5946_vm13, %v5895_v61  ;;  %v11993_v9 = vld [vmem:[#allocation4 + $0x9a] sm:$0xff] }
 0x672   : > { %6398 = vst.msk [vmem:[#allocation5 + $0x8] sm:$0xff] %vm5946_vm13, %v6378_v24 }
 0x673   : > { %8633 = vmatmul.msk.f32.gmra.mxu3 %vm635_vm0, %v11960_v26  ;;  %6174 = vst.msk [vmem:[#allocation5 + $0x10] sm:$0xff] %vm5946_vm13, %v6154_v4  ;;  %8615 = vmatmul.msk.f32.gmra.mxu2 %vm635_vm0, %v11973_v55  ;;  %v7568_v4 = vld [vmem:[%s12750_s3 + $0x230] sm:$0xff] }
 0x674   : > { %7639 = vmatpush.msra.mxu3 %v7568_v4 }
 0x676   : > { %v6081_v41 = vpop.f32.mrf.mxu2 }
 0x677   : > { %v6303_v27 = vpop.f32.mrf.mxu3  ;;  %v6135_v38 = vld [vmem:[#allocation5 + $0x18] sm:$0xff] }
 0x678   : > { %8595 = vmatmul.msk.f32.gmra.mxu1 %vm635_vm0, %v11971_v11  ;;  %v6155_v48 = vadd.f32 %v6135_v38, %v6081_v41 }
 0x67a   : > { %v6359_v24 = vld [vmem:[#allocation5 + $0x10] sm:$0xff]  ;;  %6175 = vst.msk [vmem:[#allocation5 + $0x18] sm:$0xff] %vm5946_vm13, %v6155_v48 }
 0x67b   : > { %8634 = vmatmul.msk.f32.gmra.mxu3 %vm635_vm0, %v11976_v39  ;;  %v6379_v61 = vadd.f32 %v6359_v24, %v6303_v27  ;;  %8656 = vmatmul.msk.f32.vlgmr.msrb.gmra.mxu2 %vm635_vm0, %v11500_v43 }
 0x67d   : > { %v5898_v45 = vpop.f32.mrf.mxu1  ;;  %6399 = vst.msk [vmem:[#allocation5 + $0x10] sm:$0xff] %vm5946_vm13, %v6379_v61 }
 0x67e   : > { %5951 = vst.msk [vmem:[#allocation5 + $0x20] sm:$0xff] %vm5946_vm13, %v5898_v45  ;;  %v6084_v57 = vpop.f32.mrf.mxu2  ;;  %v7117_v45 = vld [vmem:[%s12750_s3 + $0x1a8] sm:$0xff] }
 0x67f   : > { %7190 = vmatpush.msra.mxu1 %v7117_v45 }
 0x680   : > { %8636 = vmatmul.msk.f32.vlgmr.msrb.gmra.mxu1 %vm635_vm0, %v11498_v62 }
 0x681   : > { %v6360_v62 = vld [vmem:[#allocation5 + $0x18] sm:$0xff] }
 0x683   : > { %8635 = vmatmul.msk.f32.gmra.mxu3 %vm635_vm0, %v11993_v9  ;;  %8657 = vmatmul.msk.f32.gmra.mxu2 %vm635_vm0, %v11551_v2 }
 0x684   : > { %v6306_v20 = vpop.f32.mrf.mxu3 }
 0x685   : > { %v6136_v41 = vld [vmem:[#allocation5 + $0x20] sm:$0xff]  ;;  %v5901_v27 = vpop.f32.mrf.mxu1  ;;  %v6380_v43 = vadd.f32 %v6360_v62, %v6306_v20 }
 0x686   : > { %v6156_v38 = vadd.f32 %v6136_v41, %v6084_v57  ;;  %5952 = vst.msk [vmem:[#allocation5 + $0x28] sm:$0xff] %vm5946_vm13, %v5901_v27  ;;  %v6087_v48 = vpop.f32.mrf.mxu2 }
 0x687   : > { %6400 = vst.msk [vmem:[#allocation5 + $0x18] sm:$0xff] %vm5946_vm13, %v6380_v43 }
 0x688   : > { %6176 = vst.msk [vmem:[#allocation5 + $0x20] sm:$0xff] %vm5946_vm13, %v6156_v38  ;;  %8637 = vmatmul.msk.f32.gmra.mxu1 %vm635_vm0, %v11560_v6 }
 0x68b   : > { %8676 = vmatmul.msk.f32.vlgmr.msrb.gmra.mxu3 %vm635_vm0, %v11572_v40  ;;  %8658 = vmatmul.msk.f32.gmra.mxu2 %vm635_vm0, %v11640_v25  ;;  %v7342_v40 = vld [vmem:[%s12750_s3 + $0x1e8] sm:$0xff] }
 0x68c   : > { %7415 = vmatpush.msra.mxu2 %v7342_v40 }
 0x68d   : > { %v6137_v61 = vld [vmem:[#allocation5 + $0x28] sm:$0xff]  ;;  %v5904_v4 = vpop.f32.mrf.mxu1 }
 0x68e   : > { %v6309_v24 = vpop.f32.mrf.mxu3  ;;  %v6157_v57 = vadd.f32 %v6137_v61, %v6087_v48  ;;  %5953 = vst.msk [vmem:[#allocation5 + $0x30] sm:$0xff] %vm5946_vm13, %v5904_v4  ;;  %v6090_v20 = vpop.f32.mrf.mxu2  ;;  %v7341_v4 = vld [vmem:[%s12750_s3 + $0x1e0] sm:$0xff] }
 0x68f   : > { %v6361_v6 = vld [vmem:[#allocation5 + $0x20] sm:$0xff]  ;;  %7416 = vmatpush.msra.mxu2 %v7341_v4  ;;  %v5886_v4 = vpop.f32.mrf.mxu0 }
 0x690   : > { %6177 = vst.msk [vmem:[#allocation5 + $0x28] sm:$0xff] %vm5946_vm13, %v6157_v57  ;;  %v6381_v2 = vadd.f32 %v6361_v6, %v6309_v24  ;;  %8638 = vmatmul.msk.f32.gmra.mxu1 %vm635_vm0, %v11638_v10 }
 0x691   : > { %5947 = vst.msk [vmem:[#allocation5] sm:$0xff] %vm5946_vm13, %v5886_v4  ;;  %v7563_v4 = vld [vmem:[%s12750_s3 + $0x208] sm:$0xff] }
 0x692   : > { %6401 = vst.msk [vmem:[#allocation5 + $0x20] sm:$0xff] %vm5946_vm13, %v6381_v2 }
 0x693   : > { %8677 = vmatmul.msk.f32.gmra.mxu3 %vm635_vm0, %v11655_v3  ;;  %8659 = vmatmul.msk.f32.gmra.mxu2 %vm635_vm0, %v11697_v51  ;;  %v7567_v3 = vld [vmem:[%s12750_s3 + $0x228] sm:$0xff] }
 0x694   : > { %7640 = vmatpush.msra.mxu3 %v7567_v3 }
 0x695   : > { %v6138_v27 = vld [vmem:[#allocation5 + $0x30] sm:$0xff]  ;;  %v5907_v38 = vpop.f32.mrf.mxu1 }
 0x696   : > { %v6312_v41 = vpop.f32.mrf.mxu3  ;;  %v6158_v62 = vadd.f32 %v6138_v27, %v6090_v20  ;;  %5954 = vst.msk [vmem:[#allocation5 + $0x38] sm:$0xff] %vm5946_vm13, %v5907_v38  ;;  %v6093_v43 = vpop.f32.mrf.mxu2  ;;  %v7566_v20 = vld [vmem:[%s12750_s3 + $0x220] sm:$0xff] }
 0x697   : > { %v6362_v10 = vld [vmem:[#allocation5 + $0x28] sm:$0xff]  ;;  %7641 = vmatpush.msra.mxu3 %v7566_v20 }
 0x698   : > { %6178 = vst.msk [vmem:[#allocation5 + $0x30] sm:$0xff] %vm5946_vm13, %v6158_v62  ;;  %v6382_v25 = vadd.f32 %v6362_v10, %v6312_v41  ;;  %8639 = vmatmul.msk.f32.gmra.mxu1 %vm635_vm0, %v11709_v14  ;;  %v6132_v20 = vld [vmem:[#allocation5] sm:$0xff] }
 0x69a   : > { %6402 = vst.msk [vmem:[#allocation5 + $0x28] sm:$0xff] %vm5946_vm13, %v6382_v25 }
 0x69b   : > { %8678 = vmatmul.msk.f32.gmra.mxu3 %vm635_vm0, %v11718_v1  ;;  %8660 = vmatmul.msk.f32.gmra.mxu2 %vm635_vm0, %v11735_v19  ;;  %v7116_v1 = vld [vmem:[%s12750_s3 + $0x1a0] sm:$0xff] }
 0x69c   : > { %7191 = vmatpush.msra.mxu1 %v7116_v1 }
 0x69d   : > { %v6139_v48 = vld [vmem:[#allocation5 + $0x38] sm:$0xff]  ;;  %v5910_v24 = vpop.f32.mrf.mxu1 }
 0x69e   : > { %v6315_v45 = vpop.f32.mrf.mxu3  ;;  %v6159_v61 = vadd.f32 %v6139_v48, %v6093_v43  ;;  %5955 = vst.msk [vmem:[#allocation5 + $0x40] sm:$0xff] %vm5946_vm13, %v5910_v24  ;;  %v6096_v57 = vpop.f32.mrf.mxu2 }
 0x69f   : > { %v6363_v14 = vld [vmem:[#allocation5 + $0x30] sm:$0xff] }
 0x6a0   : > { %6179 = vst.msk [vmem:[#allocation5 + $0x38] sm:$0xff] %vm5946_vm13, %v6159_v61  ;;  %v6383_v51 = vadd.f32 %v6363_v14, %v6315_v45  ;;  %8640 = vmatmul.msk.f32.gmra.mxu1 %vm635_vm0, %v11733_v42 }
 0x6a2   : > { %6403 = vst.msk [vmem:[#allocation5 + $0x30] sm:$0xff] %vm5946_vm13, %v6383_v51 }
 0x6a3   : > { %8679 = vmatmul.msk.f32.gmra.mxu3 %vm635_vm0, %v11741_v49  ;;  %8661 = vmatmul.msk.f32.gmra.mxu2 %vm635_vm0, %v11748_v52 }
 0x6a5   : > { %v6140_v6 = vld [vmem:[#allocation5 + $0x40] sm:$0xff]  ;;  %v5913_v2 = vpop.f32.mrf.mxu1 }
 0x6a6   : > { %v6318_v42 = vpop.f32.mrf.mxu3  ;;  %v6160_v19 = vadd.f32 %v6140_v6, %v6096_v57  ;;  %5956 = vst.msk [vmem:[#allocation5 + $0x48] sm:$0xff] %vm5946_vm13, %v5913_v2  ;;  %v6099_v41 = vpop.f32.mrf.mxu2 }
 0x6a7   : > { %v6364_v49 = vld [vmem:[#allocation5 + $0x38] sm:$0xff] }
 0x6a8   : > { %6180 = vst.msk [vmem:[#allocation5 + $0x40] sm:$0xff] %vm5946_vm13, %v6160_v19  ;;  %v6384_v40 = vadd.f32 %v6364_v49, %v6318_v42  ;;  %8641 = vmatmul.msk.f32.gmra.mxu1 %vm635_vm0, %v11750_v44  ;;  %v7114_v19 = vld [vmem:[%s12750_s3 + $0x190] sm:$0xff] }
 0x6a9   : > { %v7339_v49 = vld [vmem:[%s12750_s3 + $0x1d0] sm:$0xff] }
 0x6aa   : > { %6404 = vst.msk [vmem:[#allocation5 + $0x38] sm:$0xff] %vm5946_vm13, %v6384_v40  ;;  %v6072_v40 = vpop.f32.mrf.mxu0 }
 0x6ab   : > { %8680 = vmatmul.msk.f32.gmra.mxu3 %vm635_vm0, %v11756_v32  ;;  %8662 = vmatmul.msk.f32.gmra.mxu2 %vm635_vm0, %v11765_v58  ;;  %v7115_v32 = vld [vmem:[%s12750_s3 + $0x198] sm:$0xff] }
 0x6ac   : > { %7192 = vmatpush.msra.mxu1 %v7115_v32 }
 0x6ad   : > { %v6141_v38 = vld [vmem:[#allocation5 + $0x48] sm:$0xff]  ;;  %v5916_v62 = vpop.f32.mrf.mxu1 }
 0x6ae   : > { %v6321_v27 = vpop.f32.mrf.mxu3  ;;  %v6161_v10 = vadd.f32 %v6141_v38, %v6099_v41  ;;  %5957 = vst.msk [vmem:[#allocation5 + $0x50] sm:$0xff] %vm5946_vm13, %v5916_v62  ;;  %v6102_v25 = vpop.f32.mrf.mxu2  ;;  %7193 = vmatpush.msra.mxu1 %v7114_v19  ;;  %v7112_v19 = vld [vmem:[%s12750_s3 + $0x180] sm:$0xff] }
 0x6af   : > { %v6365_v44 = vld [vmem:[#allocation5 + $0x40] sm:$0xff] }
 0x6b0   : > { %6181 = vst.msk [vmem:[#allocation5 + $0x48] sm:$0xff] %vm5946_vm13, %v6161_v10  ;;  %v6385_v52 = vadd.f32 %v6365_v44, %v6321_v27  ;;  %8642 = vmatmul.msk.f32.gmra.mxu1 %vm635_vm0, %v11763_v54  ;;  %v7564_v44 = vld [vmem:[%s12750_s3 + $0x210] sm:$0xff] }
 0x6b2   : > { %6405 = vst.msk [vmem:[#allocation5 + $0x40] sm:$0xff] %vm5946_vm13, %v6385_v52 }
 0x6b3   : > { %8681 = vmatmul.msk.f32.gmra.mxu3 %vm635_vm0, %v11771_v12  ;;  %8663 = vmatmul.msk.f32.gmra.mxu2 %vm635_vm0, %v11781_v56  ;;  %v7340_v12 = vld [vmem:[%s12750_s3 + $0x1d8] sm:$0xff] }
 0x6b4   : > { %7417 = vmatpush.msra.mxu2 %v7340_v12 }
 0x6b5   : > { %v6142_v43 = vld [vmem:[#allocation5 + $0x50] sm:$0xff]  ;;  %v5919_v45 = vpop.f32.mrf.mxu1 }
 0x6b6   : > { %v6324_v3 = vpop.f32.mrf.mxu3  ;;  %v6162_v48 = vadd.f32 %v6142_v43, %v6102_v25  ;;  %5958 = vst.msk [vmem:[#allocation5 + $0x58] sm:$0xff] %vm5946_vm13, %v5919_v45  ;;  %v6105_v24 = vpop.f32.mrf.mxu2  ;;  %7418 = vmatpush.msra.mxu2 %v7339_v49 }
 0x6b7   : > { %v6366_v54 = vld [vmem:[#allocation5 + $0x48] sm:$0xff] }
 0x6b8   : > { %6182 = vst.msk [vmem:[#allocation5 + $0x50] sm:$0xff] %vm5946_vm13, %v6162_v48  ;;  %v6386_v58 = vadd.f32 %v6366_v54, %v6324_v3  ;;  %8643 = vmatmul.msk.f32.gmra.mxu1 %vm635_vm0, %v11783_v46  ;;  %v7113_v54 = vld [vmem:[%s12750_s3 + $0x188] sm:$0xff] }
 0x6b9   : > { %7194 = vmatpush.msra.mxu1 %v7113_v54 }
 0x6ba   : > { %6406 = vst.msk [vmem:[#allocation5 + $0x48] sm:$0xff] %vm5946_vm13, %v6386_v58 }
 0x6bb   : > { %8682 = vmatmul.msk.f32.gmra.mxu3 %vm635_vm0, %v11789_v17  ;;  %8664 = vmatmul.msk.f32.gmra.mxu2 %vm635_vm0, %v11798_v13  ;;  %v7565_v17 = vld [vmem:[%s12750_s3 + $0x218] sm:$0xff] }
 0x6bc   : > { %7642 = vmatpush.msra.mxu3 %v7565_v17  ;;  %7195 = vmatpush.msra.mxu1 %v7112_v19 }
 0x6bd   : > { %v6143_v14 = vld [vmem:[#allocation5 + $0x58] sm:$0xff]  ;;  %v5922_v51 = vpop.f32.mrf.mxu1 }
 0x6be   : > { %v6327_v61 = vpop.f32.mrf.mxu3  ;;  %v6163_v1 = vadd.f32 %v6143_v14, %v6105_v24  ;;  %5959 = vst.msk [vmem:[#allocation5 + $0x60] sm:$0xff] %vm5946_vm13, %v5922_v51  ;;  %v6108_v57 = vpop.f32.mrf.mxu2  ;;  %7643 = vmatpush.msra.mxu3 %v7564_v44  ;;  %v7338_v14 = vld [vmem:[%s12750_s3 + $0x1c8] sm:$0xff] }
 0x6bf   : > { %v6367_v46 = vld [vmem:[#allocation5 + $0x50] sm:$0xff]  ;;  %7419 = vmatpush.msra.mxu2 %v7338_v14  ;;  %v6583_v44 = vld [vmem:[#allocation5 + $0x8] sm:$0xff] }
 0x6c0   : > { %6183 = vst.msk [vmem:[#allocation5 + $0x58] sm:$0xff] %vm5946_vm13, %v6163_v1  ;;  %v6387_v56 = vadd.f32 %v6367_v46, %v6327_v61  ;;  %8644 = vmatmul.msk.f32.gmra.mxu1 %vm635_vm0, %v11796_v60  ;;  %7644 = vmatpush.msra.mxu3 %v7563_v4 }
 0x6c2   : > { %6407 = vst.msk [vmem:[#allocation5 + $0x50] sm:$0xff] %vm5946_vm13, %v6387_v56 }
 0x6c3   : > { %8683 = vmatmul.msk.f32.gmra.mxu3 %vm635_vm0, %v11804_v34  ;;  %8665 = vmatmul.msk.f32.gmra.mxu2 %vm635_vm0, %v11811_v0 }
 0x6c5   : > { %v6144_v6 = vld [vmem:[#allocation5 + $0x60] sm:$0xff]  ;;  %v5925_v60 = vpop.f32.mrf.mxu1 }
 0x6c6   : > { %v6330_v42 = vpop.f32.mrf.mxu3  ;;  %v6164_v2 = vadd.f32 %v6144_v6, %v6108_v57  ;;  %5960 = vst.msk [vmem:[#allocation5 + $0x68] sm:$0xff] %vm5946_vm13, %v5925_v60  ;;  %v6111_v41 = vpop.f32.mrf.mxu2 }
 0x6c7   : > { %v6368_v13 = vld [vmem:[#allocation5 + $0x58] sm:$0xff] }
 0x6c8   : > { %6184 = vst.msk [vmem:[#allocation5 + $0x60] sm:$0xff] %vm5946_vm13, %v6164_v2  ;;  %v6388_v34 = vadd.f32 %v6368_v13, %v6330_v42  ;;  %8645 = vmatmul.msk.f32.gmra.mxu1 %vm635_vm0, %v11813_v33  ;;  %v6152_v33 = vadd.f32 %v6132_v20, %v6072_v40 }
 0x6ca   : > { %6408 = vst.msk [vmem:[#allocation5 + $0x58] sm:$0xff] %vm5946_vm13, %v6388_v34 }
 0x6cb   : > { %8684 = vmatmul.msk.f32.gmra.mxu3 %vm635_vm0, %v11819_v59  ;;  %6172 = vst.msk [vmem:[#allocation5] sm:$0xff] %vm5946_vm13, %v6152_v33  ;;  %8666 = vmatmul.msk.f32.gmra.mxu2 %vm635_vm0, %v11831_v5 }
 0x6cd   : > { %v6145_v27 = vld [vmem:[#allocation5 + $0x68] sm:$0xff]  ;;  %v5928_v38 = vpop.f32.mrf.mxu1 }
 0x6ce   : > { %v6333_v0 = vpop.f32.mrf.mxu3  ;;  %v6165_v59 = vadd.f32 %v6145_v27, %v6111_v41  ;;  %5961 = vst.msk [vmem:[#allocation5 + $0x70] sm:$0xff] %vm5946_vm13, %v5928_v38  ;;  %v6114_v52 = vpop.f32.mrf.mxu2  ;;  %v7562_v27 = vld [vmem:[%s12750_s3 + $0x200] sm:$0xff] }
 0x6cf   : > { %v6369_v62 = vld [vmem:[#allocation5 + $0x60] sm:$0xff]  ;;  %7645 = vmatpush.msra.mxu3 %v7562_v27  ;;  %v6588_v27 = vld [vmem:[#allocation5 + $0x30] sm:$0xff] }
 0x6d0   : > { %6185 = vst.msk [vmem:[#allocation5 + $0x68] sm:$0xff] %vm5946_vm13, %v6165_v59  ;;  %v6389_v10 = vadd.f32 %v6369_v62, %v6333_v0  ;;  %8646 = vmatmul.msk.f32.gmra.mxu1 %vm635_vm0, %v11829_v29 }
 0x6d2   : > { %6409 = vst.msk [vmem:[#allocation5 + $0x60] sm:$0xff] %vm5946_vm13, %v6389_v10  ;;  %v6357_v45 = vld [vmem:[#allocation5] sm:$0xff] }
 0x6d3   : > { %8685 = vmatmul.msk.f32.gmra.mxu3 %vm635_vm0, %v11837_v23  ;;  %8667 = vmatmul.msk.f32.gmra.mxu2 %vm635_vm0, %v11850_v21  ;;  %v6297_v23 = vpop.f32.mrf.mxu0 }
 0x6d4   : > { %v6377_v48 = vadd.f32 %v6357_v45, %v6297_v23  ;;  %v12218_v23 = vld [vmem:[#allocation4 + $0xa1] sm:$0xff] }
 0x6d5   : > { %v6146_v25 = vld [vmem:[#allocation5 + $0x70] sm:$0xff]  ;;  %v5931_v3 = vpop.f32.mrf.mxu1 }
 0x6d6   : > { %v6336_v32 = vpop.f32.mrf.mxu3  ;;  %v6166_v43 = vadd.f32 %v6146_v25, %v6114_v52  ;;  %5962 = vst.msk [vmem:[#allocation5 + $0x78] sm:$0xff] %vm5946_vm13, %v5931_v3  ;;  %v6117_v58 = vpop.f32.mrf.mxu2 }
 0x6d7   : > { %v6370_v29 = vld [vmem:[#allocation5 + $0x68] sm:$0xff]  ;;  %6397 = vst.msk [vmem:[#allocation5] sm:$0xff] %vm5946_vm13, %v6377_v48 }
 0x6d8   : > { %6186 = vst.msk [vmem:[#allocation5 + $0x70] sm:$0xff] %vm5946_vm13, %v6166_v43  ;;  %v6390_v5 = vadd.f32 %v6370_v29, %v6336_v32  ;;  %8647 = vmatmul.msk.f32.gmra.mxu1 %vm635_vm0, %v11857_v35  ;;  %v6584_v29 = vld [vmem:[#allocation5 + $0x10] sm:$0xff] }
 0x6da   : > { %6410 = vst.msk [vmem:[#allocation5 + $0x68] sm:$0xff] %vm5946_vm13, %v6390_v5  ;;  %v12216_v5 = vld [vmem:[#allocation4 + $0xa0] sm:$0xff] }
 0x6db   : > { %8686 = vmatmul.msk.f32.gmra.mxu3 %vm635_vm0, %v11866_v30  ;;  %8668 = vmatmul.msk.f32.gmra.mxu2 %vm635_vm0, %v11889_v50 }
 0x6dd   : > { %v6147_v12 = vld [vmem:[#allocation5 + $0x78] sm:$0xff]  ;;  %v5934_v24 = vpop.f32.mrf.mxu1 }
 0x6de   : > { %v6339_v35 = vpop.f32.mrf.mxu3  ;;  %v6167_v21 = vadd.f32 %v6147_v12, %v6117_v58  ;;  %5963 = vst.msk [vmem:[#allocation5 + $0x80] sm:$0xff] %vm5946_vm13, %v5934_v24  ;;  %v6120_v51 = vpop.f32.mrf.mxu2  ;;  %v6582_v20 = vld [vmem:[#allocation5] sm:$0xff]  ;;  %v6585_v12 = vld [vmem:[#allocation5 + $0x18] sm:$0xff] }
 0x6df   : > { %v6371_v61 = vld [vmem:[#allocation5 + $0x70] sm:$0xff]  ;;  %v12229_v24 = vld [vmem:[#allocation4 + $0xa8] sm:$0xff] }
 0x6e0   : > { %6187 = vst.msk [vmem:[#allocation5 + $0x78] sm:$0xff] %vm5946_vm13, %v6167_v21  ;;  %v6391_v30 = vadd.f32 %v6371_v61, %v6339_v35  ;;  %8648 = vmatmul.msk.f32.gmra.mxu1 %vm635_vm0, %v11887_v18  ;;  %v12231_v21 = vld [vmem:[#allocation4 + $0xa9] sm:$0xff] }
 0x6e2   : > { %6411 = vst.msk [vmem:[#allocation5 + $0x70] sm:$0xff] %vm5946_vm13, %v6391_v30  ;;  %v12233_v30 = vld [vmem:[#allocation4 + $0xa2] sm:$0xff] }
 0x6e3   : > { %8687 = vmatmul.msk.f32.gmra.mxu3 %vm635_vm0, %v11898_v36  ;;  %8669 = vmatmul.msk.f32.gmra.mxu2 %vm635_vm0, %v11908_v31 }
 0x6e5   : > { %v6148_v46 = vld [vmem:[#allocation5 + $0x80] sm:$0xff]  ;;  %v5937_v56 = vpop.f32.mrf.mxu1 }
 0x6e6   : > { %v6342_v1 = vpop.f32.mrf.mxu3  ;;  %v6168_v17 = vadd.f32 %v6148_v46, %v6120_v51  ;;  %5964 = vst.msk [vmem:[#allocation5 + $0x88] sm:$0xff] %vm5946_vm13, %v5937_v56  ;;  %v6123_v36 = vpop.f32.mrf.mxu2 }
 0x6e7   : > { %v6372_v18 = vld [vmem:[#allocation5 + $0x78] sm:$0xff] }
 0x6e8   : > { %6188 = vst.msk [vmem:[#allocation5 + $0x80] sm:$0xff] %vm5946_vm13, %v6168_v17  ;;  %v6392_v50 = vadd.f32 %v6372_v18, %v6342_v1  ;;  %8649 = vmatmul.msk.f32.gmra.mxu1 %vm635_vm0, %v11910_v37  ;;  %v6586_v18 = vld [vmem:[#allocation5 + $0x20] sm:$0xff] }
 0x6ea   : > { %6412 = vst.msk [vmem:[#allocation5 + $0x78] sm:$0xff] %vm5946_vm13, %v6392_v50 }
 0x6eb   : > { %8688 = vmatmul.msk.f32.gmra.mxu3 %vm635_vm0, %v11916_v28  ;;  %8670 = vmatmul.msk.f32.gmra.mxu2 %vm635_vm0, %v11924_v53 }
 0x6ed   : > { %v6149_v42 = vld [vmem:[#allocation5 + $0x88] sm:$0xff]  ;;  %v5940_v6 = vpop.f32.mrf.mxu1 }
 0x6ee   : > { %v6345_v57 = vpop.f32.mrf.mxu3  ;;  %v6169_v60 = vadd.f32 %v6149_v42, %v6123_v36  ;;  %5965 = vst.msk [vmem:[#allocation5 + $0x90] sm:$0xff] %vm5946_vm13, %v5940_v6  ;;  %v6126_v28 = vpop.f32.mrf.mxu2  ;;  %v12244_v36 = vld [vmem:[#allocation4 + $0xaa] sm:$0xff]  ;;  %v7317_v42 = vld [vmem:[#allocation4 + $0x21] sm:$0xff] }
 0x6ef   : > { %v6373_v37 = vld [vmem:[#allocation5 + $0x80] sm:$0xff] }
 0x6f0   : > { %6189 = vst.msk [vmem:[#allocation5 + $0x88] sm:$0xff] %vm5946_vm13, %v6169_v60  ;;  %v6393_v31 = vadd.f32 %v6373_v37, %v6345_v57  ;;  %8650 = vmatmul.msk.f32.gmra.mxu1 %vm635_vm0, %v11922_v22  ;;  %v7337_v22 = vld [vmem:[%s12750_s3 + $0x1c0] sm:$0xff]  ;;  %v7092_v57 = vld [vmem:[#allocation4 + $0x20] sm:$0xff] }
 0x6f1   : > { %7420 = vmatpush.msra.mxu2 %v7337_v22  ;;  %v7093_v22 = vld [vmem:[#allocation4 + $0x28] sm:$0xff] }
 0x6f2   : > { %6413 = vst.msk [vmem:[#allocation5 + $0x80] sm:$0xff] %vm5946_vm13, %v6393_v31 }
 0x6f3   : > { %8689 = vmatmul.msk.f32.gmra.mxu3 %vm635_vm0, %v11930_v7  ;;  %8671 = vmatmul.msk.f32.gmra.mxu2 %vm635_vm0, %v11940_v47 }
 0x6f5   : > { %v6150_v13 = vld [vmem:[#allocation5 + $0x90] sm:$0xff]  ;;  %v5943_v34 = vpop.f32.mrf.mxu1 }
 0x6f6   : > { %v6348_v2 = vpop.f32.mrf.mxu3  ;;  %v6170_v49 = vadd.f32 %v6150_v13, %v6126_v28  ;;  %5966 = vst.msk [vmem:[#allocation5 + $0x98] sm:$0xff] %vm5946_vm13, %v5943_v34  ;;  %v6129_v40 = vpop.f32.mrf.mxu2  ;;  %v6587_v13 = vld [vmem:[#allocation5 + $0x28] sm:$0xff] }
 0x6f7   : > { %v6374_v53 = vld [vmem:[#allocation5 + $0x88] sm:$0xff] }
 0x6f8   : > { %6190 = vst.msk [vmem:[#allocation5 + $0x90] sm:$0xff] %vm5946_vm13, %v6170_v49  ;;  %v6394_v7 = vadd.f32 %v6374_v53, %v6348_v2  ;;  %8651 = vmatmul.msk.f32.gmra.mxu1 %vm635_vm0, %v11942_v15  ;;  %v7318_v34 = vld [vmem:[#allocation4 + $0x29] sm:$0xff] }
 0x6fa   : > { %6414 = vst.msk [vmem:[#allocation5 + $0x88] sm:$0xff] %vm5946_vm13, %v6394_v7  ;;  %v7542_v7 = vld [vmem:[#allocation4 + $0x22] sm:$0xff] }
 0x6fb   : > { %8690 = vmatmul.msk.f32.gmra.mxu3 %vm635_vm0, %v11948_v63  ;;  %8672 = vmatmul.msk.f32.gmra.mxu2 %vm635_vm0, %v11957_v8 }
 0x6fd   : > { %v6151_v33 = vld [vmem:[#allocation5 + $0x98] sm:$0xff]  ;;  %v6522_v0 = vpop.f32.mrf.mxu1 }
 0x6fe   : > { %v6351_v41 = vpop.f32.mrf.mxu3  ;;  %v6171_v38 = vadd.f32 %v6151_v33, %v6129_v40  ;;  %v6602_v59 = vadd.f32 %v6582_v20, %v6522_v0  ;;  %v6747_v63 = vpop.f32.mrf.mxu2 }
 0x6ff   : > { %v6375_v15 = vld [vmem:[#allocation5 + $0x90] sm:$0xff] }
 0x700   : > { %6191 = vst.msk [vmem:[#allocation5 + $0x98] sm:$0xff] %vm5946_vm13, %v6171_v38  ;;  %v6395_v47 = vadd.f32 %v6375_v15, %v6351_v41  ;;  %8652 = vmatmul.msk.f32.gmra.mxu1 %vm635_vm0, %v11955_v16  ;;  %v7094_v15 = vld [vmem:[#allocation4 + $0x30] sm:$0xff] }
 0x701   : > { %6622 = vst.msk [vmem:[#allocation5] sm:$0xff] %vm5946_vm13, %v6602_v59 }
 0x702   : > { %6415 = vst.msk [vmem:[#allocation5 + $0x90] sm:$0xff] %vm5946_vm13, %v6395_v47  ;;  %v7319_v47 = vld [vmem:[#allocation4 + $0x31] sm:$0xff] }
 0x703   : > { %8691 = vmatmul.msk.f32.gmra.mxu3 %vm635_vm0, %v11960_v26  ;;  %8673 = vmatmul.msk.f32.gmra.mxu2 %vm635_vm0, %v11973_v55 }
 0x705   : > { %v6525_v10 = vpop.f32.mrf.mxu1 }
 0x706   : > { %v6354_v62 = vpop.f32.mrf.mxu3  ;;  %v6603_v52 = vadd.f32 %v6583_v44, %v6525_v10  ;;  %v6750_v8 = vpop.f32.mrf.mxu2 }
 0x707   : > { %v6376_v32 = vld [vmem:[#allocation5 + $0x98] sm:$0xff] }
 0x708   : > { %v6396_v25 = vadd.f32 %v6376_v32, %v6354_v62  ;;  %v6807_v3 = vld [vmem:[#allocation5] sm:$0xff]  ;;  %6623 = vst.msk [vmem:[#allocation5 + $0x8] sm:$0xff] %vm5946_vm13, %v6603_v52  ;;  %8653 = vmatmul.msk.f32.gmra.mxu1 %vm635_vm0, %v11971_v11 }
 0x709   : > { %v6827_v16 = vadd.f32 %v6807_v3, %v6747_v63  ;;  %v7543_v62 = vld [vmem:[#allocation4 + $0x2a] sm:$0xff]  ;;  %v6589_v3 = vld [vmem:[#allocation5 + $0x38] sm:$0xff] }
 0x70a   : > { %6416 = vst.msk [vmem:[#allocation5 + $0x98] sm:$0xff] %vm5946_vm13, %v6396_v25 }
 0x70b   : > { %8692 = vmatmul.msk.f32.gmra.mxu3 %vm635_vm0, %v11976_v39  ;;  %6847 = vst.msk [vmem:[#allocation5] sm:$0xff] %vm5946_vm13, %v6827_v16  ;;  %8674 = vmatmul.msk.f32.gmra.mxu2 %vm635_vm0, %v12218_v23  ;;  %v7320_v16 = vld [vmem:[#allocation4 + $0x39] sm:$0xff] }
 0x70d   : > { %v6528_v43 = vpop.f32.mrf.mxu1 }
 0x70e   : > { %v6972_v26 = vpop.f32.mrf.mxu3  ;;  %v6604_v11 = vadd.f32 %v6584_v29, %v6528_v43  ;;  %v6753_v54 = vpop.f32.mrf.mxu2  ;;  %v7095_v43 = vld [vmem:[#allocation4 + $0x38] sm:$0xff] }
 0x70f   : > { %v6808_v45 = vld [vmem:[#allocation5 + $0x8] sm:$0xff] }
 0x710   : > { %v6828_v48 = vadd.f32 %v6808_v45, %v6750_v8  ;;  %6624 = vst.msk [vmem:[#allocation5 + $0x10] sm:$0xff] %vm5946_vm13, %v6604_v11  ;;  %8654 = vmatmul.msk.f32.gmra.mxu1 %vm635_vm0, %v12216_v5  ;;  %v7544_v11 = vld [vmem:[#allocation4 + $0x32] sm:$0xff] }
 0x712   : > { %6848 = vst.msk [vmem:[#allocation5 + $0x8] sm:$0xff] %vm5946_vm13, %v6828_v48  ;;  %v7032_v55 = vld [vmem:[#allocation5] sm:$0xff] }
 0x713   : > { %8693 = vmatmul.msk.f32.gmra.mxu3 %vm635_vm0, %v11993_v9  ;;  %v7052_v39 = vadd.f32 %v7032_v55, %v6972_v26  ;;  %8675 = vmatmul.msk.f32.gmra.mxu2 %vm635_vm0, %v12231_v21 }
 0x715   : > { %7072 = vst.msk [vmem:[#allocation5] sm:$0xff] %vm5946_vm13, %v7052_v39  ;;  %v6531_v35 = vpop.f32.mrf.mxu1 }
 0x716   : > { %v6975_v58 = vpop.f32.mrf.mxu3  ;;  %v6605_v61 = vadd.f32 %v6585_v12, %v6531_v35  ;;  %v6756_v46 = vpop.f32.mrf.mxu2 }
 0x717   : > { %v6809_v14 = vld [vmem:[#allocation5 + $0x10] sm:$0xff] }
 0x718   : > { %v6829_v51 = vadd.f32 %v6809_v14, %v6753_v54  ;;  %6625 = vst.msk [vmem:[#allocation5 + $0x18] sm:$0xff] %vm5946_vm13, %v6605_v61  ;;  %8655 = vmatmul.msk.f32.gmra.mxu1 %vm635_vm0, %v12229_v24  ;;  %v7096_v61 = vld [vmem:[#allocation4 + $0x40] sm:$0xff] }
 0x719   : > { %v7033_v9 = vld [vmem:[#allocation5 + $0x8] sm:$0xff]  ;;  %v7321_v14 = vld [vmem:[#allocation4 + $0x41] sm:$0xff] }
 0x71a   : > { %6849 = vst.msk [vmem:[#allocation5 + $0x10] sm:$0xff] %vm5946_vm13, %v6829_v51  ;;  %v7053_v1 = vadd.f32 %v7033_v9, %v6975_v58  ;;  %v6590_v58 = vld [vmem:[#allocation5 + $0x40] sm:$0xff]  ;;  %v7545_v9 = vld [vmem:[#allocation4 + $0x3a] sm:$0xff] }
 0x71b   : > { %8694 = vmatmul.msk.f32.gmra.mxu3 %vm635_vm0, %v12233_v30  ;;  %8716 = vmatmul.msk.f32.vlgmr.msra.gmra.mxu2 %vm635_vm0, %v7317_v42 }
 0x71c   : > { %7073 = vst.msk [vmem:[#allocation5 + $0x8] sm:$0xff] %vm5946_vm13, %v7053_v1 }
 0x71d   : > { %v6534_v17 = vpop.f32.mrf.mxu1 }
 0x71e   : > { %v6978_v56 = vpop.f32.mrf.mxu3  ;;  %v6606_v50 = vadd.f32 %v6586_v18, %v6534_v17  ;;  %v6759_v31 = vpop.f32.mrf.mxu2 }
 0x71f   : > { %v6810_v4 = vld [vmem:[#allocation5 + $0x18] sm:$0xff] }
 0x720   : > { %v6830_v6 = vadd.f32 %v6810_v4, %v6756_v46  ;;  %6626 = vst.msk [vmem:[#allocation5 + $0x20] sm:$0xff] %vm5946_vm13, %v6606_v50  ;;  %8696 = vmatmul.msk.f32.vlgmr.msra.gmra.mxu1 %vm635_vm0, %v7092_v57  ;;  %v6591_v50 = vld [vmem:[#allocation5 + $0x48] sm:$0xff] }
 0x721   : > { %v7034_v60 = vld [vmem:[#allocation5 + $0x10] sm:$0xff]  ;;  %v7322_v4 = vld [vmem:[#allocation4 + $0x49] sm:$0xff] }
 0x722   : > { %6850 = vst.msk [vmem:[#allocation5 + $0x18] sm:$0xff] %vm5946_vm13, %v6830_v6  ;;  %v7054_v37 = vadd.f32 %v7034_v60, %v6978_v56  ;;  %v7097_v6 = vld [vmem:[#allocation4 + $0x48] sm:$0xff] }
 0x723   : > { %8695 = vmatmul.msk.f32.gmra.mxu3 %vm635_vm0, %v12244_v36  ;;  %8717 = vmatmul.msk.f32.gmra.mxu2 %vm635_vm0, %v7318_v34 }
 0x724   : > { %7074 = vst.msk [vmem:[#allocation5 + $0x10] sm:$0xff] %vm5946_vm13, %v7054_v37  ;;  %v7546_v37 = vld [vmem:[#allocation4 + $0x42] sm:$0xff] }
 0x725   : > { %v6537_v2 = vpop.f32.mrf.mxu1 }
 0x726   : > { %v6981_v28 = vpop.f32.mrf.mxu3  ;;  %v6607_v19 = vadd.f32 %v6587_v13, %v6537_v2  ;;  %v6762_v41 = vpop.f32.mrf.mxu2 }
 0x727   : > { %v6811_v49 = vld [vmem:[#allocation5 + $0x20] sm:$0xff] }
 0x728   : > { %v6831_v53 = vadd.f32 %v6811_v49, %v6759_v31  ;;  %6627 = vst.msk [vmem:[#allocation5 + $0x28] sm:$0xff] %vm5946_vm13, %v6607_v19  ;;  %8697 = vmatmul.msk.f32.gmra.mxu1 %vm635_vm0, %v7093_v22  ;;  %v6592_v19 = vld [vmem:[#allocation5 + $0x50] sm:$0xff] }
 0x729   : > { %v7035_v40 = vld [vmem:[#allocation5 + $0x18] sm:$0xff] }
 0x72a   : > { %6851 = vst.msk [vmem:[#allocation5 + $0x20] sm:$0xff] %vm5946_vm13, %v6831_v53  ;;  %v7055_v20 = vadd.f32 %v7035_v40, %v6981_v28  ;;  %v7098_v53 = vld [vmem:[#allocation4 + $0x50] sm:$0xff] }
 0x72b   : > { %8736 = vmatmul.msk.f32.vlgmr.msra.gmra.mxu3 %vm635_vm0, %v7542_v7  ;;  %8718 = vmatmul.msk.f32.gmra.mxu2 %vm635_vm0, %v7319_v47  ;;  %v7323_v7 = vld [vmem:[#allocation4 + $0x51] sm:$0xff] }
 0x72c   : > { %7075 = vst.msk [vmem:[#allocation5 + $0x18] sm:$0xff] %vm5946_vm13, %v7055_v20  ;;  %v7547_v20 = vld [vmem:[#allocation4 + $0x4a] sm:$0xff] }
 0x72d   : > { %v6540_v0 = vpop.f32.mrf.mxu1 }
 0x72e   : > { %v6984_v33 = vpop.f32.mrf.mxu3  ;;  %v6608_v38 = vadd.f32 %v6588_v27, %v6540_v0  ;;  %v6765_v52 = vpop.f32.mrf.mxu2 }
 0x72f   : > { %v6812_v59 = vld [vmem:[#allocation5 + $0x28] sm:$0xff] }
 0x730   : > { %v6832_v63 = vadd.f32 %v6812_v59, %v6762_v41  ;;  %6628 = vst.msk [vmem:[#allocation5 + $0x30] sm:$0xff] %vm5946_vm13, %v6608_v38  ;;  %8698 = vmatmul.msk.f32.gmra.mxu1 %vm635_vm0, %v7094_v15  ;;  %v6593_v59 = vld [vmem:[#allocation5 + $0x58] sm:$0xff] }
 0x731   : > { %v7036_v10 = vld [vmem:[#allocation5 + $0x20] sm:$0xff]  ;;  %v7324_v15 = vld [vmem:[#allocation4 + $0x59] sm:$0xff] }
 0x732   : > { %6852 = vst.msk [vmem:[#allocation5 + $0x28] sm:$0xff] %vm5946_vm13, %v6832_v63  ;;  %v7056_v44 = vadd.f32 %v7036_v10, %v6984_v33 }
 0x733   : > { %8737 = vmatmul.msk.f32.gmra.mxu3 %vm635_vm0, %v7543_v62  ;;  %8719 = vmatmul.msk.f32.gmra.mxu2 %vm635_vm0, %v7320_v16  ;;  %v7099_v62 = vld [vmem:[#allocation4 + $0x58] sm:$0xff] }
 0x734   : > { %7076 = vst.msk [vmem:[#allocation5 + $0x20] sm:$0xff] %vm5946_vm13, %v7056_v44  ;;  %v7548_v44 = vld [vmem:[#allocation4 + $0x52] sm:$0xff] }
 0x735   : > { %v6543_v25 = vpop.f32.mrf.mxu1 }
 0x736   : > { %v6987_v32 = vpop.f32.mrf.mxu3  ;;  %v6609_v8 = vadd.f32 %v6589_v3, %v6543_v25  ;;  %v6768_v55 = vpop.f32.mrf.mxu2 }
 0x737   : > { %v6813_v26 = vld [vmem:[#allocation5 + $0x30] sm:$0xff] }
 0x738   : > { %v6833_v29 = vadd.f32 %v6813_v26, %v6765_v52  ;;  %6629 = vst.msk [vmem:[#allocation5 + $0x38] sm:$0xff] %vm5946_vm13, %v6609_v8  ;;  %8699 = vmatmul.msk.f32.gmra.mxu1 %vm635_vm0, %v7095_v43  ;;  %v6594_v8 = vld [vmem:[#allocation5 + $0x60] sm:$0xff] }
 0x739   : > { %v7037_v45 = vld [vmem:[#allocation5 + $0x28] sm:$0xff] }
 0x73a   : > { %6853 = vst.msk [vmem:[#allocation5 + $0x30] sm:$0xff] %vm5946_vm13, %v6833_v29  ;;  %v7057_v48 = vadd.f32 %v7037_v45, %v6987_v32  ;;  %v7100_v29 = vld [vmem:[#allocation4 + $0x60] sm:$0xff] }
 0x73b   : > { %8738 = vmatmul.msk.f32.gmra.mxu3 %vm635_vm0, %v7544_v11  ;;  %8720 = vmatmul.msk.f32.gmra.mxu2 %vm635_vm0, %v7321_v14  ;;  %v7325_v11 = vld [vmem:[#allocation4 + $0x61] sm:$0xff] }
 0x73c   : > { %7077 = vst.msk [vmem:[#allocation5 + $0x28] sm:$0xff] %vm5946_vm13, %v7057_v48  ;;  %v7549_v48 = vld [vmem:[#allocation4 + $0x5a] sm:$0xff] }
 0x73d   : > { %v6546_v54 = vpop.f32.mrf.mxu1 }
 0x73e   : > { %v6990_v39 = vpop.f32.mrf.mxu3  ;;  %v6610_v35 = vadd.f32 %v6590_v58, %v6546_v54  ;;  %v6771_v56 = vpop.f32.mrf.mxu2 }
 0x73f   : > { %v6814_v12 = vld [vmem:[#allocation5 + $0x38] sm:$0xff] }
 0x740   : > { %v6834_v51 = vadd.f32 %v6814_v12, %v6768_v55  ;;  %6630 = vst.msk [vmem:[#allocation5 + $0x40] sm:$0xff] %vm5946_vm13, %v6610_v35  ;;  %8700 = vmatmul.msk.f32.gmra.mxu1 %vm635_vm0, %v7096_v61  ;;  %v6595_v12 = vld [vmem:[#allocation5 + $0x68] sm:$0xff] }
 0x741   : > { %v7038_v1 = vld [vmem:[#allocation5 + $0x30] sm:$0xff]  ;;  %v7326_v61 = vld [vmem:[#allocation4 + $0x69] sm:$0xff] }
 0x742   : > { %6854 = vst.msk [vmem:[#allocation5 + $0x38] sm:$0xff] %vm5946_vm13, %v6834_v51  ;;  %v7058_v46 = vadd.f32 %v7038_v1, %v6990_v39 }
 0x743   : > { %8739 = vmatmul.msk.f32.gmra.mxu3 %vm635_vm0, %v7545_v9  ;;  %8721 = vmatmul.msk.f32.gmra.mxu2 %vm635_vm0, %v7322_v4  ;;  %v7101_v9 = vld [vmem:[#allocation4 + $0x68] sm:$0xff] }
 0x744   : > { %7078 = vst.msk [vmem:[#allocation5 + $0x30] sm:$0xff] %vm5946_vm13, %v7058_v46  ;;  %v7550_v46 = vld [vmem:[#allocation4 + $0x62] sm:$0xff] }
 0x745   : > { %v6549_v18 = vpop.f32.mrf.mxu1 }
 0x746   : > { %v6993_v17 = vpop.f32.mrf.mxu3  ;;  %v6611_v57 = vadd.f32 %v6591_v50, %v6549_v18  ;;  %v6774_v2 = vpop.f32.mrf.mxu2 }
 0x747   : > { %v6815_v42 = vld [vmem:[#allocation5 + $0x40] sm:$0xff] }
 0x748   : > { %v6835_v60 = vadd.f32 %v6815_v42, %v6771_v56  ;;  %6631 = vst.msk [vmem:[#allocation5 + $0x48] sm:$0xff] %vm5946_vm13, %v6611_v57  ;;  %8701 = vmatmul.msk.f32.gmra.mxu1 %vm635_vm0, %v7097_v6  ;;  %v6596_v57 = vld [vmem:[#allocation5 + $0x70] sm:$0xff] }
 0x749   : > { %v7039_v31 = vld [vmem:[#allocation5 + $0x38] sm:$0xff] }
 0x74a   : > { %6855 = vst.msk [vmem:[#allocation5 + $0x40] sm:$0xff] %vm5946_vm13, %v6835_v60  ;;  %v7059_v28 = vadd.f32 %v7039_v31, %v6993_v17  ;;  %v7102_v60 = vld [vmem:[#allocation4 + $0x70] sm:$0xff] }
 0x74b   : > { %8740 = vmatmul.msk.f32.gmra.mxu3 %vm635_vm0, %v7546_v37  ;;  %8722 = vmatmul.msk.f32.gmra.mxu2 %vm635_vm0, %v7323_v7  ;;  %v7327_v37 = vld [vmem:[#allocation4 + $0x71] sm:$0xff] }
 0x74c   : > { %7079 = vst.msk [vmem:[#allocation5 + $0x38] sm:$0xff] %vm5946_vm13, %v7059_v28  ;;  %v7551_v28 = vld [vmem:[#allocation4 + $0x6a] sm:$0xff] }
 0x74d   : > { %v6552_v34 = vpop.f32.mrf.mxu1 }
 0x74e   : > { %v6996_v13 = vpop.f32.mrf.mxu3  ;;  %v6612_v49 = vadd.f32 %v6592_v19, %v6552_v34  ;;  %v6777_v0 = vpop.f32.mrf.mxu2 }
 0x74f   : > { %v6816_v22 = vld [vmem:[#allocation5 + $0x48] sm:$0xff] }
 0x750   : > { %v6836_v40 = vadd.f32 %v6816_v22, %v6774_v2  ;;  %6632 = vst.msk [vmem:[#allocation5 + $0x50] sm:$0xff] %vm5946_vm13, %v6612_v49  ;;  %8702 = vmatmul.msk.f32.gmra.mxu1 %vm635_vm0, %v7098_v53  ;;  %v6597_v22 = vld [vmem:[#allocation5 + $0x78] sm:$0xff] }
 0x751   : > { %v7040_v41 = vld [vmem:[#allocation5 + $0x40] sm:$0xff]  ;;  %v7328_v53 = vld [vmem:[#allocation4 + $0x79] sm:$0xff] }
 0x752   : > { %6856 = vst.msk [vmem:[#allocation5 + $0x48] sm:$0xff] %vm5946_vm13, %v6836_v40  ;;  %v7060_v33 = vadd.f32 %v7040_v41, %v6996_v13 }
 0x753   : > { %8741 = vmatmul.msk.f32.gmra.mxu3 %vm635_vm0, %v7547_v20  ;;  %8723 = vmatmul.msk.f32.gmra.mxu2 %vm635_vm0, %v7324_v15  ;;  %v7103_v20 = vld [vmem:[#allocation4 + $0x78] sm:$0xff] }
 0x754   : > { %7080 = vst.msk [vmem:[#allocation5 + $0x40] sm:$0xff] %vm5946_vm13, %v7060_v33  ;;  %v7552_v33 = vld [vmem:[#allocation4 + $0x72] sm:$0xff] }
 0x755   : > { %v6555_v38 = vpop.f32.mrf.mxu1 }
 0x756   : > { %v6999_v27 = vpop.f32.mrf.mxu3  ;;  %v6613_v47 = vadd.f32 %v6593_v59, %v6555_v38  ;;  %v6780_v25 = vpop.f32.mrf.mxu2 }
 0x757   : > { %v6817_v63 = vld [vmem:[#allocation5 + $0x50] sm:$0xff] }
 0x758   : > { %v6837_v10 = vadd.f32 %v6817_v63, %v6777_v0  ;;  %6633 = vst.msk [vmem:[#allocation5 + $0x58] sm:$0xff] %vm5946_vm13, %v6613_v47  ;;  %8703 = vmatmul.msk.f32.gmra.mxu1 %vm635_vm0, %v7099_v62  ;;  %v6598_v47 = vld [vmem:[#allocation5 + $0x80] sm:$0xff] }
 0x759   : > { %v7041_v52 = vld [vmem:[#allocation5 + $0x48] sm:$0xff] }
 0x75a   : > { %6857 = vst.msk [vmem:[#allocation5 + $0x50] sm:$0xff] %vm5946_vm13, %v6837_v10  ;;  %v7061_v32 = vadd.f32 %v7041_v52, %v6999_v27  ;;  %v7104_v10 = vld [vmem:[#allocation4 + $0x80] sm:$0xff] }
 0x75b   : > { %8742 = vmatmul.msk.f32.gmra.mxu3 %vm635_vm0, %v7548_v44  ;;  %8724 = vmatmul.msk.f32.gmra.mxu2 %vm635_vm0, %v7325_v11  ;;  %v7329_v44 = vld [vmem:[#allocation4 + $0x81] sm:$0xff] }
 0x75c   : > { %7081 = vst.msk [vmem:[#allocation5 + $0x48] sm:$0xff] %vm5946_vm13, %v7061_v32  ;;  %v7553_v32 = vld [vmem:[#allocation4 + $0x7a] sm:$0xff] }
 0x75d   : > { %v6558_v16 = vpop.f32.mrf.mxu1 }
 0x75e   : > { %v7002_v3 = vpop.f32.mrf.mxu3  ;;  %v6614_v26 = vadd.f32 %v6594_v8, %v6558_v16  ;;  %v6783_v54 = vpop.f32.mrf.mxu2 }
 0x75f   : > { %v6818_v43 = vld [vmem:[#allocation5 + $0x58] sm:$0xff] }
 0x760   : > { %v6838_v45 = vadd.f32 %v6818_v43, %v6780_v25  ;;  %6634 = vst.msk [vmem:[#allocation5 + $0x60] sm:$0xff] %vm5946_vm13, %v6614_v26  ;;  %8704 = vmatmul.msk.f32.gmra.mxu1 %vm635_vm0, %v7100_v29  ;;  %v6599_v43 = vld [vmem:[#allocation5 + $0x88] sm:$0xff] }
 0x761   : > { %v7042_v55 = vld [vmem:[#allocation5 + $0x50] sm:$0xff]  ;;  %v7330_v29 = vld [vmem:[#allocation4 + $0x89] sm:$0xff] }
 0x762   : > { %6858 = vst.msk [vmem:[#allocation5 + $0x58] sm:$0xff] %vm5946_vm13, %v6838_v45  ;;  %v7062_v39 = vadd.f32 %v7042_v55, %v7002_v3 }
 0x763   : > { %8743 = vmatmul.msk.f32.gmra.mxu3 %vm635_vm0, %v7549_v48  ;;  %8725 = vmatmul.msk.f32.gmra.mxu2 %vm635_vm0, %v7326_v61  ;;  %v7105_v48 = vld [vmem:[#allocation4 + $0x88] sm:$0xff] }
 0x764   : > { %7082 = vst.msk [vmem:[#allocation5 + $0x50] sm:$0xff] %vm5946_vm13, %v7062_v39  ;;  %v7554_v39 = vld [vmem:[#allocation4 + $0x82] sm:$0xff] }
 0x765   : > { %v6561_v35 = vpop.f32.mrf.mxu1 }
 0x766   : > { %v7005_v58 = vpop.f32.mrf.mxu3  ;;  %v6615_v14 = vadd.f32 %v6595_v12, %v6561_v35  ;;  %v6786_v18 = vpop.f32.mrf.mxu2 }
 0x767   : > { %v6819_v51 = vld [vmem:[#allocation5 + $0x60] sm:$0xff] }
 0x768   : > { %v6839_v1 = vadd.f32 %v6819_v51, %v6783_v54  ;;  %6635 = vst.msk [vmem:[#allocation5 + $0x68] sm:$0xff] %vm5946_vm13, %v6615_v14  ;;  %8705 = vmatmul.msk.f32.gmra.mxu1 %vm635_vm0, %v7101_v9  ;;  %v6600_v14 = vld [vmem:[#allocation5 + $0x90] sm:$0xff]  ;;  %v7106_v51 = vld [vmem:[#allocation4 + $0x90] sm:$0xff] }
 0x769   : > { %v7043_v56 = vld [vmem:[#allocation5 + $0x58] sm:$0xff]  ;;  %v7331_v9 = vld [vmem:[#allocation4 + $0x91] sm:$0xff] }
 0x76a   : > { %6859 = vst.msk [vmem:[#allocation5 + $0x60] sm:$0xff] %vm5946_vm13, %v6839_v1  ;;  %v7063_v17 = vadd.f32 %v7043_v56, %v7005_v58 }
 0x76b   : > { %8744 = vmatmul.msk.f32.gmra.mxu3 %vm635_vm0, %v7550_v46  ;;  %8726 = vmatmul.msk.f32.gmra.mxu2 %vm635_vm0, %v7327_v37  ;;  %v7555_v46 = vld [vmem:[#allocation4 + $0x8a] sm:$0xff]  ;;  %v7332_v37 = vld [vmem:[#allocation4 + $0x99] sm:$0xff] }
 0x76c   : > { %7083 = vst.msk [vmem:[#allocation5 + $0x58] sm:$0xff] %vm5946_vm13, %v7063_v17 }
 0x76d   : > { %v6564_v4 = vpop.f32.mrf.mxu1 }
 0x76e   : > { %v7008_v50 = vpop.f32.mrf.mxu3  ;;  %v6616_v42 = vadd.f32 %v6596_v57, %v6564_v4  ;;  %v6789_v34 = vpop.f32.mrf.mxu2 }
 0x76f   : > { %v6820_v6 = vld [vmem:[#allocation5 + $0x68] sm:$0xff] }
 0x770   : > { %v6840_v31 = vadd.f32 %v6820_v6, %v6786_v18  ;;  %6636 = vst.msk [vmem:[#allocation5 + $0x70] sm:$0xff] %vm5946_vm13, %v6616_v42  ;;  %8706 = vmatmul.msk.f32.gmra.mxu1 %vm635_vm0, %v7102_v60  ;;  %v6601_v6 = vld [vmem:[#allocation5 + $0x98] sm:$0xff]  ;;  %v7107_v60 = vld [vmem:[#allocation4 + $0x98] sm:$0xff] }
 0x771   : > { %v7044_v2 = vld [vmem:[#allocation5 + $0x60] sm:$0xff] }
 0x772   : > { %6860 = vst.msk [vmem:[#allocation5 + $0x68] sm:$0xff] %vm5946_vm13, %v6840_v31  ;;  %v7064_v13 = vadd.f32 %v7044_v2, %v7008_v50 }
 0x773   : > { %8745 = vmatmul.msk.f32.gmra.mxu3 %vm635_vm0, %v7551_v28  ;;  %8727 = vmatmul.msk.f32.gmra.mxu2 %vm635_vm0, %v7328_v53  ;;  %v7556_v28 = vld [vmem:[#allocation4 + $0x92] sm:$0xff] }
 0x774   : > { %7084 = vst.msk [vmem:[#allocation5 + $0x60] sm:$0xff] %vm5946_vm13, %v7064_v13 }
 0x775   : > { %v6567_v49 = vpop.f32.mrf.mxu1 }
 0x776   : > { %v7011_v19 = vpop.f32.mrf.mxu3  ;;  %v6617_v7 = vadd.f32 %v6597_v22, %v6567_v49  ;;  %v6792_v38 = vpop.f32.mrf.mxu2 }
 0x777   : > { %v6821_v40 = vld [vmem:[#allocation5 + $0x70] sm:$0xff] }
 0x778   : > { %v6841_v41 = vadd.f32 %v6821_v40, %v6789_v34  ;;  %6637 = vst.msk [vmem:[#allocation5 + $0x78] sm:$0xff] %vm5946_vm13, %v6617_v7  ;;  %8707 = vmatmul.msk.f32.gmra.mxu1 %vm635_vm0, %v7103_v20  ;;  %v7257_v7 = vld [vmem:[#allocation5] sm:$0xff]  ;;  %v7557_v20 = vld [vmem:[#allocation4 + $0x9a] sm:$0xff] }
 0x779   : > { %v7045_v0 = vld [vmem:[#allocation5 + $0x68] sm:$0xff] }
 0x77a   : > { %6861 = vst.msk [vmem:[#allocation5 + $0x70] sm:$0xff] %vm5946_vm13, %v6841_v41  ;;  %v7065_v27 = vadd.f32 %v7045_v0, %v7011_v19 }
 0x77b   : > { %8746 = vmatmul.msk.f32.gmra.mxu3 %vm635_vm0, %v7552_v33  ;;  %8728 = vmatmul.msk.f32.gmra.mxu2 %vm635_vm0, %v7329_v44 }
 0x77c   : > { %7085 = vst.msk [vmem:[#allocation5 + $0x68] sm:$0xff] %vm5946_vm13, %v7065_v27 }
 0x77d   : > { %v6570_v15 = vpop.f32.mrf.mxu1 }
 0x77e   : > { %v7014_v59 = vpop.f32.mrf.mxu3  ;;  %v6618_v63 = vadd.f32 %v6598_v47, %v6570_v15  ;;  %v6795_v16 = vpop.f32.mrf.mxu2  ;;  %v7258_v47 = vld [vmem:[#allocation5 + $0x8] sm:$0xff] }
 0x77f   : > { %v6822_v62 = vld [vmem:[#allocation5 + $0x78] sm:$0xff] }
 0x780   : > { %v6842_v52 = vadd.f32 %v6822_v62, %v6792_v38  ;;  %6638 = vst.msk [vmem:[#allocation5 + $0x80] sm:$0xff] %vm5946_vm13, %v6618_v63  ;;  %8708 = vmatmul.msk.f32.gmra.mxu1 %vm635_vm0, %v7104_v10 }
 0x781   : > { %v7046_v25 = vld [vmem:[#allocation5 + $0x70] sm:$0xff] }
 0x782   : > { %6862 = vst.msk [vmem:[#allocation5 + $0x78] sm:$0xff] %vm5946_vm13, %v6842_v52  ;;  %v7066_v3 = vadd.f32 %v7046_v25, %v7014_v59  ;;  %v7259_v25 = vld [vmem:[#allocation5 + $0x10] sm:$0xff] }
 0x783   : > { %8747 = vmatmul.msk.f32.gmra.mxu3 %vm635_vm0, %v7553_v32  ;;  %8729 = vmatmul.msk.f32.gmra.mxu2 %vm635_vm0, %v7330_v29 }
 0x784   : > { %7086 = vst.msk [vmem:[#allocation5 + $0x70] sm:$0xff] %vm5946_vm13, %v7066_v3  ;;  %v7110_v3 = vld [vmem:[#allocation4 + $0xb0] sm:$0xff] }
 0x785   : > { %v6573_v26 = vpop.f32.mrf.mxu1 }
 0x786   : > { %v7017_v8 = vpop.f32.mrf.mxu3  ;;  %v6619_v11 = vadd.f32 %v6599_v43, %v6573_v26  ;;  %v6798_v35 = vpop.f32.mrf.mxu2 }
 0x787   : > { %v6823_v45 = vld [vmem:[#allocation5 + $0x80] sm:$0xff] }
 0x788   : > { %v6843_v55 = vadd.f32 %v6823_v45, %v6795_v16  ;;  %6639 = vst.msk [vmem:[#allocation5 + $0x88] sm:$0xff] %vm5946_vm13, %v6619_v11  ;;  %8709 = vmatmul.msk.f32.gmra.mxu1 %vm635_vm0, %v7105_v48  ;;  %v7335_v16 = vld [vmem:[#allocation4 + $0xb1] sm:$0xff]  ;;  %v7260_v45 = vld [vmem:[#allocation5 + $0x18] sm:$0xff] }
 0x789   : > { %v7047_v54 = vld [vmem:[#allocation5 + $0x78] sm:$0xff]  ;;  %v7111_v48 = vld [vmem:[#allocation4 + $0xb8] sm:$0xff] }
 0x78a   : > { %6863 = vst.msk [vmem:[#allocation5 + $0x80] sm:$0xff] %vm5946_vm13, %v6843_v55  ;;  %v7067_v58 = vadd.f32 %v7047_v54, %v7017_v8 }
 0x78b   : > { %8748 = vmatmul.msk.f32.gmra.mxu3 %vm635_vm0, %v7554_v39  ;;  %8730 = vmatmul.msk.f32.gmra.mxu2 %vm635_vm0, %v7331_v9 }
 0x78c   : > { %7087 = vst.msk [vmem:[#allocation5 + $0x78] sm:$0xff] %vm5946_vm13, %v7067_v58 }
 0x78d   : > { %v6576_v61 = vpop.f32.mrf.mxu1 }
 0x78e   : > { %v7020_v12 = vpop.f32.mrf.mxu3  ;;  %v6620_v1 = vadd.f32 %v6600_v14, %v6576_v61  ;;  %v6801_v4 = vpop.f32.mrf.mxu2 }
 0x78f   : > { %v6824_v56 = vld [vmem:[#allocation5 + $0x88] sm:$0xff] }
 0x790   : > { %v6844_v17 = vadd.f32 %v6824_v56, %v6798_v35  ;;  %6640 = vst.msk [vmem:[#allocation5 + $0x90] sm:$0xff] %vm5946_vm13, %v6620_v1  ;;  %8710 = vmatmul.msk.f32.gmra.mxu1 %vm635_vm0, %v7106_v51  ;;  %v7336_v1 = vld [vmem:[#allocation4 + $0xb9] sm:$0xff] }
 0x791   : > { %v7048_v18 = vld [vmem:[#allocation5 + $0x80] sm:$0xff] }
 0x792   : > { %6864 = vst.msk [vmem:[#allocation5 + $0x88] sm:$0xff] %vm5946_vm13, %v6844_v17  ;;  %v7068_v50 = vadd.f32 %v7048_v18, %v7020_v12  ;;  %v7261_v17 = vld [vmem:[#allocation5 + $0x20] sm:$0xff]  ;;  %v7560_v18 = vld [vmem:[#allocation4 + $0xb2] sm:$0xff] }
 0x793   : > { %8749 = vmatmul.msk.f32.gmra.mxu3 %vm635_vm0, %v7555_v46  ;;  %8731 = vmatmul.msk.f32.gmra.mxu2 %vm635_vm0, %v7332_v37  ;;  %v12374_v46 = vld [vmem:[#allocation2] sm:$0xff] }
 0x794   : > { %7088 = vst.msk [vmem:[#allocation5 + $0x80] sm:$0xff] %vm5946_vm13, %v7068_v50 }
 0x795   : > { %v6579_v42 = vpop.f32.mrf.mxu1  ;;  %8195 = vst.msk [vmem:[#allocation6 + $0xd] sm:$0xf] %vm8056_vm15, %v12374_v46 }
 0x796   : > { %v7023_v57 = vpop.f32.mrf.mxu3  ;;  %v6621_v31 = vadd.f32 %v6601_v6, %v6579_v42  ;;  %v6804_v49 = vpop.f32.mrf.mxu2  ;;  %8196 = vst.msk [vmem:[#allocation6 + $0x15] sm:$0xf] %vm8056_vm15, %v12374_v46 }
 0x797   : > { %v6825_v2 = vld [vmem:[#allocation5 + $0x90] sm:$0xff]  ;;  %8197 = vst.msk [vmem:[#allocation6 + $0x1d] sm:$0xf] %vm8056_vm15, %v12374_v46 }
 0x798   : > { %v6845_v13 = vadd.f32 %v6825_v2, %v6801_v4  ;;  %6641 = vst.msk [vmem:[#allocation5 + $0x98] sm:$0xff] %vm5946_vm13, %v6621_v31  ;;  %8711 = vmatmul.msk.f32.gmra.mxu1 %vm635_vm0, %v7107_v60  ;;  %v7561_v60 = vld [vmem:[#allocation4 + $0xba] sm:$0xff]  ;;  %v7262_v31 = vld [vmem:[#allocation5 + $0x28] sm:$0xff] }
 0x799   : > { %v7049_v34 = vld [vmem:[#allocation5 + $0x88] sm:$0xff]  ;;  %8194 = vst.msk [vmem:[#allocation6 + $0x8] sm:$0x1] %vm8193_vm1, %v12374_v46 }
 0x79a   : > { %6865 = vst.msk [vmem:[#allocation5 + $0x90] sm:$0xff] %vm5946_vm13, %v6845_v13  ;;  %v7069_v19 = vadd.f32 %v7049_v34, %v7023_v57 }
 0x79b   : > { %8750 = vmatmul.msk.f32.gmra.mxu3 %vm635_vm0, %v7556_v28  ;;  %8732 = vmatmul.msk.f32.gmra.mxu2 %vm635_vm0, %v12218_v23 }
 0x79c   : > { %7089 = vst.msk [vmem:[#allocation5 + $0x88] sm:$0xff] %vm5946_vm13, %v7069_v19 }
 0x79d   : > { %v7197_v53 = vpop.f32.mrf.mxu1 }
 0x79e   : > { %v7026_v22 = vpop.f32.mrf.mxu3  ;;  %v7277_v40 = vadd.f32 %v7257_v7, %v7197_v53  ;;  %v7422_v38 = vpop.f32.mrf.mxu2 }
 0x79f   : > { %v6826_v41 = vld [vmem:[#allocation5 + $0x98] sm:$0xff] }
 0x7a0   : > { %v6846_v33 = vadd.f32 %v6826_v41, %v6804_v49  ;;  %7297 = vst.msk [vmem:[#allocation5] sm:$0xff] %vm5946_vm13, %v7277_v40  ;;  %8712 = vmatmul.msk.f32.gmra.mxu1 %vm635_vm0, %v12216_v5 }
 0x7a1   : > { %v7050_v0 = vld [vmem:[#allocation5 + $0x90] sm:$0xff] }
 0x7a2   : > { %6866 = vst.msk [vmem:[#allocation5 + $0x98] sm:$0xff] %vm5946_vm13, %v6846_v33  ;;  %v7070_v27 = vadd.f32 %v7050_v0, %v7026_v22  ;;  %v7263_v22 = vld [vmem:[#allocation5 + $0x30] sm:$0xff] }
 0x7a3   : > { %8751 = vmatmul.msk.f32.gmra.mxu3 %vm635_vm0, %v7557_v20  ;;  %8733 = vmatmul.msk.f32.gmra.mxu2 %vm635_vm0, %v12231_v21 }
 0x7a4   : > { %7090 = vst.msk [vmem:[#allocation5 + $0x90] sm:$0xff] %vm5946_vm13, %v7070_v27 }
 0x7a5   : > { %v7200_v15 = vpop.f32.mrf.mxu1 }
 0x7a6   : > { %v7029_v59 = vpop.f32.mrf.mxu3  ;;  %v7278_v63 = vadd.f32 %v7258_v47, %v7200_v15  ;;  %v7425_v44 = vpop.f32.mrf.mxu2 }
 0x7a7   : > { %v7482_v62 = vld [vmem:[#allocation5] sm:$0xff] }
 0x7a8   : > { %v7502_v10 = vadd.f32 %v7482_v62, %v7422_v38  ;;  %7298 = vst.msk [vmem:[#allocation5 + $0x8] sm:$0xff] %vm5946_vm13, %v7278_v63  ;;  %8713 = vmatmul.msk.f32.gmra.mxu1 %vm635_vm0, %v12229_v24  ;;  %v7264_v38 = vld [vmem:[#allocation5 + $0x38] sm:$0xff] }
 0x7a9   : > { %v7051_v5 = vld [vmem:[#allocation5 + $0x98] sm:$0xff] }
 0x7aa   : > { %v7071_v23 = vadd.f32 %v7051_v5, %v7029_v59  ;;  %7522 = vst.msk [vmem:[#allocation5] sm:$0xff] %vm5946_vm13, %v7502_v10 }
 0x7ab   : > { %8752 = vmatmul.msk.f32.gmra.mxu3 %vm635_vm0, %v12233_v30  ;;  %8734 = vmatmul.msk.f32.gmra.mxu2 %vm635_vm0, %v7335_v16 }
 0x7ac   : > { %7091 = vst.msk [vmem:[#allocation5 + $0x98] sm:$0xff] %vm5946_vm13, %v7071_v23 }
 0x7ad   : > { %v7203_v32 = vpop.f32.mrf.mxu1 }
 0x7ae   : > { %v7647_v52 = vpop.f32.mrf.mxu3  ;;  %v7279_v8 = vadd.f32 %v7259_v25, %v7203_v32  ;;  %v7428_v43 = vpop.f32.mrf.mxu2 }
 0x7af   : > { %v7483_v24 = vld [vmem:[#allocation5 + $0x8] sm:$0xff] }
 0x7b0   : > { %v7503_v26 = vadd.f32 %v7483_v24, %v7425_v44  ;;  %7299 = vst.msk [vmem:[#allocation5 + $0x10] sm:$0xff] %vm5946_vm13, %v7279_v8  ;;  %8714 = vmatmul.msk.f32.gmra.mxu1 %vm635_vm0, %v7110_v3  ;;  %v7265_v44 = vld [vmem:[#allocation5 + $0x40] sm:$0xff] }
 0x7b1   : > { %v7707_v21 = vld [vmem:[#allocation5] sm:$0xff] }
 0x7b2   : > { %7523 = vst.msk [vmem:[#allocation5 + $0x8] sm:$0xff] %vm5946_vm13, %v7503_v26  ;;  %v7727_v30 = vadd.f32 %v7707_v21, %v7647_v52  ;;  %v7266_v21 = vld [vmem:[#allocation5 + $0x48] sm:$0xff] }
 0x7b3   : > { %8753 = vmatmul.msk.f32.gmra.mxu3 %vm635_vm0, %v12244_v36  ;;  %8735 = vmatmul.msk.f32.gmra.mxu2 %vm635_vm0, %v7336_v1 }
 0x7b4   : > { %7747 = vst.msk [vmem:[#allocation5] sm:$0xff] %vm5946_vm13, %v7727_v30 }
 0x7b5   : > { %v7206_v11 = vpop.f32.mrf.mxu1 }
 0x7b6   : > { %v7650_v29 = vpop.f32.mrf.mxu3  ;;  %v7280_v55 = vadd.f32 %v7260_v45, %v7206_v11  ;;  %v7431_v35 = vpop.f32.mrf.mxu2 }
 0x7b7   : > { %v7484_v39 = vld [vmem:[#allocation5 + $0x10] sm:$0xff] }
 0x7b8   : > { %v7504_v54 = vadd.f32 %v7484_v39, %v7428_v43  ;;  %7300 = vst.msk [vmem:[#allocation5 + $0x18] sm:$0xff] %vm5946_vm13, %v7280_v55  ;;  %8715 = vmatmul.msk.f32.gmra.mxu1 %vm635_vm0, %v7111_v48 }
 0x7b9   : > { %v7708_v58 = vld [vmem:[#allocation5 + $0x8] sm:$0xff] }
 0x7ba   : > { %7524 = vst.msk [vmem:[#allocation5 + $0x10] sm:$0xff] %vm5946_vm13, %v7504_v54  ;;  %v7728_v36 = vadd.f32 %v7708_v58, %v7650_v29 }
 0x7bb   : > { %8754 = vmatmul.msk.f32.gmra.mxu3 %vm635_vm0, %v7560_v18  ;;  %v7768_v54 = vld [vmem:[#allocation5] sm:$0xff] }
 0x7bc   : > { %7748 = vst.msk [vmem:[#allocation5 + $0x8] sm:$0xff] %vm5946_vm13, %v7728_v36  ;;  %v7785_v18 = vrot.slane %v7768_v54, 4 }
 0x7bd   : > { %v7209_v56 = vpop.f32.mrf.mxu1 }
 0x7be   : > { %v7653_v12 = vpop.f32.mrf.mxu3  ;;  %v7281_v50 = vadd.f32 %v7261_v17, %v7209_v56  ;;  %v7434_v4 = vpop.f32.mrf.mxu2 }
 0x7bf   : > { %v7485_v61 = vld [vmem:[#allocation5 + $0x18] sm:$0xff] }
 0x7c0   : > { %v7505_v14 = vadd.f32 %v7485_v61, %v7431_v35  ;;  %7301 = vst.msk [vmem:[#allocation5 + $0x20] sm:$0xff] %vm5946_vm13, %v7281_v50  ;;  %v7267_v35 = vld [vmem:[#allocation5 + $0x50] sm:$0xff]  ;;  %v7784_v61 = vrot.slane %v7768_v54, 2  ;;  %v7786_v50 = vrot.slane %v7768_v54, 6 }
 0x7c1   : > { %v7709_v51 = vld [vmem:[#allocation5 + $0x10] sm:$0xff] }
 0x7c2   : > { %7525 = vst.msk [vmem:[#allocation5 + $0x18] sm:$0xff] %vm5946_vm13, %v7505_v14  ;;  %v7729_v9 = vadd.f32 %v7709_v51, %v7653_v12 }
 0x7c3   : > { %8755 = vmatmul.msk.f32.gmra.mxu3 %vm635_vm0, %v7561_v60  ;;  %vm7832_vm0 = vcmask 254976  }
 0x7c4   : > { %7749 = vst.msk [vmem:[#allocation5 + $0x10] sm:$0xff] %vm5946_vm13, %v7729_v9 }
 0x7c5   : > { %v7212_v37 = vpop.f32.mrf.mxu1 }
 0x7c6   : > { %v7656_v57 = vpop.f32.mrf.mxu3  ;;  %v7437_v28 = vpop.f32.mrf.mxu2  ;;  %v7282_v34 = vadd.f32 %v7262_v31, %v7212_v37 }
 0x7c7   : > { %v7486_v13 = vld [vmem:[#allocation5 + $0x20] sm:$0xff] }
 0x7c8   : > { %v7506_v19 = vadd.f32 %v7486_v13, %v7434_v4  ;;  %7302 = vst.msk [vmem:[#allocation5 + $0x28] sm:$0xff] %vm5946_vm13, %v7282_v34  ;;  %v7842_v4 = vsel %vm7832_vm0, %v7784_v61, -inf }
 0x7c9   : > { %v7710_v42 = vld [vmem:[#allocation5 + $0x18] sm:$0xff] }
 0x7ca   : > { %v7730_v6 = vadd.f32 %v7710_v42, %v7656_v57  ;;  %7526 = vst.msk [vmem:[#allocation5 + $0x20] sm:$0xff] %vm5946_vm13, %v7506_v19  ;;  %v7851_v19 = vsel %vm7832_vm0, %v7785_v18, -inf }
 0x7cb   : > { %v7769_v11 = vld [vmem:[#allocation5 + $0x10] sm:$0xff] }
 0x7cc   : > { %7750 = vst.msk [vmem:[#allocation5 + $0x18] sm:$0xff] %vm5946_vm13, %v7730_v6  ;;  %v7787_v58 = vrot.slane %v7769_v11, 2  ;;  %v7788_v51 = vrot.slane %v7769_v11, 4  ;;  %v7789_v9 = vrot.slane %v7769_v11, 6  ;;  %v7834_v57 = vsel %vm7832_vm0, %v7769_v11, -inf }
 0x7cd   : > { %v7215_v49 = vpop.f32.mrf.mxu1 }
 0x7ce   : > { %v7659_v2 = vpop.f32.mrf.mxu3  ;;  %v7283_v53 = vadd.f32 %v7263_v22, %v7215_v49  ;;  %v7440_v7 = vpop.f32.mrf.mxu2  ;;  %v7843_v1 = vsel %vm7832_vm0, %v7787_v58, -inf  ;;  %v7852_v31 = vsel %vm7832_vm0, %v7788_v51, -inf  ;;  %v7861_v13 = vsel %vm7832_vm0, %v7789_v9, -inf }
 0x7cf   : > { %v7487_v20 = vld [vmem:[#allocation5 + $0x28] sm:$0xff]  ;;  %v7844_v37 = vmax.f32 %v7842_v4, %v7843_v1 }
 0x7d0   : > { %v7507_v41 = vadd.f32 %v7487_v20, %v7437_v28  ;;  %7303 = vst.msk [vmem:[#allocation5 + $0x30] sm:$0xff] %vm5946_vm13, %v7283_v53  ;;  %v7268_v53 = vld [vmem:[#allocation5 + $0x58] sm:$0xff] }
 0x7d1   : > { %v7711_v33 = vld [vmem:[#allocation5 + $0x20] sm:$0xff] }
 0x7d2   : > { %7527 = vst.msk [vmem:[#allocation5 + $0x28] sm:$0xff] %vm5946_vm13, %v7507_v41  ;;  %v7731_v0 = vadd.f32 %v7711_v33, %v7659_v2  ;;  %v7833_v2 = vsel %vm7832_vm0, %v7768_v54, -inf }
 0x7d3   : > { %v7835_v49 = vmax.f32 %v7833_v2, %v7834_v57 }
 0x7d4   : > { %7751 = vst.msk [vmem:[#allocation5 + $0x20] sm:$0xff] %vm5946_vm13, %v7731_v0  ;;  %v7845_v0 = vrot.slane %v7844_v37, 4 }
 0x7d5   : > { %v7218_v27 = vpop.f32.mrf.mxu1 }
 0x7d6   : > { %v7662_v40 = vpop.f32.mrf.mxu3  ;;  %v7284_v59 = vadd.f32 %v7264_v38, %v7218_v27  ;;  %v7443_v63 = vpop.f32.mrf.mxu2 }
 0x7d7   : > { %v7488_v15 = vld [vmem:[#allocation5 + $0x30] sm:$0xff] }
 0x7d8   : > { %v7508_v47 = vadd.f32 %v7488_v15, %v7440_v7  ;;  %7304 = vst.msk [vmem:[#allocation5 + $0x38] sm:$0xff] %vm5946_vm13, %v7284_v59  ;;  %v7860_v7 = vsel %vm7832_vm0, %v7786_v50, -inf  ;;  %v7836_v15 = vrot.slane %v7835_v49, 4 }
 0x7d9   : > { %v7712_v10 = vld [vmem:[#allocation5 + $0x28] sm:$0xff]  ;;  %v7862_v27 = vmax.f32 %v7860_v7, %v7861_v13 }
 0x7da   : > { %7528 = vst.msk [vmem:[#allocation5 + $0x30] sm:$0xff] %vm5946_vm13, %v7508_v47  ;;  %v7732_v5 = vadd.f32 %v7712_v10, %v7662_v40  ;;  %v7853_v40 = vmax.f32 %v7851_v19, %v7852_v31 }
 0x7db   : > { %v7770_v22 = vld [vmem:[#allocation5 + $0x20] sm:$0xff] }
 0x7dc   : > { %7752 = vst.msk [vmem:[#allocation5 + $0x28] sm:$0xff] %vm5946_vm13, %v7732_v5  ;;  %v7790_v38 = vrot.slane %v7770_v22, 2 }
 0x7dd   : > { %v7221_v23 = vpop.f32.mrf.mxu1 }
 0x7de   : > { %v7665_v62 = vpop.f32.mrf.mxu3  ;;  %v7285_v52 = vadd.f32 %v7265_v44, %v7221_v23  ;;  %v7446_v8 = vpop.f32.mrf.mxu2 }
 0x7df   : > { %v7489_v32 = vld [vmem:[#allocation5 + $0x38] sm:$0xff] }
 0x7e0   : > { %7305 = vst.msk [vmem:[#allocation5 + $0x40] sm:$0xff] %vm5946_vm13, %v7285_v52  ;;  %v7509_v25 = vadd.f32 %v7489_v32, %v7443_v63  ;;  %v7846_v32 = vmax.f32 %v7844_v37, %v7845_v0  ;;  %v7270_v37 = vld [vmem:[#allocation5 + $0x68] sm:$0xff] }
 0x7e1   : > { %v7713_v3 = vld [vmem:[#allocation5 + $0x30] sm:$0xff] }
 0x7e2   : > { %7529 = vst.msk [vmem:[#allocation5 + $0x38] sm:$0xff] %vm5946_vm13, %v7509_v25  ;;  %v7733_v16 = vadd.f32 %v7713_v3, %v7665_v62  ;;  %v7854_v62 = vrot.slane %v7853_v40, 4  ;;  %v7863_v25 = vrot.slane %v7862_v27, 4  ;;  %v7791_v3 = vrot.slane %v7770_v22, 4 }
 0x7e4   : > { %7753 = vst.msk [vmem:[#allocation5 + $0x30] sm:$0xff] %vm5946_vm13, %v7733_v16  ;;  %v7792_v16 = vrot.slane %v7770_v22, 6  ;;  %v7855_v11 = vmax.f32 %v7853_v40, %v7854_v62 }
 0x7e5   : > { %v7224_v26 = vpop.f32.mrf.mxu1 }
 0x7e6   : > { %v7668_v24 = vpop.f32.mrf.mxu3  ;;  %v7286_v30 = vadd.f32 %v7266_v21, %v7224_v26  ;;  %v7449_v55 = vpop.f32.mrf.mxu2  ;;  %v7269_v26 = vld [vmem:[#allocation5 + $0x60] sm:$0xff]  ;;  %v7896_v58 = vsel %vm7832_vm0, %v7792_v16, -inf  ;;  %v7856_v1 = vrot.slane %v7855_v11, 2 }
 0x7e7   : > { %v7490_v43 = vld [vmem:[#allocation5 + $0x40] sm:$0xff] }
 0x7e8   : > { %v7510_v29 = vadd.f32 %v7490_v43, %v7446_v8  ;;  %7306 = vst.msk [vmem:[#allocation5 + $0x48] sm:$0xff] %vm5946_vm13, %v7286_v30  ;;  %v7878_v8 = vsel %vm7832_vm0, %v7790_v38, -inf }
 0x7e9   : > { %v7714_v45 = vld [vmem:[#allocation5 + $0x38] sm:$0xff] }
 0x7ea   : > { %7530 = vst.msk [vmem:[#allocation5 + $0x40] sm:$0xff] %vm5946_vm13, %v7510_v29  ;;  %v7734_v48 = vadd.f32 %v7714_v45, %v7668_v24  ;;  %v7837_v29 = vmax.f32 %v7835_v49, %v7836_v15 }
 0x7eb   : > { %v7771_v28 = vld [vmem:[#allocation5 + $0x30] sm:$0xff] }
 0x7ec   : > { %7754 = vst.msk [vmem:[#allocation5 + $0x38] sm:$0xff] %vm5946_vm13, %v7734_v48  ;;  %v7793_v20 = vrot.slane %v7771_v28, 2  ;;  %v7794_v47 = vrot.slane %v7771_v28, 4  ;;  %v7795_v10 = vrot.slane %v7771_v28, 6  ;;  %v7847_v48 = vrot.slane %v7846_v32, 2 }
 0x7ed   : > { %v7227_v36 = vpop.f32.mrf.mxu1  ;;  %v7838_v9 = vrot.slane %v7837_v29, 2 }
 0x7ee   : > { %v7671_v39 = vpop.f32.mrf.mxu3  ;;  %v7287_v12 = vadd.f32 %v7267_v35, %v7227_v36  ;;  %v7452_v6 = vpop.f32.mrf.mxu2  ;;  %v7879_v5 = vsel %vm7832_vm0, %v7793_v20, -inf  ;;  %v7888_v30 = vsel %vm7832_vm0, %v7794_v47, -inf  ;;  %v7897_v45 = vsel %vm7832_vm0, %v7795_v10, -inf }
 0x7ef   : > { %v7491_v14 = vld [vmem:[#allocation5 + $0x48] sm:$0xff]  ;;  %v7880_v21 = vmax.f32 %v7878_v8, %v7879_v5  ;;  %v7870_v36 = vsel %vm7832_vm0, %v7771_v28, -inf  ;;  %v7848_v4 = vmax.f32 %v7846_v32, %v7847_v48  ;;  %v7839_v13 = vmax.f32 %v7837_v29, %v7838_v9  ;;  %v7271_v8 = vld [vmem:[#allocation5 + $0x70] sm:$0xff] }
 0x7f0   : > { %7307 = vst.msk [vmem:[#allocation5 + $0x50] sm:$0xff] %vm5946_vm13, %v7287_v12  ;;  %v7511_v56 = vadd.f32 %v7491_v14, %v7449_v55  ;;  %v7864_v55 = vmax.f32 %v7862_v27, %v7863_v25  ;;  %v7898_v14 = vmax.f32 %v7896_v58, %v7897_v45 }
 0x7f1   : > { %v7715_v17 = vld [vmem:[#allocation5 + $0x40] sm:$0xff]  ;;  %v7881_v61 = vrot.slane %v7880_v21, 4  ;;  %v7849_v49 = vrot.slane %v7848_v4, 1  ;;  %v7840_v27 = vrot.slane %v7839_v13, 1 }
 0x7f2   : > { %7531 = vst.msk [vmem:[#allocation5 + $0x48] sm:$0xff] %vm5946_vm13, %v7511_v56  ;;  %v7735_v42 = vadd.f32 %v7715_v17, %v7671_v39  ;;  %v7887_v39 = vsel %vm7832_vm0, %v7791_v3, -inf  ;;  %v7869_v56 = vsel %vm7832_vm0, %v7770_v22, -inf  ;;  %v7865_v57 = vrot.slane %v7864_v55, 2 }
 0x7f3   : > { %v7889_v35 = vmax.f32 %v7887_v39, %v7888_v30  ;;  %v7882_v31 = vmax.f32 %v7880_v21, %v7881_v61  ;;  %v7899_v28 = vrot.slane %v7898_v14, 4 }
 0x7f4   : > { %7755 = vst.msk [vmem:[#allocation5 + $0x40] sm:$0xff] %vm5946_vm13, %v7735_v42  ;;  %v7871_v42 = vmax.f32 %v7869_v56, %v7870_v36  ;;  %v7866_v22 = vmax.f32 %v7864_v55, %v7865_v57 }
 0x7f5   : > { %v7230_v34 = vpop.f32.mrf.mxu1 }
 0x7f6   : > { %v7674_v60 = vpop.f32.mrf.mxu3  ;;  %v7288_v33 = vadd.f32 %v7268_v53, %v7230_v34  ;;  %v7455_v44 = vpop.f32.mrf.mxu2  ;;  %v7857_v34 = vmax.f32 %v7855_v11, %v7856_v1  ;;  %v7872_v53 = vrot.slane %v7871_v42, 4  ;;  %v7867_v10 = vrot.slane %v7866_v22, 1 }
 0x7f7   : > { %v7492_v41 = vld [vmem:[#allocation5 + $0x50] sm:$0xff] }
 0x7f8   : > { %v7512_v59 = vadd.f32 %v7492_v41, %v7452_v6  ;;  %7308 = vst.msk [vmem:[#allocation5 + $0x58] sm:$0xff] %vm5946_vm13, %v7288_v33  ;;  %v7890_v6 = vrot.slane %v7889_v35, 4  ;;  %v7883_v41 = vrot.slane %v7882_v31, 2  ;;  %v7900_v33 = vmax.f32 %v7898_v14, %v7899_v28 }
 0x7f9   : > { %v7716_v63 = vld [vmem:[#allocation5 + $0x48] sm:$0xff]  ;;  %v7858_v62 = vrot.slane %v7857_v34, 1  ;;  %v7873_v5 = vmax.f32 %v7871_v42, %v7872_v53 }
 0x7fa   : > { %7532 = vst.msk [vmem:[#allocation5 + $0x50] sm:$0xff] %vm5946_vm13, %v7512_v59  ;;  %v7736_v23 = vadd.f32 %v7716_v63, %v7674_v60  ;;  %v7891_v20 = vmax.f32 %v7889_v35, %v7890_v6  ;;  %v7850_v63 = vmax.f32 %v7848_v4, %v7849_v49  ;;  %v7901_v21 = vrot.slane %v7900_v33, 2 }
 0x7fb   : > { %v7772_v7 = vld [vmem:[#allocation5 + $0x40] sm:$0xff]  ;;  %v7859_v39 = vmax.f32 %v7857_v34, %v7858_v62  ;;  %v7841_v6 = vmax.f32 %v7839_v13, %v7840_v27 }
 0x7fc   : > { %7756 = vst.msk [vmem:[#allocation5 + $0x48] sm:$0xff] %vm5946_vm13, %v7736_v23  ;;  %v7796_v38 = vrot.slane %v7772_v7, 2  ;;  %v7797_v59 = vrot.slane %v7772_v7, 4  ;;  %v7798_v30 = vrot.slane %v7772_v7, 6  ;;  %v7902_v56 = vmax.f32 %v7900_v33, %v7901_v21 }
 0x7fd   : > { %v7233_v24 = vpop.f32.mrf.mxu1 }
 0x7fe   : > { %v7677_v52 = vpop.f32.mrf.mxu3  ;;  %v7289_v43 = vadd.f32 %v7269_v26, %v7233_v24  ;;  %v7458_v18 = vpop.f32.mrf.mxu2  ;;  %v12431_v24 = vld [vmem:[%s12751_s4] ss:$0 sm:$0xff]  ;;  %v7884_v26 = vmax.f32 %v7882_v31, %v7883_v41  ;;  %v7914_v29 = vsel %vm7832_vm0, %v7796_v38, -inf  ;;  %v7923_v11 = vsel %vm7832_vm0, %v7797_v59, -inf }
 0x7ff   : > { %v7493_v54 = vld [vmem:[#allocation5 + $0x58] sm:$0xff]  ;;  %v7981_v35 = vadd.f32 %v12431_v24, %v7850_v63  ;;  %v7868_v31 = vmax.f32 %v7866_v22, %v7867_v10  ;;  %v7982_v28 = vadd.f32 %v12431_v24, %v7859_v39  ;;  %v7980_v27 = vadd.f32 %v12431_v24, %v7841_v6 }
 0x800   : > { %7309 = vst.msk [vmem:[#allocation5 + $0x60] sm:$0xff] %vm5946_vm13, %v7289_v43  ;;  %v7513_v12 = vadd.f32 %v7493_v54, %v7455_v44  ;;  %v7892_v44 = vrot.slane %v7891_v20, 2  ;;  %v7885_v9 = vrot.slane %v7884_v26, 1 }
 0x801   : > { %v7717_v51 = vld [vmem:[#allocation5 + $0x50] sm:$0xff]  ;;  %v12446_v49 = vmax.f32 %v7981_v35, 0.0  ;;  %v7983_v59 = vadd.f32 %v12431_v24, %v7868_v31 }
 0x802   : > { %7533 = vst.msk [vmem:[#allocation5 + $0x58] sm:$0xff] %vm5946_vm13, %v7513_v12  ;;  %v7737_v17 = vadd.f32 %v7717_v51, %v7677_v52  ;;  %v7874_v12 = vrot.slane %v7873_v5, 2  ;;  %v7893_v1 = vmax.f32 %v7891_v20, %v7892_v44  ;;  %v7886_v20 = vmax.f32 %v7884_v26, %v7885_v9 }
 0x803   : > { %v8028_v62 = vrot.slane %v12446_v49, 7  ;;  %v12458_v26 = vmax.f32 %v7983_v59, 0.0 }
 0x804   : > { %7757 = vst.msk [vmem:[#allocation5 + $0x50] sm:$0xff] %vm5946_vm13, %v7737_v17  ;;  %v7905_v17 = vsel %vm7832_vm0, %v7772_v7, -inf  ;;  %v7894_v53 = vrot.slane %v7893_v1, 1  ;;  %v7903_v7 = vrot.slane %v7902_v56, 1  ;;  %v7985_v44 = vadd.f32 %v12431_v24, %v7886_v20 }
 0x805   : > { %v7236_v60 = vpop.f32.mrf.mxu1 }
 0x806   : > { %v7680_v50 = vpop.f32.mrf.mxu3  ;;  %v7290_v2 = vadd.f32 %v7270_v37, %v7236_v60  ;;  %v7461_v47 = vpop.f32.mrf.mxu2  ;;  %v7895_v10 = vmax.f32 %v7893_v1, %v7894_v53  ;;  %v8032_v1 = vrot.slane %v12458_v26, 5 }
 0x807   : > { %v7494_v19 = vld [vmem:[#allocation5 + $0x60] sm:$0xff] }
 0x808   : > { %v7514_v40 = vadd.f32 %v7494_v19, %v7458_v18  ;;  %7310 = vst.msk [vmem:[#allocation5 + $0x68] sm:$0xff] %vm5946_vm13, %v7290_v2  ;;  %v7932_v18 = vsel %vm7832_vm0, %v7798_v30, -inf  ;;  %v7875_v2 = vmax.f32 %v7873_v5, %v7874_v12  ;;  %v7904_v5 = vmax.f32 %v7902_v56, %v7903_v7 }
 0x809   : > { %v7718_v0 = vld [vmem:[#allocation5 + $0x58] sm:$0xff]  ;;  %v12476_v56 = vmul.f32 %v12458_v26, %v12458_v26 }
 0x80a   : > { %7534 = vst.msk [vmem:[#allocation5 + $0x60] sm:$0xff] %vm5946_vm13, %v7514_v40  ;;  %v7738_v15 = vadd.f32 %v7718_v0, %v7680_v50  ;;  %v7272_v40 = vld [vmem:[#allocation5 + $0x78] sm:$0xff]  ;;  %v7987_v39 = vadd.f32 %v12431_v24, %v7904_v5 }
 0x80b   : > { %v7773_v23 = vld [vmem:[#allocation5 + $0x50] sm:$0xff] }
 0x80c   : > { %v7799_v52 = vrot.slane %v7773_v23, 2  ;;  %v7800_v32 = vrot.slane %v7773_v23, 4  ;;  %v7801_v25 = vrot.slane %v7773_v23, 6  ;;  %7758 = vst.msk [vmem:[#allocation5 + $0x58] sm:$0xff] %vm5946_vm13, %v7738_v15  ;;  %v7906_v54 = vsel %vm7832_vm0, %v7773_v23, -inf }
 0x80d   : > { %v7239_v16 = vpop.f32.mrf.mxu1  ;;  %v7907_v50 = vmax.f32 %v7905_v17, %v7906_v54  ;;  %v12450_v15 = vmax.f32 %v7982_v28, 0.0  ;;  %v12482_v6 = vmax.f32 %v7987_v39, 0.0 }
 0x80e   : > { %v7683_v3 = vpop.f32.mrf.mxu3  ;;  %v7291_v43 = vadd.f32 %v7271_v8, %v7239_v16  ;;  %v7915_v45 = vsel %vm7832_vm0, %v7799_v52, -inf  ;;  %v7924_v48 = vsel %vm7832_vm0, %v7800_v32, -inf  ;;  %v7933_v61 = vsel %vm7832_vm0, %v7801_v25, -inf  ;;  %v7464_v42 = vpop.f32.mrf.mxu2 }
 0x80f   : > { %v7495_v55 = vld [vmem:[#allocation5 + $0x68] sm:$0xff]  ;;  %v7916_v58 = vmax.f32 %v7914_v29, %v7915_v45  ;;  %v7925_v36 = vmax.f32 %v7923_v11, %v7924_v48  ;;  %v7934_v37 = vmax.f32 %v7932_v18, %v7933_v61  ;;  %v7908_v41 = vrot.slane %v7907_v50, 4  ;;  %v7273_v29 = vld [vmem:[#allocation5 + $0x80] sm:$0xff] }
 0x810   : > { %7311 = vst.msk [vmem:[#allocation5 + $0x70] sm:$0xff] %vm5946_vm13, %v7291_v43  ;;  %v7515_v51 = vadd.f32 %v7495_v55, %v7461_v47  ;;  %v7876_v47 = vrot.slane %v7875_v2, 1  ;;  %v12456_v8 = vmax.f32 %v7980_v27, 0.0  ;;  %v8030_v21 = vrot.slane %v12450_v15, 6 }
 0x811   : > { %v7719_v14 = vld [vmem:[#allocation5 + $0x60] sm:$0xff]  ;;  %v7917_v4 = vrot.slane %v7916_v58, 4  ;;  %v7926_v60 = vrot.slane %v7925_v36, 4  ;;  %v7935_v38 = vrot.slane %v7934_v37, 4  ;;  %v7909_v52 = vmax.f32 %v7907_v50, %v7908_v41 }
 0x812   : > { %v7739_v57 = vadd.f32 %v7719_v14, %v7683_v3  ;;  %7535 = vst.msk [vmem:[#allocation5 + $0x68] sm:$0xff] %vm5946_vm13, %v7515_v51  ;;  %v7877_v30 = vmax.f32 %v7875_v2, %v7876_v47  ;;  %v8071_v45 = vmul.f32 %v12446_v49, %v12446_v49  ;;  %v7986_v48 = vadd.f32 %v12431_v24, %v7895_v10 }
 0x813   : > { %v7918_v33 = vmax.f32 %v7916_v58, %v7917_v4  ;;  %v7927_v22 = vmax.f32 %v7925_v36, %v7926_v60  ;;  %v7936_v16 = vmax.f32 %v7934_v37, %v7935_v38  ;;  %v8029_v54 = vsel %vm5008_vm2, %v8028_v62, %v12456_v8 }
 0x814   : > { %7759 = vst.msk [vmem:[#allocation5 + $0x60] sm:$0xff] %vm5946_vm13, %v7739_v57  ;;  %v12468_v58 = vmax.f32 %v7985_v44, 0.0  ;;  %v7910_v36 = vrot.slane %v7909_v52, 2  ;;  %v8072_v61 = vmul.f32 %v12450_v15, %v12450_v15  ;;  %v7984_v17 = vadd.f32 %v12431_v24, %v7877_v30 }
 0x815   : > { %v7242_v34 = vpop.f32.mrf.mxu1  ;;  %v7919_v32 = vrot.slane %v7918_v33, 2  ;;  %v7928_v3 = vrot.slane %v7927_v22, 2  ;;  %v7937_v51 = vrot.slane %v7936_v16, 2  ;;  %v8031_v50 = vsel %vm5011_vm3, %v8030_v21, %v8029_v54 }
 0x816   : > { %v7686_v19 = vpop.f32.mrf.mxu3  ;;  %v7292_v0 = vadd.f32 %v7272_v40, %v7242_v34  ;;  %v7467_v11 = vpop.f32.mrf.mxu2  ;;  %v8102_v4 = vrot.slane %v8071_v45, 7  ;;  %v8034_v60 = vrot.slane %v12468_v58, 7  ;;  %v7911_v37 = vmax.f32 %v7909_v52, %v7910_v36 }
 0x817   : > { %v7496_v13 = vld [vmem:[#allocation5 + $0x70] sm:$0xff]  ;;  %v7920_v35 = vmax.f32 %v7918_v33, %v7919_v32  ;;  %v7929_v14 = vmax.f32 %v7927_v22, %v7928_v3  ;;  %v8070_v2 = vmul.f32 %v12456_v8, %v12456_v8  ;;  %v8104_v34 = vrot.slane %v8072_v61, 6 }
 0x818   : > { %7312 = vst.msk [vmem:[#allocation5 + $0x78] sm:$0xff] %vm5946_vm13, %v7292_v0  ;;  %v7516_v63 = vadd.f32 %v7496_v13, %v7464_v42  ;;  %v12480_v42 = vmax.f32 %v7986_v48, 0.0  ;;  %v7938_v53 = vmax.f32 %v7936_v16, %v7937_v51  ;;  %v12489_v7 = vsel %vm5014_vm4, %v8032_v1, %v8031_v50  ;;  %v7274_v13 = vld [vmem:[#allocation5 + $0x88] sm:$0xff] }
 0x819   : > { %v7720_v23 = vld [vmem:[#allocation5 + $0x68] sm:$0xff]  ;;  %v7921_v31 = vrot.slane %v7920_v35, 1  ;;  %v8106_v40 = vrot.slane %v12476_v56, 5  ;;  %v12492_v20 = vmax.f32 %v7984_v17, 0.0  ;;  %v12496_v41 = vmul.f32 %v12468_v58, %v12468_v58 }
 0x81a   : > { %7536 = vst.msk [vmem:[#allocation5 + $0x70] sm:$0xff] %vm5946_vm13, %v7516_v63  ;;  %v7740_v25 = vadd.f32 %v7720_v23, %v7686_v19  ;;  %v7930_v19 = vrot.slane %v7929_v14, 1  ;;  %v8103_v27 = vsel %vm5008_vm2, %v8102_v4, %v8070_v2  ;;  %v8036_v38 = vrot.slane %v12480_v42, 6 }
 0x81b   : > { %v7774_v33 = vld [vmem:[#allocation5 + $0x60] sm:$0xff]  ;;  %v12503_v59 = vmul.f32 %v12480_v42, %v12480_v42  ;;  %v8035_v47 = vsel %vm5008_vm2, %v8034_v60, %v12492_v20  ;;  %v7912_v63 = vrot.slane %v7911_v37, 1  ;;  %v7922_v62 = vmax.f32 %v7920_v35, %v7921_v31 }
 0x81c   : > { %7760 = vst.msk [vmem:[#allocation5 + $0x68] sm:$0xff] %vm5946_vm13, %v7740_v25  ;;  %v12509_v23 = vmul.f32 %v12482_v6, %v12482_v6  ;;  %v7931_v44 = vmax.f32 %v7929_v14, %v7930_v19  ;;  %v7939_v52 = vrot.slane %v7938_v53, 1  ;;  %v7802_v32 = vrot.slane %v7774_v33, 2 }
 0x81d   : > { %v7245_v43 = vpop.f32.mrf.mxu1  ;;  %v12513_v3 = vsel %vm5011_vm3, %v8104_v34, %v8103_v27  ;;  %v8074_v16 = vmul.f32 %v12492_v20, %v12492_v20  ;;  %v8108_v21 = vrot.slane %v12496_v41, 7  ;;  %v8037_v48 = vsel %vm5011_vm3, %v8036_v38, %v8035_v47 }
 0x81e   : > { %v7293_v55 = vadd.f32 %v7273_v29, %v7245_v43  ;;  %v7689_v12 = vpop.f32.mrf.mxu3  ;;  %v7470_v10 = vpop.f32.mrf.mxu2  ;;  %v8038_v43 = vrot.slane %v12482_v6, 5  ;;  %v7803_v29 = vrot.slane %v7774_v33, 4  ;;  %v7913_v39 = vmax.f32 %v7911_v37, %v7912_v63 }
 0x81f   : > { %v7497_v9 = vld [vmem:[#allocation5 + $0x78] sm:$0xff]  ;;  %v7989_v54 = vadd.f32 %v12431_v24, %v7922_v62  ;;  %v8112_v35 = vrot.slane %v12509_v23, 5  ;;  %v7990_v61 = vadd.f32 %v12431_v24, %v7931_v44  ;;  %v7941_v14 = vsel %vm7832_vm0, %v7774_v33, -inf }
 0x820   : > { %7313 = vst.msk [vmem:[#allocation5 + $0x80] sm:$0xff] %vm5946_vm13, %v7293_v55  ;;  %v7517_v18 = vadd.f32 %v7497_v9, %v7467_v11  ;;  %v7804_v11 = vrot.slane %v7774_v33, 6  ;;  %v8110_v55 = vrot.slane %v12503_v59, 6  ;;  %v7950_v51 = vsel %vm7832_vm0, %v7802_v32, -inf }
 0x821   : > { %v7721_v57 = vld [vmem:[#allocation5 + $0x70] sm:$0xff]  ;;  %v7959_v60 = vsel %vm7832_vm0, %v7803_v29, -inf  ;;  %v12531_v2 = vmax.f32 %v7989_v54, 0.0  ;;  %v7988_v38 = vadd.f32 %v12431_v24, %v7913_v39  ;;  %v8057_v56 = vsel %vm8056_vm15, %v12489_v7, 0.0 }
 0x822   : > { %7537 = vst.msk [vmem:[#allocation5 + $0x78] sm:$0xff] %vm5946_vm13, %v7517_v18  ;;  %v7741_v28 = vadd.f32 %v7721_v57, %v7689_v12  ;;  %v7940_v12 = vmax.f32 %v7938_v53, %v7939_v52  ;;  %v7275_v57 = vld [vmem:[#allocation5 + $0x90] sm:$0xff]  ;;  %v7968_v37 = vsel %vm7832_vm0, %v7804_v11, -inf }
 0x823   : > { %v8040_v29 = vrot.slane %v12531_v2, 7  ;;  %v8079_v11 = vmul.f32 %v12531_v2, %v12531_v2 }
 0x824   : > { %7761 = vst.msk [vmem:[#allocation5 + $0x70] sm:$0xff] %vm5946_vm13, %v7741_v28 }
 0x825   : > { %v7248_v0 = vpop.f32.mrf.mxu1 }
 0x826   : > { %v7294_v22 = vadd.f32 %v7274_v13, %v7248_v0  ;;  %v7692_v30 = vpop.f32.mrf.mxu3  ;;  %v7473_v41 = vpop.f32.mrf.mxu2 }
 0x827   : > { %v7498_v5 = vld [vmem:[#allocation5 + $0x80] sm:$0xff] }
 0x828   : > { %7314 = vst.msk [vmem:[#allocation5 + $0x88] sm:$0xff] %vm5946_vm13, %v7294_v22  ;;  %v7518_v25 = vadd.f32 %v7498_v5, %v7470_v10  ;;  %v7991_v10 = vadd.f32 %v12431_v24, %v7940_v12  ;;  %v12539_v5 = vmax.f32 %v7990_v61, 0.0  ;;  %v12546_v61 = vmax.f32 %v7988_v38, 0.0 }
 0x829   : > { %v7722_v45 = vld [vmem:[#allocation5 + $0x78] sm:$0xff] }
 0x82a   : > { %7538 = vst.msk [vmem:[#allocation5 + $0x80] sm:$0xff] %vm5946_vm13, %v7518_v25  ;;  %v7742_v36 = vadd.f32 %v7722_v45, %v7692_v30  ;;  %v8109_v30 = vsel %vm5008_vm2, %v8108_v21, %v8074_v16  ;;  %v8039_v16 = vsel %vm5014_vm4, %v8038_v43, %v8037_v48  ;;  %v8042_v21 = vrot.slane %v12539_v5, 6 }
 0x82b   : > { %v7775_v9 = vld [vmem:[#allocation5 + $0x70] sm:$0xff] }
 0x82c   : > { %v7805_v1 = vrot.slane %v7775_v9, 2  ;;  %v7806_v17 = vrot.slane %v7775_v9, 4  ;;  %v7807_v18 = vrot.slane %v7775_v9, 6  ;;  %v7942_v50 = vsel %vm7832_vm0, %v7775_v9, -inf  ;;  %7762 = vst.msk [vmem:[#allocation5 + $0x78] sm:$0xff] %vm5946_vm13, %v7742_v36 }
 0x82d   : > { %v7251_v4 = vpop.f32.mrf.mxu1  ;;  %v7943_v31 = vmax.f32 %v7941_v14, %v7942_v50  ;;  %v7276_v50 = vld [vmem:[#allocation5 + $0x98] sm:$0xff] }
 0x82e   : > { %v7295_v28 = vadd.f32 %v7275_v57, %v7251_v4  ;;  %v7951_v34 = vsel %vm7832_vm0, %v7805_v1, -inf  ;;  %v7960_v19 = vsel %vm7832_vm0, %v7806_v17, -inf  ;;  %v7969_v53 = vsel %vm7832_vm0, %v7807_v18, -inf  ;;  %v7695_v63 = vpop.f32.mrf.mxu3 }
 0x82f   : > { %v7499_v33 = vld [vmem:[#allocation5 + $0x88] sm:$0xff]  ;;  %v7944_v0 = vrot.slane %v7943_v31, 4  ;;  %v7952_v13 = vmax.f32 %v7950_v51, %v7951_v34  ;;  %v7961_v27 = vmax.f32 %v7959_v60, %v7960_v19  ;;  %v7970_v22 = vmax.f32 %v7968_v37, %v7969_v53  ;;  %v7476_v37 = vpop.f32.mrf.mxu2 }
 0x830   : > { %7315 = vst.msk [vmem:[#allocation5 + $0x90] sm:$0xff] %vm5946_vm13, %v7295_v28  ;;  %v7519_v47 = vadd.f32 %v7499_v33, %v7473_v41  ;;  %v12549_v51 = vmax.f32 %v7991_v10, 0.0  ;;  %v8041_v4 = vsel %vm5008_vm2, %v8040_v29, %v12546_v61  ;;  %v8114_v57 = vrot.slane %v8079_v11, 7 }
 0x831   : > { %v7723_v62 = vld [vmem:[#allocation5 + $0x80] sm:$0xff]  ;;  %v7945_v44 = vmax.f32 %v7943_v31, %v7944_v0  ;;  %v7953_v52 = vrot.slane %v7952_v13, 4  ;;  %v7962_v32 = vrot.slane %v7961_v27, 4  ;;  %v7971_v25 = vrot.slane %v7970_v22, 4 }
 0x832   : > { %7539 = vst.msk [vmem:[#allocation5 + $0x88] sm:$0xff] %vm5946_vm13, %v7519_v47  ;;  %v7743_v45 = vadd.f32 %v7723_v62, %v7695_v63  ;;  %v8080_v28 = vmul.f32 %v12539_v5, %v12539_v5  ;;  %v8078_v53 = vmul.f32 %v12546_v61, %v12546_v61  ;;  %v8081_v0 = vmul.f32 %v12549_v51, %v12549_v51 }
 0x833   : > { %v7946_v39 = vrot.slane %v7945_v44, 2  ;;  %v7954_v54 = vmax.f32 %v7952_v13, %v7953_v52  ;;  %v7963_v36 = vmax.f32 %v7961_v27, %v7962_v32  ;;  %v7972_v12 = vmax.f32 %v7970_v22, %v7971_v25 }
 0x834   : > { %7763 = vst.msk [vmem:[#allocation5 + $0x80] sm:$0xff] %vm5946_vm13, %v7743_v45  ;;  %v8111_v13 = vsel %vm5011_vm3, %v8110_v55, %v8109_v30  ;;  %v8115_v62 = vsel %vm5008_vm2, %v8114_v57, %v8078_v53  ;;  %v8116_v52 = vrot.slane %v8080_v28, 6  ;;  %v8107_v55 = vsel %vm5014_vm4, %v8106_v40, %v12513_v3 }
 0x835   : > { %v7254_v14 = vpop.f32.mrf.mxu1  ;;  %v7947_v9 = vmax.f32 %v7945_v44, %v7946_v39  ;;  %v7955_v1 = vrot.slane %v7954_v54, 2  ;;  %v7964_v17 = vrot.slane %v7963_v36, 2  ;;  %v7973_v18 = vrot.slane %v7972_v12, 2 }
 0x836   : > { %v7296_v60 = vadd.f32 %v7276_v50, %v7254_v14  ;;  %v7698_v33 = vpop.f32.mrf.mxu3  ;;  %v8043_v44 = vsel %vm5011_vm3, %v8042_v21, %v8041_v4  ;;  %v8044_v30 = vrot.slane %v12549_v51, 5  ;;  %v8058_v11 = vsel %vm8056_vm15, %v8039_v16, 0.0 }
 0x837   : > { %v7500_v31 = vld [vmem:[#allocation5 + $0x90] sm:$0xff]  ;;  %v7948_v34 = vrot.slane %v7947_v9, 1  ;;  %v7956_v19 = vmax.f32 %v7954_v54, %v7955_v1  ;;  %v7965_v43 = vmax.f32 %v7963_v36, %v7964_v17  ;;  %v7974_v48 = vmax.f32 %v7972_v12, %v7973_v18  ;;  %v7479_v40 = vpop.f32.mrf.mxu2 }
 0x838   : > { %7316 = vst.msk [vmem:[#allocation5 + $0x98] sm:$0xff] %vm5946_vm13, %v7296_v60  ;;  %v7520_v41 = vadd.f32 %v7500_v31, %v7476_v37  ;;  %v8113_v36 = vsel %vm5014_vm4, %v8112_v35, %v8111_v13  ;;  %v8045_v3 = vsel %vm5014_vm4, %v8044_v30, %v8043_v44  ;;  %v8117_v12 = vsel %vm5011_vm3, %v8116_v52, %v8115_v62 }
 0x839   : > { %v7949_v27 = vmax.f32 %v7947_v9, %v7948_v34  ;;  %v7957_v22 = vrot.slane %v7956_v19, 1  ;;  %v7966_v38 = vrot.slane %v7965_v43, 1  ;;  %v7975_v47 = vrot.slane %v7974_v48, 1  ;;  %v7724_v63 = vld [vmem:[#allocation5 + $0x88] sm:$0xff] }
 0x83a   : > { %7540 = vst.msk [vmem:[#allocation5 + $0x90] sm:$0xff] %vm5946_vm13, %v7520_v41  ;;  %v7744_v10 = vadd.f32 %v7724_v63, %v7698_v33  ;;  %v8118_v14 = vrot.slane %v8081_v0, 5  ;;  %v8059_v17 = vadd.f32 %v8058_v11, %v8057_v56  ;;  %v8130_v7 = vsel %vm8056_vm15, %v8107_v55, 0.0 }
 0x83b   : > { %v7958_v32 = vmax.f32 %v7956_v19, %v7957_v22  ;;  %v7967_v25 = vmax.f32 %v7965_v43, %v7966_v38  ;;  %v7976_v29 = vmax.f32 %v7974_v48, %v7975_v47  ;;  %v7992_v59 = vadd.f32 %v12431_v24, %v7949_v27 }
 0x83c   : > { %7764 = vst.msk [vmem:[#allocation5 + $0x88] sm:$0xff] %vm5946_vm13, %v7744_v10  ;;  %v8131_v18 = vsel %vm8056_vm15, %v8113_v36, 0.0  ;;  %v8119_v37 = vsel %vm5014_vm4, %v8118_v14, %v8117_v12  ;;  %v8060_v19 = vsel %vm8056_vm15, %v8045_v3, 0.0 }
 0x83d   : > { %v7993_v45 = vadd.f32 %v12431_v24, %v7958_v32  ;;  %v7994_v39 = vadd.f32 %v12431_v24, %v7967_v25  ;;  %v7995_v54 = vadd.f32 %v12431_v24, %v7976_v29  ;;  %v12586_v16 = vmax.f32 %v7992_v59, 0.0 }
 0x83e   : > { %v7701_v35 = vpop.f32.mrf.mxu3  ;;  %v8132_v13 = vadd.f32 %v8131_v18, %v8130_v7  ;;  %v8133_v27 = vsel %vm8056_vm15, %v8119_v37, 0.0  ;;  %v8061_v63 = vadd.f32 %v8060_v19, %v8059_v17 }
 0x83f   : > { %v12588_v21 = vmax.f32 %v7993_v45, 0.0  ;;  %v12590_v9 = vmax.f32 %v7994_v39, 0.0  ;;  %v12592_v24 = vmax.f32 %v7995_v54, 0.0  ;;  %v7501_v23 = vld [vmem:[#allocation5 + $0x98] sm:$0xff]  ;;  %v8082_v53 = vmul.f32 %v12586_v16, %v12586_v16 }
 0x840   : > { %v7521_v1 = vadd.f32 %v7501_v23, %v7479_v40  ;;  %v8134_v32 = vadd.f32 %v8133_v27, %v8132_v13 }
 0x841   : > { %v8046_v50 = vrot.slane %v12588_v21, 7  ;;  %v8048_v4 = vrot.slane %v12590_v9, 6  ;;  %v8083_v57 = vmul.f32 %v12588_v21, %v12588_v21  ;;  %v7725_v60 = vld [vmem:[#allocation5 + $0x90] sm:$0xff]  ;;  %v8084_v31 = vmul.f32 %v12590_v9, %v12590_v9 }
 0x842   : > { %v8085_v28 = vmul.f32 %v12592_v24, %v12592_v24  ;;  %7541 = vst.msk [vmem:[#allocation5 + $0x98] sm:$0xff] %vm5946_vm13, %v7521_v1  ;;  %v7745_v34 = vadd.f32 %v7725_v60, %v7701_v35  ;;  %v8050_v48 = vrot.slane %v12592_v24, 5 }
 0x843   : > { %v8047_v43 = vsel %vm5008_vm2, %v8046_v50, %v12586_v16  ;;  %v8120_v41 = vrot.slane %v8083_v57, 7  ;;  %v8122_v0 = vrot.slane %v8084_v31, 6 }
 0x844   : > { %v8049_v33 = vsel %vm5011_vm3, %v8048_v4, %v8047_v43  ;;  %7765 = vst.msk [vmem:[#allocation5 + $0x90] sm:$0xff] %vm5946_vm13, %v7745_v34  ;;  %v8124_v47 = vrot.slane %v8085_v28, 5 }
 0x845   : > { %v8051_v22 = vsel %vm5014_vm4, %v8050_v48, %v8049_v33  ;;  %v8121_v38 = vsel %vm5008_vm2, %v8120_v41, %v8082_v53 }
 0x846   : > { %v8062_v62 = vsel %vm8056_vm15, %v8051_v22, 0.0  ;;  %v8123_v10 = vsel %vm5011_vm3, %v8122_v0, %v8121_v38  ;;  %v7704_v29 = vpop.f32.mrf.mxu3 }
 0x847   : > { %v8125_v44 = vsel %vm5014_vm4, %v8124_v47, %v8123_v10  ;;  %v8063_v52 = vadd.f32 %v8062_v62, %v8061_v63 }
 0x848   : > { %v8135_v25 = vsel %vm8056_vm15, %v8125_v44, 0.0 }
 0x849   : > { %v7726_v59 = vld [vmem:[#allocation5 + $0x98] sm:$0xff]  ;;  %v8064_v55 = vrot.slane %v8063_v52, 4  ;;  %v8136_v30 = vadd.f32 %v8135_v25, %v8134_v32 }
 0x84a   : > { %v7746_v11 = vadd.f32 %v7726_v59, %v7704_v29 }
 0x84b   : > { %v8065_v45 = vadd.f32 %v8064_v55, %v8063_v52  ;;  %v8137_v39 = vrot.slane %v8136_v30, 4 }
 0x84c   : > { %7766 = vst.msk [vmem:[#allocation5 + $0x98] sm:$0xff] %vm5946_vm13, %v7746_v11 }
 0x84d   : > { %v8066_v54 = vrot.slane %v8065_v45, 2  ;;  %v8138_v36 = vadd.f32 %v8137_v39, %v8136_v30 }
 0x84f   : > { %v8067_v56 = vadd.f32 %v8066_v54, %v8065_v45  ;;  %v8139_v40 = vrot.slane %v8138_v36, 2 }
 0x851   : > { %v8068_v3 = vrot.slane %v8067_v56, 1  ;;  %v8140_v12 = vadd.f32 %v8139_v40, %v8138_v36  ;;  %v8827_v36 = vld [vmem:[%s12752_s5] ss:$0 sm:$0xff] }
 0x853   : > { %v8069_v14 = vadd.f32 %v8068_v3, %v8067_v56  ;;  %v8141_v23 = vrot.slane %v8140_v12, 1  ;;  %v8828_v56 = vld [vmem:[%s12752_s5 + $0x1] ss:$0 sm:$0xff] }
 0x855   : > { %v8142_v1 = vadd.f32 %v8141_v23, %v8140_v12  ;;  %v8143_v35 = vmul.f32 0.0625, %v8069_v14  ;;  %v8252_v23 = vld [vmem:[#allocation6] sm:$0xff] }
 0x857   : > { %v8144_v17 = vmul.f32 0.0625, %v8142_v1  ;;  %v8145_v7 = vmul.f32 %v8143_v35, %v8143_v35  ;;  %v12623_v37 = vperm.slane %v8143_v35, 0  ;;  %v8262_v1 = vld [vmem:[#allocation6 + $0x1] sm:$0xff] }
 0x859   : > { %v8146_v18 = vsub.f32 %v8144_v17, %v8145_v7  ;;  %v8148_v34 = vsub.f32 %v12456_v8, %v12623_v37  ;;  %v8149_v46 = vsub.f32 %v12446_v49, %v12623_v37  ;;  %v8150_v43 = vsub.f32 %v12450_v15, %v12623_v37 }
 0x85a   : > { %v8151_v48 = vsub.f32 %v12458_v26, %v12623_v37  ;;  %v8152_v53 = vsub.f32 %v12492_v20, %v12623_v37  ;;  %v8153_v41 = vsub.f32 %v12468_v58, %v12623_v37  ;;  %v8154_v8 = vsub.f32 %v12480_v42, %v12623_v37 }
 0x85b   : > { %v8164_v50 = vadd.f32 1e-05, %v8146_v18  ;;  %v8155_v33 = vsub.f32 %v12482_v6, %v12623_v37  ;;  %v8156_v15 = vsub.f32 %v12546_v61, %v12623_v37  ;;  %v8157_v26 = vsub.f32 %v12531_v2, %v12623_v37 }
 0x85c   : > { %v8158_v20 = vsub.f32 %v12539_v5, %v12623_v37  ;;  %v8159_v58 = vsub.f32 %v12549_v51, %v12623_v37  ;;  %v8160_v42 = vsub.f32 %v12586_v16, %v12623_v37  ;;  %v8161_v6 = vsub.f32 %v12588_v21, %v12623_v37 }
 0x85d   : > { %8838 = vrsqrt.f32 %v8164_v50  ;;  %vm8171_vm6 = vweird.f32 %v8164_v50  ;;  %v8162_v13 = vsub.f32 %v12590_v9, %v12623_v37  ;;  %v8163_v2 = vsub.f32 %v12592_v24, %v12623_v37 }
 0x863   : > { %v8839_v4 = vpop.eup %8838 }
 0x864   : > { %v8166_v57 = vmul.f32 %v8839_v4, %v8164_v50  ;;  %vm8172_vm5 = vweird.f32 %v8839_v4 }
 0x865   : > { %vm8173_vm7 = vmor %vm8171_vm6, %vm8172_vm5 }
 0x866   : > { %v8167_v60 = vmul.f32 %v8839_v4, %v8166_v57  ;;  %v8258_v57 = vmul.f32 %v8827_v36, %v8252_v23 }
 0x868   : > { %v8168_v31 = vmul.f32 0.5, %v8167_v60  ;;  %v8268_v60 = vmul.f32 %v8828_v56, %v8262_v1 }
 0x86a   : > { %v8169_v28 = vsub.f32 1.5, %v8168_v31 }
 0x86c   : > { %v8170_v19 = vmul.f32 %v8839_v4, %v8169_v28 }
 0x86e   : > { %v8174_v49 = vsel %vm8173_vm7, %v8839_v4, %v8170_v19  ;;  %v8829_v19 = vld [vmem:[%s12752_s5 + $0x2] ss:$0 sm:$0xff] }
 0x86f   : > { %v8175_v0 = vperm.slane %v8174_v49, 0 }
 0x871   : > { %v8177_v61 = vmul.f32 %v8175_v0, %v8149_v46  ;;  %v8178_v27 = vmul.f32 %v8175_v0, %v8150_v43  ;;  %v8179_v22 = vmul.f32 %v8175_v0, %v8151_v48  ;;  %v8176_v5 = vmul.f32 %v8175_v0, %v8148_v34  ;;  %v8861_v34 = vld [vmem:[#allocation2] sm:$0xff] }
 0x872   : > { %v8181_v38 = vmul.f32 %v8175_v0, %v8153_v41  ;;  %v8182_v47 = vmul.f32 %v8175_v0, %v8154_v8  ;;  %v8183_v63 = vmul.f32 %v8175_v0, %v8155_v33  ;;  %v8180_v51 = vmul.f32 %v8175_v0, %v8152_v53  ;;  %8200 = vst.msk [vmem:[#allocation6 + $0x2d] sm:$0x7] %vm8199_vm8, %v8861_v34  ;;  %v8830_v48 = vld [vmem:[%s12752_s5 + $0x3] ss:$0 sm:$0xff] }
 0x873   : > { %v8185_v62 = vmul.f32 %v8175_v0, %v8157_v26  ;;  %v8186_v10 = vmul.f32 %v8175_v0, %v8158_v20  ;;  %v8187_v16 = vmul.f32 %v8175_v0, %v8159_v58  ;;  %v8184_v44 = vmul.f32 %v8175_v0, %v8156_v15  ;;  %v8831_v26 = vld [vmem:[%s12752_s5 + $0x4] ss:$0 sm:$0xff] }
 0x874   : > { %v8208_v52 = vrot.slane %v8177_v61, 7  ;;  %v8210_v21 = vrot.slane %v8178_v27, 6  ;;  %v8220_v32 = vrot.slane %v8181_v38, 7  ;;  %v8212_v25 = vrot.slane %v8179_v22, 5  ;;  %v8832_v22 = vld [vmem:[%s12752_s5 + $0x5] ss:$0 sm:$0xff] }
 0x875   : > { %v8222_v9 = vrot.slane %v8182_v47, 6  ;;  %v8232_v29 = vrot.slane %v8185_v62, 7  ;;  %v8234_v59 = vrot.slane %v8186_v10, 6  ;;  %v8224_v30 = vrot.slane %v8183_v63, 5 }
 0x876   : > { %v8209_v55 = vsel %vm5008_vm2, %v8208_v52, %v8176_v5  ;;  %v8221_v24 = vsel %vm5008_vm2, %v8220_v32, %v8180_v51  ;;  %v8236_v11 = vrot.slane %v8187_v16, 5  ;;  %v8189_v40 = vmul.f32 %v8175_v0, %v8161_v6  ;;  %v8833_v51 = vld [vmem:[%s12752_s5 + $0x6] ss:$0 sm:$0xff] }
 0x877   : > { %v8211_v45 = vsel %vm5011_vm3, %v8210_v21, %v8209_v55  ;;  %v8223_v39 = vsel %vm5011_vm3, %v8222_v9, %v8221_v24  ;;  %v8233_v54 = vsel %vm5008_vm2, %v8232_v29, %v8184_v44  ;;  %v8190_v35 = vmul.f32 %v8175_v0, %v8162_v13 }
 0x878   : > { %v8213_v3 = vsel %vm5014_vm4, %v8212_v25, %v8211_v45  ;;  %v8225_v12 = vsel %vm5014_vm4, %v8224_v30, %v8223_v39  ;;  %v8235_v14 = vsel %vm5011_vm3, %v8234_v59, %v8233_v54  ;;  %v8188_v7 = vmul.f32 %v8175_v0, %v8160_v42  ;;  %v8834_v59 = vld [vmem:[%s12752_s5 + $0x7] ss:$0 sm:$0xff] }
 0x879   : > { %8215 = vst.msk [vmem:[#allocation6 + $0x9] sm:$0xf] %vm8056_vm15, %v8213_v3  ;;  %v8237_v17 = vsel %vm5014_vm4, %v8236_v11, %v8235_v14  ;;  %v8191_v18 = vmul.f32 %v8175_v0, %v8163_v2  ;;  %v8244_v50 = vrot.slane %v8189_v40, 7  ;;  %v8246_v4 = vrot.slane %v8190_v35, 6 }
 0x87a   : > { %8227 = vst.msk [vmem:[#allocation6 + $0x11] sm:$0xf] %vm8056_vm15, %v8225_v12  ;;  %v8272_v43 = vadd.f32 %v8268_v60, %v8258_v57  ;;  %v8323_v57 = vld [vmem:[#allocation6 + $0x28] sm:$0xff] }
 0x87b   : > { %8239 = vst.msk [vmem:[#allocation6 + $0x19] sm:$0xf] %vm8056_vm15, %v8237_v17  ;;  %v8245_v37 = vsel %vm5008_vm2, %v8244_v50, %v8188_v7  ;;  %v8248_v31 = vrot.slane %v8191_v18, 5 }
 0x87c   : > { %v8247_v28 = vsel %vm5011_vm3, %v8246_v4, %v8245_v37 }
 0x87d   : > { %v8249_v46 = vsel %vm5014_vm4, %v8248_v31, %v8247_v28 }
 0x87e   : > { %8251 = vst.msk [vmem:[#allocation6 + $0x21] sm:$0xf] %vm8056_vm15, %v8249_v46 }
 0x880   : > { %v8253_v53 = vld [vmem:[#allocation6 + $0x8] sm:$0xff] }
 0x881   : > { %v8263_v41 = vld [vmem:[#allocation6 + $0x9] sm:$0xff]  ;;  %v8264_v49 = vld [vmem:[#allocation6 + $0x11] sm:$0xff]  ;;  %v8293_v27 = vmul.f32 %v8830_v48, %v8253_v53  ;;  %v8259_v62 = vmul.f32 %v8827_v36, %v8253_v53 }
 0x882   : > { %v8276_v8 = vld [vmem:[#allocation6 + $0x2] sm:$0xff]  ;;  %v8254_v33 = vld [vmem:[#allocation6 + $0x10] sm:$0xff]  ;;  %v8270_v0 = vmul.f32 %v8828_v56, %v8264_v49  ;;  %v8255_v42 = vld [vmem:[#allocation6 + $0x18] sm:$0xff]  ;;  %v8269_v6 = vmul.f32 %v8828_v56, %v8263_v41  ;;  %v8304_v63 = vmul.f32 %v8831_v26, %v8263_v41  ;;  %v8305_v54 = vmul.f32 %v8831_v26, %v8264_v49 }
 0x883   : > { %v8282_v15 = vmul.f32 %v8829_v19, %v8276_v8  ;;  %v8260_v20 = vmul.f32 %v8827_v36, %v8254_v33  ;;  %v8278_v58 = vld [vmem:[#allocation6 + $0x12] sm:$0xff]  ;;  %v8277_v13 = vld [vmem:[#allocation6 + $0xa] sm:$0xff]  ;;  %v8261_v10 = vmul.f32 %v8827_v36, %v8255_v42  ;;  %v8295_v32 = vmul.f32 %v8830_v48, %v8255_v42 }
 0x884   : > { %v8265_v2 = vld [vmem:[#allocation6 + $0x19] sm:$0xff]  ;;  %v8284_v38 = vmul.f32 %v8829_v19, %v8278_v58  ;;  %v8283_v44 = vmul.f32 %v8829_v19, %v8277_v13  ;;  %v8294_v25 = vmul.f32 %v8830_v48, %v8254_v33  ;;  %v8315_v29 = vmul.f32 %v8832_v22, %v8277_v13  ;;  %v8334_v53 = vld [vmem:[#allocation6 + $0x29] sm:$0xff] }
 0x885   : > { %v8286_v61 = vadd.f32 %v8282_v15, %v8272_v43  ;;  %v8274_v5 = vadd.f32 %v8270_v0, %v8260_v20  ;;  %v8279_v16 = vld [vmem:[#allocation6 + $0x1a] sm:$0xff]  ;;  %v8271_v21 = vmul.f32 %v8828_v56, %v8265_v2  ;;  %v8273_v55 = vadd.f32 %v8269_v6, %v8259_v62  ;;  %v8835_v56 = vld [vmem:[%s12752_s5 + $0x8] ss:$0 sm:$0xff] }
 0x886   : > { %v8290_v24 = vld [vmem:[#allocation6 + $0x20] sm:$0xff]  ;;  %v8285_v11 = vmul.f32 %v8829_v19, %v8279_v16  ;;  %v8306_v39 = vmul.f32 %v8831_v26, %v8265_v2  ;;  %v8326_v40 = vmul.f32 %v8833_v51, %v8254_v33  ;;  %v8317_v17 = vmul.f32 %v8832_v22, %v8279_v16 }
 0x887   : > { %v8297_v47 = vadd.f32 %v8293_v27, %v8286_v61  ;;  %v8288_v52 = vadd.f32 %v8284_v38, %v8274_v5  ;;  %v8275_v30 = vadd.f32 %v8271_v21, %v8261_v10  ;;  %v8287_v3 = vadd.f32 %v8283_v44, %v8273_v55  ;;  %v8301_v12 = vld [vmem:[#allocation6 + $0x21] sm:$0xff]  ;;  %v8345_v38 = vld [vmem:[#allocation6 + $0x2a] sm:$0xff] }
 0x888   : > { %v8296_v23 = vmul.f32 %v8830_v48, %v8290_v24  ;;  %v8312_v35 = vld [vmem:[#allocation6 + $0x22] sm:$0xff]  ;;  %v8316_v7 = vmul.f32 %v8832_v22, %v8278_v58  ;;  %v8337_v50 = vmul.f32 %v8834_v59, %v8264_v49  ;;  %v8307_v37 = vmul.f32 %v8831_v26, %v8301_v12 }
 0x889   : > { %v8308_v9 = vadd.f32 %v8304_v63, %v8297_v47  ;;  %v8299_v45 = vadd.f32 %v8295_v32, %v8288_v52  ;;  %v8289_v14 = vadd.f32 %v8285_v11, %v8275_v30  ;;  %v8298_v4 = vadd.f32 %v8294_v25, %v8287_v3 }
 0x88a   : > { %v8328_v28 = vmul.f32 %v8833_v51, %v8290_v24  ;;  %v8348_v19 = vmul.f32 %v8835_v56, %v8278_v58  ;;  %v8318_v46 = vmul.f32 %v8832_v22, %v8312_v35  ;;  %v8339_v48 = vmul.f32 %v8834_v59, %v8301_v12 }
 0x88b   : > { %v8319_v36 = vadd.f32 %v8315_v29, %v8308_v9  ;;  %v8310_v1 = vadd.f32 %v8306_v39, %v8299_v45  ;;  %v8300_v60 = vadd.f32 %v8296_v23, %v8289_v14  ;;  %v8309_v43 = vadd.f32 %v8305_v54, %v8298_v4 }
 0x88c   : > { %v8329_v33 = vmul.f32 %v8833_v51, %v8323_v57  ;;  %v8327_v0 = vmul.f32 %v8833_v51, %v8255_v42  ;;  %v8350_v13 = vmul.f32 %v8835_v56, %v8312_v35  ;;  %v8340_v61 = vmul.f32 %v8834_v59, %v8334_v53 }
 0x88d   : > { %v8330_v18 = vadd.f32 %v8326_v40, %v8319_v36  ;;  %v8321_v31 = vadd.f32 %v8317_v17, %v8310_v1  ;;  %v8311_v41 = vadd.f32 %v8307_v37, %v8300_v60  ;;  %v8320_v20 = vadd.f32 %v8316_v7, %v8309_v43 }
 0x88e   : > { %v8338_v5 = vmul.f32 %v8834_v59, %v8265_v2  ;;  %v8349_v63 = vmul.f32 %v8835_v56, %v8279_v16  ;;  %v8351_v44 = vmul.f32 %v8835_v56, %v8345_v38  ;;  %v8927_v2 = vmov 269488144  }
 0x88f   : > { %v8341_v34 = vadd.f32 %v8337_v50, %v8330_v18  ;;  %v8332_v8 = vadd.f32 %v8328_v28, %v8321_v31  ;;  %v8322_v6 = vadd.f32 %v8318_v46, %v8311_v41  ;;  %v8331_v27 = vadd.f32 %v8327_v0, %v8320_v20 }
 0x890   : > { %v8374_v32 = vunpack.c.l.s4 %v8927_v2  ;;  %v8928_v25 = vmov 842150450  }
 0x891   : > { %v8352_v15 = vadd.f32 %v8348_v19, %v8341_v34  ;;  %v8343_v49 = vadd.f32 %v8339_v48, %v8332_v8  ;;  %v8333_v22 = vadd.f32 %v8329_v33, %v8322_v6  ;;  %v8342_v47 = vadd.f32 %v8338_v5, %v8331_v27 }
 0x892   : > { %v8378_v9 = vunpack.c.l.s4 %v8928_v25  ;;  %v8375_v59 = vunpack.c.0.s8 %v8374_v32 }
 0x893   : > { %v8356_v26 = vsel %vm5946_vm13, %v8352_v15, 0.0  ;;  %v8354_v58 = vadd.f32 %v8350_v13, %v8343_v49  ;;  %v8344_v10 = vadd.f32 %v8340_v61, %v8333_v22  ;;  %v8353_v42 = vadd.f32 %v8349_v63, %v8342_v47 }
 0x894   : > { %8357 = vadd.xlane.f32.xlu0 %v8356_v26  ;;  %v8379_v16 = vunpack.c.0.s8 %v8378_v9  ;;  %v8450_v49 = vstv %s8368_s20 }
 0x895   : > { %v8362_v62 = vsel %vm5946_vm13, %v8354_v58, 0.0  ;;  %v8355_v51 = vadd.f32 %v8351_v44, %v8344_v10  ;;  %v8359_v52 = vsel %vm5946_vm13, %v8353_v42, 0.0 }
 0x896   : > { %8363 = vadd.xlane.f32.xlu1 %v8362_v62  ;;  %v8466_v62 = vlaneseq }
 0x897   : > { %v8365_v21 = vsel %vm5946_vm13, %v8355_v51, 0.0 }
 0x898   : > { %v8467_v32 = vand.u32 127, %v8466_v62 }
 0x89c   : > { %8360 = vadd.xlane.f32.xlu0 %v8359_v52 }
 0x89e   : > { %8366 = vadd.xlane.f32.xlu1 %v8365_v21 }
 0x907   : > { %v8358_v29 = vpop.xlane.xlu0 %8357 }
 0x908   : > { %v8376_v24 = vperm.slane %v8358_v29, %v8375_v59  ;;  %v8380_v30 = vperm.slane %v8358_v29, %v8379_v16 }
 0x909   : > { %v8364_v55 = vpop.xlane.xlu1 %8363 }
 0x90a   : > { %v8392_v45 = vperm.slane %v8364_v55, %v8375_v59  ;;  %v8396_v39 = vperm.slane %v8364_v55, %v8379_v16  ;;  %v8414_v40 = vsel %vm8413_vm9, %v8376_v24, -inf  ;;  %v8423_v56 = vsel %vm8413_vm9, %v8380_v30, -inf }
 0x90c   : > { %v8432_v7 = vsel %vm8413_vm9, %v8392_v45, -inf  ;;  %v8441_v18 = vsel %vm8413_vm9, %v8396_v39, -inf }
 0x90f   : > { %v8361_v11 = vpop.xlane.xlu0 %8360 }
 0x910   : > { %v8384_v54 = vperm.slane %v8361_v11, %v8375_v59  ;;  %v8388_v36 = vperm.slane %v8361_v11, %v8379_v16 }
 0x911   : > { %v8367_v14 = vpop.xlane.xlu1 %8366 }
 0x912   : > { %v8415_v3 = vsel %vm8413_vm9, %v8384_v54, -inf  ;;  %v8424_v12 = vsel %vm8413_vm9, %v8388_v36, -inf  ;;  %v8400_v35 = vperm.slane %v8367_v14, %v8375_v59  ;;  %v8404_v17 = vperm.slane %v8367_v14, %v8379_v16 }
 0x913   : > { %v8416_v23 = vmax.f32 %v8414_v40, %v8415_v3  ;;  %v8425_v1 = vmax.f32 %v8423_v56, %v8424_v12 }
 0x914   : > { %v8433_v57 = vsel %vm8413_vm9, %v8400_v35, -inf  ;;  %v8442_v60 = vsel %vm8413_vm9, %v8404_v17, -inf }
 0x915   : > { %v8417_v50 = vrot.slane %v8416_v23, 4  ;;  %v8426_v4 = vrot.slane %v8425_v1, 4  ;;  %v8434_v37 = vmax.f32 %v8432_v7, %v8433_v57  ;;  %v8443_v31 = vmax.f32 %v8441_v18, %v8442_v60 }
 0x917   : > { %v8418_v28 = vmax.f32 %v8416_v23, %v8417_v50  ;;  %v8427_v34 = vmax.f32 %v8425_v1, %v8426_v4  ;;  %v8435_v19 = vrot.slane %v8434_v37, 4  ;;  %v8444_v46 = vrot.slane %v8443_v31, 4 }
 0x919   : > { %v8419_v43 = vrot.slane %v8418_v28, 2  ;;  %v8428_v53 = vrot.slane %v8427_v34, 2  ;;  %v8436_v41 = vmax.f32 %v8434_v37, %v8435_v19  ;;  %v8445_v8 = vmax.f32 %v8443_v31, %v8444_v46 }
 0x91b   : > { %v8420_v48 = vmax.f32 %v8418_v28, %v8419_v43  ;;  %v8429_v33 = vmax.f32 %v8427_v34, %v8428_v53  ;;  %v8437_v15 = vrot.slane %v8436_v41, 2  ;;  %v8446_v20 = vrot.slane %v8445_v8, 2 }
 0x91d   : > { %v8421_v0 = vrot.slane %v8420_v48, 1  ;;  %v8430_v6 = vrot.slane %v8429_v33, 1  ;;  %v8438_v13 = vmax.f32 %v8436_v41, %v8437_v15  ;;  %v8447_v61 = vmax.f32 %v8445_v8, %v8446_v20 }
 0x91f   : > { %v8422_v26 = vmax.f32 %v8420_v48, %v8421_v0  ;;  %v8431_v27 = vmax.f32 %v8429_v33, %v8430_v6  ;;  %v8439_v5 = vrot.slane %v8438_v13, 1  ;;  %v8448_v38 = vrot.slane %v8447_v61, 1 }
 0x921   : > { %v8451_v58 = vadd.f32 %v8450_v49, %v8422_v26  ;;  %v8452_v22 = vadd.f32 %v8450_v49, %v8431_v27  ;;  %v8440_v47 = vmax.f32 %v8438_v13, %v8439_v5  ;;  %v8449_v63 = vmax.f32 %v8447_v61, %v8448_v38 }
 0x923   : > { %v8455_v10 = vmax.f32 %v8451_v58, 0.0  ;;  %v8456_v44 = vmax.f32 %v8452_v22, 0.0  ;;  %v8453_v42 = vadd.f32 %v8450_v49, %v8440_v47  ;;  %v8454_v51 = vadd.f32 %v8450_v49, %v8449_v63 }
 0x925   : > { %v8463_v52 = vsel %vm5008_vm2, %v8456_v44, %v8455_v10  ;;  %v8457_v21 = vmax.f32 %v8453_v42, 0.0  ;;  %v8458_v2 = vmax.f32 %v8454_v51, 0.0 }
 0x927   : > { %v8464_v25 = vsel %vm5011_vm3, %v8457_v21, %v8463_v52 }
 0x928   : > { %v8465_v9 = vsel %vm5014_vm4, %v8458_v2, %v8464_v25 }
 0x929   : > { %v8468_v29 = vperm.slane %v8465_v9, %v8467_v32 }
 0x92b   : > { %8471 = vst.msk [vmem:[%s271_s16] sm:$0x1] %vm8470_vm10, %v8468_v29 }
 0x92c   : > { %8889 = shalt.err (!%p8886_p3)
}
 0x92d   : > { %8783 = dma.vmem_to_hbm [thread:$0]  (%p9010_p5), %s8484_s17, 16, %s8486_s18, %s8473_s19  }
 0x92e PF: > { %p8789_p4 = scmp.ge.s32.totalorder %s8924_s29, 2  ;;  %s8497_s20 = sand.u32 1, %s8912_s26  }
 0x92f   : > { %s8498_s14 = scalar_lea.sflag [#allocation9], %s8497_s20 }
 0x930   : > { %p8786_p7 = pnand %p8789_p4, %p9014_p6 }
 0x932   : > { %p8787_p8 = pneg %p8786_p7 }
 0x934   : > { %8907 = dma.done.wait (%p8787_p8), %s8498_s14, 16  }
 0x935   : > { %8909 = vsyncadd (%p8787_p8), %s8498_s14, 4294967280  ;;  %p18_p9 = scmp.ge.s32.totalorder %s8997_s8, 4   ;;  %s12995_s26 = smov %s8916_s27 }
 0x936   : > { %s12996_s27 = smov %s8920_s28  ;;  %s12997_s28 = smov %s9008_s11 }
 0x937   : > { %s12998_s29 = smov %s8997_s8  ;;  %20 = sbr.rel (!%p18_p9) target bundleno = 5 (0x5), region = 98 }
 0x93c   :  { %8503 = vsyncpa [#allocation9], 1 }
 0x93d   :  { %8505 = vsyncpa [#allocation9 + $0x1], 1 }

</bundles_post_ra>
